<compile_context>
chip_gen: v6e
topology: v6e:2x2x1
jax: 0.10.0
libtpu: 0.0.40
codegen_flags: <defaults>
</compile_context>

<pallas_src>
import math
import functools

import jax
import jax.numpy as jnp
from jax.experimental import pallas as pl
from jax.experimental.pallas import tpu as pltpu

SQRT2 = math.sqrt(2.0)


# -----------------------------------------------------------------------------
# Pallas kernel: OPE embedding + linear-combination + local-ensemble blend
# -----------------------------------------------------------------------------
def ope_render_kernel(latent_ref, rel_ref, out_ref, *, max_freq, omega):
    # latent_ref: (1, 4, 3c, tqs, 128)
    # rel_ref:    (1, 4, 2,  tqs, 128)
    # out_ref:    (1, 3,     tqs, 128)
    K = 2 * max_freq + 1
    c = K * K

    preds = []   # preds[v] = [R, G, B], each (tqs, 128)
    areas = []
    for v in range(4):  # neighbour order: (vx,vy) = (-1,-1), (-1,1), (1,-1), (1,1)
        rx = rel_ref[0, v, 0]                 # (tqs, 128) rel coord along H (already *H)
        ry = rel_ref[0, v, 1]                 # (tqs, 128) rel coord along W (already *W)

        # local-ensemble area weight (on un-omega-scaled rel coords)
        areas.append(jnp.abs(rx * ry) + 1e-9)

        ax = rx * omega
        ay = ry * omega

        # 1-D OPE embeddings [1, sqrt2*cos(f a), sqrt2*sin(f a), ...] built with
        # the angle-addition recurrence: only 4 cos/sin evaluations per neighbour.
        cos_ax = jnp.cos(ax); sin_ax = jnp.sin(ax)
        cos_ay = jnp.cos(ay); sin_ay = jnp.sin(ay)
        Ex = [None]   # Ex[0] == 1 (handled implicitly, no multiply by ones)
        Ey = [None]
        cx, sx = cos_ax, sin_ax
        cy, sy = cos_ay, sin_ay
        for f in range(1, max_freq + 1):
            Ex += [SQRT2 * cx, SQRT2 * sx]
            Ey += [SQRT2 * cy, SQRT2 * sy]
            if f < max_freq:
                cx, sx = cx * cos_ax - sx * sin_ax, sx * cos_ax + cx * sin_ax
                cy, sy = cy * cos_ay - sy * sin_ay, sy * cos_ay + cy * sin_ay

        # Direct accumulation of the (Ex_i * Ey_j) outer-product terms against
        # the gathered latent rows.  Row-major index i*K+j matches the PyTorch
        # ope_mat.view(N, Q, -1) flattening; each term is reused for R, G, B.
        acc = [None, None, None]
        for i in range(K):
            for j in range(K):
                if i == 0 and j == 0:
                    term = None                   # 1 * 1
                elif i == 0:
                    term = Ey[j]                  # 1 * Ey_j
                elif j == 0:
                    term = Ex[i]                  # Ex_i * 1
                else:
                    term = Ex[i] * Ey[j]
                idx = i * K + j
                for ch in range(3):
                    lat = latent_ref[0, v, ch * c + idx]        # (tqs, 128)
                    contrib = lat if term is None else term * lat
                    acc[ch] = contrib if acc[ch] is None else acc[ch] + contrib
        preds.append(acc)

    tot = areas[0] + areas[1] + areas[2] + areas[3]
    inv_tot = pl.reciprocal(tot, approx=False)   # exact: one divide instead of four
    # diagonal swap of areas (as in the PyTorch code)
    weights = [areas[3] * inv_tot, areas[2] * inv_tot,
               areas[1] * inv_tot, areas[0] * inv_tot]

    for ch in range(3):
        ret = (preds[0][ch] * weights[0] + preds[1][ch] * weights[1]
               + preds[2][ch] * weights[2] + preds[3][ch] * weights[3])
        out_ref[0, ch] = ret.astype(out_ref.dtype)


# -----------------------------------------------------------------------------
# Glue: make_coord + nearest-neighbour grid_sample gather (plain JAX)
# -----------------------------------------------------------------------------
def _make_coord(shape):
    seqs = []
    for n in shape:
        r = 1.0 / n
        seqs.append(-1.0 + r + 2.0 * r * jnp.arange(n, dtype=jnp.float32))
    gx, gy = jnp.meshgrid(seqs[0], seqs[1], indexing="ij")
    return jnp.stack([gx, gy], axis=-1)            # (h, w, 2)


def ope_render_intp_forward(feat, h, w, *, max_freq, omega=0.5 * math.pi, tqs=16):
    """feat: (N, 3*(2n+1)^2, H, W) float32  ->  (N, 3, h, w)"""
    N, C, H, W = feat.shape
    K = 2 * max_freq + 1
    c = K * K
    assert C == 3 * c

    Q = h * w
    coord = _make_coord((h, w)).reshape(-1, 2)                    # (Q, 2)
    coord = jnp.broadcast_to(coord[None], (N, Q, 2))              # (N, Q, 2)

    rx = 1.0 / H     # = 2 / H / 2
    ry = 1.0 / W
    eps = 1e-6
    feat_flat = feat.reshape(N, C, H * W)

    latents, rels = [], []
    for vx in (-1, 1):
        for vy in (-1, 1):
            cx = jnp.clip(coord[..., 0] + vx * rx + eps, -1 + 1e-6, 1 - 1e-6)
            cy = jnp.clip(coord[..., 1] + vy * ry + eps, -1 + 1e-6, 1 - 1e-6)
            # grid_sample nearest, align_corners=False: idx = round(((x+1)*size-1)/2)
            iH = jnp.clip(jnp.round(((cx + 1.0) * H - 1.0) * 0.5).astype(jnp.int32), 0, H - 1)
            iW = jnp.clip(jnp.round(((cy + 1.0) * W - 1.0) * 0.5).astype(jnp.int32), 0, W - 1)
            flat_idx = iH * W + iW                                # (N, Q)
            # (N, C, Q) -- kept channel-major so Q ends up on the (sublane, lane) axes.
            gathered = jnp.take_along_axis(feat_flat, flat_idx[:, None, :], axis=2)
            latents.append(gathered)
            # q_coord = centre coordinate of the sampled feature cell
            qx = -1.0 + (2.0 * iH.astype(jnp.float32) + 1.0) / H
            qy = -1.0 + (2.0 * iW.astype(jnp.float32) + 1.0) / W
            relx = (coord[..., 0] - qx) * H
            rely = (coord[..., 1] - qy) * W
            rels.append(jnp.stack([relx, rely], axis=1))          # (N, 2, Q)

    latent_all = jnp.stack(latents, axis=1)                       # (N, 4, C, Q)
    rel_all = jnp.stack(rels, axis=1)                             # (N, 4, 2, Q)

    # Split Q into (q_blocks, 128) so the kernel sees full (tqs, 128) vreg tiles.
    q_blocks = -(-Q // 128)
    tqs = max(1, min(tqs, q_blocks))
    qb_pad = -(-q_blocks // tqs) * tqs
    Qp = qb_pad * 128
    if Qp != Q:
        pad = Qp - Q
        latent_all = jnp.pad(latent_all, ((0, 0), (0, 0), (0, 0), (0, pad)))
        rel_all = jnp.pad(rel_all, ((0, 0), (0, 0), (0, 0), (0, pad)))
    latent_all = latent_all.reshape(N, 4, C, qb_pad, 128)
    rel_all = rel_all.reshape(N, 4, 2, qb_pad, 128)

    grid = (qb_pad // tqs, N)    # big query axis first so it carries megacore parallelism

    kernel = functools.partial(ope_render_kernel, max_freq=max_freq, omega=omega)
    out = pl.pallas_call(
        kernel,
        out_shape=jax.ShapeDtypeStruct((N, 3, qb_pad, 128), feat.dtype),
        grid_spec=pltpu.PrefetchScalarGridSpec(
            num_scalar_prefetch=0,
            grid=grid,
            in_specs=[
                pl.BlockSpec((1, 4, C, tqs, 128), lambda q, n: (n, 0, 0, q, 0)),
                pl.BlockSpec((1, 4, 2, tqs, 128), lambda q, n: (n, 0, 0, q, 0)),
            ],
            out_specs=pl.BlockSpec((1, 3, tqs, 128), lambda q, n: (n, 0, q, 0)),
        ),
        compiler_params=pltpu.CompilerParams(
            dimension_semantics=("parallel", "parallel")),
    )(latent_all, rel_all)

    # (N, 3, qb_pad, 128) -> (N, 3, Q) -> (N, 3, h, w): reshapes + slice only.
    out = out.reshape(N, 3, Qp)[:, :, :Q]
    return out.reshape(N, 3, h, w)


# -----------------------------------------------------------------------------
# Pure-JAX reference of the kernel math (for a correctness sanity check)
# -----------------------------------------------------------------------------
def _reference_from_gathered(latent_all, rel_all, max_freq, omega):
    # latent_all: (N, 4, Q, 3c)   rel_all: (N, 4, Q, 2)   (PyTorch-style layout)
    K = 2 * max_freq + 1
    c = K * K
    preds, areas = [], []
    for v in range(4):
        latent = latent_all[:, v]                  # (N, Q, 3c)
        rel = rel_all[:, v]                        # (N, Q, 2)
        rx, ry = rel[..., 0:1], rel[..., 1:2]
        areas.append(jnp.abs(rx * ry) + 1e-9)
        ax, ay = rx * omega, ry * omega
        ex = [jnp.ones_like(ax)]
        ey = [jnp.ones_like(ay)]
        for f in range(1, max_freq + 1):
            ex += [SQRT2 * jnp.cos(ax * f), SQRT2 * jnp.sin(ax * f)]
            ey += [SQRT2 * jnp.cos(ay * f), SQRT2 * jnp.sin(ay * f)]
        Ex = jnp.concatenate(ex, -1)
        Ey = jnp.concatenate(ey, -1)
        ope = (Ex[..., :, None] * Ey[..., None, :]).reshape(*Ex.shape[:-1], c)
        chans = [jnp.sum(ope * latent[..., ch * c:(ch + 1) * c], -1, keepdims=True)
                 for ch in range(3)]
        preds.append(jnp.concatenate(chans, -1))
    tot = sum(areas)
    weights = [areas[3], areas[2], areas[1], areas[0]]
    ret = sum(p * (w / tot) for p, w in zip(preds, weights))
    return ret                                     # (N, Q, 3)


if __name__ == "__main__":
    max_freq = 2                         # c = (2*2+1)^2 = 25, C = 75
    omega = 0.5 * math.pi
    N, H, W = 2, 8, 8
    C = 3 * (2 * max_freq + 1) ** 2
    h_out, w_out = 32, 32

    key = jax.random.PRNGKey(0)
    img_feature = jax.random.normal(key, (N, C, H, W), dtype=jnp.float32)

    out = ope_render_intp_forward(img_feature, h_out, w_out,
                                  max_freq=max_freq, omega=omega, tqs=16)
    out = jax.block_until_ready(out)
    assert out.shape == (N, 3, h_out, w_out)

    # sanity check against a pure-JAX reference of the same math
    Q = h_out * w_out
    coord = _make_coord((h_out, w_out)).reshape(-1, 2)
    coord = jnp.broadcast_to(coord[None], (N, Q, 2))
    feat_flat = img_feature.reshape(N, C, H * W)
    latents, rels = [], []
    for vx in (-1, 1):
        for vy in (-1, 1):
            cx = jnp.clip(coord[..., 0] + vx / H + 1e-6, -1 + 1e-6, 1 - 1e-6)
            cy = jnp.clip(coord[..., 1] + vy / W + 1e-6, -1 + 1e-6, 1 - 1e-6)
            iH = jnp.clip(jnp.round(((cx + 1) * H - 1) * 0.5).astype(jnp.int32), 0, H - 1)
            iW = jnp.clip(jnp.round(((cy + 1) * W - 1) * 0.5).astype(jnp.int32), 0, W - 1)
            g = jnp.take_along_axis(feat_flat, (iH * W + iW)[:, None, :], axis=2)
            latents.append(jnp.transpose(g, (0, 2, 1)))           # (N, Q, C)
            qx = -1.0 + (2.0 * iH + 1.0) / H
            qy = -1.0 + (2.0 * iW + 1.0) / W
            rels.append(jnp.stack([(coord[..., 0] - qx) * H,
                                   (coord[..., 1] - qy) * W], axis=-1))
    ref = _reference_from_gathered(jnp.stack(latents, 1), jnp.stack(rels, 1),
                                   max_freq, omega)
    ref = ref.reshape(N, h_out, w_out, 3).transpose(0, 3, 1, 2)
    assert jnp.allclose(out, ref, rtol=1e-4, atol=1e-4)

    print("KERNEL_OK")
</pallas_src>

<mosaic_0001>
module attributes {stable_mosaic.version = 11 : i64} {
  func.func @ope_render_kernel(%arg0: i32, %arg1: i32, %arg2: memref<1x4x75x8x128xf32, #tpu.memory_space<vmem>>, %arg3: memref<1x4x2x8x128xf32, #tpu.memory_space<vmem>>, %arg4: memref<1x3x8x128xf32, #tpu.memory_space<vmem>>) attributes {dimension_semantics = [#tpu.dimension_semantics<parallel>, #tpu.dimension_semantics<parallel>], iteration_bounds = array<i64: 1, 2>, scalar_prefetch = 0 : i64, scratch_operands = 0 : i64, tpu.core_type = #tpu.core_type<tc>, window_params = [{transform_indices = @transform_0, window_bounds = array<i64: 1, 4, 75, 8, 128>}, {transform_indices = @transform_1, window_bounds = array<i64: 1, 4, 2, 8, 128>}, {transform_indices = @transform_2, window_bounds = array<i64: 1, 3, 8, 128>}]} {
    %c0 = arith.constant 0 : index
    %c0_0 = arith.constant 0 : index
    %c0_1 = arith.constant 0 : index
    %c0_2 = arith.constant 0 : index
    %c0_3 = arith.constant 0 : index
    %0 = vector.load %arg3[%c0, %c0_0, %c0_1, %c0_2, %c0_3] : memref<1x4x2x8x128xf32, #tpu.memory_space<vmem>>, vector<1x1x1x8x128xf32>
    %1 = vector.shape_cast %0 : vector<1x1x1x8x128xf32> to vector<8x128xf32>
    %c0_4 = arith.constant 0 : index
    %c0_5 = arith.constant 0 : index
    %c1 = arith.constant 1 : index
    %c0_6 = arith.constant 0 : index
    %c0_7 = arith.constant 0 : index
    %2 = vector.load %arg3[%c0_4, %c0_5, %c1, %c0_6, %c0_7] : memref<1x4x2x8x128xf32, #tpu.memory_space<vmem>>, vector<1x1x1x8x128xf32>
    %3 = vector.shape_cast %2 : vector<1x1x1x8x128xf32> to vector<8x128xf32>
    %4 = arith.mulf %1, %3 : vector<8x128xf32>
    %5 = math.absf %4 : vector<8x128xf32>
    %cst = arith.constant 9.99999971E-10 : f32
    %6 = vector.broadcast %cst : f32 to vector<8x128xf32>
    %7 = arith.addf %5, %6 : vector<8x128xf32>
    %cst_8 = arith.constant 1.57079637 : f32
    %8 = vector.broadcast %cst_8 : f32 to vector<8x128xf32>
    %9 = arith.mulf %1, %8 : vector<8x128xf32>
    %cst_9 = arith.constant 1.57079637 : f32
    %10 = vector.broadcast %cst_9 : f32 to vector<8x128xf32>
    %11 = arith.mulf %3, %10 : vector<8x128xf32>
    %12 = math.cos %9 : vector<8x128xf32>
    %13 = math.sin %9 : vector<8x128xf32>
    %14 = math.cos %11 : vector<8x128xf32>
    %15 = math.sin %11 : vector<8x128xf32>
    %cst_10 = arith.constant 1.41421354 : f32
    %16 = vector.broadcast %cst_10 : f32 to vector<8x128xf32>
    %17 = arith.mulf %16, %12 : vector<8x128xf32>
    %cst_11 = arith.constant 1.41421354 : f32
    %18 = vector.broadcast %cst_11 : f32 to vector<8x128xf32>
    %19 = arith.mulf %18, %13 : vector<8x128xf32>
    %cst_12 = arith.constant 1.41421354 : f32
    %20 = vector.broadcast %cst_12 : f32 to vector<8x128xf32>
    %21 = arith.mulf %20, %14 : vector<8x128xf32>
    %cst_13 = arith.constant 1.41421354 : f32
    %22 = vector.broadcast %cst_13 : f32 to vector<8x128xf32>
    %23 = arith.mulf %22, %15 : vector<8x128xf32>
    %24 = arith.mulf %12, %12 : vector<8x128xf32>
    %25 = arith.mulf %13, %13 : vector<8x128xf32>
    %26 = arith.subf %24, %25 : vector<8x128xf32>
    %27 = arith.mulf %13, %12 : vector<8x128xf32>
    %28 = arith.mulf %12, %13 : vector<8x128xf32>
    %29 = arith.addf %27, %28 : vector<8x128xf32>
    %30 = arith.mulf %14, %14 : vector<8x128xf32>
    %31 = arith.mulf %15, %15 : vector<8x128xf32>
    %32 = arith.subf %30, %31 : vector<8x128xf32>
    %33 = arith.mulf %15, %14 : vector<8x128xf32>
    %34 = arith.mulf %14, %15 : vector<8x128xf32>
    %35 = arith.addf %33, %34 : vector<8x128xf32>
    %cst_14 = arith.constant 1.41421354 : f32
    %36 = vector.broadcast %cst_14 : f32 to vector<8x128xf32>
    %37 = arith.mulf %36, %26 : vector<8x128xf32>
    %cst_15 = arith.constant 1.41421354 : f32
    %38 = vector.broadcast %cst_15 : f32 to vector<8x128xf32>
    %39 = arith.mulf %38, %29 : vector<8x128xf32>
    %cst_16 = arith.constant 1.41421354 : f32
    %40 = vector.broadcast %cst_16 : f32 to vector<8x128xf32>
    %41 = arith.mulf %40, %32 : vector<8x128xf32>
    %cst_17 = arith.constant 1.41421354 : f32
    %42 = vector.broadcast %cst_17 : f32 to vector<8x128xf32>
    %43 = arith.mulf %42, %35 : vector<8x128xf32>
    %c0_18 = arith.constant 0 : index
    %c0_19 = arith.constant 0 : index
    %c0_20 = arith.constant 0 : index
    %c0_21 = arith.constant 0 : index
    %c0_22 = arith.constant 0 : index
    %44 = vector.load %arg2[%c0_18, %c0_19, %c0_20, %c0_21, %c0_22] : memref<1x4x75x8x128xf32, #tpu.memory_space<vmem>>, vector<1x1x1x8x128xf32>
    %45 = vector.shape_cast %44 : vector<1x1x1x8x128xf32> to vector<8x128xf32>
    %c0_23 = arith.constant 0 : index
    %c0_24 = arith.constant 0 : index
    %c25 = arith.constant 25 : index
    %c0_25 = arith.constant 0 : index
    %c0_26 = arith.constant 0 : index
    %46 = vector.load %arg2[%c0_23, %c0_24, %c25, %c0_25, %c0_26] : memref<1x4x75x8x128xf32, #tpu.memory_space<vmem>>, vector<1x1x1x8x128xf32>
    %47 = vector.shape_cast %46 : vector<1x1x1x8x128xf32> to vector<8x128xf32>
    %c0_27 = arith.constant 0 : index
    %c0_28 = arith.constant 0 : index
    %c50 = arith.constant 50 : index
    %c0_29 = arith.constant 0 : index
    %c0_30 = arith.constant 0 : index
    %48 = vector.load %arg2[%c0_27, %c0_28, %c50, %c0_29, %c0_30] : memref<1x4x75x8x128xf32, #tpu.memory_space<vmem>>, vector<1x1x1x8x128xf32>
    %49 = vector.shape_cast %48 : vector<1x1x1x8x128xf32> to vector<8x128xf32>
    %c0_31 = arith.constant 0 : index
    %c0_32 = arith.constant 0 : index
    %c1_33 = arith.constant 1 : index
    %c0_34 = arith.constant 0 : index
    %c0_35 = arith.constant 0 : index
    %50 = vector.load %arg2[%c0_31, %c0_32, %c1_33, %c0_34, %c0_35] : memref<1x4x75x8x128xf32, #tpu.memory_space<vmem>>, vector<1x1x1x8x128xf32>
    %51 = vector.shape_cast %50 : vector<1x1x1x8x128xf32> to vector<8x128xf32>
    %52 = arith.mulf %21, %51 : vector<8x128xf32>
    %53 = arith.addf %45, %52 : vector<8x128xf32>
    %c0_36 = arith.constant 0 : index
    %c0_37 = arith.constant 0 : index
    %c26 = arith.constant 26 : index
    %c0_38 = arith.constant 0 : index
    %c0_39 = arith.constant 0 : index
    %54 = vector.load %arg2[%c0_36, %c0_37, %c26, %c0_38, %c0_39] : memref<1x4x75x8x128xf32, #tpu.memory_space<vmem>>, vector<1x1x1x8x128xf32>
    %55 = vector.shape_cast %54 : vector<1x1x1x8x128xf32> to vector<8x128xf32>
    %56 = arith.mulf %21, %55 : vector<8x128xf32>
    %57 = arith.addf %47, %56 : vector<8x128xf32>
    %c0_40 = arith.constant 0 : index
    %c0_41 = arith.constant 0 : index
    %c51 = arith.constant 51 : index
    %c0_42 = arith.constant 0 : index
    %c0_43 = arith.constant 0 : index
    %58 = vector.load %arg2[%c0_40, %c0_41, %c51, %c0_42, %c0_43] : memref<1x4x75x8x128xf32, #tpu.memory_space<vmem>>, vector<1x1x1x8x128xf32>
    %59 = vector.shape_cast %58 : vector<1x1x1x8x128xf32> to vector<8x128xf32>
    %60 = arith.mulf %21, %59 : vector<8x128xf32>
    %61 = arith.addf %49, %60 : vector<8x128xf32>
    %c0_44 = arith.constant 0 : index
    %c0_45 = arith.constant 0 : index
    %c2 = arith.constant 2 : index
    %c0_46 = arith.constant 0 : index
    %c0_47 = arith.constant 0 : index
    %62 = vector.load %arg2[%c0_44, %c0_45, %c2, %c0_46, %c0_47] : memref<1x4x75x8x128xf32, #tpu.memory_space<vmem>>, vector<1x1x1x8x128xf32>
    %63 = vector.shape_cast %62 : vector<1x1x1x8x128xf32> to vector<8x128xf32>
    %64 = arith.mulf %23, %63 : vector<8x128xf32>
    %65 = arith.addf %53, %64 : vector<8x128xf32>
    %c0_48 = arith.constant 0 : index
    %c0_49 = arith.constant 0 : index
    %c27 = arith.constant 27 : index
    %c0_50 = arith.constant 0 : index
    %c0_51 = arith.constant 0 : index
    %66 = vector.load %arg2[%c0_48, %c0_49, %c27, %c0_50, %c0_51] : memref<1x4x75x8x128xf32, #tpu.memory_space<vmem>>, vector<1x1x1x8x128xf32>
    %67 = vector.shape_cast %66 : vector<1x1x1x8x128xf32> to vector<8x128xf32>
    %68 = arith.mulf %23, %67 : vector<8x128xf32>
    %69 = arith.addf %57, %68 : vector<8x128xf32>
    %c0_52 = arith.constant 0 : index
    %c0_53 = arith.constant 0 : index
    %c52 = arith.constant 52 : index
    %c0_54 = arith.constant 0 : index
    %c0_55 = arith.constant 0 : index
    %70 = vector.load %arg2[%c0_52, %c0_53, %c52, %c0_54, %c0_55] : memref<1x4x75x8x128xf32, #tpu.memory_space<vmem>>, vector<1x1x1x8x128xf32>
    %71 = vector.shape_cast %70 : vector<1x1x1x8x128xf32> to vector<8x128xf32>
    %72 = arith.mulf %23, %71 : vector<8x128xf32>
    %73 = arith.addf %61, %72 : vector<8x128xf32>
    %c0_56 = arith.constant 0 : index
    %c0_57 = arith.constant 0 : index
    %c3 = arith.constant 3 : index
    %c0_58 = arith.constant 0 : index
    %c0_59 = arith.constant 0 : index
    %74 = vector.load %arg2[%c0_56, %c0_57, %c3, %c0_58, %c0_59] : memref<1x4x75x8x128xf32, #tpu.memory_space<vmem>>, vector<1x1x1x8x128xf32>
    %75 = vector.shape_cast %74 : vector<1x1x1x8x128xf32> to vector<8x128xf32>
    %76 = arith.mulf %41, %75 : vector<8x128xf32>
    %77 = arith.addf %65, %76 : vector<8x128xf32>
    %c0_60 = arith.constant 0 : index
    %c0_61 = arith.constant 0 : index
    %c28 = arith.constant 28 : index
    %c0_62 = arith.constant 0 : index
    %c0_63 = arith.constant 0 : index
    %78 = vector.load %arg2[%c0_60, %c0_61, %c28, %c0_62, %c0_63] : memref<1x4x75x8x128xf32, #tpu.memory_space<vmem>>, vector<1x1x1x8x128xf32>
    %79 = vector.shape_cast %78 : vector<1x1x1x8x128xf32> to vector<8x128xf32>
    %80 = arith.mulf %41, %79 : vector<8x128xf32>
    %81 = arith.addf %69, %80 : vector<8x128xf32>
    %c0_64 = arith.constant 0 : index
    %c0_65 = arith.constant 0 : index
    %c53 = arith.constant 53 : index
    %c0_66 = arith.constant 0 : index
    %c0_67 = arith.constant 0 : index
    %82 = vector.load %arg2[%c0_64, %c0_65, %c53, %c0_66, %c0_67] : memref<1x4x75x8x128xf32, #tpu.memory_space<vmem>>, vector<1x1x1x8x128xf32>
    %83 = vector.shape_cast %82 : vector<1x1x1x8x128xf32> to vector<8x128xf32>
    %84 = arith.mulf %41, %83 : vector<8x128xf32>
    %85 = arith.addf %73, %84 : vector<8x128xf32>
    %c0_68 = arith.constant 0 : index
    %c0_69 = arith.constant 0 : index
    %c4 = arith.constant 4 : index
    %c0_70 = arith.constant 0 : index
    %c0_71 = arith.constant 0 : index
    %86 = vector.load %arg2[%c0_68, %c0_69, %c4, %c0_70, %c0_71] : memref<1x4x75x8x128xf32, #tpu.memory_space<vmem>>, vector<1x1x1x8x128xf32>
    %87 = vector.shape_cast %86 : vector<1x1x1x8x128xf32> to vector<8x128xf32>
    %88 = arith.mulf %43, %87 : vector<8x128xf32>
    %89 = arith.addf %77, %88 : vector<8x128xf32>
    %c0_72 = arith.constant 0 : index
    %c0_73 = arith.constant 0 : index
    %c29 = arith.constant 29 : index
    %c0_74 = arith.constant 0 : index
    %c0_75 = arith.constant 0 : index
    %90 = vector.load %arg2[%c0_72, %c0_73, %c29, %c0_74, %c0_75] : memref<1x4x75x8x128xf32, #tpu.memory_space<vmem>>, vector<1x1x1x8x128xf32>
    %91 = vector.shape_cast %90 : vector<1x1x1x8x128xf32> to vector<8x128xf32>
    %92 = arith.mulf %43, %91 : vector<8x128xf32>
    %93 = arith.addf %81, %92 : vector<8x128xf32>
    %c0_76 = arith.constant 0 : index
    %c0_77 = arith.constant 0 : index
    %c54 = arith.constant 54 : index
    %c0_78 = arith.constant 0 : index
    %c0_79 = arith.constant 0 : index
    %94 = vector.load %arg2[%c0_76, %c0_77, %c54, %c0_78, %c0_79] : memref<1x4x75x8x128xf32, #tpu.memory_space<vmem>>, vector<1x1x1x8x128xf32>
    %95 = vector.shape_cast %94 : vector<1x1x1x8x128xf32> to vector<8x128xf32>
    %96 = arith.mulf %43, %95 : vector<8x128xf32>
    %97 = arith.addf %85, %96 : vector<8x128xf32>
    %c0_80 = arith.constant 0 : index
    %c0_81 = arith.constant 0 : index
    %c5 = arith.constant 5 : index
    %c0_82 = arith.constant 0 : index
    %c0_83 = arith.constant 0 : index
    %98 = vector.load %arg2[%c0_80, %c0_81, %c5, %c0_82, %c0_83] : memref<1x4x75x8x128xf32, #tpu.memory_space<vmem>>, vector<1x1x1x8x128xf32>
    %99 = vector.shape_cast %98 : vector<1x1x1x8x128xf32> to vector<8x128xf32>
    %100 = arith.mulf %17, %99 : vector<8x128xf32>
    %101 = arith.addf %89, %100 : vector<8x128xf32>
    %c0_84 = arith.constant 0 : index
    %c0_85 = arith.constant 0 : index
    %c30 = arith.constant 30 : index
    %c0_86 = arith.constant 0 : index
    %c0_87 = arith.constant 0 : index
    %102 = vector.load %arg2[%c0_84, %c0_85, %c30, %c0_86, %c0_87] : memref<1x4x75x8x128xf32, #tpu.memory_space<vmem>>, vector<1x1x1x8x128xf32>
    %103 = vector.shape_cast %102 : vector<1x1x1x8x128xf32> to vector<8x128xf32>
    %104 = arith.mulf %17, %103 : vector<8x128xf32>
    %105 = arith.addf %93, %104 : vector<8x128xf32>
    %c0_88 = arith.constant 0 : index
    %c0_89 = arith.constant 0 : index
    %c55 = arith.constant 55 : index
    %c0_90 = arith.constant 0 : index
    %c0_91 = arith.constant 0 : index
    %106 = vector.load %arg2[%c0_88, %c0_89, %c55, %c0_90, %c0_91] : memref<1x4x75x8x128xf32, #tpu.memory_space<vmem>>, vector<1x1x1x8x128xf32>
    %107 = vector.shape_cast %106 : vector<1x1x1x8x128xf32> to vector<8x128xf32>
    %108 = arith.mulf %17, %107 : vector<8x128xf32>
    %109 = arith.addf %97, %108 : vector<8x128xf32>
    %110 = arith.mulf %17, %21 : vector<8x128xf32>
    %c0_92 = arith.constant 0 : index
    %c0_93 = arith.constant 0 : index
    %c6 = arith.constant 6 : index
    %c0_94 = arith.constant 0 : index
    %c0_95 = arith.constant 0 : index
    %111 = vector.load %arg2[%c0_92, %c0_93, %c6, %c0_94, %c0_95] : memref<1x4x75x8x128xf32, #tpu.memory_space<vmem>>, vector<1x1x1x8x128xf32>
    %112 = vector.shape_cast %111 : vector<1x1x1x8x128xf32> to vector<8x128xf32>
    %113 = arith.mulf %110, %112 : vector<8x128xf32>
    %114 = arith.addf %101, %113 : vector<8x128xf32>
    %c0_96 = arith.constant 0 : index
    %c0_97 = arith.constant 0 : index
    %c31 = arith.constant 31 : index
    %c0_98 = arith.constant 0 : index
    %c0_99 = arith.constant 0 : index
    %115 = vector.load %arg2[%c0_96, %c0_97, %c31, %c0_98, %c0_99] : memref<1x4x75x8x128xf32, #tpu.memory_space<vmem>>, vector<1x1x1x8x128xf32>
    %116 = vector.shape_cast %115 : vector<1x1x1x8x128xf32> to vector<8x128xf32>
    %117 = arith.mulf %110, %116 : vector<8x128xf32>
    %118 = arith.addf %105, %117 : vector<8x128xf32>
    %c0_100 = arith.constant 0 : index
    %c0_101 = arith.constant 0 : index
    %c56 = arith.constant 56 : index
    %c0_102 = arith.constant 0 : index
    %c0_103 = arith.constant 0 : index
    %119 = vector.load %arg2[%c0_100, %c0_101, %c56, %c0_102, %c0_103] : memref<1x4x75x8x128xf32, #tpu.memory_space<vmem>>, vector<1x1x1x8x128xf32>
    %120 = vector.shape_cast %119 : vector<1x1x1x8x128xf32> to vector<8x128xf32>
    %121 = arith.mulf %110, %120 : vector<8x128xf32>
    %122 = arith.addf %109, %121 : vector<8x128xf32>
    %123 = arith.mulf %17, %23 : vector<8x128xf32>
    %c0_104 = arith.constant 0 : index
    %c0_105 = arith.constant 0 : index
    %c7 = arith.constant 7 : index
    %c0_106 = arith.constant 0 : index
    %c0_107 = arith.constant 0 : index
    %124 = vector.load %arg2[%c0_104, %c0_105, %c7, %c0_106, %c0_107] : memref<1x4x75x8x128xf32, #tpu.memory_space<vmem>>, vector<1x1x1x8x128xf32>
    %125 = vector.shape_cast %124 : vector<1x1x1x8x128xf32> to vector<8x128xf32>
    %126 = arith.mulf %123, %125 : vector<8x128xf32>
    %127 = arith.addf %114, %126 : vector<8x128xf32>
    %c0_108 = arith.constant 0 : index
    %c0_109 = arith.constant 0 : index
    %c32 = arith.constant 32 : index
    %c0_110 = arith.constant 0 : index
    %c0_111 = arith.constant 0 : index
    %128 = vector.load %arg2[%c0_108, %c0_109, %c32, %c0_110, %c0_111] : memref<1x4x75x8x128xf32, #tpu.memory_space<vmem>>, vector<1x1x1x8x128xf32>
    %129 = vector.shape_cast %128 : vector<1x1x1x8x128xf32> to vector<8x128xf32>
    %130 = arith.mulf %123, %129 : vector<8x128xf32>
    %131 = arith.addf %118, %130 : vector<8x128xf32>
    %c0_112 = arith.constant 0 : index
    %c0_113 = arith.constant 0 : index
    %c57 = arith.constant 57 : index
    %c0_114 = arith.constant 0 : index
    %c0_115 = arith.constant 0 : index
    %132 = vector.load %arg2[%c0_112, %c0_113, %c57, %c0_114, %c0_115] : memref<1x4x75x8x128xf32, #tpu.memory_space<vmem>>, vector<1x1x1x8x128xf32>
    %133 = vector.shape_cast %132 : vector<1x1x1x8x128xf32> to vector<8x128xf32>
    %134 = arith.mulf %123, %133 : vector<8x128xf32>
    %135 = arith.addf %122, %134 : vector<8x128xf32>
    %136 = arith.mulf %17, %41 : vector<8x128xf32>
    %c0_116 = arith.constant 0 : index
    %c0_117 = arith.constant 0 : index
    %c8 = arith.constant 8 : index
    %c0_118 = arith.constant 0 : index
    %c0_119 = arith.constant 0 : index
    %137 = vector.load %arg2[%c0_116, %c0_117, %c8, %c0_118, %c0_119] : memref<1x4x75x8x128xf32, #tpu.memory_space<vmem>>, vector<1x1x1x8x128xf32>
    %138 = vector.shape_cast %137 : vector<1x1x1x8x128xf32> to vector<8x128xf32>
    %139 = arith.mulf %136, %138 : vector<8x128xf32>
    %140 = arith.addf %127, %139 : vector<8x128xf32>
    %c0_120 = arith.constant 0 : index
    %c0_121 = arith.constant 0 : index
    %c33 = arith.constant 33 : index
    %c0_122 = arith.constant 0 : index
    %c0_123 = arith.constant 0 : index
    %141 = vector.load %arg2[%c0_120, %c0_121, %c33, %c0_122, %c0_123] : memref<1x4x75x8x128xf32, #tpu.memory_space<vmem>>, vector<1x1x1x8x128xf32>
    %142 = vector.shape_cast %141 : vector<1x1x1x8x128xf32> to vector<8x128xf32>
    %143 = arith.mulf %136, %142 : vector<8x128xf32>
    %144 = arith.addf %131, %143 : vector<8x128xf32>
    %c0_124 = arith.constant 0 : index
    %c0_125 = arith.constant 0 : index
    %c58 = arith.constant 58 : index
    %c0_126 = arith.constant 0 : index
    %c0_127 = arith.constant 0 : index
    %145 = vector.load %arg2[%c0_124, %c0_125, %c58, %c0_126, %c0_127] : memref<1x4x75x8x128xf32, #tpu.memory_space<vmem>>, vector<1x1x1x8x128xf32>
    %146 = vector.shape_cast %145 : vector<1x1x1x8x128xf32> to vector<8x128xf32>
    %147 = arith.mulf %136, %146 : vector<8x128xf32>
    %148 = arith.addf %135, %147 : vector<8x128xf32>
    %149 = arith.mulf %17, %43 : vector<8x128xf32>
    %c0_128 = arith.constant 0 : index
    %c0_129 = arith.constant 0 : index
    %c9 = arith.constant 9 : index
    %c0_130 = arith.constant 0 : index
    %c0_131 = arith.constant 0 : index
    %150 = vector.load %arg2[%c0_128, %c0_129, %c9, %c0_130, %c0_131] : memref<1x4x75x8x128xf32, #tpu.memory_space<vmem>>, vector<1x1x1x8x128xf32>
    %151 = vector.shape_cast %150 : vector<1x1x1x8x128xf32> to vector<8x128xf32>
    %152 = arith.mulf %149, %151 : vector<8x128xf32>
    %153 = arith.addf %140, %152 : vector<8x128xf32>
    %c0_132 = arith.constant 0 : index
    %c0_133 = arith.constant 0 : index
    %c34 = arith.constant 34 : index
    %c0_134 = arith.constant 0 : index
    %c0_135 = arith.constant 0 : index
    %154 = vector.load %arg2[%c0_132, %c0_133, %c34, %c0_134, %c0_135] : memref<1x4x75x8x128xf32, #tpu.memory_space<vmem>>, vector<1x1x1x8x128xf32>
    %155 = vector.shape_cast %154 : vector<1x1x1x8x128xf32> to vector<8x128xf32>
    %156 = arith.mulf %149, %155 : vector<8x128xf32>
    %157 = arith.addf %144, %156 : vector<8x128xf32>
    %c0_136 = arith.constant 0 : index
    %c0_137 = arith.constant 0 : index
    %c59 = arith.constant 59 : index
    %c0_138 = arith.constant 0 : index
    %c0_139 = arith.constant 0 : index
    %158 = vector.load %arg2[%c0_136, %c0_137, %c59, %c0_138, %c0_139] : memref<1x4x75x8x128xf32, #tpu.memory_space<vmem>>, vector<1x1x1x8x128xf32>
    %159 = vector.shape_cast %158 : vector<1x1x1x8x128xf32> to vector<8x128xf32>
    %160 = arith.mulf %149, %159 : vector<8x128xf32>
    %161 = arith.addf %148, %160 : vector<8x128xf32>
    %c0_140 = arith.constant 0 : index
    %c0_141 = arith.constant 0 : index
    %c10 = arith.constant 10 : index
    %c0_142 = arith.constant 0 : index
    %c0_143 = arith.constant 0 : index
    %162 = vector.load %arg2[%c0_140, %c0_141, %c10, %c0_142, %c0_143] : memref<1x4x75x8x128xf32, #tpu.memory_space<vmem>>, vector<1x1x1x8x128xf32>
    %163 = vector.shape_cast %162 : vector<1x1x1x8x128xf32> to vector<8x128xf32>
    %164 = arith.mulf %19, %163 : vector<8x128xf32>
    %165 = arith.addf %153, %164 : vector<8x128xf32>
    %c0_144 = arith.constant 0 : index
    %c0_145 = arith.constant 0 : index
    %c35 = arith.constant 35 : index
    %c0_146 = arith.constant 0 : index
    %c0_147 = arith.constant 0 : index
    %166 = vector.load %arg2[%c0_144, %c0_145, %c35, %c0_146, %c0_147] : memref<1x4x75x8x128xf32, #tpu.memory_space<vmem>>, vector<1x1x1x8x128xf32>
    %167 = vector.shape_cast %166 : vector<1x1x1x8x128xf32> to vector<8x128xf32>
    %168 = arith.mulf %19, %167 : vector<8x128xf32>
    %169 = arith.addf %157, %168 : vector<8x128xf32>
    %c0_148 = arith.constant 0 : index
    %c0_149 = arith.constant 0 : index
    %c60 = arith.constant 60 : index
    %c0_150 = arith.constant 0 : index
    %c0_151 = arith.constant 0 : index
    %170 = vector.load %arg2[%c0_148, %c0_149, %c60, %c0_150, %c0_151] : memref<1x4x75x8x128xf32, #tpu.memory_space<vmem>>, vector<1x1x1x8x128xf32>
    %171 = vector.shape_cast %170 : vector<1x1x1x8x128xf32> to vector<8x128xf32>
    %172 = arith.mulf %19, %171 : vector<8x128xf32>
    %173 = arith.addf %161, %172 : vector<8x128xf32>
    %174 = arith.mulf %19, %21 : vector<8x128xf32>
    %c0_152 = arith.constant 0 : index
    %c0_153 = arith.constant 0 : index
    %c11 = arith.constant 11 : index
    %c0_154 = arith.constant 0 : index
    %c0_155 = arith.constant 0 : index
    %175 = vector.load %arg2[%c0_152, %c0_153, %c11, %c0_154, %c0_155] : memref<1x4x75x8x128xf32, #tpu.memory_space<vmem>>, vector<1x1x1x8x128xf32>
    %176 = vector.shape_cast %175 : vector<1x1x1x8x128xf32> to vector<8x128xf32>
    %177 = arith.mulf %174, %176 : vector<8x128xf32>
    %178 = arith.addf %165, %177 : vector<8x128xf32>
    %c0_156 = arith.constant 0 : index
    %c0_157 = arith.constant 0 : index
    %c36 = arith.constant 36 : index
    %c0_158 = arith.constant 0 : index
    %c0_159 = arith.constant 0 : index
    %179 = vector.load %arg2[%c0_156, %c0_157, %c36, %c0_158, %c0_159] : memref<1x4x75x8x128xf32, #tpu.memory_space<vmem>>, vector<1x1x1x8x128xf32>
    %180 = vector.shape_cast %179 : vector<1x1x1x8x128xf32> to vector<8x128xf32>
    %181 = arith.mulf %174, %180 : vector<8x128xf32>
    %182 = arith.addf %169, %181 : vector<8x128xf32>
    %c0_160 = arith.constant 0 : index
    %c0_161 = arith.constant 0 : index
    %c61 = arith.constant 61 : index
    %c0_162 = arith.constant 0 : index
    %c0_163 = arith.constant 0 : index
    %183 = vector.load %arg2[%c0_160, %c0_161, %c61, %c0_162, %c0_163] : memref<1x4x75x8x128xf32, #tpu.memory_space<vmem>>, vector<1x1x1x8x128xf32>
    %184 = vector.shape_cast %183 : vector<1x1x1x8x128xf32> to vector<8x128xf32>
    %185 = arith.mulf %174, %184 : vector<8x128xf32>
    %186 = arith.addf %173, %185 : vector<8x128xf32>
    %187 = arith.mulf %19, %23 : vector<8x128xf32>
    %c0_164 = arith.constant 0 : index
    %c0_165 = arith.constant 0 : index
    %c12 = arith.constant 12 : index
    %c0_166 = arith.constant 0 : index
    %c0_167 = arith.constant 0 : index
    %188 = vector.load %arg2[%c0_164, %c0_165, %c12, %c0_166, %c0_167] : memref<1x4x75x8x128xf32, #tpu.memory_space<vmem>>, vector<1x1x1x8x128xf32>
    %189 = vector.shape_cast %188 : vector<1x1x1x8x128xf32> to vector<8x128xf32>
    %190 = arith.mulf %187, %189 : vector<8x128xf32>
    %191 = arith.addf %178, %190 : vector<8x128xf32>
    %c0_168 = arith.constant 0 : index
    %c0_169 = arith.constant 0 : index
    %c37 = arith.constant 37 : index
    %c0_170 = arith.constant 0 : index
    %c0_171 = arith.constant 0 : index
    %192 = vector.load %arg2[%c0_168, %c0_169, %c37, %c0_170, %c0_171] : memref<1x4x75x8x128xf32, #tpu.memory_space<vmem>>, vector<1x1x1x8x128xf32>
    %193 = vector.shape_cast %192 : vector<1x1x1x8x128xf32> to vector<8x128xf32>
    %194 = arith.mulf %187, %193 : vector<8x128xf32>
    %195 = arith.addf %182, %194 : vector<8x128xf32>
    %c0_172 = arith.constant 0 : index
    %c0_173 = arith.constant 0 : index
    %c62 = arith.constant 62 : index
    %c0_174 = arith.constant 0 : index
    %c0_175 = arith.constant 0 : index
    %196 = vector.load %arg2[%c0_172, %c0_173, %c62, %c0_174, %c0_175] : memref<1x4x75x8x128xf32, #tpu.memory_space<vmem>>, vector<1x1x1x8x128xf32>
    %197 = vector.shape_cast %196 : vector<1x1x1x8x128xf32> to vector<8x128xf32>
    %198 = arith.mulf %187, %197 : vector<8x128xf32>
    %199 = arith.addf %186, %198 : vector<8x128xf32>
    %200 = arith.mulf %19, %41 : vector<8x128xf32>
    %c0_176 = arith.constant 0 : index
    %c0_177 = arith.constant 0 : index
    %c13 = arith.constant 13 : index
    %c0_178 = arith.constant 0 : index
    %c0_179 = arith.constant 0 : index
    %201 = vector.load %arg2[%c0_176, %c0_177, %c13, %c0_178, %c0_179] : memref<1x4x75x8x128xf32, #tpu.memory_space<vmem>>, vector<1x1x1x8x128xf32>
    %202 = vector.shape_cast %201 : vector<1x1x1x8x128xf32> to vector<8x128xf32>
    %203 = arith.mulf %200, %202 : vector<8x128xf32>
    %204 = arith.addf %191, %203 : vector<8x128xf32>
    %c0_180 = arith.constant 0 : index
    %c0_181 = arith.constant 0 : index
    %c38 = arith.constant 38 : index
    %c0_182 = arith.constant 0 : index
    %c0_183 = arith.constant 0 : index
    %205 = vector.load %arg2[%c0_180, %c0_181, %c38, %c0_182, %c0_183] : memref<1x4x75x8x128xf32, #tpu.memory_space<vmem>>, vector<1x1x1x8x128xf32>
    %206 = vector.shape_cast %205 : vector<1x1x1x8x128xf32> to vector<8x128xf32>
    %207 = arith.mulf %200, %206 : vector<8x128xf32>
    %208 = arith.addf %195, %207 : vector<8x128xf32>
    %c0_184 = arith.constant 0 : index
    %c0_185 = arith.constant 0 : index
    %c63 = arith.constant 63 : index
    %c0_186 = arith.constant 0 : index
    %c0_187 = arith.constant 0 : index
    %209 = vector.load %arg2[%c0_184, %c0_185, %c63, %c0_186, %c0_187] : memref<1x4x75x8x128xf32, #tpu.memory_space<vmem>>, vector<1x1x1x8x128xf32>
    %210 = vector.shape_cast %209 : vector<1x1x1x8x128xf32> to vector<8x128xf32>
    %211 = arith.mulf %200, %210 : vector<8x128xf32>
    %212 = arith.addf %199, %211 : vector<8x128xf32>
    %213 = arith.mulf %19, %43 : vector<8x128xf32>
    %c0_188 = arith.constant 0 : index
    %c0_189 = arith.constant 0 : index
    %c14 = arith.constant 14 : index
    %c0_190 = arith.constant 0 : index
    %c0_191 = arith.constant 0 : index
    %214 = vector.load %arg2[%c0_188, %c0_189, %c14, %c0_190, %c0_191] : memref<1x4x75x8x128xf32, #tpu.memory_space<vmem>>, vector<1x1x1x8x128xf32>
    %215 = vector.shape_cast %214 : vector<1x1x1x8x128xf32> to vector<8x128xf32>
    %216 = arith.mulf %213, %215 : vector<8x128xf32>
    %217 = arith.addf %204, %216 : vector<8x128xf32>
    %c0_192 = arith.constant 0 : index
    %c0_193 = arith.constant 0 : index
    %c39 = arith.constant 39 : index
    %c0_194 = arith.constant 0 : index
    %c0_195 = arith.constant 0 : index
    %218 = vector.load %arg2[%c0_192, %c0_193, %c39, %c0_194, %c0_195] : memref<1x4x75x8x128xf32, #tpu.memory_space<vmem>>, vector<1x1x1x8x128xf32>
    %219 = vector.shape_cast %218 : vector<1x1x1x8x128xf32> to vector<8x128xf32>
    %220 = arith.mulf %213, %219 : vector<8x128xf32>
    %221 = arith.addf %208, %220 : vector<8x128xf32>
    %c0_196 = arith.constant 0 : index
    %c0_197 = arith.constant 0 : index
    %c64 = arith.constant 64 : index
    %c0_198 = arith.constant 0 : index
    %c0_199 = arith.constant 0 : index
    %222 = vector.load %arg2[%c0_196, %c0_197, %c64, %c0_198, %c0_199] : memref<1x4x75x8x128xf32, #tpu.memory_space<vmem>>, vector<1x1x1x8x128xf32>
    %223 = vector.shape_cast %222 : vector<1x1x1x8x128xf32> to vector<8x128xf32>
    %224 = arith.mulf %213, %223 : vector<8x128xf32>
    %225 = arith.addf %212, %224 : vector<8x128xf32>
    %c0_200 = arith.constant 0 : index
    %c0_201 = arith.constant 0 : index
    %c15 = arith.constant 15 : index
    %c0_202 = arith.constant 0 : index
    %c0_203 = arith.constant 0 : index
    %226 = vector.load %arg2[%c0_200, %c0_201, %c15, %c0_202, %c0_203] : memref<1x4x75x8x128xf32, #tpu.memory_space<vmem>>, vector<1x1x1x8x128xf32>
    %227 = vector.shape_cast %226 : vector<1x1x1x8x128xf32> to vector<8x128xf32>
    %228 = arith.mulf %37, %227 : vector<8x128xf32>
    %229 = arith.addf %217, %228 : vector<8x128xf32>
    %c0_204 = arith.constant 0 : index
    %c0_205 = arith.constant 0 : index
    %c40 = arith.constant 40 : index
    %c0_206 = arith.constant 0 : index
    %c0_207 = arith.constant 0 : index
    %230 = vector.load %arg2[%c0_204, %c0_205, %c40, %c0_206, %c0_207] : memref<1x4x75x8x128xf32, #tpu.memory_space<vmem>>, vector<1x1x1x8x128xf32>
    %231 = vector.shape_cast %230 : vector<1x1x1x8x128xf32> to vector<8x128xf32>
    %232 = arith.mulf %37, %231 : vector<8x128xf32>
    %233 = arith.addf %221, %232 : vector<8x128xf32>
    %c0_208 = arith.constant 0 : index
    %c0_209 = arith.constant 0 : index
    %c65 = arith.constant 65 : index
    %c0_210 = arith.constant 0 : index
    %c0_211 = arith.constant 0 : index
    %234 = vector.load %arg2[%c0_208, %c0_209, %c65, %c0_210, %c0_211] : memref<1x4x75x8x128xf32, #tpu.memory_space<vmem>>, vector<1x1x1x8x128xf32>
    %235 = vector.shape_cast %234 : vector<1x1x1x8x128xf32> to vector<8x128xf32>
    %236 = arith.mulf %37, %235 : vector<8x128xf32>
    %237 = arith.addf %225, %236 : vector<8x128xf32>
    %238 = arith.mulf %37, %21 : vector<8x128xf32>
    %c0_212 = arith.constant 0 : index
    %c0_213 = arith.constant 0 : index
    %c16 = arith.constant 16 : index
    %c0_214 = arith.constant 0 : index
    %c0_215 = arith.constant 0 : index
    %239 = vector.load %arg2[%c0_212, %c0_213, %c16, %c0_214, %c0_215] : memref<1x4x75x8x128xf32, #tpu.memory_space<vmem>>, vector<1x1x1x8x128xf32>
    %240 = vector.shape_cast %239 : vector<1x1x1x8x128xf32> to vector<8x128xf32>
    %241 = arith.mulf %238, %240 : vector<8x128xf32>
    %242 = arith.addf %229, %241 : vector<8x128xf32>
    %c0_216 = arith.constant 0 : index
    %c0_217 = arith.constant 0 : index
    %c41 = arith.constant 41 : index
    %c0_218 = arith.constant 0 : index
    %c0_219 = arith.constant 0 : index
    %243 = vector.load %arg2[%c0_216, %c0_217, %c41, %c0_218, %c0_219] : memref<1x4x75x8x128xf32, #tpu.memory_space<vmem>>, vector<1x1x1x8x128xf32>
    %244 = vector.shape_cast %243 : vector<1x1x1x8x128xf32> to vector<8x128xf32>
    %245 = arith.mulf %238, %244 : vector<8x128xf32>
    %246 = arith.addf %233, %245 : vector<8x128xf32>
    %c0_220 = arith.constant 0 : index
    %c0_221 = arith.constant 0 : index
    %c66 = arith.constant 66 : index
    %c0_222 = arith.constant 0 : index
    %c0_223 = arith.constant 0 : index
    %247 = vector.load %arg2[%c0_220, %c0_221, %c66, %c0_222, %c0_223] : memref<1x4x75x8x128xf32, #tpu.memory_space<vmem>>, vector<1x1x1x8x128xf32>
    %248 = vector.shape_cast %247 : vector<1x1x1x8x128xf32> to vector<8x128xf32>
    %249 = arith.mulf %238, %248 : vector<8x128xf32>
    %250 = arith.addf %237, %249 : vector<8x128xf32>
    %251 = arith.mulf %37, %23 : vector<8x128xf32>
    %c0_224 = arith.constant 0 : index
    %c0_225 = arith.constant 0 : index
    %c17 = arith.constant 17 : index
    %c0_226 = arith.constant 0 : index
    %c0_227 = arith.constant 0 : index
    %252 = vector.load %arg2[%c0_224, %c0_225, %c17, %c0_226, %c0_227] : memref<1x4x75x8x128xf32, #tpu.memory_space<vmem>>, vector<1x1x1x8x128xf32>
    %253 = vector.shape_cast %252 : vector<1x1x1x8x128xf32> to vector<8x128xf32>
    %254 = arith.mulf %251, %253 : vector<8x128xf32>
    %255 = arith.addf %242, %254 : vector<8x128xf32>
    %c0_228 = arith.constant 0 : index
    %c0_229 = arith.constant 0 : index
    %c42 = arith.constant 42 : index
    %c0_230 = arith.constant 0 : index
    %c0_231 = arith.constant 0 : index
    %256 = vector.load %arg2[%c0_228, %c0_229, %c42, %c0_230, %c0_231] : memref<1x4x75x8x128xf32, #tpu.memory_space<vmem>>, vector<1x1x1x8x128xf32>
    %257 = vector.shape_cast %256 : vector<1x1x1x8x128xf32> to vector<8x128xf32>
    %258 = arith.mulf %251, %257 : vector<8x128xf32>
    %259 = arith.addf %246, %258 : vector<8x128xf32>
    %c0_232 = arith.constant 0 : index
    %c0_233 = arith.constant 0 : index
    %c67 = arith.constant 67 : index
    %c0_234 = arith.constant 0 : index
    %c0_235 = arith.constant 0 : index
    %260 = vector.load %arg2[%c0_232, %c0_233, %c67, %c0_234, %c0_235] : memref<1x4x75x8x128xf32, #tpu.memory_space<vmem>>, vector<1x1x1x8x128xf32>
    %261 = vector.shape_cast %260 : vector<1x1x1x8x128xf32> to vector<8x128xf32>
    %262 = arith.mulf %251, %261 : vector<8x128xf32>
    %263 = arith.addf %250, %262 : vector<8x128xf32>
    %264 = arith.mulf %37, %41 : vector<8x128xf32>
    %c0_236 = arith.constant 0 : index
    %c0_237 = arith.constant 0 : index
    %c18 = arith.constant 18 : index
    %c0_238 = arith.constant 0 : index
    %c0_239 = arith.constant 0 : index
    %265 = vector.load %arg2[%c0_236, %c0_237, %c18, %c0_238, %c0_239] : memref<1x4x75x8x128xf32, #tpu.memory_space<vmem>>, vector<1x1x1x8x128xf32>
    %266 = vector.shape_cast %265 : vector<1x1x1x8x128xf32> to vector<8x128xf32>
    %267 = arith.mulf %264, %266 : vector<8x128xf32>
    %268 = arith.addf %255, %267 : vector<8x128xf32>
    %c0_240 = arith.constant 0 : index
    %c0_241 = arith.constant 0 : index
    %c43 = arith.constant 43 : index
    %c0_242 = arith.constant 0 : index
    %c0_243 = arith.constant 0 : index
    %269 = vector.load %arg2[%c0_240, %c0_241, %c43, %c0_242, %c0_243] : memref<1x4x75x8x128xf32, #tpu.memory_space<vmem>>, vector<1x1x1x8x128xf32>
    %270 = vector.shape_cast %269 : vector<1x1x1x8x128xf32> to vector<8x128xf32>
    %271 = arith.mulf %264, %270 : vector<8x128xf32>
    %272 = arith.addf %259, %271 : vector<8x128xf32>
    %c0_244 = arith.constant 0 : index
    %c0_245 = arith.constant 0 : index
    %c68 = arith.constant 68 : index
    %c0_246 = arith.constant 0 : index
    %c0_247 = arith.constant 0 : index
    %273 = vector.load %arg2[%c0_244, %c0_245, %c68, %c0_246, %c0_247] : memref<1x4x75x8x128xf32, #tpu.memory_space<vmem>>, vector<1x1x1x8x128xf32>
    %274 = vector.shape_cast %273 : vector<1x1x1x8x128xf32> to vector<8x128xf32>
    %275 = arith.mulf %264, %274 : vector<8x128xf32>
    %276 = arith.addf %263, %275 : vector<8x128xf32>
    %277 = arith.mulf %37, %43 : vector<8x128xf32>
    %c0_248 = arith.constant 0 : index
    %c0_249 = arith.constant 0 : index
    %c19 = arith.constant 19 : index
    %c0_250 = arith.constant 0 : index
    %c0_251 = arith.constant 0 : index
    %278 = vector.load %arg2[%c0_248, %c0_249, %c19, %c0_250, %c0_251] : memref<1x4x75x8x128xf32, #tpu.memory_space<vmem>>, vector<1x1x1x8x128xf32>
    %279 = vector.shape_cast %278 : vector<1x1x1x8x128xf32> to vector<8x128xf32>
    %280 = arith.mulf %277, %279 : vector<8x128xf32>
    %281 = arith.addf %268, %280 : vector<8x128xf32>
    %c0_252 = arith.constant 0 : index
    %c0_253 = arith.constant 0 : index
    %c44 = arith.constant 44 : index
    %c0_254 = arith.constant 0 : index
    %c0_255 = arith.constant 0 : index
    %282 = vector.load %arg2[%c0_252, %c0_253, %c44, %c0_254, %c0_255] : memref<1x4x75x8x128xf32, #tpu.memory_space<vmem>>, vector<1x1x1x8x128xf32>
    %283 = vector.shape_cast %282 : vector<1x1x1x8x128xf32> to vector<8x128xf32>
    %284 = arith.mulf %277, %283 : vector<8x128xf32>
    %285 = arith.addf %272, %284 : vector<8x128xf32>
    %c0_256 = arith.constant 0 : index
    %c0_257 = arith.constant 0 : index
    %c69 = arith.constant 69 : index
    %c0_258 = arith.constant 0 : index
    %c0_259 = arith.constant 0 : index
    %286 = vector.load %arg2[%c0_256, %c0_257, %c69, %c0_258, %c0_259] : memref<1x4x75x8x128xf32, #tpu.memory_space<vmem>>, vector<1x1x1x8x128xf32>
    %287 = vector.shape_cast %286 : vector<1x1x1x8x128xf32> to vector<8x128xf32>
    %288 = arith.mulf %277, %287 : vector<8x128xf32>
    %289 = arith.addf %276, %288 : vector<8x128xf32>
    %c0_260 = arith.constant 0 : index
    %c0_261 = arith.constant 0 : index
    %c20 = arith.constant 20 : index
    %c0_262 = arith.constant 0 : index
    %c0_263 = arith.constant 0 : index
    %290 = vector.load %arg2[%c0_260, %c0_261, %c20, %c0_262, %c0_263] : memref<1x4x75x8x128xf32, #tpu.memory_space<vmem>>, vector<1x1x1x8x128xf32>
    %291 = vector.shape_cast %290 : vector<1x1x1x8x128xf32> to vector<8x128xf32>
    %292 = arith.mulf %39, %291 : vector<8x128xf32>
    %293 = arith.addf %281, %292 : vector<8x128xf32>
    %c0_264 = arith.constant 0 : index
    %c0_265 = arith.constant 0 : index
    %c45 = arith.constant 45 : index
    %c0_266 = arith.constant 0 : index
    %c0_267 = arith.constant 0 : index
    %294 = vector.load %arg2[%c0_264, %c0_265, %c45, %c0_266, %c0_267] : memref<1x4x75x8x128xf32, #tpu.memory_space<vmem>>, vector<1x1x1x8x128xf32>
    %295 = vector.shape_cast %294 : vector<1x1x1x8x128xf32> to vector<8x128xf32>
    %296 = arith.mulf %39, %295 : vector<8x128xf32>
    %297 = arith.addf %285, %296 : vector<8x128xf32>
    %c0_268 = arith.constant 0 : index
    %c0_269 = arith.constant 0 : index
    %c70 = arith.constant 70 : index
    %c0_270 = arith.constant 0 : index
    %c0_271 = arith.constant 0 : index
    %298 = vector.load %arg2[%c0_268, %c0_269, %c70, %c0_270, %c0_271] : memref<1x4x75x8x128xf32, #tpu.memory_space<vmem>>, vector<1x1x1x8x128xf32>
    %299 = vector.shape_cast %298 : vector<1x1x1x8x128xf32> to vector<8x128xf32>
    %300 = arith.mulf %39, %299 : vector<8x128xf32>
    %301 = arith.addf %289, %300 : vector<8x128xf32>
    %302 = arith.mulf %39, %21 : vector<8x128xf32>
    %c0_272 = arith.constant 0 : index
    %c0_273 = arith.constant 0 : index
    %c21 = arith.constant 21 : index
    %c0_274 = arith.constant 0 : index
    %c0_275 = arith.constant 0 : index
    %303 = vector.load %arg2[%c0_272, %c0_273, %c21, %c0_274, %c0_275] : memref<1x4x75x8x128xf32, #tpu.memory_space<vmem>>, vector<1x1x1x8x128xf32>
    %304 = vector.shape_cast %303 : vector<1x1x1x8x128xf32> to vector<8x128xf32>
    %305 = arith.mulf %302, %304 : vector<8x128xf32>
    %306 = arith.addf %293, %305 : vector<8x128xf32>
    %c0_276 = arith.constant 0 : index
    %c0_277 = arith.constant 0 : index
    %c46 = arith.constant 46 : index
    %c0_278 = arith.constant 0 : index
    %c0_279 = arith.constant 0 : index
    %307 = vector.load %arg2[%c0_276, %c0_277, %c46, %c0_278, %c0_279] : memref<1x4x75x8x128xf32, #tpu.memory_space<vmem>>, vector<1x1x1x8x128xf32>
    %308 = vector.shape_cast %307 : vector<1x1x1x8x128xf32> to vector<8x128xf32>
    %309 = arith.mulf %302, %308 : vector<8x128xf32>
    %310 = arith.addf %297, %309 : vector<8x128xf32>
    %c0_280 = arith.constant 0 : index
    %c0_281 = arith.constant 0 : index
    %c71 = arith.constant 71 : index
    %c0_282 = arith.constant 0 : index
    %c0_283 = arith.constant 0 : index
    %311 = vector.load %arg2[%c0_280, %c0_281, %c71, %c0_282, %c0_283] : memref<1x4x75x8x128xf32, #tpu.memory_space<vmem>>, vector<1x1x1x8x128xf32>
    %312 = vector.shape_cast %311 : vector<1x1x1x8x128xf32> to vector<8x128xf32>
    %313 = arith.mulf %302, %312 : vector<8x128xf32>
    %314 = arith.addf %301, %313 : vector<8x128xf32>
    %315 = arith.mulf %39, %23 : vector<8x128xf32>
    %c0_284 = arith.constant 0 : index
    %c0_285 = arith.constant 0 : index
    %c22 = arith.constant 22 : index
    %c0_286 = arith.constant 0 : index
    %c0_287 = arith.constant 0 : index
    %316 = vector.load %arg2[%c0_284, %c0_285, %c22, %c0_286, %c0_287] : memref<1x4x75x8x128xf32, #tpu.memory_space<vmem>>, vector<1x1x1x8x128xf32>
    %317 = vector.shape_cast %316 : vector<1x1x1x8x128xf32> to vector<8x128xf32>
    %318 = arith.mulf %315, %317 : vector<8x128xf32>
    %319 = arith.addf %306, %318 : vector<8x128xf32>
    %c0_288 = arith.constant 0 : index
    %c0_289 = arith.constant 0 : index
    %c47 = arith.constant 47 : index
    %c0_290 = arith.constant 0 : index
    %c0_291 = arith.constant 0 : index
    %320 = vector.load %arg2[%c0_288, %c0_289, %c47, %c0_290, %c0_291] : memref<1x4x75x8x128xf32, #tpu.memory_space<vmem>>, vector<1x1x1x8x128xf32>
    %321 = vector.shape_cast %320 : vector<1x1x1x8x128xf32> to vector<8x128xf32>
    %322 = arith.mulf %315, %321 : vector<8x128xf32>
    %323 = arith.addf %310, %322 : vector<8x128xf32>
    %c0_292 = arith.constant 0 : index
    %c0_293 = arith.constant 0 : index
    %c72 = arith.constant 72 : index
    %c0_294 = arith.constant 0 : index
    %c0_295 = arith.constant 0 : index
    %324 = vector.load %arg2[%c0_292, %c0_293, %c72, %c0_294, %c0_295] : memref<1x4x75x8x128xf32, #tpu.memory_space<vmem>>, vector<1x1x1x8x128xf32>
    %325 = vector.shape_cast %324 : vector<1x1x1x8x128xf32> to vector<8x128xf32>
    %326 = arith.mulf %315, %325 : vector<8x128xf32>
    %327 = arith.addf %314, %326 : vector<8x128xf32>
    %328 = arith.mulf %39, %41 : vector<8x128xf32>
    %c0_296 = arith.constant 0 : index
    %c0_297 = arith.constant 0 : index
    %c23 = arith.constant 23 : index
    %c0_298 = arith.constant 0 : index
    %c0_299 = arith.constant 0 : index
    %329 = vector.load %arg2[%c0_296, %c0_297, %c23, %c0_298, %c0_299] : memref<1x4x75x8x128xf32, #tpu.memory_space<vmem>>, vector<1x1x1x8x128xf32>
    %330 = vector.shape_cast %329 : vector<1x1x1x8x128xf32> to vector<8x128xf32>
    %331 = arith.mulf %328, %330 : vector<8x128xf32>
    %332 = arith.addf %319, %331 : vector<8x128xf32>
    %c0_300 = arith.constant 0 : index
    %c0_301 = arith.constant 0 : index
    %c48 = arith.constant 48 : index
    %c0_302 = arith.constant 0 : index
    %c0_303 = arith.constant 0 : index
    %333 = vector.load %arg2[%c0_300, %c0_301, %c48, %c0_302, %c0_303] : memref<1x4x75x8x128xf32, #tpu.memory_space<vmem>>, vector<1x1x1x8x128xf32>
    %334 = vector.shape_cast %333 : vector<1x1x1x8x128xf32> to vector<8x128xf32>
    %335 = arith.mulf %328, %334 : vector<8x128xf32>
    %336 = arith.addf %323, %335 : vector<8x128xf32>
    %c0_304 = arith.constant 0 : index
    %c0_305 = arith.constant 0 : index
    %c73 = arith.constant 73 : index
    %c0_306 = arith.constant 0 : index
    %c0_307 = arith.constant 0 : index
    %337 = vector.load %arg2[%c0_304, %c0_305, %c73, %c0_306, %c0_307] : memref<1x4x75x8x128xf32, #tpu.memory_space<vmem>>, vector<1x1x1x8x128xf32>
    %338 = vector.shape_cast %337 : vector<1x1x1x8x128xf32> to vector<8x128xf32>
    %339 = arith.mulf %328, %338 : vector<8x128xf32>
    %340 = arith.addf %327, %339 : vector<8x128xf32>
    %341 = arith.mulf %39, %43 : vector<8x128xf32>
    %c0_308 = arith.constant 0 : index
    %c0_309 = arith.constant 0 : index
    %c24 = arith.constant 24 : index
    %c0_310 = arith.constant 0 : index
    %c0_311 = arith.constant 0 : index
    %342 = vector.load %arg2[%c0_308, %c0_309, %c24, %c0_310, %c0_311] : memref<1x4x75x8x128xf32, #tpu.memory_space<vmem>>, vector<1x1x1x8x128xf32>
    %343 = vector.shape_cast %342 : vector<1x1x1x8x128xf32> to vector<8x128xf32>
    %344 = arith.mulf %341, %343 : vector<8x128xf32>
    %345 = arith.addf %332, %344 : vector<8x128xf32>
    %c0_312 = arith.constant 0 : index
    %c0_313 = arith.constant 0 : index
    %c49 = arith.constant 49 : index
    %c0_314 = arith.constant 0 : index
    %c0_315 = arith.constant 0 : index
    %346 = vector.load %arg2[%c0_312, %c0_313, %c49, %c0_314, %c0_315] : memref<1x4x75x8x128xf32, #tpu.memory_space<vmem>>, vector<1x1x1x8x128xf32>
    %347 = vector.shape_cast %346 : vector<1x1x1x8x128xf32> to vector<8x128xf32>
    %348 = arith.mulf %341, %347 : vector<8x128xf32>
    %349 = arith.addf %336, %348 : vector<8x128xf32>
    %c0_316 = arith.constant 0 : index
    %c0_317 = arith.constant 0 : index
    %c74 = arith.constant 74 : index
    %c0_318 = arith.constant 0 : index
    %c0_319 = arith.constant 0 : index
    %350 = vector.load %arg2[%c0_316, %c0_317, %c74, %c0_318, %c0_319] : memref<1x4x75x8x128xf32, #tpu.memory_space<vmem>>, vector<1x1x1x8x128xf32>
    %351 = vector.shape_cast %350 : vector<1x1x1x8x128xf32> to vector<8x128xf32>
    %352 = arith.mulf %341, %351 : vector<8x128xf32>
    %353 = arith.addf %340, %352 : vector<8x128xf32>
    %c0_320 = arith.constant 0 : index
    %c1_321 = arith.constant 1 : index
    %c0_322 = arith.constant 0 : index
    %c0_323 = arith.constant 0 : index
    %c0_324 = arith.constant 0 : index
    %354 = vector.load %arg3[%c0_320, %c1_321, %c0_322, %c0_323, %c0_324] : memref<1x4x2x8x128xf32, #tpu.memory_space<vmem>>, vector<1x1x1x8x128xf32>
    %355 = vector.shape_cast %354 : vector<1x1x1x8x128xf32> to vector<8x128xf32>
    %c0_325 = arith.constant 0 : index
    %c1_326 = arith.constant 1 : index
    %c1_327 = arith.constant 1 : index
    %c0_328 = arith.constant 0 : index
    %c0_329 = arith.constant 0 : index
    %356 = vector.load %arg3[%c0_325, %c1_326, %c1_327, %c0_328, %c0_329] : memref<1x4x2x8x128xf32, #tpu.memory_space<vmem>>, vector<1x1x1x8x128xf32>
    %357 = vector.shape_cast %356 : vector<1x1x1x8x128xf32> to vector<8x128xf32>
    %358 = arith.mulf %355, %357 : vector<8x128xf32>
    %359 = math.absf %358 : vector<8x128xf32>
    %cst_330 = arith.constant 9.99999971E-10 : f32
    %360 = vector.broadcast %cst_330 : f32 to vector<8x128xf32>
    %361 = arith.addf %359, %360 : vector<8x128xf32>
    %cst_331 = arith.constant 1.57079637 : f32
    %362 = vector.broadcast %cst_331 : f32 to vector<8x128xf32>
    %363 = arith.mulf %355, %362 : vector<8x128xf32>
    %cst_332 = arith.constant 1.57079637 : f32
    %364 = vector.broadcast %cst_332 : f32 to vector<8x128xf32>
    %365 = arith.mulf %357, %364 : vector<8x128xf32>
    %366 = math.cos %363 : vector<8x128xf32>
    %367 = math.sin %363 : vector<8x128xf32>
    %368 = math.cos %365 : vector<8x128xf32>
    %369 = math.sin %365 : vector<8x128xf32>
    %cst_333 = arith.constant 1.41421354 : f32
    %370 = vector.broadcast %cst_333 : f32 to vector<8x128xf32>
    %371 = arith.mulf %370, %366 : vector<8x128xf32>
    %cst_334 = arith.constant 1.41421354 : f32
    %372 = vector.broadcast %cst_334 : f32 to vector<8x128xf32>
    %373 = arith.mulf %372, %367 : vector<8x128xf32>
    %cst_335 = arith.constant 1.41421354 : f32
    %374 = vector.broadcast %cst_335 : f32 to vector<8x128xf32>
    %375 = arith.mulf %374, %368 : vector<8x128xf32>
    %cst_336 = arith.constant 1.41421354 : f32
    %376 = vector.broadcast %cst_336 : f32 to vector<8x128xf32>
    %377 = arith.mulf %376, %369 : vector<8x128xf32>
    %378 = arith.mulf %366, %366 : vector<8x128xf32>
    %379 = arith.mulf %367, %367 : vector<8x128xf32>
    %380 = arith.subf %378, %379 : vector<8x128xf32>
    %381 = arith.mulf %367, %366 : vector<8x128xf32>
    %382 = arith.mulf %366, %367 : vector<8x128xf32>
    %383 = arith.addf %381, %382 : vector<8x128xf32>
    %384 = arith.mulf %368, %368 : vector<8x128xf32>
    %385 = arith.mulf %369, %369 : vector<8x128xf32>
    %386 = arith.subf %384, %385 : vector<8x128xf32>
    %387 = arith.mulf %369, %368 : vector<8x128xf32>
    %388 = arith.mulf %368, %369 : vector<8x128xf32>
    %389 = arith.addf %387, %388 : vector<8x128xf32>
    %cst_337 = arith.constant 1.41421354 : f32
    %390 = vector.broadcast %cst_337 : f32 to vector<8x128xf32>
    %391 = arith.mulf %390, %380 : vector<8x128xf32>
    %cst_338 = arith.constant 1.41421354 : f32
    %392 = vector.broadcast %cst_338 : f32 to vector<8x128xf32>
    %393 = arith.mulf %392, %383 : vector<8x128xf32>
    %cst_339 = arith.constant 1.41421354 : f32
    %394 = vector.broadcast %cst_339 : f32 to vector<8x128xf32>
    %395 = arith.mulf %394, %386 : vector<8x128xf32>
    %cst_340 = arith.constant 1.41421354 : f32
    %396 = vector.broadcast %cst_340 : f32 to vector<8x128xf32>
    %397 = arith.mulf %396, %389 : vector<8x128xf32>
    %c0_341 = arith.constant 0 : index
    %c1_342 = arith.constant 1 : index
    %c0_343 = arith.constant 0 : index
    %c0_344 = arith.constant 0 : index
    %c0_345 = arith.constant 0 : index
    %398 = vector.load %arg2[%c0_341, %c1_342, %c0_343, %c0_344, %c0_345] : memref<1x4x75x8x128xf32, #tpu.memory_space<vmem>>, vector<1x1x1x8x128xf32>
    %399 = vector.shape_cast %398 : vector<1x1x1x8x128xf32> to vector<8x128xf32>
    %c0_346 = arith.constant 0 : index
    %c1_347 = arith.constant 1 : index
    %c25_348 = arith.constant 25 : index
    %c0_349 = arith.constant 0 : index
    %c0_350 = arith.constant 0 : index
    %400 = vector.load %arg2[%c0_346, %c1_347, %c25_348, %c0_349, %c0_350] : memref<1x4x75x8x128xf32, #tpu.memory_space<vmem>>, vector<1x1x1x8x128xf32>
    %401 = vector.shape_cast %400 : vector<1x1x1x8x128xf32> to vector<8x128xf32>
    %c0_351 = arith.constant 0 : index
    %c1_352 = arith.constant 1 : index
    %c50_353 = arith.constant 50 : index
    %c0_354 = arith.constant 0 : index
    %c0_355 = arith.constant 0 : index
    %402 = vector.load %arg2[%c0_351, %c1_352, %c50_353, %c0_354, %c0_355] : memref<1x4x75x8x128xf32, #tpu.memory_space<vmem>>, vector<1x1x1x8x128xf32>
    %403 = vector.shape_cast %402 : vector<1x1x1x8x128xf32> to vector<8x128xf32>
    %c0_356 = arith.constant 0 : index
    %c1_357 = arith.constant 1 : index
    %c1_358 = arith.constant 1 : index
    %c0_359 = arith.constant 0 : index
    %c0_360 = arith.constant 0 : index
    %404 = vector.load %arg2[%c0_356, %c1_357, %c1_358, %c0_359, %c0_360] : memref<1x4x75x8x128xf32, #tpu.memory_space<vmem>>, vector<1x1x1x8x128xf32>
    %405 = vector.shape_cast %404 : vector<1x1x1x8x128xf32> to vector<8x128xf32>
    %406 = arith.mulf %375, %405 : vector<8x128xf32>
    %407 = arith.addf %399, %406 : vector<8x128xf32>
    %c0_361 = arith.constant 0 : index
    %c1_362 = arith.constant 1 : index
    %c26_363 = arith.constant 26 : index
    %c0_364 = arith.constant 0 : index
    %c0_365 = arith.constant 0 : index
    %408 = vector.load %arg2[%c0_361, %c1_362, %c26_363, %c0_364, %c0_365] : memref<1x4x75x8x128xf32, #tpu.memory_space<vmem>>, vector<1x1x1x8x128xf32>
    %409 = vector.shape_cast %408 : vector<1x1x1x8x128xf32> to vector<8x128xf32>
    %410 = arith.mulf %375, %409 : vector<8x128xf32>
    %411 = arith.addf %401, %410 : vector<8x128xf32>
    %c0_366 = arith.constant 0 : index
    %c1_367 = arith.constant 1 : index
    %c51_368 = arith.constant 51 : index
    %c0_369 = arith.constant 0 : index
    %c0_370 = arith.constant 0 : index
    %412 = vector.load %arg2[%c0_366, %c1_367, %c51_368, %c0_369, %c0_370] : memref<1x4x75x8x128xf32, #tpu.memory_space<vmem>>, vector<1x1x1x8x128xf32>
    %413 = vector.shape_cast %412 : vector<1x1x1x8x128xf32> to vector<8x128xf32>
    %414 = arith.mulf %375, %413 : vector<8x128xf32>
    %415 = arith.addf %403, %414 : vector<8x128xf32>
    %c0_371 = arith.constant 0 : index
    %c1_372 = arith.constant 1 : index
    %c2_373 = arith.constant 2 : index
    %c0_374 = arith.constant 0 : index
    %c0_375 = arith.constant 0 : index
    %416 = vector.load %arg2[%c0_371, %c1_372, %c2_373, %c0_374, %c0_375] : memref<1x4x75x8x128xf32, #tpu.memory_space<vmem>>, vector<1x1x1x8x128xf32>
    %417 = vector.shape_cast %416 : vector<1x1x1x8x128xf32> to vector<8x128xf32>
    %418 = arith.mulf %377, %417 : vector<8x128xf32>
    %419 = arith.addf %407, %418 : vector<8x128xf32>
    %c0_376 = arith.constant 0 : index
    %c1_377 = arith.constant 1 : index
    %c27_378 = arith.constant 27 : index
    %c0_379 = arith.constant 0 : index
    %c0_380 = arith.constant 0 : index
    %420 = vector.load %arg2[%c0_376, %c1_377, %c27_378, %c0_379, %c0_380] : memref<1x4x75x8x128xf32, #tpu.memory_space<vmem>>, vector<1x1x1x8x128xf32>
    %421 = vector.shape_cast %420 : vector<1x1x1x8x128xf32> to vector<8x128xf32>
    %422 = arith.mulf %377, %421 : vector<8x128xf32>
    %423 = arith.addf %411, %422 : vector<8x128xf32>
    %c0_381 = arith.constant 0 : index
    %c1_382 = arith.constant 1 : index
    %c52_383 = arith.constant 52 : index
    %c0_384 = arith.constant 0 : index
    %c0_385 = arith.constant 0 : index
    %424 = vector.load %arg2[%c0_381, %c1_382, %c52_383, %c0_384, %c0_385] : memref<1x4x75x8x128xf32, #tpu.memory_space<vmem>>, vector<1x1x1x8x128xf32>
    %425 = vector.shape_cast %424 : vector<1x1x1x8x128xf32> to vector<8x128xf32>
    %426 = arith.mulf %377, %425 : vector<8x128xf32>
    %427 = arith.addf %415, %426 : vector<8x128xf32>
    %c0_386 = arith.constant 0 : index
    %c1_387 = arith.constant 1 : index
    %c3_388 = arith.constant 3 : index
    %c0_389 = arith.constant 0 : index
    %c0_390 = arith.constant 0 : index
    %428 = vector.load %arg2[%c0_386, %c1_387, %c3_388, %c0_389, %c0_390] : memref<1x4x75x8x128xf32, #tpu.memory_space<vmem>>, vector<1x1x1x8x128xf32>
    %429 = vector.shape_cast %428 : vector<1x1x1x8x128xf32> to vector<8x128xf32>
    %430 = arith.mulf %395, %429 : vector<8x128xf32>
    %431 = arith.addf %419, %430 : vector<8x128xf32>
    %c0_391 = arith.constant 0 : index
    %c1_392 = arith.constant 1 : index
    %c28_393 = arith.constant 28 : index
    %c0_394 = arith.constant 0 : index
    %c0_395 = arith.constant 0 : index
    %432 = vector.load %arg2[%c0_391, %c1_392, %c28_393, %c0_394, %c0_395] : memref<1x4x75x8x128xf32, #tpu.memory_space<vmem>>, vector<1x1x1x8x128xf32>
    %433 = vector.shape_cast %432 : vector<1x1x1x8x128xf32> to vector<8x128xf32>
    %434 = arith.mulf %395, %433 : vector<8x128xf32>
    %435 = arith.addf %423, %434 : vector<8x128xf32>
    %c0_396 = arith.constant 0 : index
    %c1_397 = arith.constant 1 : index
    %c53_398 = arith.constant 53 : index
    %c0_399 = arith.constant 0 : index
    %c0_400 = arith.constant 0 : index
    %436 = vector.load %arg2[%c0_396, %c1_397, %c53_398, %c0_399, %c0_400] : memref<1x4x75x8x128xf32, #tpu.memory_space<vmem>>, vector<1x1x1x8x128xf32>
    %437 = vector.shape_cast %436 : vector<1x1x1x8x128xf32> to vector<8x128xf32>
    %438 = arith.mulf %395, %437 : vector<8x128xf32>
    %439 = arith.addf %427, %438 : vector<8x128xf32>
    %c0_401 = arith.constant 0 : index
    %c1_402 = arith.constant 1 : index
    %c4_403 = arith.constant 4 : index
    %c0_404 = arith.constant 0 : index
    %c0_405 = arith.constant 0 : index
    %440 = vector.load %arg2[%c0_401, %c1_402, %c4_403, %c0_404, %c0_405] : memref<1x4x75x8x128xf32, #tpu.memory_space<vmem>>, vector<1x1x1x8x128xf32>
    %441 = vector.shape_cast %440 : vector<1x1x1x8x128xf32> to vector<8x128xf32>
    %442 = arith.mulf %397, %441 : vector<8x128xf32>
    %443 = arith.addf %431, %442 : vector<8x128xf32>
    %c0_406 = arith.constant 0 : index
    %c1_407 = arith.constant 1 : index
    %c29_408 = arith.constant 29 : index
    %c0_409 = arith.constant 0 : index
    %c0_410 = arith.constant 0 : index
    %444 = vector.load %arg2[%c0_406, %c1_407, %c29_408, %c0_409, %c0_410] : memref<1x4x75x8x128xf32, #tpu.memory_space<vmem>>, vector<1x1x1x8x128xf32>
    %445 = vector.shape_cast %444 : vector<1x1x1x8x128xf32> to vector<8x128xf32>
    %446 = arith.mulf %397, %445 : vector<8x128xf32>
    %447 = arith.addf %435, %446 : vector<8x128xf32>
    %c0_411 = arith.constant 0 : index
    %c1_412 = arith.constant 1 : index
    %c54_413 = arith.constant 54 : index
    %c0_414 = arith.constant 0 : index
    %c0_415 = arith.constant 0 : index
    %448 = vector.load %arg2[%c0_411, %c1_412, %c54_413, %c0_414, %c0_415] : memref<1x4x75x8x128xf32, #tpu.memory_space<vmem>>, vector<1x1x1x8x128xf32>
    %449 = vector.shape_cast %448 : vector<1x1x1x8x128xf32> to vector<8x128xf32>
    %450 = arith.mulf %397, %449 : vector<8x128xf32>
    %451 = arith.addf %439, %450 : vector<8x128xf32>
    %c0_416 = arith.constant 0 : index
    %c1_417 = arith.constant 1 : index
    %c5_418 = arith.constant 5 : index
    %c0_419 = arith.constant 0 : index
    %c0_420 = arith.constant 0 : index
    %452 = vector.load %arg2[%c0_416, %c1_417, %c5_418, %c0_419, %c0_420] : memref<1x4x75x8x128xf32, #tpu.memory_space<vmem>>, vector<1x1x1x8x128xf32>
    %453 = vector.shape_cast %452 : vector<1x1x1x8x128xf32> to vector<8x128xf32>
    %454 = arith.mulf %371, %453 : vector<8x128xf32>
    %455 = arith.addf %443, %454 : vector<8x128xf32>
    %c0_421 = arith.constant 0 : index
    %c1_422 = arith.constant 1 : index
    %c30_423 = arith.constant 30 : index
    %c0_424 = arith.constant 0 : index
    %c0_425 = arith.constant 0 : index
    %456 = vector.load %arg2[%c0_421, %c1_422, %c30_423, %c0_424, %c0_425] : memref<1x4x75x8x128xf32, #tpu.memory_space<vmem>>, vector<1x1x1x8x128xf32>
    %457 = vector.shape_cast %456 : vector<1x1x1x8x128xf32> to vector<8x128xf32>
    %458 = arith.mulf %371, %457 : vector<8x128xf32>
    %459 = arith.addf %447, %458 : vector<8x128xf32>
    %c0_426 = arith.constant 0 : index
    %c1_427 = arith.constant 1 : index
    %c55_428 = arith.constant 55 : index
    %c0_429 = arith.constant 0 : index
    %c0_430 = arith.constant 0 : index
    %460 = vector.load %arg2[%c0_426, %c1_427, %c55_428, %c0_429, %c0_430] : memref<1x4x75x8x128xf32, #tpu.memory_space<vmem>>, vector<1x1x1x8x128xf32>
    %461 = vector.shape_cast %460 : vector<1x1x1x8x128xf32> to vector<8x128xf32>
    %462 = arith.mulf %371, %461 : vector<8x128xf32>
    %463 = arith.addf %451, %462 : vector<8x128xf32>
    %464 = arith.mulf %371, %375 : vector<8x128xf32>
    %c0_431 = arith.constant 0 : index
    %c1_432 = arith.constant 1 : index
    %c6_433 = arith.constant 6 : index
    %c0_434 = arith.constant 0 : index
    %c0_435 = arith.constant 0 : index
    %465 = vector.load %arg2[%c0_431, %c1_432, %c6_433, %c0_434, %c0_435] : memref<1x4x75x8x128xf32, #tpu.memory_space<vmem>>, vector<1x1x1x8x128xf32>
    %466 = vector.shape_cast %465 : vector<1x1x1x8x128xf32> to vector<8x128xf32>
    %467 = arith.mulf %464, %466 : vector<8x128xf32>
    %468 = arith.addf %455, %467 : vector<8x128xf32>
    %c0_436 = arith.constant 0 : index
    %c1_437 = arith.constant 1 : index
    %c31_438 = arith.constant 31 : index
    %c0_439 = arith.constant 0 : index
    %c0_440 = arith.constant 0 : index
    %469 = vector.load %arg2[%c0_436, %c1_437, %c31_438, %c0_439, %c0_440] : memref<1x4x75x8x128xf32, #tpu.memory_space<vmem>>, vector<1x1x1x8x128xf32>
    %470 = vector.shape_cast %469 : vector<1x1x1x8x128xf32> to vector<8x128xf32>
    %471 = arith.mulf %464, %470 : vector<8x128xf32>
    %472 = arith.addf %459, %471 : vector<8x128xf32>
    %c0_441 = arith.constant 0 : index
    %c1_442 = arith.constant 1 : index
    %c56_443 = arith.constant 56 : index
    %c0_444 = arith.constant 0 : index
    %c0_445 = arith.constant 0 : index
    %473 = vector.load %arg2[%c0_441, %c1_442, %c56_443, %c0_444, %c0_445] : memref<1x4x75x8x128xf32, #tpu.memory_space<vmem>>, vector<1x1x1x8x128xf32>
    %474 = vector.shape_cast %473 : vector<1x1x1x8x128xf32> to vector<8x128xf32>
    %475 = arith.mulf %464, %474 : vector<8x128xf32>
    %476 = arith.addf %463, %475 : vector<8x128xf32>
    %477 = arith.mulf %371, %377 : vector<8x128xf32>
    %c0_446 = arith.constant 0 : index
    %c1_447 = arith.constant 1 : index
    %c7_448 = arith.constant 7 : index
    %c0_449 = arith.constant 0 : index
    %c0_450 = arith.constant 0 : index
    %478 = vector.load %arg2[%c0_446, %c1_447, %c7_448, %c0_449, %c0_450] : memref<1x4x75x8x128xf32, #tpu.memory_space<vmem>>, vector<1x1x1x8x128xf32>
    %479 = vector.shape_cast %478 : vector<1x1x1x8x128xf32> to vector<8x128xf32>
    %480 = arith.mulf %477, %479 : vector<8x128xf32>
    %481 = arith.addf %468, %480 : vector<8x128xf32>
    %c0_451 = arith.constant 0 : index
    %c1_452 = arith.constant 1 : index
    %c32_453 = arith.constant 32 : index
    %c0_454 = arith.constant 0 : index
    %c0_455 = arith.constant 0 : index
    %482 = vector.load %arg2[%c0_451, %c1_452, %c32_453, %c0_454, %c0_455] : memref<1x4x75x8x128xf32, #tpu.memory_space<vmem>>, vector<1x1x1x8x128xf32>
    %483 = vector.shape_cast %482 : vector<1x1x1x8x128xf32> to vector<8x128xf32>
    %484 = arith.mulf %477, %483 : vector<8x128xf32>
    %485 = arith.addf %472, %484 : vector<8x128xf32>
    %c0_456 = arith.constant 0 : index
    %c1_457 = arith.constant 1 : index
    %c57_458 = arith.constant 57 : index
    %c0_459 = arith.constant 0 : index
    %c0_460 = arith.constant 0 : index
    %486 = vector.load %arg2[%c0_456, %c1_457, %c57_458, %c0_459, %c0_460] : memref<1x4x75x8x128xf32, #tpu.memory_space<vmem>>, vector<1x1x1x8x128xf32>
    %487 = vector.shape_cast %486 : vector<1x1x1x8x128xf32> to vector<8x128xf32>
    %488 = arith.mulf %477, %487 : vector<8x128xf32>
    %489 = arith.addf %476, %488 : vector<8x128xf32>
    %490 = arith.mulf %371, %395 : vector<8x128xf32>
    %c0_461 = arith.constant 0 : index
    %c1_462 = arith.constant 1 : index
    %c8_463 = arith.constant 8 : index
    %c0_464 = arith.constant 0 : index
    %c0_465 = arith.constant 0 : index
    %491 = vector.load %arg2[%c0_461, %c1_462, %c8_463, %c0_464, %c0_465] : memref<1x4x75x8x128xf32, #tpu.memory_space<vmem>>, vector<1x1x1x8x128xf32>
    %492 = vector.shape_cast %491 : vector<1x1x1x8x128xf32> to vector<8x128xf32>
    %493 = arith.mulf %490, %492 : vector<8x128xf32>
    %494 = arith.addf %481, %493 : vector<8x128xf32>
    %c0_466 = arith.constant 0 : index
    %c1_467 = arith.constant 1 : index
    %c33_468 = arith.constant 33 : index
    %c0_469 = arith.constant 0 : index
    %c0_470 = arith.constant 0 : index
    %495 = vector.load %arg2[%c0_466, %c1_467, %c33_468, %c0_469, %c0_470] : memref<1x4x75x8x128xf32, #tpu.memory_space<vmem>>, vector<1x1x1x8x128xf32>
    %496 = vector.shape_cast %495 : vector<1x1x1x8x128xf32> to vector<8x128xf32>
    %497 = arith.mulf %490, %496 : vector<8x128xf32>
    %498 = arith.addf %485, %497 : vector<8x128xf32>
    %c0_471 = arith.constant 0 : index
    %c1_472 = arith.constant 1 : index
    %c58_473 = arith.constant 58 : index
    %c0_474 = arith.constant 0 : index
    %c0_475 = arith.constant 0 : index
    %499 = vector.load %arg2[%c0_471, %c1_472, %c58_473, %c0_474, %c0_475] : memref<1x4x75x8x128xf32, #tpu.memory_space<vmem>>, vector<1x1x1x8x128xf32>
    %500 = vector.shape_cast %499 : vector<1x1x1x8x128xf32> to vector<8x128xf32>
    %501 = arith.mulf %490, %500 : vector<8x128xf32>
    %502 = arith.addf %489, %501 : vector<8x128xf32>
    %503 = arith.mulf %371, %397 : vector<8x128xf32>
    %c0_476 = arith.constant 0 : index
    %c1_477 = arith.constant 1 : index
    %c9_478 = arith.constant 9 : index
    %c0_479 = arith.constant 0 : index
    %c0_480 = arith.constant 0 : index
    %504 = vector.load %arg2[%c0_476, %c1_477, %c9_478, %c0_479, %c0_480] : memref<1x4x75x8x128xf32, #tpu.memory_space<vmem>>, vector<1x1x1x8x128xf32>
    %505 = vector.shape_cast %504 : vector<1x1x1x8x128xf32> to vector<8x128xf32>
    %506 = arith.mulf %503, %505 : vector<8x128xf32>
    %507 = arith.addf %494, %506 : vector<8x128xf32>
    %c0_481 = arith.constant 0 : index
    %c1_482 = arith.constant 1 : index
    %c34_483 = arith.constant 34 : index
    %c0_484 = arith.constant 0 : index
    %c0_485 = arith.constant 0 : index
    %508 = vector.load %arg2[%c0_481, %c1_482, %c34_483, %c0_484, %c0_485] : memref<1x4x75x8x128xf32, #tpu.memory_space<vmem>>, vector<1x1x1x8x128xf32>
    %509 = vector.shape_cast %508 : vector<1x1x1x8x128xf32> to vector<8x128xf32>
    %510 = arith.mulf %503, %509 : vector<8x128xf32>
    %511 = arith.addf %498, %510 : vector<8x128xf32>
    %c0_486 = arith.constant 0 : index
    %c1_487 = arith.constant 1 : index
    %c59_488 = arith.constant 59 : index
    %c0_489 = arith.constant 0 : index
    %c0_490 = arith.constant 0 : index
    %512 = vector.load %arg2[%c0_486, %c1_487, %c59_488, %c0_489, %c0_490] : memref<1x4x75x8x128xf32, #tpu.memory_space<vmem>>, vector<1x1x1x8x128xf32>
    %513 = vector.shape_cast %512 : vector<1x1x1x8x128xf32> to vector<8x128xf32>
    %514 = arith.mulf %503, %513 : vector<8x128xf32>
    %515 = arith.addf %502, %514 : vector<8x128xf32>
    %c0_491 = arith.constant 0 : index
    %c1_492 = arith.constant 1 : index
    %c10_493 = arith.constant 10 : index
    %c0_494 = arith.constant 0 : index
    %c0_495 = arith.constant 0 : index
    %516 = vector.load %arg2[%c0_491, %c1_492, %c10_493, %c0_494, %c0_495] : memref<1x4x75x8x128xf32, #tpu.memory_space<vmem>>, vector<1x1x1x8x128xf32>
    %517 = vector.shape_cast %516 : vector<1x1x1x8x128xf32> to vector<8x128xf32>
    %518 = arith.mulf %373, %517 : vector<8x128xf32>
    %519 = arith.addf %507, %518 : vector<8x128xf32>
    %c0_496 = arith.constant 0 : index
    %c1_497 = arith.constant 1 : index
    %c35_498 = arith.constant 35 : index
    %c0_499 = arith.constant 0 : index
    %c0_500 = arith.constant 0 : index
    %520 = vector.load %arg2[%c0_496, %c1_497, %c35_498, %c0_499, %c0_500] : memref<1x4x75x8x128xf32, #tpu.memory_space<vmem>>, vector<1x1x1x8x128xf32>
    %521 = vector.shape_cast %520 : vector<1x1x1x8x128xf32> to vector<8x128xf32>
    %522 = arith.mulf %373, %521 : vector<8x128xf32>
    %523 = arith.addf %511, %522 : vector<8x128xf32>
    %c0_501 = arith.constant 0 : index
    %c1_502 = arith.constant 1 : index
    %c60_503 = arith.constant 60 : index
    %c0_504 = arith.constant 0 : index
    %c0_505 = arith.constant 0 : index
    %524 = vector.load %arg2[%c0_501, %c1_502, %c60_503, %c0_504, %c0_505] : memref<1x4x75x8x128xf32, #tpu.memory_space<vmem>>, vector<1x1x1x8x128xf32>
    %525 = vector.shape_cast %524 : vector<1x1x1x8x128xf32> to vector<8x128xf32>
    %526 = arith.mulf %373, %525 : vector<8x128xf32>
    %527 = arith.addf %515, %526 : vector<8x128xf32>
    %528 = arith.mulf %373, %375 : vector<8x128xf32>
    %c0_506 = arith.constant 0 : index
    %c1_507 = arith.constant 1 : index
    %c11_508 = arith.constant 11 : index
    %c0_509 = arith.constant 0 : index
    %c0_510 = arith.constant 0 : index
    %529 = vector.load %arg2[%c0_506, %c1_507, %c11_508, %c0_509, %c0_510] : memref<1x4x75x8x128xf32, #tpu.memory_space<vmem>>, vector<1x1x1x8x128xf32>
    %530 = vector.shape_cast %529 : vector<1x1x1x8x128xf32> to vector<8x128xf32>
    %531 = arith.mulf %528, %530 : vector<8x128xf32>
    %532 = arith.addf %519, %531 : vector<8x128xf32>
    %c0_511 = arith.constant 0 : index
    %c1_512 = arith.constant 1 : index
    %c36_513 = arith.constant 36 : index
    %c0_514 = arith.constant 0 : index
    %c0_515 = arith.constant 0 : index
    %533 = vector.load %arg2[%c0_511, %c1_512, %c36_513, %c0_514, %c0_515] : memref<1x4x75x8x128xf32, #tpu.memory_space<vmem>>, vector<1x1x1x8x128xf32>
    %534 = vector.shape_cast %533 : vector<1x1x1x8x128xf32> to vector<8x128xf32>
    %535 = arith.mulf %528, %534 : vector<8x128xf32>
    %536 = arith.addf %523, %535 : vector<8x128xf32>
    %c0_516 = arith.constant 0 : index
    %c1_517 = arith.constant 1 : index
    %c61_518 = arith.constant 61 : index
    %c0_519 = arith.constant 0 : index
    %c0_520 = arith.constant 0 : index
    %537 = vector.load %arg2[%c0_516, %c1_517, %c61_518, %c0_519, %c0_520] : memref<1x4x75x8x128xf32, #tpu.memory_space<vmem>>, vector<1x1x1x8x128xf32>
    %538 = vector.shape_cast %537 : vector<1x1x1x8x128xf32> to vector<8x128xf32>
    %539 = arith.mulf %528, %538 : vector<8x128xf32>
    %540 = arith.addf %527, %539 : vector<8x128xf32>
    %541 = arith.mulf %373, %377 : vector<8x128xf32>
    %c0_521 = arith.constant 0 : index
    %c1_522 = arith.constant 1 : index
    %c12_523 = arith.constant 12 : index
    %c0_524 = arith.constant 0 : index
    %c0_525 = arith.constant 0 : index
    %542 = vector.load %arg2[%c0_521, %c1_522, %c12_523, %c0_524, %c0_525] : memref<1x4x75x8x128xf32, #tpu.memory_space<vmem>>, vector<1x1x1x8x128xf32>
    %543 = vector.shape_cast %542 : vector<1x1x1x8x128xf32> to vector<8x128xf32>
    %544 = arith.mulf %541, %543 : vector<8x128xf32>
    %545 = arith.addf %532, %544 : vector<8x128xf32>
    %c0_526 = arith.constant 0 : index
    %c1_527 = arith.constant 1 : index
    %c37_528 = arith.constant 37 : index
    %c0_529 = arith.constant 0 : index
    %c0_530 = arith.constant 0 : index
    %546 = vector.load %arg2[%c0_526, %c1_527, %c37_528, %c0_529, %c0_530] : memref<1x4x75x8x128xf32, #tpu.memory_space<vmem>>, vector<1x1x1x8x128xf32>
    %547 = vector.shape_cast %546 : vector<1x1x1x8x128xf32> to vector<8x128xf32>
    %548 = arith.mulf %541, %547 : vector<8x128xf32>
    %549 = arith.addf %536, %548 : vector<8x128xf32>
    %c0_531 = arith.constant 0 : index
    %c1_532 = arith.constant 1 : index
    %c62_533 = arith.constant 62 : index
    %c0_534 = arith.constant 0 : index
    %c0_535 = arith.constant 0 : index
    %550 = vector.load %arg2[%c0_531, %c1_532, %c62_533, %c0_534, %c0_535] : memref<1x4x75x8x128xf32, #tpu.memory_space<vmem>>, vector<1x1x1x8x128xf32>
    %551 = vector.shape_cast %550 : vector<1x1x1x8x128xf32> to vector<8x128xf32>
    %552 = arith.mulf %541, %551 : vector<8x128xf32>
    %553 = arith.addf %540, %552 : vector<8x128xf32>
    %554 = arith.mulf %373, %395 : vector<8x128xf32>
    %c0_536 = arith.constant 0 : index
    %c1_537 = arith.constant 1 : index
    %c13_538 = arith.constant 13 : index
    %c0_539 = arith.constant 0 : index
    %c0_540 = arith.constant 0 : index
    %555 = vector.load %arg2[%c0_536, %c1_537, %c13_538, %c0_539, %c0_540] : memref<1x4x75x8x128xf32, #tpu.memory_space<vmem>>, vector<1x1x1x8x128xf32>
    %556 = vector.shape_cast %555 : vector<1x1x1x8x128xf32> to vector<8x128xf32>
    %557 = arith.mulf %554, %556 : vector<8x128xf32>
    %558 = arith.addf %545, %557 : vector<8x128xf32>
    %c0_541 = arith.constant 0 : index
    %c1_542 = arith.constant 1 : index
    %c38_543 = arith.constant 38 : index
    %c0_544 = arith.constant 0 : index
    %c0_545 = arith.constant 0 : index
    %559 = vector.load %arg2[%c0_541, %c1_542, %c38_543, %c0_544, %c0_545] : memref<1x4x75x8x128xf32, #tpu.memory_space<vmem>>, vector<1x1x1x8x128xf32>
    %560 = vector.shape_cast %559 : vector<1x1x1x8x128xf32> to vector<8x128xf32>
    %561 = arith.mulf %554, %560 : vector<8x128xf32>
    %562 = arith.addf %549, %561 : vector<8x128xf32>
    %c0_546 = arith.constant 0 : index
    %c1_547 = arith.constant 1 : index
    %c63_548 = arith.constant 63 : index
    %c0_549 = arith.constant 0 : index
    %c0_550 = arith.constant 0 : index
    %563 = vector.load %arg2[%c0_546, %c1_547, %c63_548, %c0_549, %c0_550] : memref<1x4x75x8x128xf32, #tpu.memory_space<vmem>>, vector<1x1x1x8x128xf32>
    %564 = vector.shape_cast %563 : vector<1x1x1x8x128xf32> to vector<8x128xf32>
    %565 = arith.mulf %554, %564 : vector<8x128xf32>
    %566 = arith.addf %553, %565 : vector<8x128xf32>
    %567 = arith.mulf %373, %397 : vector<8x128xf32>
    %c0_551 = arith.constant 0 : index
    %c1_552 = arith.constant 1 : index
    %c14_553 = arith.constant 14 : index
    %c0_554 = arith.constant 0 : index
    %c0_555 = arith.constant 0 : index
    %568 = vector.load %arg2[%c0_551, %c1_552, %c14_553, %c0_554, %c0_555] : memref<1x4x75x8x128xf32, #tpu.memory_space<vmem>>, vector<1x1x1x8x128xf32>
    %569 = vector.shape_cast %568 : vector<1x1x1x8x128xf32> to vector<8x128xf32>
    %570 = arith.mulf %567, %569 : vector<8x128xf32>
    %571 = arith.addf %558, %570 : vector<8x128xf32>
    %c0_556 = arith.constant 0 : index
    %c1_557 = arith.constant 1 : index
    %c39_558 = arith.constant 39 : index
    %c0_559 = arith.constant 0 : index
    %c0_560 = arith.constant 0 : index
    %572 = vector.load %arg2[%c0_556, %c1_557, %c39_558, %c0_559, %c0_560] : memref<1x4x75x8x128xf32, #tpu.memory_space<vmem>>, vector<1x1x1x8x128xf32>
    %573 = vector.shape_cast %572 : vector<1x1x1x8x128xf32> to vector<8x128xf32>
    %574 = arith.mulf %567, %573 : vector<8x128xf32>
    %575 = arith.addf %562, %574 : vector<8x128xf32>
    %c0_561 = arith.constant 0 : index
    %c1_562 = arith.constant 1 : index
    %c64_563 = arith.constant 64 : index
    %c0_564 = arith.constant 0 : index
    %c0_565 = arith.constant 0 : index
    %576 = vector.load %arg2[%c0_561, %c1_562, %c64_563, %c0_564, %c0_565] : memref<1x4x75x8x128xf32, #tpu.memory_space<vmem>>, vector<1x1x1x8x128xf32>
    %577 = vector.shape_cast %576 : vector<1x1x1x8x128xf32> to vector<8x128xf32>
    %578 = arith.mulf %567, %577 : vector<8x128xf32>
    %579 = arith.addf %566, %578 : vector<8x128xf32>
    %c0_566 = arith.constant 0 : index
    %c1_567 = arith.constant 1 : index
    %c15_568 = arith.constant 15 : index
    %c0_569 = arith.constant 0 : index
    %c0_570 = arith.constant 0 : index
    %580 = vector.load %arg2[%c0_566, %c1_567, %c15_568, %c0_569, %c0_570] : memref<1x4x75x8x128xf32, #tpu.memory_space<vmem>>, vector<1x1x1x8x128xf32>
    %581 = vector.shape_cast %580 : vector<1x1x1x8x128xf32> to vector<8x128xf32>
    %582 = arith.mulf %391, %581 : vector<8x128xf32>
    %583 = arith.addf %571, %582 : vector<8x128xf32>
    %c0_571 = arith.constant 0 : index
    %c1_572 = arith.constant 1 : index
    %c40_573 = arith.constant 40 : index
    %c0_574 = arith.constant 0 : index
    %c0_575 = arith.constant 0 : index
    %584 = vector.load %arg2[%c0_571, %c1_572, %c40_573, %c0_574, %c0_575] : memref<1x4x75x8x128xf32, #tpu.memory_space<vmem>>, vector<1x1x1x8x128xf32>
    %585 = vector.shape_cast %584 : vector<1x1x1x8x128xf32> to vector<8x128xf32>
    %586 = arith.mulf %391, %585 : vector<8x128xf32>
    %587 = arith.addf %575, %586 : vector<8x128xf32>
    %c0_576 = arith.constant 0 : index
    %c1_577 = arith.constant 1 : index
    %c65_578 = arith.constant 65 : index
    %c0_579 = arith.constant 0 : index
    %c0_580 = arith.constant 0 : index
    %588 = vector.load %arg2[%c0_576, %c1_577, %c65_578, %c0_579, %c0_580] : memref<1x4x75x8x128xf32, #tpu.memory_space<vmem>>, vector<1x1x1x8x128xf32>
    %589 = vector.shape_cast %588 : vector<1x1x1x8x128xf32> to vector<8x128xf32>
    %590 = arith.mulf %391, %589 : vector<8x128xf32>
    %591 = arith.addf %579, %590 : vector<8x128xf32>
    %592 = arith.mulf %391, %375 : vector<8x128xf32>
    %c0_581 = arith.constant 0 : index
    %c1_582 = arith.constant 1 : index
    %c16_583 = arith.constant 16 : index
    %c0_584 = arith.constant 0 : index
    %c0_585 = arith.constant 0 : index
    %593 = vector.load %arg2[%c0_581, %c1_582, %c16_583, %c0_584, %c0_585] : memref<1x4x75x8x128xf32, #tpu.memory_space<vmem>>, vector<1x1x1x8x128xf32>
    %594 = vector.shape_cast %593 : vector<1x1x1x8x128xf32> to vector<8x128xf32>
    %595 = arith.mulf %592, %594 : vector<8x128xf32>
    %596 = arith.addf %583, %595 : vector<8x128xf32>
    %c0_586 = arith.constant 0 : index
    %c1_587 = arith.constant 1 : index
    %c41_588 = arith.constant 41 : index
    %c0_589 = arith.constant 0 : index
    %c0_590 = arith.constant 0 : index
    %597 = vector.load %arg2[%c0_586, %c1_587, %c41_588, %c0_589, %c0_590] : memref<1x4x75x8x128xf32, #tpu.memory_space<vmem>>, vector<1x1x1x8x128xf32>
    %598 = vector.shape_cast %597 : vector<1x1x1x8x128xf32> to vector<8x128xf32>
    %599 = arith.mulf %592, %598 : vector<8x128xf32>
    %600 = arith.addf %587, %599 : vector<8x128xf32>
    %c0_591 = arith.constant 0 : index
    %c1_592 = arith.constant 1 : index
    %c66_593 = arith.constant 66 : index
    %c0_594 = arith.constant 0 : index
    %c0_595 = arith.constant 0 : index
    %601 = vector.load %arg2[%c0_591, %c1_592, %c66_593, %c0_594, %c0_595] : memref<1x4x75x8x128xf32, #tpu.memory_space<vmem>>, vector<1x1x1x8x128xf32>
    %602 = vector.shape_cast %601 : vector<1x1x1x8x128xf32> to vector<8x128xf32>
    %603 = arith.mulf %592, %602 : vector<8x128xf32>
    %604 = arith.addf %591, %603 : vector<8x128xf32>
    %605 = arith.mulf %391, %377 : vector<8x128xf32>
    %c0_596 = arith.constant 0 : index
    %c1_597 = arith.constant 1 : index
    %c17_598 = arith.constant 17 : index
    %c0_599 = arith.constant 0 : index
    %c0_600 = arith.constant 0 : index
    %606 = vector.load %arg2[%c0_596, %c1_597, %c17_598, %c0_599, %c0_600] : memref<1x4x75x8x128xf32, #tpu.memory_space<vmem>>, vector<1x1x1x8x128xf32>
    %607 = vector.shape_cast %606 : vector<1x1x1x8x128xf32> to vector<8x128xf32>
    %608 = arith.mulf %605, %607 : vector<8x128xf32>
    %609 = arith.addf %596, %608 : vector<8x128xf32>
    %c0_601 = arith.constant 0 : index
    %c1_602 = arith.constant 1 : index
    %c42_603 = arith.constant 42 : index
    %c0_604 = arith.constant 0 : index
    %c0_605 = arith.constant 0 : index
    %610 = vector.load %arg2[%c0_601, %c1_602, %c42_603, %c0_604, %c0_605] : memref<1x4x75x8x128xf32, #tpu.memory_space<vmem>>, vector<1x1x1x8x128xf32>
    %611 = vector.shape_cast %610 : vector<1x1x1x8x128xf32> to vector<8x128xf32>
    %612 = arith.mulf %605, %611 : vector<8x128xf32>
    %613 = arith.addf %600, %612 : vector<8x128xf32>
    %c0_606 = arith.constant 0 : index
    %c1_607 = arith.constant 1 : index
    %c67_608 = arith.constant 67 : index
    %c0_609 = arith.constant 0 : index
    %c0_610 = arith.constant 0 : index
    %614 = vector.load %arg2[%c0_606, %c1_607, %c67_608, %c0_609, %c0_610] : memref<1x4x75x8x128xf32, #tpu.memory_space<vmem>>, vector<1x1x1x8x128xf32>
    %615 = vector.shape_cast %614 : vector<1x1x1x8x128xf32> to vector<8x128xf32>
    %616 = arith.mulf %605, %615 : vector<8x128xf32>
    %617 = arith.addf %604, %616 : vector<8x128xf32>
    %618 = arith.mulf %391, %395 : vector<8x128xf32>
    %c0_611 = arith.constant 0 : index
    %c1_612 = arith.constant 1 : index
    %c18_613 = arith.constant 18 : index
    %c0_614 = arith.constant 0 : index
    %c0_615 = arith.constant 0 : index
    %619 = vector.load %arg2[%c0_611, %c1_612, %c18_613, %c0_614, %c0_615] : memref<1x4x75x8x128xf32, #tpu.memory_space<vmem>>, vector<1x1x1x8x128xf32>
    %620 = vector.shape_cast %619 : vector<1x1x1x8x128xf32> to vector<8x128xf32>
    %621 = arith.mulf %618, %620 : vector<8x128xf32>
    %622 = arith.addf %609, %621 : vector<8x128xf32>
    %c0_616 = arith.constant 0 : index
    %c1_617 = arith.constant 1 : index
    %c43_618 = arith.constant 43 : index
    %c0_619 = arith.constant 0 : index
    %c0_620 = arith.constant 0 : index
    %623 = vector.load %arg2[%c0_616, %c1_617, %c43_618, %c0_619, %c0_620] : memref<1x4x75x8x128xf32, #tpu.memory_space<vmem>>, vector<1x1x1x8x128xf32>
    %624 = vector.shape_cast %623 : vector<1x1x1x8x128xf32> to vector<8x128xf32>
    %625 = arith.mulf %618, %624 : vector<8x128xf32>
    %626 = arith.addf %613, %625 : vector<8x128xf32>
    %c0_621 = arith.constant 0 : index
    %c1_622 = arith.constant 1 : index
    %c68_623 = arith.constant 68 : index
    %c0_624 = arith.constant 0 : index
    %c0_625 = arith.constant 0 : index
    %627 = vector.load %arg2[%c0_621, %c1_622, %c68_623, %c0_624, %c0_625] : memref<1x4x75x8x128xf32, #tpu.memory_space<vmem>>, vector<1x1x1x8x128xf32>
    %628 = vector.shape_cast %627 : vector<1x1x1x8x128xf32> to vector<8x128xf32>
    %629 = arith.mulf %618, %628 : vector<8x128xf32>
    %630 = arith.addf %617, %629 : vector<8x128xf32>
    %631 = arith.mulf %391, %397 : vector<8x128xf32>
    %c0_626 = arith.constant 0 : index
    %c1_627 = arith.constant 1 : index
    %c19_628 = arith.constant 19 : index
    %c0_629 = arith.constant 0 : index
    %c0_630 = arith.constant 0 : index
    %632 = vector.load %arg2[%c0_626, %c1_627, %c19_628, %c0_629, %c0_630] : memref<1x4x75x8x128xf32, #tpu.memory_space<vmem>>, vector<1x1x1x8x128xf32>
    %633 = vector.shape_cast %632 : vector<1x1x1x8x128xf32> to vector<8x128xf32>
    %634 = arith.mulf %631, %633 : vector<8x128xf32>
    %635 = arith.addf %622, %634 : vector<8x128xf32>
    %c0_631 = arith.constant 0 : index
    %c1_632 = arith.constant 1 : index
    %c44_633 = arith.constant 44 : index
    %c0_634 = arith.constant 0 : index
    %c0_635 = arith.constant 0 : index
    %636 = vector.load %arg2[%c0_631, %c1_632, %c44_633, %c0_634, %c0_635] : memref<1x4x75x8x128xf32, #tpu.memory_space<vmem>>, vector<1x1x1x8x128xf32>
    %637 = vector.shape_cast %636 : vector<1x1x1x8x128xf32> to vector<8x128xf32>
    %638 = arith.mulf %631, %637 : vector<8x128xf32>
    %639 = arith.addf %626, %638 : vector<8x128xf32>
    %c0_636 = arith.constant 0 : index
    %c1_637 = arith.constant 1 : index
    %c69_638 = arith.constant 69 : index
    %c0_639 = arith.constant 0 : index
    %c0_640 = arith.constant 0 : index
    %640 = vector.load %arg2[%c0_636, %c1_637, %c69_638, %c0_639, %c0_640] : memref<1x4x75x8x128xf32, #tpu.memory_space<vmem>>, vector<1x1x1x8x128xf32>
    %641 = vector.shape_cast %640 : vector<1x1x1x8x128xf32> to vector<8x128xf32>
    %642 = arith.mulf %631, %641 : vector<8x128xf32>
    %643 = arith.addf %630, %642 : vector<8x128xf32>
    %c0_641 = arith.constant 0 : index
    %c1_642 = arith.constant 1 : index
    %c20_643 = arith.constant 20 : index
    %c0_644 = arith.constant 0 : index
    %c0_645 = arith.constant 0 : index
    %644 = vector.load %arg2[%c0_641, %c1_642, %c20_643, %c0_644, %c0_645] : memref<1x4x75x8x128xf32, #tpu.memory_space<vmem>>, vector<1x1x1x8x128xf32>
    %645 = vector.shape_cast %644 : vector<1x1x1x8x128xf32> to vector<8x128xf32>
    %646 = arith.mulf %393, %645 : vector<8x128xf32>
    %647 = arith.addf %635, %646 : vector<8x128xf32>
    %c0_646 = arith.constant 0 : index
    %c1_647 = arith.constant 1 : index
    %c45_648 = arith.constant 45 : index
    %c0_649 = arith.constant 0 : index
    %c0_650 = arith.constant 0 : index
    %648 = vector.load %arg2[%c0_646, %c1_647, %c45_648, %c0_649, %c0_650] : memref<1x4x75x8x128xf32, #tpu.memory_space<vmem>>, vector<1x1x1x8x128xf32>
    %649 = vector.shape_cast %648 : vector<1x1x1x8x128xf32> to vector<8x128xf32>
    %650 = arith.mulf %393, %649 : vector<8x128xf32>
    %651 = arith.addf %639, %650 : vector<8x128xf32>
    %c0_651 = arith.constant 0 : index
    %c1_652 = arith.constant 1 : index
    %c70_653 = arith.constant 70 : index
    %c0_654 = arith.constant 0 : index
    %c0_655 = arith.constant 0 : index
    %652 = vector.load %arg2[%c0_651, %c1_652, %c70_653, %c0_654, %c0_655] : memref<1x4x75x8x128xf32, #tpu.memory_space<vmem>>, vector<1x1x1x8x128xf32>
    %653 = vector.shape_cast %652 : vector<1x1x1x8x128xf32> to vector<8x128xf32>
    %654 = arith.mulf %393, %653 : vector<8x128xf32>
    %655 = arith.addf %643, %654 : vector<8x128xf32>
    %656 = arith.mulf %393, %375 : vector<8x128xf32>
    %c0_656 = arith.constant 0 : index
    %c1_657 = arith.constant 1 : index
    %c21_658 = arith.constant 21 : index
    %c0_659 = arith.constant 0 : index
    %c0_660 = arith.constant 0 : index
    %657 = vector.load %arg2[%c0_656, %c1_657, %c21_658, %c0_659, %c0_660] : memref<1x4x75x8x128xf32, #tpu.memory_space<vmem>>, vector<1x1x1x8x128xf32>
    %658 = vector.shape_cast %657 : vector<1x1x1x8x128xf32> to vector<8x128xf32>
    %659 = arith.mulf %656, %658 : vector<8x128xf32>
    %660 = arith.addf %647, %659 : vector<8x128xf32>
    %c0_661 = arith.constant 0 : index
    %c1_662 = arith.constant 1 : index
    %c46_663 = arith.constant 46 : index
    %c0_664 = arith.constant 0 : index
    %c0_665 = arith.constant 0 : index
    %661 = vector.load %arg2[%c0_661, %c1_662, %c46_663, %c0_664, %c0_665] : memref<1x4x75x8x128xf32, #tpu.memory_space<vmem>>, vector<1x1x1x8x128xf32>
    %662 = vector.shape_cast %661 : vector<1x1x1x8x128xf32> to vector<8x128xf32>
    %663 = arith.mulf %656, %662 : vector<8x128xf32>
    %664 = arith.addf %651, %663 : vector<8x128xf32>
    %c0_666 = arith.constant 0 : index
    %c1_667 = arith.constant 1 : index
    %c71_668 = arith.constant 71 : index
    %c0_669 = arith.constant 0 : index
    %c0_670 = arith.constant 0 : index
    %665 = vector.load %arg2[%c0_666, %c1_667, %c71_668, %c0_669, %c0_670] : memref<1x4x75x8x128xf32, #tpu.memory_space<vmem>>, vector<1x1x1x8x128xf32>
    %666 = vector.shape_cast %665 : vector<1x1x1x8x128xf32> to vector<8x128xf32>
    %667 = arith.mulf %656, %666 : vector<8x128xf32>
    %668 = arith.addf %655, %667 : vector<8x128xf32>
    %669 = arith.mulf %393, %377 : vector<8x128xf32>
    %c0_671 = arith.constant 0 : index
    %c1_672 = arith.constant 1 : index
    %c22_673 = arith.constant 22 : index
    %c0_674 = arith.constant 0 : index
    %c0_675 = arith.constant 0 : index
    %670 = vector.load %arg2[%c0_671, %c1_672, %c22_673, %c0_674, %c0_675] : memref<1x4x75x8x128xf32, #tpu.memory_space<vmem>>, vector<1x1x1x8x128xf32>
    %671 = vector.shape_cast %670 : vector<1x1x1x8x128xf32> to vector<8x128xf32>
    %672 = arith.mulf %669, %671 : vector<8x128xf32>
    %673 = arith.addf %660, %672 : vector<8x128xf32>
    %c0_676 = arith.constant 0 : index
    %c1_677 = arith.constant 1 : index
    %c47_678 = arith.constant 47 : index
    %c0_679 = arith.constant 0 : index
    %c0_680 = arith.constant 0 : index
    %674 = vector.load %arg2[%c0_676, %c1_677, %c47_678, %c0_679, %c0_680] : memref<1x4x75x8x128xf32, #tpu.memory_space<vmem>>, vector<1x1x1x8x128xf32>
    %675 = vector.shape_cast %674 : vector<1x1x1x8x128xf32> to vector<8x128xf32>
    %676 = arith.mulf %669, %675 : vector<8x128xf32>
    %677 = arith.addf %664, %676 : vector<8x128xf32>
    %c0_681 = arith.constant 0 : index
    %c1_682 = arith.constant 1 : index
    %c72_683 = arith.constant 72 : index
    %c0_684 = arith.constant 0 : index
    %c0_685 = arith.constant 0 : index
    %678 = vector.load %arg2[%c0_681, %c1_682, %c72_683, %c0_684, %c0_685] : memref<1x4x75x8x128xf32, #tpu.memory_space<vmem>>, vector<1x1x1x8x128xf32>
    %679 = vector.shape_cast %678 : vector<1x1x1x8x128xf32> to vector<8x128xf32>
    %680 = arith.mulf %669, %679 : vector<8x128xf32>
    %681 = arith.addf %668, %680 : vector<8x128xf32>
    %682 = arith.mulf %393, %395 : vector<8x128xf32>
    %c0_686 = arith.constant 0 : index
    %c1_687 = arith.constant 1 : index
    %c23_688 = arith.constant 23 : index
    %c0_689 = arith.constant 0 : index
    %c0_690 = arith.constant 0 : index
    %683 = vector.load %arg2[%c0_686, %c1_687, %c23_688, %c0_689, %c0_690] : memref<1x4x75x8x128xf32, #tpu.memory_space<vmem>>, vector<1x1x1x8x128xf32>
    %684 = vector.shape_cast %683 : vector<1x1x1x8x128xf32> to vector<8x128xf32>
    %685 = arith.mulf %682, %684 : vector<8x128xf32>
    %686 = arith.addf %673, %685 : vector<8x128xf32>
    %c0_691 = arith.constant 0 : index
    %c1_692 = arith.constant 1 : index
    %c48_693 = arith.constant 48 : index
    %c0_694 = arith.constant 0 : index
    %c0_695 = arith.constant 0 : index
    %687 = vector.load %arg2[%c0_691, %c1_692, %c48_693, %c0_694, %c0_695] : memref<1x4x75x8x128xf32, #tpu.memory_space<vmem>>, vector<1x1x1x8x128xf32>
    %688 = vector.shape_cast %687 : vector<1x1x1x8x128xf32> to vector<8x128xf32>
    %689 = arith.mulf %682, %688 : vector<8x128xf32>
    %690 = arith.addf %677, %689 : vector<8x128xf32>
    %c0_696 = arith.constant 0 : index
    %c1_697 = arith.constant 1 : index
    %c73_698 = arith.constant 73 : index
    %c0_699 = arith.constant 0 : index
    %c0_700 = arith.constant 0 : index
    %691 = vector.load %arg2[%c0_696, %c1_697, %c73_698, %c0_699, %c0_700] : memref<1x4x75x8x128xf32, #tpu.memory_space<vmem>>, vector<1x1x1x8x128xf32>
    %692 = vector.shape_cast %691 : vector<1x1x1x8x128xf32> to vector<8x128xf32>
    %693 = arith.mulf %682, %692 : vector<8x128xf32>
    %694 = arith.addf %681, %693 : vector<8x128xf32>
    %695 = arith.mulf %393, %397 : vector<8x128xf32>
    %c0_701 = arith.constant 0 : index
    %c1_702 = arith.constant 1 : index
    %c24_703 = arith.constant 24 : index
    %c0_704 = arith.constant 0 : index
    %c0_705 = arith.constant 0 : index
    %696 = vector.load %arg2[%c0_701, %c1_702, %c24_703, %c0_704, %c0_705] : memref<1x4x75x8x128xf32, #tpu.memory_space<vmem>>, vector<1x1x1x8x128xf32>
    %697 = vector.shape_cast %696 : vector<1x1x1x8x128xf32> to vector<8x128xf32>
    %698 = arith.mulf %695, %697 : vector<8x128xf32>
    %699 = arith.addf %686, %698 : vector<8x128xf32>
    %c0_706 = arith.constant 0 : index
    %c1_707 = arith.constant 1 : index
    %c49_708 = arith.constant 49 : index
    %c0_709 = arith.constant 0 : index
    %c0_710 = arith.constant 0 : index
    %700 = vector.load %arg2[%c0_706, %c1_707, %c49_708, %c0_709, %c0_710] : memref<1x4x75x8x128xf32, #tpu.memory_space<vmem>>, vector<1x1x1x8x128xf32>
    %701 = vector.shape_cast %700 : vector<1x1x1x8x128xf32> to vector<8x128xf32>
    %702 = arith.mulf %695, %701 : vector<8x128xf32>
    %703 = arith.addf %690, %702 : vector<8x128xf32>
    %c0_711 = arith.constant 0 : index
    %c1_712 = arith.constant 1 : index
    %c74_713 = arith.constant 74 : index
    %c0_714 = arith.constant 0 : index
    %c0_715 = arith.constant 0 : index
    %704 = vector.load %arg2[%c0_711, %c1_712, %c74_713, %c0_714, %c0_715] : memref<1x4x75x8x128xf32, #tpu.memory_space<vmem>>, vector<1x1x1x8x128xf32>
    %705 = vector.shape_cast %704 : vector<1x1x1x8x128xf32> to vector<8x128xf32>
    %706 = arith.mulf %695, %705 : vector<8x128xf32>
    %707 = arith.addf %694, %706 : vector<8x128xf32>
    %c0_716 = arith.constant 0 : index
    %c2_717 = arith.constant 2 : index
    %c0_718 = arith.constant 0 : index
    %c0_719 = arith.constant 0 : index
    %c0_720 = arith.constant 0 : index
    %708 = vector.load %arg3[%c0_716, %c2_717, %c0_718, %c0_719, %c0_720] : memref<1x4x2x8x128xf32, #tpu.memory_space<vmem>>, vector<1x1x1x8x128xf32>
    %709 = vector.shape_cast %708 : vector<1x1x1x8x128xf32> to vector<8x128xf32>
    %c0_721 = arith.constant 0 : index
    %c2_722 = arith.constant 2 : index
    %c1_723 = arith.constant 1 : index
    %c0_724 = arith.constant 0 : index
    %c0_725 = arith.constant 0 : index
    %710 = vector.load %arg3[%c0_721, %c2_722, %c1_723, %c0_724, %c0_725] : memref<1x4x2x8x128xf32, #tpu.memory_space<vmem>>, vector<1x1x1x8x128xf32>
    %711 = vector.shape_cast %710 : vector<1x1x1x8x128xf32> to vector<8x128xf32>
    %712 = arith.mulf %709, %711 : vector<8x128xf32>
    %713 = math.absf %712 : vector<8x128xf32>
    %cst_726 = arith.constant 9.99999971E-10 : f32
    %714 = vector.broadcast %cst_726 : f32 to vector<8x128xf32>
    %715 = arith.addf %713, %714 : vector<8x128xf32>
    %cst_727 = arith.constant 1.57079637 : f32
    %716 = vector.broadcast %cst_727 : f32 to vector<8x128xf32>
    %717 = arith.mulf %709, %716 : vector<8x128xf32>
    %cst_728 = arith.constant 1.57079637 : f32
    %718 = vector.broadcast %cst_728 : f32 to vector<8x128xf32>
    %719 = arith.mulf %711, %718 : vector<8x128xf32>
    %720 = math.cos %717 : vector<8x128xf32>
    %721 = math.sin %717 : vector<8x128xf32>
    %722 = math.cos %719 : vector<8x128xf32>
    %723 = math.sin %719 : vector<8x128xf32>
    %cst_729 = arith.constant 1.41421354 : f32
    %724 = vector.broadcast %cst_729 : f32 to vector<8x128xf32>
    %725 = arith.mulf %724, %720 : vector<8x128xf32>
    %cst_730 = arith.constant 1.41421354 : f32
    %726 = vector.broadcast %cst_730 : f32 to vector<8x128xf32>
    %727 = arith.mulf %726, %721 : vector<8x128xf32>
    %cst_731 = arith.constant 1.41421354 : f32
    %728 = vector.broadcast %cst_731 : f32 to vector<8x128xf32>
    %729 = arith.mulf %728, %722 : vector<8x128xf32>
    %cst_732 = arith.constant 1.41421354 : f32
    %730 = vector.broadcast %cst_732 : f32 to vector<8x128xf32>
    %731 = arith.mulf %730, %723 : vector<8x128xf32>
    %732 = arith.mulf %720, %720 : vector<8x128xf32>
    %733 = arith.mulf %721, %721 : vector<8x128xf32>
    %734 = arith.subf %732, %733 : vector<8x128xf32>
    %735 = arith.mulf %721, %720 : vector<8x128xf32>
    %736 = arith.mulf %720, %721 : vector<8x128xf32>
    %737 = arith.addf %735, %736 : vector<8x128xf32>
    %738 = arith.mulf %722, %722 : vector<8x128xf32>
    %739 = arith.mulf %723, %723 : vector<8x128xf32>
    %740 = arith.subf %738, %739 : vector<8x128xf32>
    %741 = arith.mulf %723, %722 : vector<8x128xf32>
    %742 = arith.mulf %722, %723 : vector<8x128xf32>
    %743 = arith.addf %741, %742 : vector<8x128xf32>
    %cst_733 = arith.constant 1.41421354 : f32
    %744 = vector.broadcast %cst_733 : f32 to vector<8x128xf32>
    %745 = arith.mulf %744, %734 : vector<8x128xf32>
    %cst_734 = arith.constant 1.41421354 : f32
    %746 = vector.broadcast %cst_734 : f32 to vector<8x128xf32>
    %747 = arith.mulf %746, %737 : vector<8x128xf32>
    %cst_735 = arith.constant 1.41421354 : f32
    %748 = vector.broadcast %cst_735 : f32 to vector<8x128xf32>
    %749 = arith.mulf %748, %740 : vector<8x128xf32>
    %cst_736 = arith.constant 1.41421354 : f32
    %750 = vector.broadcast %cst_736 : f32 to vector<8x128xf32>
    %751 = arith.mulf %750, %743 : vector<8x128xf32>
    %c0_737 = arith.constant 0 : index
    %c2_738 = arith.constant 2 : index
    %c0_739 = arith.constant 0 : index
    %c0_740 = arith.constant 0 : index
    %c0_741 = arith.constant 0 : index
    %752 = vector.load %arg2[%c0_737, %c2_738, %c0_739, %c0_740, %c0_741] : memref<1x4x75x8x128xf32, #tpu.memory_space<vmem>>, vector<1x1x1x8x128xf32>
    %753 = vector.shape_cast %752 : vector<1x1x1x8x128xf32> to vector<8x128xf32>
    %c0_742 = arith.constant 0 : index
    %c2_743 = arith.constant 2 : index
    %c25_744 = arith.constant 25 : index
    %c0_745 = arith.constant 0 : index
    %c0_746 = arith.constant 0 : index
    %754 = vector.load %arg2[%c0_742, %c2_743, %c25_744, %c0_745, %c0_746] : memref<1x4x75x8x128xf32, #tpu.memory_space<vmem>>, vector<1x1x1x8x128xf32>
    %755 = vector.shape_cast %754 : vector<1x1x1x8x128xf32> to vector<8x128xf32>
    %c0_747 = arith.constant 0 : index
    %c2_748 = arith.constant 2 : index
    %c50_749 = arith.constant 50 : index
    %c0_750 = arith.constant 0 : index
    %c0_751 = arith.constant 0 : index
    %756 = vector.load %arg2[%c0_747, %c2_748, %c50_749, %c0_750, %c0_751] : memref<1x4x75x8x128xf32, #tpu.memory_space<vmem>>, vector<1x1x1x8x128xf32>
    %757 = vector.shape_cast %756 : vector<1x1x1x8x128xf32> to vector<8x128xf32>
    %c0_752 = arith.constant 0 : index
    %c2_753 = arith.constant 2 : index
    %c1_754 = arith.constant 1 : index
    %c0_755 = arith.constant 0 : index
    %c0_756 = arith.constant 0 : index
    %758 = vector.load %arg2[%c0_752, %c2_753, %c1_754, %c0_755, %c0_756] : memref<1x4x75x8x128xf32, #tpu.memory_space<vmem>>, vector<1x1x1x8x128xf32>
    %759 = vector.shape_cast %758 : vector<1x1x1x8x128xf32> to vector<8x128xf32>
    %760 = arith.mulf %729, %759 : vector<8x128xf32>
    %761 = arith.addf %753, %760 : vector<8x128xf32>
    %c0_757 = arith.constant 0 : index
    %c2_758 = arith.constant 2 : index
    %c26_759 = arith.constant 26 : index
    %c0_760 = arith.constant 0 : index
    %c0_761 = arith.constant 0 : index
    %762 = vector.load %arg2[%c0_757, %c2_758, %c26_759, %c0_760, %c0_761] : memref<1x4x75x8x128xf32, #tpu.memory_space<vmem>>, vector<1x1x1x8x128xf32>
    %763 = vector.shape_cast %762 : vector<1x1x1x8x128xf32> to vector<8x128xf32>
    %764 = arith.mulf %729, %763 : vector<8x128xf32>
    %765 = arith.addf %755, %764 : vector<8x128xf32>
    %c0_762 = arith.constant 0 : index
    %c2_763 = arith.constant 2 : index
    %c51_764 = arith.constant 51 : index
    %c0_765 = arith.constant 0 : index
    %c0_766 = arith.constant 0 : index
    %766 = vector.load %arg2[%c0_762, %c2_763, %c51_764, %c0_765, %c0_766] : memref<1x4x75x8x128xf32, #tpu.memory_space<vmem>>, vector<1x1x1x8x128xf32>
    %767 = vector.shape_cast %766 : vector<1x1x1x8x128xf32> to vector<8x128xf32>
    %768 = arith.mulf %729, %767 : vector<8x128xf32>
    %769 = arith.addf %757, %768 : vector<8x128xf32>
    %c0_767 = arith.constant 0 : index
    %c2_768 = arith.constant 2 : index
    %c2_769 = arith.constant 2 : index
    %c0_770 = arith.constant 0 : index
    %c0_771 = arith.constant 0 : index
    %770 = vector.load %arg2[%c0_767, %c2_768, %c2_769, %c0_770, %c0_771] : memref<1x4x75x8x128xf32, #tpu.memory_space<vmem>>, vector<1x1x1x8x128xf32>
    %771 = vector.shape_cast %770 : vector<1x1x1x8x128xf32> to vector<8x128xf32>
    %772 = arith.mulf %731, %771 : vector<8x128xf32>
    %773 = arith.addf %761, %772 : vector<8x128xf32>
    %c0_772 = arith.constant 0 : index
    %c2_773 = arith.constant 2 : index
    %c27_774 = arith.constant 27 : index
    %c0_775 = arith.constant 0 : index
    %c0_776 = arith.constant 0 : index
    %774 = vector.load %arg2[%c0_772, %c2_773, %c27_774, %c0_775, %c0_776] : memref<1x4x75x8x128xf32, #tpu.memory_space<vmem>>, vector<1x1x1x8x128xf32>
    %775 = vector.shape_cast %774 : vector<1x1x1x8x128xf32> to vector<8x128xf32>
    %776 = arith.mulf %731, %775 : vector<8x128xf32>
    %777 = arith.addf %765, %776 : vector<8x128xf32>
    %c0_777 = arith.constant 0 : index
    %c2_778 = arith.constant 2 : index
    %c52_779 = arith.constant 52 : index
    %c0_780 = arith.constant 0 : index
    %c0_781 = arith.constant 0 : index
    %778 = vector.load %arg2[%c0_777, %c2_778, %c52_779, %c0_780, %c0_781] : memref<1x4x75x8x128xf32, #tpu.memory_space<vmem>>, vector<1x1x1x8x128xf32>
    %779 = vector.shape_cast %778 : vector<1x1x1x8x128xf32> to vector<8x128xf32>
    %780 = arith.mulf %731, %779 : vector<8x128xf32>
    %781 = arith.addf %769, %780 : vector<8x128xf32>
    %c0_782 = arith.constant 0 : index
    %c2_783 = arith.constant 2 : index
    %c3_784 = arith.constant 3 : index
    %c0_785 = arith.constant 0 : index
    %c0_786 = arith.constant 0 : index
    %782 = vector.load %arg2[%c0_782, %c2_783, %c3_784, %c0_785, %c0_786] : memref<1x4x75x8x128xf32, #tpu.memory_space<vmem>>, vector<1x1x1x8x128xf32>
    %783 = vector.shape_cast %782 : vector<1x1x1x8x128xf32> to vector<8x128xf32>
    %784 = arith.mulf %749, %783 : vector<8x128xf32>
    %785 = arith.addf %773, %784 : vector<8x128xf32>
    %c0_787 = arith.constant 0 : index
    %c2_788 = arith.constant 2 : index
    %c28_789 = arith.constant 28 : index
    %c0_790 = arith.constant 0 : index
    %c0_791 = arith.constant 0 : index
    %786 = vector.load %arg2[%c0_787, %c2_788, %c28_789, %c0_790, %c0_791] : memref<1x4x75x8x128xf32, #tpu.memory_space<vmem>>, vector<1x1x1x8x128xf32>
    %787 = vector.shape_cast %786 : vector<1x1x1x8x128xf32> to vector<8x128xf32>
    %788 = arith.mulf %749, %787 : vector<8x128xf32>
    %789 = arith.addf %777, %788 : vector<8x128xf32>
    %c0_792 = arith.constant 0 : index
    %c2_793 = arith.constant 2 : index
    %c53_794 = arith.constant 53 : index
    %c0_795 = arith.constant 0 : index
    %c0_796 = arith.constant 0 : index
    %790 = vector.load %arg2[%c0_792, %c2_793, %c53_794, %c0_795, %c0_796] : memref<1x4x75x8x128xf32, #tpu.memory_space<vmem>>, vector<1x1x1x8x128xf32>
    %791 = vector.shape_cast %790 : vector<1x1x1x8x128xf32> to vector<8x128xf32>
    %792 = arith.mulf %749, %791 : vector<8x128xf32>
    %793 = arith.addf %781, %792 : vector<8x128xf32>
    %c0_797 = arith.constant 0 : index
    %c2_798 = arith.constant 2 : index
    %c4_799 = arith.constant 4 : index
    %c0_800 = arith.constant 0 : index
    %c0_801 = arith.constant 0 : index
    %794 = vector.load %arg2[%c0_797, %c2_798, %c4_799, %c0_800, %c0_801] : memref<1x4x75x8x128xf32, #tpu.memory_space<vmem>>, vector<1x1x1x8x128xf32>
    %795 = vector.shape_cast %794 : vector<1x1x1x8x128xf32> to vector<8x128xf32>
    %796 = arith.mulf %751, %795 : vector<8x128xf32>
    %797 = arith.addf %785, %796 : vector<8x128xf32>
    %c0_802 = arith.constant 0 : index
    %c2_803 = arith.constant 2 : index
    %c29_804 = arith.constant 29 : index
    %c0_805 = arith.constant 0 : index
    %c0_806 = arith.constant 0 : index
    %798 = vector.load %arg2[%c0_802, %c2_803, %c29_804, %c0_805, %c0_806] : memref<1x4x75x8x128xf32, #tpu.memory_space<vmem>>, vector<1x1x1x8x128xf32>
    %799 = vector.shape_cast %798 : vector<1x1x1x8x128xf32> to vector<8x128xf32>
    %800 = arith.mulf %751, %799 : vector<8x128xf32>
    %801 = arith.addf %789, %800 : vector<8x128xf32>
    %c0_807 = arith.constant 0 : index
    %c2_808 = arith.constant 2 : index
    %c54_809 = arith.constant 54 : index
    %c0_810 = arith.constant 0 : index
    %c0_811 = arith.constant 0 : index
    %802 = vector.load %arg2[%c0_807, %c2_808, %c54_809, %c0_810, %c0_811] : memref<1x4x75x8x128xf32, #tpu.memory_space<vmem>>, vector<1x1x1x8x128xf32>
    %803 = vector.shape_cast %802 : vector<1x1x1x8x128xf32> to vector<8x128xf32>
    %804 = arith.mulf %751, %803 : vector<8x128xf32>
    %805 = arith.addf %793, %804 : vector<8x128xf32>
    %c0_812 = arith.constant 0 : index
    %c2_813 = arith.constant 2 : index
    %c5_814 = arith.constant 5 : index
    %c0_815 = arith.constant 0 : index
    %c0_816 = arith.constant 0 : index
    %806 = vector.load %arg2[%c0_812, %c2_813, %c5_814, %c0_815, %c0_816] : memref<1x4x75x8x128xf32, #tpu.memory_space<vmem>>, vector<1x1x1x8x128xf32>
    %807 = vector.shape_cast %806 : vector<1x1x1x8x128xf32> to vector<8x128xf32>
    %808 = arith.mulf %725, %807 : vector<8x128xf32>
    %809 = arith.addf %797, %808 : vector<8x128xf32>
    %c0_817 = arith.constant 0 : index
    %c2_818 = arith.constant 2 : index
    %c30_819 = arith.constant 30 : index
    %c0_820 = arith.constant 0 : index
    %c0_821 = arith.constant 0 : index
    %810 = vector.load %arg2[%c0_817, %c2_818, %c30_819, %c0_820, %c0_821] : memref<1x4x75x8x128xf32, #tpu.memory_space<vmem>>, vector<1x1x1x8x128xf32>
    %811 = vector.shape_cast %810 : vector<1x1x1x8x128xf32> to vector<8x128xf32>
    %812 = arith.mulf %725, %811 : vector<8x128xf32>
    %813 = arith.addf %801, %812 : vector<8x128xf32>
    %c0_822 = arith.constant 0 : index
    %c2_823 = arith.constant 2 : index
    %c55_824 = arith.constant 55 : index
    %c0_825 = arith.constant 0 : index
    %c0_826 = arith.constant 0 : index
    %814 = vector.load %arg2[%c0_822, %c2_823, %c55_824, %c0_825, %c0_826] : memref<1x4x75x8x128xf32, #tpu.memory_space<vmem>>, vector<1x1x1x8x128xf32>
    %815 = vector.shape_cast %814 : vector<1x1x1x8x128xf32> to vector<8x128xf32>
    %816 = arith.mulf %725, %815 : vector<8x128xf32>
    %817 = arith.addf %805, %816 : vector<8x128xf32>
    %818 = arith.mulf %725, %729 : vector<8x128xf32>
    %c0_827 = arith.constant 0 : index
    %c2_828 = arith.constant 2 : index
    %c6_829 = arith.constant 6 : index
    %c0_830 = arith.constant 0 : index
    %c0_831 = arith.constant 0 : index
    %819 = vector.load %arg2[%c0_827, %c2_828, %c6_829, %c0_830, %c0_831] : memref<1x4x75x8x128xf32, #tpu.memory_space<vmem>>, vector<1x1x1x8x128xf32>
    %820 = vector.shape_cast %819 : vector<1x1x1x8x128xf32> to vector<8x128xf32>
    %821 = arith.mulf %818, %820 : vector<8x128xf32>
    %822 = arith.addf %809, %821 : vector<8x128xf32>
    %c0_832 = arith.constant 0 : index
    %c2_833 = arith.constant 2 : index
    %c31_834 = arith.constant 31 : index
    %c0_835 = arith.constant 0 : index
    %c0_836 = arith.constant 0 : index
    %823 = vector.load %arg2[%c0_832, %c2_833, %c31_834, %c0_835, %c0_836] : memref<1x4x75x8x128xf32, #tpu.memory_space<vmem>>, vector<1x1x1x8x128xf32>
    %824 = vector.shape_cast %823 : vector<1x1x1x8x128xf32> to vector<8x128xf32>
    %825 = arith.mulf %818, %824 : vector<8x128xf32>
    %826 = arith.addf %813, %825 : vector<8x128xf32>
    %c0_837 = arith.constant 0 : index
    %c2_838 = arith.constant 2 : index
    %c56_839 = arith.constant 56 : index
    %c0_840 = arith.constant 0 : index
    %c0_841 = arith.constant 0 : index
    %827 = vector.load %arg2[%c0_837, %c2_838, %c56_839, %c0_840, %c0_841] : memref<1x4x75x8x128xf32, #tpu.memory_space<vmem>>, vector<1x1x1x8x128xf32>
    %828 = vector.shape_cast %827 : vector<1x1x1x8x128xf32> to vector<8x128xf32>
    %829 = arith.mulf %818, %828 : vector<8x128xf32>
    %830 = arith.addf %817, %829 : vector<8x128xf32>
    %831 = arith.mulf %725, %731 : vector<8x128xf32>
    %c0_842 = arith.constant 0 : index
    %c2_843 = arith.constant 2 : index
    %c7_844 = arith.constant 7 : index
    %c0_845 = arith.constant 0 : index
    %c0_846 = arith.constant 0 : index
    %832 = vector.load %arg2[%c0_842, %c2_843, %c7_844, %c0_845, %c0_846] : memref<1x4x75x8x128xf32, #tpu.memory_space<vmem>>, vector<1x1x1x8x128xf32>
    %833 = vector.shape_cast %832 : vector<1x1x1x8x128xf32> to vector<8x128xf32>
    %834 = arith.mulf %831, %833 : vector<8x128xf32>
    %835 = arith.addf %822, %834 : vector<8x128xf32>
    %c0_847 = arith.constant 0 : index
    %c2_848 = arith.constant 2 : index
    %c32_849 = arith.constant 32 : index
    %c0_850 = arith.constant 0 : index
    %c0_851 = arith.constant 0 : index
    %836 = vector.load %arg2[%c0_847, %c2_848, %c32_849, %c0_850, %c0_851] : memref<1x4x75x8x128xf32, #tpu.memory_space<vmem>>, vector<1x1x1x8x128xf32>
    %837 = vector.shape_cast %836 : vector<1x1x1x8x128xf32> to vector<8x128xf32>
    %838 = arith.mulf %831, %837 : vector<8x128xf32>
    %839 = arith.addf %826, %838 : vector<8x128xf32>
    %c0_852 = arith.constant 0 : index
    %c2_853 = arith.constant 2 : index
    %c57_854 = arith.constant 57 : index
    %c0_855 = arith.constant 0 : index
    %c0_856 = arith.constant 0 : index
    %840 = vector.load %arg2[%c0_852, %c2_853, %c57_854, %c0_855, %c0_856] : memref<1x4x75x8x128xf32, #tpu.memory_space<vmem>>, vector<1x1x1x8x128xf32>
    %841 = vector.shape_cast %840 : vector<1x1x1x8x128xf32> to vector<8x128xf32>
    %842 = arith.mulf %831, %841 : vector<8x128xf32>
    %843 = arith.addf %830, %842 : vector<8x128xf32>
    %844 = arith.mulf %725, %749 : vector<8x128xf32>
    %c0_857 = arith.constant 0 : index
    %c2_858 = arith.constant 2 : index
    %c8_859 = arith.constant 8 : index
    %c0_860 = arith.constant 0 : index
    %c0_861 = arith.constant 0 : index
    %845 = vector.load %arg2[%c0_857, %c2_858, %c8_859, %c0_860, %c0_861] : memref<1x4x75x8x128xf32, #tpu.memory_space<vmem>>, vector<1x1x1x8x128xf32>
    %846 = vector.shape_cast %845 : vector<1x1x1x8x128xf32> to vector<8x128xf32>
    %847 = arith.mulf %844, %846 : vector<8x128xf32>
    %848 = arith.addf %835, %847 : vector<8x128xf32>
    %c0_862 = arith.constant 0 : index
    %c2_863 = arith.constant 2 : index
    %c33_864 = arith.constant 33 : index
    %c0_865 = arith.constant 0 : index
    %c0_866 = arith.constant 0 : index
    %849 = vector.load %arg2[%c0_862, %c2_863, %c33_864, %c0_865, %c0_866] : memref<1x4x75x8x128xf32, #tpu.memory_space<vmem>>, vector<1x1x1x8x128xf32>
    %850 = vector.shape_cast %849 : vector<1x1x1x8x128xf32> to vector<8x128xf32>
    %851 = arith.mulf %844, %850 : vector<8x128xf32>
    %852 = arith.addf %839, %851 : vector<8x128xf32>
    %c0_867 = arith.constant 0 : index
    %c2_868 = arith.constant 2 : index
    %c58_869 = arith.constant 58 : index
    %c0_870 = arith.constant 0 : index
    %c0_871 = arith.constant 0 : index
    %853 = vector.load %arg2[%c0_867, %c2_868, %c58_869, %c0_870, %c0_871] : memref<1x4x75x8x128xf32, #tpu.memory_space<vmem>>, vector<1x1x1x8x128xf32>
    %854 = vector.shape_cast %853 : vector<1x1x1x8x128xf32> to vector<8x128xf32>
    %855 = arith.mulf %844, %854 : vector<8x128xf32>
    %856 = arith.addf %843, %855 : vector<8x128xf32>
    %857 = arith.mulf %725, %751 : vector<8x128xf32>
    %c0_872 = arith.constant 0 : index
    %c2_873 = arith.constant 2 : index
    %c9_874 = arith.constant 9 : index
    %c0_875 = arith.constant 0 : index
    %c0_876 = arith.constant 0 : index
    %858 = vector.load %arg2[%c0_872, %c2_873, %c9_874, %c0_875, %c0_876] : memref<1x4x75x8x128xf32, #tpu.memory_space<vmem>>, vector<1x1x1x8x128xf32>
    %859 = vector.shape_cast %858 : vector<1x1x1x8x128xf32> to vector<8x128xf32>
    %860 = arith.mulf %857, %859 : vector<8x128xf32>
    %861 = arith.addf %848, %860 : vector<8x128xf32>
    %c0_877 = arith.constant 0 : index
    %c2_878 = arith.constant 2 : index
    %c34_879 = arith.constant 34 : index
    %c0_880 = arith.constant 0 : index
    %c0_881 = arith.constant 0 : index
    %862 = vector.load %arg2[%c0_877, %c2_878, %c34_879, %c0_880, %c0_881] : memref<1x4x75x8x128xf32, #tpu.memory_space<vmem>>, vector<1x1x1x8x128xf32>
    %863 = vector.shape_cast %862 : vector<1x1x1x8x128xf32> to vector<8x128xf32>
    %864 = arith.mulf %857, %863 : vector<8x128xf32>
    %865 = arith.addf %852, %864 : vector<8x128xf32>
    %c0_882 = arith.constant 0 : index
    %c2_883 = arith.constant 2 : index
    %c59_884 = arith.constant 59 : index
    %c0_885 = arith.constant 0 : index
    %c0_886 = arith.constant 0 : index
    %866 = vector.load %arg2[%c0_882, %c2_883, %c59_884, %c0_885, %c0_886] : memref<1x4x75x8x128xf32, #tpu.memory_space<vmem>>, vector<1x1x1x8x128xf32>
    %867 = vector.shape_cast %866 : vector<1x1x1x8x128xf32> to vector<8x128xf32>
    %868 = arith.mulf %857, %867 : vector<8x128xf32>
    %869 = arith.addf %856, %868 : vector<8x128xf32>
    %c0_887 = arith.constant 0 : index
    %c2_888 = arith.constant 2 : index
    %c10_889 = arith.constant 10 : index
    %c0_890 = arith.constant 0 : index
    %c0_891 = arith.constant 0 : index
    %870 = vector.load %arg2[%c0_887, %c2_888, %c10_889, %c0_890, %c0_891] : memref<1x4x75x8x128xf32, #tpu.memory_space<vmem>>, vector<1x1x1x8x128xf32>
    %871 = vector.shape_cast %870 : vector<1x1x1x8x128xf32> to vector<8x128xf32>
    %872 = arith.mulf %727, %871 : vector<8x128xf32>
    %873 = arith.addf %861, %872 : vector<8x128xf32>
    %c0_892 = arith.constant 0 : index
    %c2_893 = arith.constant 2 : index
    %c35_894 = arith.constant 35 : index
    %c0_895 = arith.constant 0 : index
    %c0_896 = arith.constant 0 : index
    %874 = vector.load %arg2[%c0_892, %c2_893, %c35_894, %c0_895, %c0_896] : memref<1x4x75x8x128xf32, #tpu.memory_space<vmem>>, vector<1x1x1x8x128xf32>
    %875 = vector.shape_cast %874 : vector<1x1x1x8x128xf32> to vector<8x128xf32>
    %876 = arith.mulf %727, %875 : vector<8x128xf32>
    %877 = arith.addf %865, %876 : vector<8x128xf32>
    %c0_897 = arith.constant 0 : index
    %c2_898 = arith.constant 2 : index
    %c60_899 = arith.constant 60 : index
    %c0_900 = arith.constant 0 : index
    %c0_901 = arith.constant 0 : index
    %878 = vector.load %arg2[%c0_897, %c2_898, %c60_899, %c0_900, %c0_901] : memref<1x4x75x8x128xf32, #tpu.memory_space<vmem>>, vector<1x1x1x8x128xf32>
    %879 = vector.shape_cast %878 : vector<1x1x1x8x128xf32> to vector<8x128xf32>
    %880 = arith.mulf %727, %879 : vector<8x128xf32>
    %881 = arith.addf %869, %880 : vector<8x128xf32>
    %882 = arith.mulf %727, %729 : vector<8x128xf32>
    %c0_902 = arith.constant 0 : index
    %c2_903 = arith.constant 2 : index
    %c11_904 = arith.constant 11 : index
    %c0_905 = arith.constant 0 : index
    %c0_906 = arith.constant 0 : index
    %883 = vector.load %arg2[%c0_902, %c2_903, %c11_904, %c0_905, %c0_906] : memref<1x4x75x8x128xf32, #tpu.memory_space<vmem>>, vector<1x1x1x8x128xf32>
    %884 = vector.shape_cast %883 : vector<1x1x1x8x128xf32> to vector<8x128xf32>
    %885 = arith.mulf %882, %884 : vector<8x128xf32>
    %886 = arith.addf %873, %885 : vector<8x128xf32>
    %c0_907 = arith.constant 0 : index
    %c2_908 = arith.constant 2 : index
    %c36_909 = arith.constant 36 : index
    %c0_910 = arith.constant 0 : index
    %c0_911 = arith.constant 0 : index
    %887 = vector.load %arg2[%c0_907, %c2_908, %c36_909, %c0_910, %c0_911] : memref<1x4x75x8x128xf32, #tpu.memory_space<vmem>>, vector<1x1x1x8x128xf32>
    %888 = vector.shape_cast %887 : vector<1x1x1x8x128xf32> to vector<8x128xf32>
    %889 = arith.mulf %882, %888 : vector<8x128xf32>
    %890 = arith.addf %877, %889 : vector<8x128xf32>
    %c0_912 = arith.constant 0 : index
    %c2_913 = arith.constant 2 : index
    %c61_914 = arith.constant 61 : index
    %c0_915 = arith.constant 0 : index
    %c0_916 = arith.constant 0 : index
    %891 = vector.load %arg2[%c0_912, %c2_913, %c61_914, %c0_915, %c0_916] : memref<1x4x75x8x128xf32, #tpu.memory_space<vmem>>, vector<1x1x1x8x128xf32>
    %892 = vector.shape_cast %891 : vector<1x1x1x8x128xf32> to vector<8x128xf32>
    %893 = arith.mulf %882, %892 : vector<8x128xf32>
    %894 = arith.addf %881, %893 : vector<8x128xf32>
    %895 = arith.mulf %727, %731 : vector<8x128xf32>
    %c0_917 = arith.constant 0 : index
    %c2_918 = arith.constant 2 : index
    %c12_919 = arith.constant 12 : index
    %c0_920 = arith.constant 0 : index
    %c0_921 = arith.constant 0 : index
    %896 = vector.load %arg2[%c0_917, %c2_918, %c12_919, %c0_920, %c0_921] : memref<1x4x75x8x128xf32, #tpu.memory_space<vmem>>, vector<1x1x1x8x128xf32>
    %897 = vector.shape_cast %896 : vector<1x1x1x8x128xf32> to vector<8x128xf32>
    %898 = arith.mulf %895, %897 : vector<8x128xf32>
    %899 = arith.addf %886, %898 : vector<8x128xf32>
    %c0_922 = arith.constant 0 : index
    %c2_923 = arith.constant 2 : index
    %c37_924 = arith.constant 37 : index
    %c0_925 = arith.constant 0 : index
    %c0_926 = arith.constant 0 : index
    %900 = vector.load %arg2[%c0_922, %c2_923, %c37_924, %c0_925, %c0_926] : memref<1x4x75x8x128xf32, #tpu.memory_space<vmem>>, vector<1x1x1x8x128xf32>
    %901 = vector.shape_cast %900 : vector<1x1x1x8x128xf32> to vector<8x128xf32>
    %902 = arith.mulf %895, %901 : vector<8x128xf32>
    %903 = arith.addf %890, %902 : vector<8x128xf32>
    %c0_927 = arith.constant 0 : index
    %c2_928 = arith.constant 2 : index
    %c62_929 = arith.constant 62 : index
    %c0_930 = arith.constant 0 : index
    %c0_931 = arith.constant 0 : index
    %904 = vector.load %arg2[%c0_927, %c2_928, %c62_929, %c0_930, %c0_931] : memref<1x4x75x8x128xf32, #tpu.memory_space<vmem>>, vector<1x1x1x8x128xf32>
    %905 = vector.shape_cast %904 : vector<1x1x1x8x128xf32> to vector<8x128xf32>
    %906 = arith.mulf %895, %905 : vector<8x128xf32>
    %907 = arith.addf %894, %906 : vector<8x128xf32>
    %908 = arith.mulf %727, %749 : vector<8x128xf32>
    %c0_932 = arith.constant 0 : index
    %c2_933 = arith.constant 2 : index
    %c13_934 = arith.constant 13 : index
    %c0_935 = arith.constant 0 : index
    %c0_936 = arith.constant 0 : index
    %909 = vector.load %arg2[%c0_932, %c2_933, %c13_934, %c0_935, %c0_936] : memref<1x4x75x8x128xf32, #tpu.memory_space<vmem>>, vector<1x1x1x8x128xf32>
    %910 = vector.shape_cast %909 : vector<1x1x1x8x128xf32> to vector<8x128xf32>
    %911 = arith.mulf %908, %910 : vector<8x128xf32>
    %912 = arith.addf %899, %911 : vector<8x128xf32>
    %c0_937 = arith.constant 0 : index
    %c2_938 = arith.constant 2 : index
    %c38_939 = arith.constant 38 : index
    %c0_940 = arith.constant 0 : index
    %c0_941 = arith.constant 0 : index
    %913 = vector.load %arg2[%c0_937, %c2_938, %c38_939, %c0_940, %c0_941] : memref<1x4x75x8x128xf32, #tpu.memory_space<vmem>>, vector<1x1x1x8x128xf32>
    %914 = vector.shape_cast %913 : vector<1x1x1x8x128xf32> to vector<8x128xf32>
    %915 = arith.mulf %908, %914 : vector<8x128xf32>
    %916 = arith.addf %903, %915 : vector<8x128xf32>
    %c0_942 = arith.constant 0 : index
    %c2_943 = arith.constant 2 : index
    %c63_944 = arith.constant 63 : index
    %c0_945 = arith.constant 0 : index
    %c0_946 = arith.constant 0 : index
    %917 = vector.load %arg2[%c0_942, %c2_943, %c63_944, %c0_945, %c0_946] : memref<1x4x75x8x128xf32, #tpu.memory_space<vmem>>, vector<1x1x1x8x128xf32>
    %918 = vector.shape_cast %917 : vector<1x1x1x8x128xf32> to vector<8x128xf32>
    %919 = arith.mulf %908, %918 : vector<8x128xf32>
    %920 = arith.addf %907, %919 : vector<8x128xf32>
    %921 = arith.mulf %727, %751 : vector<8x128xf32>
    %c0_947 = arith.constant 0 : index
    %c2_948 = arith.constant 2 : index
    %c14_949 = arith.constant 14 : index
    %c0_950 = arith.constant 0 : index
    %c0_951 = arith.constant 0 : index
    %922 = vector.load %arg2[%c0_947, %c2_948, %c14_949, %c0_950, %c0_951] : memref<1x4x75x8x128xf32, #tpu.memory_space<vmem>>, vector<1x1x1x8x128xf32>
    %923 = vector.shape_cast %922 : vector<1x1x1x8x128xf32> to vector<8x128xf32>
    %924 = arith.mulf %921, %923 : vector<8x128xf32>
    %925 = arith.addf %912, %924 : vector<8x128xf32>
    %c0_952 = arith.constant 0 : index
    %c2_953 = arith.constant 2 : index
    %c39_954 = arith.constant 39 : index
    %c0_955 = arith.constant 0 : index
    %c0_956 = arith.constant 0 : index
    %926 = vector.load %arg2[%c0_952, %c2_953, %c39_954, %c0_955, %c0_956] : memref<1x4x75x8x128xf32, #tpu.memory_space<vmem>>, vector<1x1x1x8x128xf32>
    %927 = vector.shape_cast %926 : vector<1x1x1x8x128xf32> to vector<8x128xf32>
    %928 = arith.mulf %921, %927 : vector<8x128xf32>
    %929 = arith.addf %916, %928 : vector<8x128xf32>
    %c0_957 = arith.constant 0 : index
    %c2_958 = arith.constant 2 : index
    %c64_959 = arith.constant 64 : index
    %c0_960 = arith.constant 0 : index
    %c0_961 = arith.constant 0 : index
    %930 = vector.load %arg2[%c0_957, %c2_958, %c64_959, %c0_960, %c0_961] : memref<1x4x75x8x128xf32, #tpu.memory_space<vmem>>, vector<1x1x1x8x128xf32>
    %931 = vector.shape_cast %930 : vector<1x1x1x8x128xf32> to vector<8x128xf32>
    %932 = arith.mulf %921, %931 : vector<8x128xf32>
    %933 = arith.addf %920, %932 : vector<8x128xf32>
    %c0_962 = arith.constant 0 : index
    %c2_963 = arith.constant 2 : index
    %c15_964 = arith.constant 15 : index
    %c0_965 = arith.constant 0 : index
    %c0_966 = arith.constant 0 : index
    %934 = vector.load %arg2[%c0_962, %c2_963, %c15_964, %c0_965, %c0_966] : memref<1x4x75x8x128xf32, #tpu.memory_space<vmem>>, vector<1x1x1x8x128xf32>
    %935 = vector.shape_cast %934 : vector<1x1x1x8x128xf32> to vector<8x128xf32>
    %936 = arith.mulf %745, %935 : vector<8x128xf32>
    %937 = arith.addf %925, %936 : vector<8x128xf32>
    %c0_967 = arith.constant 0 : index
    %c2_968 = arith.constant 2 : index
    %c40_969 = arith.constant 40 : index
    %c0_970 = arith.constant 0 : index
    %c0_971 = arith.constant 0 : index
    %938 = vector.load %arg2[%c0_967, %c2_968, %c40_969, %c0_970, %c0_971] : memref<1x4x75x8x128xf32, #tpu.memory_space<vmem>>, vector<1x1x1x8x128xf32>
    %939 = vector.shape_cast %938 : vector<1x1x1x8x128xf32> to vector<8x128xf32>
    %940 = arith.mulf %745, %939 : vector<8x128xf32>
    %941 = arith.addf %929, %940 : vector<8x128xf32>
    %c0_972 = arith.constant 0 : index
    %c2_973 = arith.constant 2 : index
    %c65_974 = arith.constant 65 : index
    %c0_975 = arith.constant 0 : index
    %c0_976 = arith.constant 0 : index
    %942 = vector.load %arg2[%c0_972, %c2_973, %c65_974, %c0_975, %c0_976] : memref<1x4x75x8x128xf32, #tpu.memory_space<vmem>>, vector<1x1x1x8x128xf32>
    %943 = vector.shape_cast %942 : vector<1x1x1x8x128xf32> to vector<8x128xf32>
    %944 = arith.mulf %745, %943 : vector<8x128xf32>
    %945 = arith.addf %933, %944 : vector<8x128xf32>
    %946 = arith.mulf %745, %729 : vector<8x128xf32>
    %c0_977 = arith.constant 0 : index
    %c2_978 = arith.constant 2 : index
    %c16_979 = arith.constant 16 : index
    %c0_980 = arith.constant 0 : index
    %c0_981 = arith.constant 0 : index
    %947 = vector.load %arg2[%c0_977, %c2_978, %c16_979, %c0_980, %c0_981] : memref<1x4x75x8x128xf32, #tpu.memory_space<vmem>>, vector<1x1x1x8x128xf32>
    %948 = vector.shape_cast %947 : vector<1x1x1x8x128xf32> to vector<8x128xf32>
    %949 = arith.mulf %946, %948 : vector<8x128xf32>
    %950 = arith.addf %937, %949 : vector<8x128xf32>
    %c0_982 = arith.constant 0 : index
    %c2_983 = arith.constant 2 : index
    %c41_984 = arith.constant 41 : index
    %c0_985 = arith.constant 0 : index
    %c0_986 = arith.constant 0 : index
    %951 = vector.load %arg2[%c0_982, %c2_983, %c41_984, %c0_985, %c0_986] : memref<1x4x75x8x128xf32, #tpu.memory_space<vmem>>, vector<1x1x1x8x128xf32>
    %952 = vector.shape_cast %951 : vector<1x1x1x8x128xf32> to vector<8x128xf32>
    %953 = arith.mulf %946, %952 : vector<8x128xf32>
    %954 = arith.addf %941, %953 : vector<8x128xf32>
    %c0_987 = arith.constant 0 : index
    %c2_988 = arith.constant 2 : index
    %c66_989 = arith.constant 66 : index
    %c0_990 = arith.constant 0 : index
    %c0_991 = arith.constant 0 : index
    %955 = vector.load %arg2[%c0_987, %c2_988, %c66_989, %c0_990, %c0_991] : memref<1x4x75x8x128xf32, #tpu.memory_space<vmem>>, vector<1x1x1x8x128xf32>
    %956 = vector.shape_cast %955 : vector<1x1x1x8x128xf32> to vector<8x128xf32>
    %957 = arith.mulf %946, %956 : vector<8x128xf32>
    %958 = arith.addf %945, %957 : vector<8x128xf32>
    %959 = arith.mulf %745, %731 : vector<8x128xf32>
    %c0_992 = arith.constant 0 : index
    %c2_993 = arith.constant 2 : index
    %c17_994 = arith.constant 17 : index
    %c0_995 = arith.constant 0 : index
    %c0_996 = arith.constant 0 : index
    %960 = vector.load %arg2[%c0_992, %c2_993, %c17_994, %c0_995, %c0_996] : memref<1x4x75x8x128xf32, #tpu.memory_space<vmem>>, vector<1x1x1x8x128xf32>
    %961 = vector.shape_cast %960 : vector<1x1x1x8x128xf32> to vector<8x128xf32>
    %962 = arith.mulf %959, %961 : vector<8x128xf32>
    %963 = arith.addf %950, %962 : vector<8x128xf32>
    %c0_997 = arith.constant 0 : index
    %c2_998 = arith.constant 2 : index
    %c42_999 = arith.constant 42 : index
    %c0_1000 = arith.constant 0 : index
    %c0_1001 = arith.constant 0 : index
    %964 = vector.load %arg2[%c0_997, %c2_998, %c42_999, %c0_1000, %c0_1001] : memref<1x4x75x8x128xf32, #tpu.memory_space<vmem>>, vector<1x1x1x8x128xf32>
    %965 = vector.shape_cast %964 : vector<1x1x1x8x128xf32> to vector<8x128xf32>
    %966 = arith.mulf %959, %965 : vector<8x128xf32>
    %967 = arith.addf %954, %966 : vector<8x128xf32>
    %c0_1002 = arith.constant 0 : index
    %c2_1003 = arith.constant 2 : index
    %c67_1004 = arith.constant 67 : index
    %c0_1005 = arith.constant 0 : index
    %c0_1006 = arith.constant 0 : index
    %968 = vector.load %arg2[%c0_1002, %c2_1003, %c67_1004, %c0_1005, %c0_1006] : memref<1x4x75x8x128xf32, #tpu.memory_space<vmem>>, vector<1x1x1x8x128xf32>
    %969 = vector.shape_cast %968 : vector<1x1x1x8x128xf32> to vector<8x128xf32>
    %970 = arith.mulf %959, %969 : vector<8x128xf32>
    %971 = arith.addf %958, %970 : vector<8x128xf32>
    %972 = arith.mulf %745, %749 : vector<8x128xf32>
    %c0_1007 = arith.constant 0 : index
    %c2_1008 = arith.constant 2 : index
    %c18_1009 = arith.constant 18 : index
    %c0_1010 = arith.constant 0 : index
    %c0_1011 = arith.constant 0 : index
    %973 = vector.load %arg2[%c0_1007, %c2_1008, %c18_1009, %c0_1010, %c0_1011] : memref<1x4x75x8x128xf32, #tpu.memory_space<vmem>>, vector<1x1x1x8x128xf32>
    %974 = vector.shape_cast %973 : vector<1x1x1x8x128xf32> to vector<8x128xf32>
    %975 = arith.mulf %972, %974 : vector<8x128xf32>
    %976 = arith.addf %963, %975 : vector<8x128xf32>
    %c0_1012 = arith.constant 0 : index
    %c2_1013 = arith.constant 2 : index
    %c43_1014 = arith.constant 43 : index
    %c0_1015 = arith.constant 0 : index
    %c0_1016 = arith.constant 0 : index
    %977 = vector.load %arg2[%c0_1012, %c2_1013, %c43_1014, %c0_1015, %c0_1016] : memref<1x4x75x8x128xf32, #tpu.memory_space<vmem>>, vector<1x1x1x8x128xf32>
    %978 = vector.shape_cast %977 : vector<1x1x1x8x128xf32> to vector<8x128xf32>
    %979 = arith.mulf %972, %978 : vector<8x128xf32>
    %980 = arith.addf %967, %979 : vector<8x128xf32>
    %c0_1017 = arith.constant 0 : index
    %c2_1018 = arith.constant 2 : index
    %c68_1019 = arith.constant 68 : index
    %c0_1020 = arith.constant 0 : index
    %c0_1021 = arith.constant 0 : index
    %981 = vector.load %arg2[%c0_1017, %c2_1018, %c68_1019, %c0_1020, %c0_1021] : memref<1x4x75x8x128xf32, #tpu.memory_space<vmem>>, vector<1x1x1x8x128xf32>
    %982 = vector.shape_cast %981 : vector<1x1x1x8x128xf32> to vector<8x128xf32>
    %983 = arith.mulf %972, %982 : vector<8x128xf32>
    %984 = arith.addf %971, %983 : vector<8x128xf32>
    %985 = arith.mulf %745, %751 : vector<8x128xf32>
    %c0_1022 = arith.constant 0 : index
    %c2_1023 = arith.constant 2 : index
    %c19_1024 = arith.constant 19 : index
    %c0_1025 = arith.constant 0 : index
    %c0_1026 = arith.constant 0 : index
    %986 = vector.load %arg2[%c0_1022, %c2_1023, %c19_1024, %c0_1025, %c0_1026] : memref<1x4x75x8x128xf32, #tpu.memory_space<vmem>>, vector<1x1x1x8x128xf32>
    %987 = vector.shape_cast %986 : vector<1x1x1x8x128xf32> to vector<8x128xf32>
    %988 = arith.mulf %985, %987 : vector<8x128xf32>
    %989 = arith.addf %976, %988 : vector<8x128xf32>
    %c0_1027 = arith.constant 0 : index
    %c2_1028 = arith.constant 2 : index
    %c44_1029 = arith.constant 44 : index
    %c0_1030 = arith.constant 0 : index
    %c0_1031 = arith.constant 0 : index
    %990 = vector.load %arg2[%c0_1027, %c2_1028, %c44_1029, %c0_1030, %c0_1031] : memref<1x4x75x8x128xf32, #tpu.memory_space<vmem>>, vector<1x1x1x8x128xf32>
    %991 = vector.shape_cast %990 : vector<1x1x1x8x128xf32> to vector<8x128xf32>
    %992 = arith.mulf %985, %991 : vector<8x128xf32>
    %993 = arith.addf %980, %992 : vector<8x128xf32>
    %c0_1032 = arith.constant 0 : index
    %c2_1033 = arith.constant 2 : index
    %c69_1034 = arith.constant 69 : index
    %c0_1035 = arith.constant 0 : index
    %c0_1036 = arith.constant 0 : index
    %994 = vector.load %arg2[%c0_1032, %c2_1033, %c69_1034, %c0_1035, %c0_1036] : memref<1x4x75x8x128xf32, #tpu.memory_space<vmem>>, vector<1x1x1x8x128xf32>
    %995 = vector.shape_cast %994 : vector<1x1x1x8x128xf32> to vector<8x128xf32>
    %996 = arith.mulf %985, %995 : vector<8x128xf32>
    %997 = arith.addf %984, %996 : vector<8x128xf32>
    %c0_1037 = arith.constant 0 : index
    %c2_1038 = arith.constant 2 : index
    %c20_1039 = arith.constant 20 : index
    %c0_1040 = arith.constant 0 : index
    %c0_1041 = arith.constant 0 : index
    %998 = vector.load %arg2[%c0_1037, %c2_1038, %c20_1039, %c0_1040, %c0_1041] : memref<1x4x75x8x128xf32, #tpu.memory_space<vmem>>, vector<1x1x1x8x128xf32>
    %999 = vector.shape_cast %998 : vector<1x1x1x8x128xf32> to vector<8x128xf32>
    %1000 = arith.mulf %747, %999 : vector<8x128xf32>
    %1001 = arith.addf %989, %1000 : vector<8x128xf32>
    %c0_1042 = arith.constant 0 : index
    %c2_1043 = arith.constant 2 : index
    %c45_1044 = arith.constant 45 : index
    %c0_1045 = arith.constant 0 : index
    %c0_1046 = arith.constant 0 : index
    %1002 = vector.load %arg2[%c0_1042, %c2_1043, %c45_1044, %c0_1045, %c0_1046] : memref<1x4x75x8x128xf32, #tpu.memory_space<vmem>>, vector<1x1x1x8x128xf32>
    %1003 = vector.shape_cast %1002 : vector<1x1x1x8x128xf32> to vector<8x128xf32>
    %1004 = arith.mulf %747, %1003 : vector<8x128xf32>
    %1005 = arith.addf %993, %1004 : vector<8x128xf32>
    %c0_1047 = arith.constant 0 : index
    %c2_1048 = arith.constant 2 : index
    %c70_1049 = arith.constant 70 : index
    %c0_1050 = arith.constant 0 : index
    %c0_1051 = arith.constant 0 : index
    %1006 = vector.load %arg2[%c0_1047, %c2_1048, %c70_1049, %c0_1050, %c0_1051] : memref<1x4x75x8x128xf32, #tpu.memory_space<vmem>>, vector<1x1x1x8x128xf32>
    %1007 = vector.shape_cast %1006 : vector<1x1x1x8x128xf32> to vector<8x128xf32>
    %1008 = arith.mulf %747, %1007 : vector<8x128xf32>
    %1009 = arith.addf %997, %1008 : vector<8x128xf32>
    %1010 = arith.mulf %747, %729 : vector<8x128xf32>
    %c0_1052 = arith.constant 0 : index
    %c2_1053 = arith.constant 2 : index
    %c21_1054 = arith.constant 21 : index
    %c0_1055 = arith.constant 0 : index
    %c0_1056 = arith.constant 0 : index
    %1011 = vector.load %arg2[%c0_1052, %c2_1053, %c21_1054, %c0_1055, %c0_1056] : memref<1x4x75x8x128xf32, #tpu.memory_space<vmem>>, vector<1x1x1x8x128xf32>
    %1012 = vector.shape_cast %1011 : vector<1x1x1x8x128xf32> to vector<8x128xf32>
    %1013 = arith.mulf %1010, %1012 : vector<8x128xf32>
    %1014 = arith.addf %1001, %1013 : vector<8x128xf32>
    %c0_1057 = arith.constant 0 : index
    %c2_1058 = arith.constant 2 : index
    %c46_1059 = arith.constant 46 : index
    %c0_1060 = arith.constant 0 : index
    %c0_1061 = arith.constant 0 : index
    %1015 = vector.load %arg2[%c0_1057, %c2_1058, %c46_1059, %c0_1060, %c0_1061] : memref<1x4x75x8x128xf32, #tpu.memory_space<vmem>>, vector<1x1x1x8x128xf32>
    %1016 = vector.shape_cast %1015 : vector<1x1x1x8x128xf32> to vector<8x128xf32>
    %1017 = arith.mulf %1010, %1016 : vector<8x128xf32>
    %1018 = arith.addf %1005, %1017 : vector<8x128xf32>
    %c0_1062 = arith.constant 0 : index
    %c2_1063 = arith.constant 2 : index
    %c71_1064 = arith.constant 71 : index
    %c0_1065 = arith.constant 0 : index
    %c0_1066 = arith.constant 0 : index
    %1019 = vector.load %arg2[%c0_1062, %c2_1063, %c71_1064, %c0_1065, %c0_1066] : memref<1x4x75x8x128xf32, #tpu.memory_space<vmem>>, vector<1x1x1x8x128xf32>
    %1020 = vector.shape_cast %1019 : vector<1x1x1x8x128xf32> to vector<8x128xf32>
    %1021 = arith.mulf %1010, %1020 : vector<8x128xf32>
    %1022 = arith.addf %1009, %1021 : vector<8x128xf32>
    %1023 = arith.mulf %747, %731 : vector<8x128xf32>
    %c0_1067 = arith.constant 0 : index
    %c2_1068 = arith.constant 2 : index
    %c22_1069 = arith.constant 22 : index
    %c0_1070 = arith.constant 0 : index
    %c0_1071 = arith.constant 0 : index
    %1024 = vector.load %arg2[%c0_1067, %c2_1068, %c22_1069, %c0_1070, %c0_1071] : memref<1x4x75x8x128xf32, #tpu.memory_space<vmem>>, vector<1x1x1x8x128xf32>
    %1025 = vector.shape_cast %1024 : vector<1x1x1x8x128xf32> to vector<8x128xf32>
    %1026 = arith.mulf %1023, %1025 : vector<8x128xf32>
    %1027 = arith.addf %1014, %1026 : vector<8x128xf32>
    %c0_1072 = arith.constant 0 : index
    %c2_1073 = arith.constant 2 : index
    %c47_1074 = arith.constant 47 : index
    %c0_1075 = arith.constant 0 : index
    %c0_1076 = arith.constant 0 : index
    %1028 = vector.load %arg2[%c0_1072, %c2_1073, %c47_1074, %c0_1075, %c0_1076] : memref<1x4x75x8x128xf32, #tpu.memory_space<vmem>>, vector<1x1x1x8x128xf32>
    %1029 = vector.shape_cast %1028 : vector<1x1x1x8x128xf32> to vector<8x128xf32>
    %1030 = arith.mulf %1023, %1029 : vector<8x128xf32>
    %1031 = arith.addf %1018, %1030 : vector<8x128xf32>
    %c0_1077 = arith.constant 0 : index
    %c2_1078 = arith.constant 2 : index
    %c72_1079 = arith.constant 72 : index
    %c0_1080 = arith.constant 0 : index
    %c0_1081 = arith.constant 0 : index
    %1032 = vector.load %arg2[%c0_1077, %c2_1078, %c72_1079, %c0_1080, %c0_1081] : memref<1x4x75x8x128xf32, #tpu.memory_space<vmem>>, vector<1x1x1x8x128xf32>
    %1033 = vector.shape_cast %1032 : vector<1x1x1x8x128xf32> to vector<8x128xf32>
    %1034 = arith.mulf %1023, %1033 : vector<8x128xf32>
    %1035 = arith.addf %1022, %1034 : vector<8x128xf32>
    %1036 = arith.mulf %747, %749 : vector<8x128xf32>
    %c0_1082 = arith.constant 0 : index
    %c2_1083 = arith.constant 2 : index
    %c23_1084 = arith.constant 23 : index
    %c0_1085 = arith.constant 0 : index
    %c0_1086 = arith.constant 0 : index
    %1037 = vector.load %arg2[%c0_1082, %c2_1083, %c23_1084, %c0_1085, %c0_1086] : memref<1x4x75x8x128xf32, #tpu.memory_space<vmem>>, vector<1x1x1x8x128xf32>
    %1038 = vector.shape_cast %1037 : vector<1x1x1x8x128xf32> to vector<8x128xf32>
    %1039 = arith.mulf %1036, %1038 : vector<8x128xf32>
    %1040 = arith.addf %1027, %1039 : vector<8x128xf32>
    %c0_1087 = arith.constant 0 : index
    %c2_1088 = arith.constant 2 : index
    %c48_1089 = arith.constant 48 : index
    %c0_1090 = arith.constant 0 : index
    %c0_1091 = arith.constant 0 : index
    %1041 = vector.load %arg2[%c0_1087, %c2_1088, %c48_1089, %c0_1090, %c0_1091] : memref<1x4x75x8x128xf32, #tpu.memory_space<vmem>>, vector<1x1x1x8x128xf32>
    %1042 = vector.shape_cast %1041 : vector<1x1x1x8x128xf32> to vector<8x128xf32>
    %1043 = arith.mulf %1036, %1042 : vector<8x128xf32>
    %1044 = arith.addf %1031, %1043 : vector<8x128xf32>
    %c0_1092 = arith.constant 0 : index
    %c2_1093 = arith.constant 2 : index
    %c73_1094 = arith.constant 73 : index
    %c0_1095 = arith.constant 0 : index
    %c0_1096 = arith.constant 0 : index
    %1045 = vector.load %arg2[%c0_1092, %c2_1093, %c73_1094, %c0_1095, %c0_1096] : memref<1x4x75x8x128xf32, #tpu.memory_space<vmem>>, vector<1x1x1x8x128xf32>
    %1046 = vector.shape_cast %1045 : vector<1x1x1x8x128xf32> to vector<8x128xf32>
    %1047 = arith.mulf %1036, %1046 : vector<8x128xf32>
    %1048 = arith.addf %1035, %1047 : vector<8x128xf32>
    %1049 = arith.mulf %747, %751 : vector<8x128xf32>
    %c0_1097 = arith.constant 0 : index
    %c2_1098 = arith.constant 2 : index
    %c24_1099 = arith.constant 24 : index
    %c0_1100 = arith.constant 0 : index
    %c0_1101 = arith.constant 0 : index
    %1050 = vector.load %arg2[%c0_1097, %c2_1098, %c24_1099, %c0_1100, %c0_1101] : memref<1x4x75x8x128xf32, #tpu.memory_space<vmem>>, vector<1x1x1x8x128xf32>
    %1051 = vector.shape_cast %1050 : vector<1x1x1x8x128xf32> to vector<8x128xf32>
    %1052 = arith.mulf %1049, %1051 : vector<8x128xf32>
    %1053 = arith.addf %1040, %1052 : vector<8x128xf32>
    %c0_1102 = arith.constant 0 : index
    %c2_1103 = arith.constant 2 : index
    %c49_1104 = arith.constant 49 : index
    %c0_1105 = arith.constant 0 : index
    %c0_1106 = arith.constant 0 : index
    %1054 = vector.load %arg2[%c0_1102, %c2_1103, %c49_1104, %c0_1105, %c0_1106] : memref<1x4x75x8x128xf32, #tpu.memory_space<vmem>>, vector<1x1x1x8x128xf32>
    %1055 = vector.shape_cast %1054 : vector<1x1x1x8x128xf32> to vector<8x128xf32>
    %1056 = arith.mulf %1049, %1055 : vector<8x128xf32>
    %1057 = arith.addf %1044, %1056 : vector<8x128xf32>
    %c0_1107 = arith.constant 0 : index
    %c2_1108 = arith.constant 2 : index
    %c74_1109 = arith.constant 74 : index
    %c0_1110 = arith.constant 0 : index
    %c0_1111 = arith.constant 0 : index
    %1058 = vector.load %arg2[%c0_1107, %c2_1108, %c74_1109, %c0_1110, %c0_1111] : memref<1x4x75x8x128xf32, #tpu.memory_space<vmem>>, vector<1x1x1x8x128xf32>
    %1059 = vector.shape_cast %1058 : vector<1x1x1x8x128xf32> to vector<8x128xf32>
    %1060 = arith.mulf %1049, %1059 : vector<8x128xf32>
    %1061 = arith.addf %1048, %1060 : vector<8x128xf32>
    %c0_1112 = arith.constant 0 : index
    %c3_1113 = arith.constant 3 : index
    %c0_1114 = arith.constant 0 : index
    %c0_1115 = arith.constant 0 : index
    %c0_1116 = arith.constant 0 : index
    %1062 = vector.load %arg3[%c0_1112, %c3_1113, %c0_1114, %c0_1115, %c0_1116] : memref<1x4x2x8x128xf32, #tpu.memory_space<vmem>>, vector<1x1x1x8x128xf32>
    %1063 = vector.shape_cast %1062 : vector<1x1x1x8x128xf32> to vector<8x128xf32>
    %c0_1117 = arith.constant 0 : index
    %c3_1118 = arith.constant 3 : index
    %c1_1119 = arith.constant 1 : index
    %c0_1120 = arith.constant 0 : index
    %c0_1121 = arith.constant 0 : index
    %1064 = vector.load %arg3[%c0_1117, %c3_1118, %c1_1119, %c0_1120, %c0_1121] : memref<1x4x2x8x128xf32, #tpu.memory_space<vmem>>, vector<1x1x1x8x128xf32>
    %1065 = vector.shape_cast %1064 : vector<1x1x1x8x128xf32> to vector<8x128xf32>
    %1066 = arith.mulf %1063, %1065 : vector<8x128xf32>
    %1067 = math.absf %1066 : vector<8x128xf32>
    %cst_1122 = arith.constant 9.99999971E-10 : f32
    %1068 = vector.broadcast %cst_1122 : f32 to vector<8x128xf32>
    %1069 = arith.addf %1067, %1068 : vector<8x128xf32>
    %cst_1123 = arith.constant 1.57079637 : f32
    %1070 = vector.broadcast %cst_1123 : f32 to vector<8x128xf32>
    %1071 = arith.mulf %1063, %1070 : vector<8x128xf32>
    %cst_1124 = arith.constant 1.57079637 : f32
    %1072 = vector.broadcast %cst_1124 : f32 to vector<8x128xf32>
    %1073 = arith.mulf %1065, %1072 : vector<8x128xf32>
    %1074 = math.cos %1071 : vector<8x128xf32>
    %1075 = math.sin %1071 : vector<8x128xf32>
    %1076 = math.cos %1073 : vector<8x128xf32>
    %1077 = math.sin %1073 : vector<8x128xf32>
    %cst_1125 = arith.constant 1.41421354 : f32
    %1078 = vector.broadcast %cst_1125 : f32 to vector<8x128xf32>
    %1079 = arith.mulf %1078, %1074 : vector<8x128xf32>
    %cst_1126 = arith.constant 1.41421354 : f32
    %1080 = vector.broadcast %cst_1126 : f32 to vector<8x128xf32>
    %1081 = arith.mulf %1080, %1075 : vector<8x128xf32>
    %cst_1127 = arith.constant 1.41421354 : f32
    %1082 = vector.broadcast %cst_1127 : f32 to vector<8x128xf32>
    %1083 = arith.mulf %1082, %1076 : vector<8x128xf32>
    %cst_1128 = arith.constant 1.41421354 : f32
    %1084 = vector.broadcast %cst_1128 : f32 to vector<8x128xf32>
    %1085 = arith.mulf %1084, %1077 : vector<8x128xf32>
    %1086 = arith.mulf %1074, %1074 : vector<8x128xf32>
    %1087 = arith.mulf %1075, %1075 : vector<8x128xf32>
    %1088 = arith.subf %1086, %1087 : vector<8x128xf32>
    %1089 = arith.mulf %1075, %1074 : vector<8x128xf32>
    %1090 = arith.mulf %1074, %1075 : vector<8x128xf32>
    %1091 = arith.addf %1089, %1090 : vector<8x128xf32>
    %1092 = arith.mulf %1076, %1076 : vector<8x128xf32>
    %1093 = arith.mulf %1077, %1077 : vector<8x128xf32>
    %1094 = arith.subf %1092, %1093 : vector<8x128xf32>
    %1095 = arith.mulf %1077, %1076 : vector<8x128xf32>
    %1096 = arith.mulf %1076, %1077 : vector<8x128xf32>
    %1097 = arith.addf %1095, %1096 : vector<8x128xf32>
    %cst_1129 = arith.constant 1.41421354 : f32
    %1098 = vector.broadcast %cst_1129 : f32 to vector<8x128xf32>
    %1099 = arith.mulf %1098, %1088 : vector<8x128xf32>
    %cst_1130 = arith.constant 1.41421354 : f32
    %1100 = vector.broadcast %cst_1130 : f32 to vector<8x128xf32>
    %1101 = arith.mulf %1100, %1091 : vector<8x128xf32>
    %cst_1131 = arith.constant 1.41421354 : f32
    %1102 = vector.broadcast %cst_1131 : f32 to vector<8x128xf32>
    %1103 = arith.mulf %1102, %1094 : vector<8x128xf32>
    %cst_1132 = arith.constant 1.41421354 : f32
    %1104 = vector.broadcast %cst_1132 : f32 to vector<8x128xf32>
    %1105 = arith.mulf %1104, %1097 : vector<8x128xf32>
    %c0_1133 = arith.constant 0 : index
    %c3_1134 = arith.constant 3 : index
    %c0_1135 = arith.constant 0 : index
    %c0_1136 = arith.constant 0 : index
    %c0_1137 = arith.constant 0 : index
    %1106 = vector.load %arg2[%c0_1133, %c3_1134, %c0_1135, %c0_1136, %c0_1137] : memref<1x4x75x8x128xf32, #tpu.memory_space<vmem>>, vector<1x1x1x8x128xf32>
    %1107 = vector.shape_cast %1106 : vector<1x1x1x8x128xf32> to vector<8x128xf32>
    %c0_1138 = arith.constant 0 : index
    %c3_1139 = arith.constant 3 : index
    %c25_1140 = arith.constant 25 : index
    %c0_1141 = arith.constant 0 : index
    %c0_1142 = arith.constant 0 : index
    %1108 = vector.load %arg2[%c0_1138, %c3_1139, %c25_1140, %c0_1141, %c0_1142] : memref<1x4x75x8x128xf32, #tpu.memory_space<vmem>>, vector<1x1x1x8x128xf32>
    %1109 = vector.shape_cast %1108 : vector<1x1x1x8x128xf32> to vector<8x128xf32>
    %c0_1143 = arith.constant 0 : index
    %c3_1144 = arith.constant 3 : index
    %c50_1145 = arith.constant 50 : index
    %c0_1146 = arith.constant 0 : index
    %c0_1147 = arith.constant 0 : index
    %1110 = vector.load %arg2[%c0_1143, %c3_1144, %c50_1145, %c0_1146, %c0_1147] : memref<1x4x75x8x128xf32, #tpu.memory_space<vmem>>, vector<1x1x1x8x128xf32>
    %1111 = vector.shape_cast %1110 : vector<1x1x1x8x128xf32> to vector<8x128xf32>
    %c0_1148 = arith.constant 0 : index
    %c3_1149 = arith.constant 3 : index
    %c1_1150 = arith.constant 1 : index
    %c0_1151 = arith.constant 0 : index
    %c0_1152 = arith.constant 0 : index
    %1112 = vector.load %arg2[%c0_1148, %c3_1149, %c1_1150, %c0_1151, %c0_1152] : memref<1x4x75x8x128xf32, #tpu.memory_space<vmem>>, vector<1x1x1x8x128xf32>
    %1113 = vector.shape_cast %1112 : vector<1x1x1x8x128xf32> to vector<8x128xf32>
    %1114 = arith.mulf %1083, %1113 : vector<8x128xf32>
    %1115 = arith.addf %1107, %1114 : vector<8x128xf32>
    %c0_1153 = arith.constant 0 : index
    %c3_1154 = arith.constant 3 : index
    %c26_1155 = arith.constant 26 : index
    %c0_1156 = arith.constant 0 : index
    %c0_1157 = arith.constant 0 : index
    %1116 = vector.load %arg2[%c0_1153, %c3_1154, %c26_1155, %c0_1156, %c0_1157] : memref<1x4x75x8x128xf32, #tpu.memory_space<vmem>>, vector<1x1x1x8x128xf32>
    %1117 = vector.shape_cast %1116 : vector<1x1x1x8x128xf32> to vector<8x128xf32>
    %1118 = arith.mulf %1083, %1117 : vector<8x128xf32>
    %1119 = arith.addf %1109, %1118 : vector<8x128xf32>
    %c0_1158 = arith.constant 0 : index
    %c3_1159 = arith.constant 3 : index
    %c51_1160 = arith.constant 51 : index
    %c0_1161 = arith.constant 0 : index
    %c0_1162 = arith.constant 0 : index
    %1120 = vector.load %arg2[%c0_1158, %c3_1159, %c51_1160, %c0_1161, %c0_1162] : memref<1x4x75x8x128xf32, #tpu.memory_space<vmem>>, vector<1x1x1x8x128xf32>
    %1121 = vector.shape_cast %1120 : vector<1x1x1x8x128xf32> to vector<8x128xf32>
    %1122 = arith.mulf %1083, %1121 : vector<8x128xf32>
    %1123 = arith.addf %1111, %1122 : vector<8x128xf32>
    %c0_1163 = arith.constant 0 : index
    %c3_1164 = arith.constant 3 : index
    %c2_1165 = arith.constant 2 : index
    %c0_1166 = arith.constant 0 : index
    %c0_1167 = arith.constant 0 : index
    %1124 = vector.load %arg2[%c0_1163, %c3_1164, %c2_1165, %c0_1166, %c0_1167] : memref<1x4x75x8x128xf32, #tpu.memory_space<vmem>>, vector<1x1x1x8x128xf32>
    %1125 = vector.shape_cast %1124 : vector<1x1x1x8x128xf32> to vector<8x128xf32>
    %1126 = arith.mulf %1085, %1125 : vector<8x128xf32>
    %1127 = arith.addf %1115, %1126 : vector<8x128xf32>
    %c0_1168 = arith.constant 0 : index
    %c3_1169 = arith.constant 3 : index
    %c27_1170 = arith.constant 27 : index
    %c0_1171 = arith.constant 0 : index
    %c0_1172 = arith.constant 0 : index
    %1128 = vector.load %arg2[%c0_1168, %c3_1169, %c27_1170, %c0_1171, %c0_1172] : memref<1x4x75x8x128xf32, #tpu.memory_space<vmem>>, vector<1x1x1x8x128xf32>
    %1129 = vector.shape_cast %1128 : vector<1x1x1x8x128xf32> to vector<8x128xf32>
    %1130 = arith.mulf %1085, %1129 : vector<8x128xf32>
    %1131 = arith.addf %1119, %1130 : vector<8x128xf32>
    %c0_1173 = arith.constant 0 : index
    %c3_1174 = arith.constant 3 : index
    %c52_1175 = arith.constant 52 : index
    %c0_1176 = arith.constant 0 : index
    %c0_1177 = arith.constant 0 : index
    %1132 = vector.load %arg2[%c0_1173, %c3_1174, %c52_1175, %c0_1176, %c0_1177] : memref<1x4x75x8x128xf32, #tpu.memory_space<vmem>>, vector<1x1x1x8x128xf32>
    %1133 = vector.shape_cast %1132 : vector<1x1x1x8x128xf32> to vector<8x128xf32>
    %1134 = arith.mulf %1085, %1133 : vector<8x128xf32>
    %1135 = arith.addf %1123, %1134 : vector<8x128xf32>
    %c0_1178 = arith.constant 0 : index
    %c3_1179 = arith.constant 3 : index
    %c3_1180 = arith.constant 3 : index
    %c0_1181 = arith.constant 0 : index
    %c0_1182 = arith.constant 0 : index
    %1136 = vector.load %arg2[%c0_1178, %c3_1179, %c3_1180, %c0_1181, %c0_1182] : memref<1x4x75x8x128xf32, #tpu.memory_space<vmem>>, vector<1x1x1x8x128xf32>
    %1137 = vector.shape_cast %1136 : vector<1x1x1x8x128xf32> to vector<8x128xf32>
    %1138 = arith.mulf %1103, %1137 : vector<8x128xf32>
    %1139 = arith.addf %1127, %1138 : vector<8x128xf32>
    %c0_1183 = arith.constant 0 : index
    %c3_1184 = arith.constant 3 : index
    %c28_1185 = arith.constant 28 : index
    %c0_1186 = arith.constant 0 : index
    %c0_1187 = arith.constant 0 : index
    %1140 = vector.load %arg2[%c0_1183, %c3_1184, %c28_1185, %c0_1186, %c0_1187] : memref<1x4x75x8x128xf32, #tpu.memory_space<vmem>>, vector<1x1x1x8x128xf32>
    %1141 = vector.shape_cast %1140 : vector<1x1x1x8x128xf32> to vector<8x128xf32>
    %1142 = arith.mulf %1103, %1141 : vector<8x128xf32>
    %1143 = arith.addf %1131, %1142 : vector<8x128xf32>
    %c0_1188 = arith.constant 0 : index
    %c3_1189 = arith.constant 3 : index
    %c53_1190 = arith.constant 53 : index
    %c0_1191 = arith.constant 0 : index
    %c0_1192 = arith.constant 0 : index
    %1144 = vector.load %arg2[%c0_1188, %c3_1189, %c53_1190, %c0_1191, %c0_1192] : memref<1x4x75x8x128xf32, #tpu.memory_space<vmem>>, vector<1x1x1x8x128xf32>
    %1145 = vector.shape_cast %1144 : vector<1x1x1x8x128xf32> to vector<8x128xf32>
    %1146 = arith.mulf %1103, %1145 : vector<8x128xf32>
    %1147 = arith.addf %1135, %1146 : vector<8x128xf32>
    %c0_1193 = arith.constant 0 : index
    %c3_1194 = arith.constant 3 : index
    %c4_1195 = arith.constant 4 : index
    %c0_1196 = arith.constant 0 : index
    %c0_1197 = arith.constant 0 : index
    %1148 = vector.load %arg2[%c0_1193, %c3_1194, %c4_1195, %c0_1196, %c0_1197] : memref<1x4x75x8x128xf32, #tpu.memory_space<vmem>>, vector<1x1x1x8x128xf32>
    %1149 = vector.shape_cast %1148 : vector<1x1x1x8x128xf32> to vector<8x128xf32>
    %1150 = arith.mulf %1105, %1149 : vector<8x128xf32>
    %1151 = arith.addf %1139, %1150 : vector<8x128xf32>
    %c0_1198 = arith.constant 0 : index
    %c3_1199 = arith.constant 3 : index
    %c29_1200 = arith.constant 29 : index
    %c0_1201 = arith.constant 0 : index
    %c0_1202 = arith.constant 0 : index
    %1152 = vector.load %arg2[%c0_1198, %c3_1199, %c29_1200, %c0_1201, %c0_1202] : memref<1x4x75x8x128xf32, #tpu.memory_space<vmem>>, vector<1x1x1x8x128xf32>
    %1153 = vector.shape_cast %1152 : vector<1x1x1x8x128xf32> to vector<8x128xf32>
    %1154 = arith.mulf %1105, %1153 : vector<8x128xf32>
    %1155 = arith.addf %1143, %1154 : vector<8x128xf32>
    %c0_1203 = arith.constant 0 : index
    %c3_1204 = arith.constant 3 : index
    %c54_1205 = arith.constant 54 : index
    %c0_1206 = arith.constant 0 : index
    %c0_1207 = arith.constant 0 : index
    %1156 = vector.load %arg2[%c0_1203, %c3_1204, %c54_1205, %c0_1206, %c0_1207] : memref<1x4x75x8x128xf32, #tpu.memory_space<vmem>>, vector<1x1x1x8x128xf32>
    %1157 = vector.shape_cast %1156 : vector<1x1x1x8x128xf32> to vector<8x128xf32>
    %1158 = arith.mulf %1105, %1157 : vector<8x128xf32>
    %1159 = arith.addf %1147, %1158 : vector<8x128xf32>
    %c0_1208 = arith.constant 0 : index
    %c3_1209 = arith.constant 3 : index
    %c5_1210 = arith.constant 5 : index
    %c0_1211 = arith.constant 0 : index
    %c0_1212 = arith.constant 0 : index
    %1160 = vector.load %arg2[%c0_1208, %c3_1209, %c5_1210, %c0_1211, %c0_1212] : memref<1x4x75x8x128xf32, #tpu.memory_space<vmem>>, vector<1x1x1x8x128xf32>
    %1161 = vector.shape_cast %1160 : vector<1x1x1x8x128xf32> to vector<8x128xf32>
    %1162 = arith.mulf %1079, %1161 : vector<8x128xf32>
    %1163 = arith.addf %1151, %1162 : vector<8x128xf32>
    %c0_1213 = arith.constant 0 : index
    %c3_1214 = arith.constant 3 : index
    %c30_1215 = arith.constant 30 : index
    %c0_1216 = arith.constant 0 : index
    %c0_1217 = arith.constant 0 : index
    %1164 = vector.load %arg2[%c0_1213, %c3_1214, %c30_1215, %c0_1216, %c0_1217] : memref<1x4x75x8x128xf32, #tpu.memory_space<vmem>>, vector<1x1x1x8x128xf32>
    %1165 = vector.shape_cast %1164 : vector<1x1x1x8x128xf32> to vector<8x128xf32>
    %1166 = arith.mulf %1079, %1165 : vector<8x128xf32>
    %1167 = arith.addf %1155, %1166 : vector<8x128xf32>
    %c0_1218 = arith.constant 0 : index
    %c3_1219 = arith.constant 3 : index
    %c55_1220 = arith.constant 55 : index
    %c0_1221 = arith.constant 0 : index
    %c0_1222 = arith.constant 0 : index
    %1168 = vector.load %arg2[%c0_1218, %c3_1219, %c55_1220, %c0_1221, %c0_1222] : memref<1x4x75x8x128xf32, #tpu.memory_space<vmem>>, vector<1x1x1x8x128xf32>
    %1169 = vector.shape_cast %1168 : vector<1x1x1x8x128xf32> to vector<8x128xf32>
    %1170 = arith.mulf %1079, %1169 : vector<8x128xf32>
    %1171 = arith.addf %1159, %1170 : vector<8x128xf32>
    %1172 = arith.mulf %1079, %1083 : vector<8x128xf32>
    %c0_1223 = arith.constant 0 : index
    %c3_1224 = arith.constant 3 : index
    %c6_1225 = arith.constant 6 : index
    %c0_1226 = arith.constant 0 : index
    %c0_1227 = arith.constant 0 : index
    %1173 = vector.load %arg2[%c0_1223, %c3_1224, %c6_1225, %c0_1226, %c0_1227] : memref<1x4x75x8x128xf32, #tpu.memory_space<vmem>>, vector<1x1x1x8x128xf32>
    %1174 = vector.shape_cast %1173 : vector<1x1x1x8x128xf32> to vector<8x128xf32>
    %1175 = arith.mulf %1172, %1174 : vector<8x128xf32>
    %1176 = arith.addf %1163, %1175 : vector<8x128xf32>
    %c0_1228 = arith.constant 0 : index
    %c3_1229 = arith.constant 3 : index
    %c31_1230 = arith.constant 31 : index
    %c0_1231 = arith.constant 0 : index
    %c0_1232 = arith.constant 0 : index
    %1177 = vector.load %arg2[%c0_1228, %c3_1229, %c31_1230, %c0_1231, %c0_1232] : memref<1x4x75x8x128xf32, #tpu.memory_space<vmem>>, vector<1x1x1x8x128xf32>
    %1178 = vector.shape_cast %1177 : vector<1x1x1x8x128xf32> to vector<8x128xf32>
    %1179 = arith.mulf %1172, %1178 : vector<8x128xf32>
    %1180 = arith.addf %1167, %1179 : vector<8x128xf32>
    %c0_1233 = arith.constant 0 : index
    %c3_1234 = arith.constant 3 : index
    %c56_1235 = arith.constant 56 : index
    %c0_1236 = arith.constant 0 : index
    %c0_1237 = arith.constant 0 : index
    %1181 = vector.load %arg2[%c0_1233, %c3_1234, %c56_1235, %c0_1236, %c0_1237] : memref<1x4x75x8x128xf32, #tpu.memory_space<vmem>>, vector<1x1x1x8x128xf32>
    %1182 = vector.shape_cast %1181 : vector<1x1x1x8x128xf32> to vector<8x128xf32>
    %1183 = arith.mulf %1172, %1182 : vector<8x128xf32>
    %1184 = arith.addf %1171, %1183 : vector<8x128xf32>
    %1185 = arith.mulf %1079, %1085 : vector<8x128xf32>
    %c0_1238 = arith.constant 0 : index
    %c3_1239 = arith.constant 3 : index
    %c7_1240 = arith.constant 7 : index
    %c0_1241 = arith.constant 0 : index
    %c0_1242 = arith.constant 0 : index
    %1186 = vector.load %arg2[%c0_1238, %c3_1239, %c7_1240, %c0_1241, %c0_1242] : memref<1x4x75x8x128xf32, #tpu.memory_space<vmem>>, vector<1x1x1x8x128xf32>
    %1187 = vector.shape_cast %1186 : vector<1x1x1x8x128xf32> to vector<8x128xf32>
    %1188 = arith.mulf %1185, %1187 : vector<8x128xf32>
    %1189 = arith.addf %1176, %1188 : vector<8x128xf32>
    %c0_1243 = arith.constant 0 : index
    %c3_1244 = arith.constant 3 : index
    %c32_1245 = arith.constant 32 : index
    %c0_1246 = arith.constant 0 : index
    %c0_1247 = arith.constant 0 : index
    %1190 = vector.load %arg2[%c0_1243, %c3_1244, %c32_1245, %c0_1246, %c0_1247] : memref<1x4x75x8x128xf32, #tpu.memory_space<vmem>>, vector<1x1x1x8x128xf32>
    %1191 = vector.shape_cast %1190 : vector<1x1x1x8x128xf32> to vector<8x128xf32>
    %1192 = arith.mulf %1185, %1191 : vector<8x128xf32>
    %1193 = arith.addf %1180, %1192 : vector<8x128xf32>
    %c0_1248 = arith.constant 0 : index
    %c3_1249 = arith.constant 3 : index
    %c57_1250 = arith.constant 57 : index
    %c0_1251 = arith.constant 0 : index
    %c0_1252 = arith.constant 0 : index
    %1194 = vector.load %arg2[%c0_1248, %c3_1249, %c57_1250, %c0_1251, %c0_1252] : memref<1x4x75x8x128xf32, #tpu.memory_space<vmem>>, vector<1x1x1x8x128xf32>
    %1195 = vector.shape_cast %1194 : vector<1x1x1x8x128xf32> to vector<8x128xf32>
    %1196 = arith.mulf %1185, %1195 : vector<8x128xf32>
    %1197 = arith.addf %1184, %1196 : vector<8x128xf32>
    %1198 = arith.mulf %1079, %1103 : vector<8x128xf32>
    %c0_1253 = arith.constant 0 : index
    %c3_1254 = arith.constant 3 : index
    %c8_1255 = arith.constant 8 : index
    %c0_1256 = arith.constant 0 : index
    %c0_1257 = arith.constant 0 : index
    %1199 = vector.load %arg2[%c0_1253, %c3_1254, %c8_1255, %c0_1256, %c0_1257] : memref<1x4x75x8x128xf32, #tpu.memory_space<vmem>>, vector<1x1x1x8x128xf32>
    %1200 = vector.shape_cast %1199 : vector<1x1x1x8x128xf32> to vector<8x128xf32>
    %1201 = arith.mulf %1198, %1200 : vector<8x128xf32>
    %1202 = arith.addf %1189, %1201 : vector<8x128xf32>
    %c0_1258 = arith.constant 0 : index
    %c3_1259 = arith.constant 3 : index
    %c33_1260 = arith.constant 33 : index
    %c0_1261 = arith.constant 0 : index
    %c0_1262 = arith.constant 0 : index
    %1203 = vector.load %arg2[%c0_1258, %c3_1259, %c33_1260, %c0_1261, %c0_1262] : memref<1x4x75x8x128xf32, #tpu.memory_space<vmem>>, vector<1x1x1x8x128xf32>
    %1204 = vector.shape_cast %1203 : vector<1x1x1x8x128xf32> to vector<8x128xf32>
    %1205 = arith.mulf %1198, %1204 : vector<8x128xf32>
    %1206 = arith.addf %1193, %1205 : vector<8x128xf32>
    %c0_1263 = arith.constant 0 : index
    %c3_1264 = arith.constant 3 : index
    %c58_1265 = arith.constant 58 : index
    %c0_1266 = arith.constant 0 : index
    %c0_1267 = arith.constant 0 : index
    %1207 = vector.load %arg2[%c0_1263, %c3_1264, %c58_1265, %c0_1266, %c0_1267] : memref<1x4x75x8x128xf32, #tpu.memory_space<vmem>>, vector<1x1x1x8x128xf32>
    %1208 = vector.shape_cast %1207 : vector<1x1x1x8x128xf32> to vector<8x128xf32>
    %1209 = arith.mulf %1198, %1208 : vector<8x128xf32>
    %1210 = arith.addf %1197, %1209 : vector<8x128xf32>
    %1211 = arith.mulf %1079, %1105 : vector<8x128xf32>
    %c0_1268 = arith.constant 0 : index
    %c3_1269 = arith.constant 3 : index
    %c9_1270 = arith.constant 9 : index
    %c0_1271 = arith.constant 0 : index
    %c0_1272 = arith.constant 0 : index
    %1212 = vector.load %arg2[%c0_1268, %c3_1269, %c9_1270, %c0_1271, %c0_1272] : memref<1x4x75x8x128xf32, #tpu.memory_space<vmem>>, vector<1x1x1x8x128xf32>
    %1213 = vector.shape_cast %1212 : vector<1x1x1x8x128xf32> to vector<8x128xf32>
    %1214 = arith.mulf %1211, %1213 : vector<8x128xf32>
    %1215 = arith.addf %1202, %1214 : vector<8x128xf32>
    %c0_1273 = arith.constant 0 : index
    %c3_1274 = arith.constant 3 : index
    %c34_1275 = arith.constant 34 : index
    %c0_1276 = arith.constant 0 : index
    %c0_1277 = arith.constant 0 : index
    %1216 = vector.load %arg2[%c0_1273, %c3_1274, %c34_1275, %c0_1276, %c0_1277] : memref<1x4x75x8x128xf32, #tpu.memory_space<vmem>>, vector<1x1x1x8x128xf32>
    %1217 = vector.shape_cast %1216 : vector<1x1x1x8x128xf32> to vector<8x128xf32>
    %1218 = arith.mulf %1211, %1217 : vector<8x128xf32>
    %1219 = arith.addf %1206, %1218 : vector<8x128xf32>
    %c0_1278 = arith.constant 0 : index
    %c3_1279 = arith.constant 3 : index
    %c59_1280 = arith.constant 59 : index
    %c0_1281 = arith.constant 0 : index
    %c0_1282 = arith.constant 0 : index
    %1220 = vector.load %arg2[%c0_1278, %c3_1279, %c59_1280, %c0_1281, %c0_1282] : memref<1x4x75x8x128xf32, #tpu.memory_space<vmem>>, vector<1x1x1x8x128xf32>
    %1221 = vector.shape_cast %1220 : vector<1x1x1x8x128xf32> to vector<8x128xf32>
    %1222 = arith.mulf %1211, %1221 : vector<8x128xf32>
    %1223 = arith.addf %1210, %1222 : vector<8x128xf32>
    %c0_1283 = arith.constant 0 : index
    %c3_1284 = arith.constant 3 : index
    %c10_1285 = arith.constant 10 : index
    %c0_1286 = arith.constant 0 : index
    %c0_1287 = arith.constant 0 : index
    %1224 = vector.load %arg2[%c0_1283, %c3_1284, %c10_1285, %c0_1286, %c0_1287] : memref<1x4x75x8x128xf32, #tpu.memory_space<vmem>>, vector<1x1x1x8x128xf32>
    %1225 = vector.shape_cast %1224 : vector<1x1x1x8x128xf32> to vector<8x128xf32>
    %1226 = arith.mulf %1081, %1225 : vector<8x128xf32>
    %1227 = arith.addf %1215, %1226 : vector<8x128xf32>
    %c0_1288 = arith.constant 0 : index
    %c3_1289 = arith.constant 3 : index
    %c35_1290 = arith.constant 35 : index
    %c0_1291 = arith.constant 0 : index
    %c0_1292 = arith.constant 0 : index
    %1228 = vector.load %arg2[%c0_1288, %c3_1289, %c35_1290, %c0_1291, %c0_1292] : memref<1x4x75x8x128xf32, #tpu.memory_space<vmem>>, vector<1x1x1x8x128xf32>
    %1229 = vector.shape_cast %1228 : vector<1x1x1x8x128xf32> to vector<8x128xf32>
    %1230 = arith.mulf %1081, %1229 : vector<8x128xf32>
    %1231 = arith.addf %1219, %1230 : vector<8x128xf32>
    %c0_1293 = arith.constant 0 : index
    %c3_1294 = arith.constant 3 : index
    %c60_1295 = arith.constant 60 : index
    %c0_1296 = arith.constant 0 : index
    %c0_1297 = arith.constant 0 : index
    %1232 = vector.load %arg2[%c0_1293, %c3_1294, %c60_1295, %c0_1296, %c0_1297] : memref<1x4x75x8x128xf32, #tpu.memory_space<vmem>>, vector<1x1x1x8x128xf32>
    %1233 = vector.shape_cast %1232 : vector<1x1x1x8x128xf32> to vector<8x128xf32>
    %1234 = arith.mulf %1081, %1233 : vector<8x128xf32>
    %1235 = arith.addf %1223, %1234 : vector<8x128xf32>
    %1236 = arith.mulf %1081, %1083 : vector<8x128xf32>
    %c0_1298 = arith.constant 0 : index
    %c3_1299 = arith.constant 3 : index
    %c11_1300 = arith.constant 11 : index
    %c0_1301 = arith.constant 0 : index
    %c0_1302 = arith.constant 0 : index
    %1237 = vector.load %arg2[%c0_1298, %c3_1299, %c11_1300, %c0_1301, %c0_1302] : memref<1x4x75x8x128xf32, #tpu.memory_space<vmem>>, vector<1x1x1x8x128xf32>
    %1238 = vector.shape_cast %1237 : vector<1x1x1x8x128xf32> to vector<8x128xf32>
    %1239 = arith.mulf %1236, %1238 : vector<8x128xf32>
    %1240 = arith.addf %1227, %1239 : vector<8x128xf32>
    %c0_1303 = arith.constant 0 : index
    %c3_1304 = arith.constant 3 : index
    %c36_1305 = arith.constant 36 : index
    %c0_1306 = arith.constant 0 : index
    %c0_1307 = arith.constant 0 : index
    %1241 = vector.load %arg2[%c0_1303, %c3_1304, %c36_1305, %c0_1306, %c0_1307] : memref<1x4x75x8x128xf32, #tpu.memory_space<vmem>>, vector<1x1x1x8x128xf32>
    %1242 = vector.shape_cast %1241 : vector<1x1x1x8x128xf32> to vector<8x128xf32>
    %1243 = arith.mulf %1236, %1242 : vector<8x128xf32>
    %1244 = arith.addf %1231, %1243 : vector<8x128xf32>
    %c0_1308 = arith.constant 0 : index
    %c3_1309 = arith.constant 3 : index
    %c61_1310 = arith.constant 61 : index
    %c0_1311 = arith.constant 0 : index
    %c0_1312 = arith.constant 0 : index
    %1245 = vector.load %arg2[%c0_1308, %c3_1309, %c61_1310, %c0_1311, %c0_1312] : memref<1x4x75x8x128xf32, #tpu.memory_space<vmem>>, vector<1x1x1x8x128xf32>
    %1246 = vector.shape_cast %1245 : vector<1x1x1x8x128xf32> to vector<8x128xf32>
    %1247 = arith.mulf %1236, %1246 : vector<8x128xf32>
    %1248 = arith.addf %1235, %1247 : vector<8x128xf32>
    %1249 = arith.mulf %1081, %1085 : vector<8x128xf32>
    %c0_1313 = arith.constant 0 : index
    %c3_1314 = arith.constant 3 : index
    %c12_1315 = arith.constant 12 : index
    %c0_1316 = arith.constant 0 : index
    %c0_1317 = arith.constant 0 : index
    %1250 = vector.load %arg2[%c0_1313, %c3_1314, %c12_1315, %c0_1316, %c0_1317] : memref<1x4x75x8x128xf32, #tpu.memory_space<vmem>>, vector<1x1x1x8x128xf32>
    %1251 = vector.shape_cast %1250 : vector<1x1x1x8x128xf32> to vector<8x128xf32>
    %1252 = arith.mulf %1249, %1251 : vector<8x128xf32>
    %1253 = arith.addf %1240, %1252 : vector<8x128xf32>
    %c0_1318 = arith.constant 0 : index
    %c3_1319 = arith.constant 3 : index
    %c37_1320 = arith.constant 37 : index
    %c0_1321 = arith.constant 0 : index
    %c0_1322 = arith.constant 0 : index
    %1254 = vector.load %arg2[%c0_1318, %c3_1319, %c37_1320, %c0_1321, %c0_1322] : memref<1x4x75x8x128xf32, #tpu.memory_space<vmem>>, vector<1x1x1x8x128xf32>
    %1255 = vector.shape_cast %1254 : vector<1x1x1x8x128xf32> to vector<8x128xf32>
    %1256 = arith.mulf %1249, %1255 : vector<8x128xf32>
    %1257 = arith.addf %1244, %1256 : vector<8x128xf32>
    %c0_1323 = arith.constant 0 : index
    %c3_1324 = arith.constant 3 : index
    %c62_1325 = arith.constant 62 : index
    %c0_1326 = arith.constant 0 : index
    %c0_1327 = arith.constant 0 : index
    %1258 = vector.load %arg2[%c0_1323, %c3_1324, %c62_1325, %c0_1326, %c0_1327] : memref<1x4x75x8x128xf32, #tpu.memory_space<vmem>>, vector<1x1x1x8x128xf32>
    %1259 = vector.shape_cast %1258 : vector<1x1x1x8x128xf32> to vector<8x128xf32>
    %1260 = arith.mulf %1249, %1259 : vector<8x128xf32>
    %1261 = arith.addf %1248, %1260 : vector<8x128xf32>
    %1262 = arith.mulf %1081, %1103 : vector<8x128xf32>
    %c0_1328 = arith.constant 0 : index
    %c3_1329 = arith.constant 3 : index
    %c13_1330 = arith.constant 13 : index
    %c0_1331 = arith.constant 0 : index
    %c0_1332 = arith.constant 0 : index
    %1263 = vector.load %arg2[%c0_1328, %c3_1329, %c13_1330, %c0_1331, %c0_1332] : memref<1x4x75x8x128xf32, #tpu.memory_space<vmem>>, vector<1x1x1x8x128xf32>
    %1264 = vector.shape_cast %1263 : vector<1x1x1x8x128xf32> to vector<8x128xf32>
    %1265 = arith.mulf %1262, %1264 : vector<8x128xf32>
    %1266 = arith.addf %1253, %1265 : vector<8x128xf32>
    %c0_1333 = arith.constant 0 : index
    %c3_1334 = arith.constant 3 : index
    %c38_1335 = arith.constant 38 : index
    %c0_1336 = arith.constant 0 : index
    %c0_1337 = arith.constant 0 : index
    %1267 = vector.load %arg2[%c0_1333, %c3_1334, %c38_1335, %c0_1336, %c0_1337] : memref<1x4x75x8x128xf32, #tpu.memory_space<vmem>>, vector<1x1x1x8x128xf32>
    %1268 = vector.shape_cast %1267 : vector<1x1x1x8x128xf32> to vector<8x128xf32>
    %1269 = arith.mulf %1262, %1268 : vector<8x128xf32>
    %1270 = arith.addf %1257, %1269 : vector<8x128xf32>
    %c0_1338 = arith.constant 0 : index
    %c3_1339 = arith.constant 3 : index
    %c63_1340 = arith.constant 63 : index
    %c0_1341 = arith.constant 0 : index
    %c0_1342 = arith.constant 0 : index
    %1271 = vector.load %arg2[%c0_1338, %c3_1339, %c63_1340, %c0_1341, %c0_1342] : memref<1x4x75x8x128xf32, #tpu.memory_space<vmem>>, vector<1x1x1x8x128xf32>
    %1272 = vector.shape_cast %1271 : vector<1x1x1x8x128xf32> to vector<8x128xf32>
    %1273 = arith.mulf %1262, %1272 : vector<8x128xf32>
    %1274 = arith.addf %1261, %1273 : vector<8x128xf32>
    %1275 = arith.mulf %1081, %1105 : vector<8x128xf32>
    %c0_1343 = arith.constant 0 : index
    %c3_1344 = arith.constant 3 : index
    %c14_1345 = arith.constant 14 : index
    %c0_1346 = arith.constant 0 : index
    %c0_1347 = arith.constant 0 : index
    %1276 = vector.load %arg2[%c0_1343, %c3_1344, %c14_1345, %c0_1346, %c0_1347] : memref<1x4x75x8x128xf32, #tpu.memory_space<vmem>>, vector<1x1x1x8x128xf32>
    %1277 = vector.shape_cast %1276 : vector<1x1x1x8x128xf32> to vector<8x128xf32>
    %1278 = arith.mulf %1275, %1277 : vector<8x128xf32>
    %1279 = arith.addf %1266, %1278 : vector<8x128xf32>
    %c0_1348 = arith.constant 0 : index
    %c3_1349 = arith.constant 3 : index
    %c39_1350 = arith.constant 39 : index
    %c0_1351 = arith.constant 0 : index
    %c0_1352 = arith.constant 0 : index
    %1280 = vector.load %arg2[%c0_1348, %c3_1349, %c39_1350, %c0_1351, %c0_1352] : memref<1x4x75x8x128xf32, #tpu.memory_space<vmem>>, vector<1x1x1x8x128xf32>
    %1281 = vector.shape_cast %1280 : vector<1x1x1x8x128xf32> to vector<8x128xf32>
    %1282 = arith.mulf %1275, %1281 : vector<8x128xf32>
    %1283 = arith.addf %1270, %1282 : vector<8x128xf32>
    %c0_1353 = arith.constant 0 : index
    %c3_1354 = arith.constant 3 : index
    %c64_1355 = arith.constant 64 : index
    %c0_1356 = arith.constant 0 : index
    %c0_1357 = arith.constant 0 : index
    %1284 = vector.load %arg2[%c0_1353, %c3_1354, %c64_1355, %c0_1356, %c0_1357] : memref<1x4x75x8x128xf32, #tpu.memory_space<vmem>>, vector<1x1x1x8x128xf32>
    %1285 = vector.shape_cast %1284 : vector<1x1x1x8x128xf32> to vector<8x128xf32>
    %1286 = arith.mulf %1275, %1285 : vector<8x128xf32>
    %1287 = arith.addf %1274, %1286 : vector<8x128xf32>
    %c0_1358 = arith.constant 0 : index
    %c3_1359 = arith.constant 3 : index
    %c15_1360 = arith.constant 15 : index
    %c0_1361 = arith.constant 0 : index
    %c0_1362 = arith.constant 0 : index
    %1288 = vector.load %arg2[%c0_1358, %c3_1359, %c15_1360, %c0_1361, %c0_1362] : memref<1x4x75x8x128xf32, #tpu.memory_space<vmem>>, vector<1x1x1x8x128xf32>
    %1289 = vector.shape_cast %1288 : vector<1x1x1x8x128xf32> to vector<8x128xf32>
    %1290 = arith.mulf %1099, %1289 : vector<8x128xf32>
    %1291 = arith.addf %1279, %1290 : vector<8x128xf32>
    %c0_1363 = arith.constant 0 : index
    %c3_1364 = arith.constant 3 : index
    %c40_1365 = arith.constant 40 : index
    %c0_1366 = arith.constant 0 : index
    %c0_1367 = arith.constant 0 : index
    %1292 = vector.load %arg2[%c0_1363, %c3_1364, %c40_1365, %c0_1366, %c0_1367] : memref<1x4x75x8x128xf32, #tpu.memory_space<vmem>>, vector<1x1x1x8x128xf32>
    %1293 = vector.shape_cast %1292 : vector<1x1x1x8x128xf32> to vector<8x128xf32>
    %1294 = arith.mulf %1099, %1293 : vector<8x128xf32>
    %1295 = arith.addf %1283, %1294 : vector<8x128xf32>
    %c0_1368 = arith.constant 0 : index
    %c3_1369 = arith.constant 3 : index
    %c65_1370 = arith.constant 65 : index
    %c0_1371 = arith.constant 0 : index
    %c0_1372 = arith.constant 0 : index
    %1296 = vector.load %arg2[%c0_1368, %c3_1369, %c65_1370, %c0_1371, %c0_1372] : memref<1x4x75x8x128xf32, #tpu.memory_space<vmem>>, vector<1x1x1x8x128xf32>
    %1297 = vector.shape_cast %1296 : vector<1x1x1x8x128xf32> to vector<8x128xf32>
    %1298 = arith.mulf %1099, %1297 : vector<8x128xf32>
    %1299 = arith.addf %1287, %1298 : vector<8x128xf32>
    %1300 = arith.mulf %1099, %1083 : vector<8x128xf32>
    %c0_1373 = arith.constant 0 : index
    %c3_1374 = arith.constant 3 : index
    %c16_1375 = arith.constant 16 : index
    %c0_1376 = arith.constant 0 : index
    %c0_1377 = arith.constant 0 : index
    %1301 = vector.load %arg2[%c0_1373, %c3_1374, %c16_1375, %c0_1376, %c0_1377] : memref<1x4x75x8x128xf32, #tpu.memory_space<vmem>>, vector<1x1x1x8x128xf32>
    %1302 = vector.shape_cast %1301 : vector<1x1x1x8x128xf32> to vector<8x128xf32>
    %1303 = arith.mulf %1300, %1302 : vector<8x128xf32>
    %1304 = arith.addf %1291, %1303 : vector<8x128xf32>
    %c0_1378 = arith.constant 0 : index
    %c3_1379 = arith.constant 3 : index
    %c41_1380 = arith.constant 41 : index
    %c0_1381 = arith.constant 0 : index
    %c0_1382 = arith.constant 0 : index
    %1305 = vector.load %arg2[%c0_1378, %c3_1379, %c41_1380, %c0_1381, %c0_1382] : memref<1x4x75x8x128xf32, #tpu.memory_space<vmem>>, vector<1x1x1x8x128xf32>
    %1306 = vector.shape_cast %1305 : vector<1x1x1x8x128xf32> to vector<8x128xf32>
    %1307 = arith.mulf %1300, %1306 : vector<8x128xf32>
    %1308 = arith.addf %1295, %1307 : vector<8x128xf32>
    %c0_1383 = arith.constant 0 : index
    %c3_1384 = arith.constant 3 : index
    %c66_1385 = arith.constant 66 : index
    %c0_1386 = arith.constant 0 : index
    %c0_1387 = arith.constant 0 : index
    %1309 = vector.load %arg2[%c0_1383, %c3_1384, %c66_1385, %c0_1386, %c0_1387] : memref<1x4x75x8x128xf32, #tpu.memory_space<vmem>>, vector<1x1x1x8x128xf32>
    %1310 = vector.shape_cast %1309 : vector<1x1x1x8x128xf32> to vector<8x128xf32>
    %1311 = arith.mulf %1300, %1310 : vector<8x128xf32>
    %1312 = arith.addf %1299, %1311 : vector<8x128xf32>
    %1313 = arith.mulf %1099, %1085 : vector<8x128xf32>
    %c0_1388 = arith.constant 0 : index
    %c3_1389 = arith.constant 3 : index
    %c17_1390 = arith.constant 17 : index
    %c0_1391 = arith.constant 0 : index
    %c0_1392 = arith.constant 0 : index
    %1314 = vector.load %arg2[%c0_1388, %c3_1389, %c17_1390, %c0_1391, %c0_1392] : memref<1x4x75x8x128xf32, #tpu.memory_space<vmem>>, vector<1x1x1x8x128xf32>
    %1315 = vector.shape_cast %1314 : vector<1x1x1x8x128xf32> to vector<8x128xf32>
    %1316 = arith.mulf %1313, %1315 : vector<8x128xf32>
    %1317 = arith.addf %1304, %1316 : vector<8x128xf32>
    %c0_1393 = arith.constant 0 : index
    %c3_1394 = arith.constant 3 : index
    %c42_1395 = arith.constant 42 : index
    %c0_1396 = arith.constant 0 : index
    %c0_1397 = arith.constant 0 : index
    %1318 = vector.load %arg2[%c0_1393, %c3_1394, %c42_1395, %c0_1396, %c0_1397] : memref<1x4x75x8x128xf32, #tpu.memory_space<vmem>>, vector<1x1x1x8x128xf32>
    %1319 = vector.shape_cast %1318 : vector<1x1x1x8x128xf32> to vector<8x128xf32>
    %1320 = arith.mulf %1313, %1319 : vector<8x128xf32>
    %1321 = arith.addf %1308, %1320 : vector<8x128xf32>
    %c0_1398 = arith.constant 0 : index
    %c3_1399 = arith.constant 3 : index
    %c67_1400 = arith.constant 67 : index
    %c0_1401 = arith.constant 0 : index
    %c0_1402 = arith.constant 0 : index
    %1322 = vector.load %arg2[%c0_1398, %c3_1399, %c67_1400, %c0_1401, %c0_1402] : memref<1x4x75x8x128xf32, #tpu.memory_space<vmem>>, vector<1x1x1x8x128xf32>
    %1323 = vector.shape_cast %1322 : vector<1x1x1x8x128xf32> to vector<8x128xf32>
    %1324 = arith.mulf %1313, %1323 : vector<8x128xf32>
    %1325 = arith.addf %1312, %1324 : vector<8x128xf32>
    %1326 = arith.mulf %1099, %1103 : vector<8x128xf32>
    %c0_1403 = arith.constant 0 : index
    %c3_1404 = arith.constant 3 : index
    %c18_1405 = arith.constant 18 : index
    %c0_1406 = arith.constant 0 : index
    %c0_1407 = arith.constant 0 : index
    %1327 = vector.load %arg2[%c0_1403, %c3_1404, %c18_1405, %c0_1406, %c0_1407] : memref<1x4x75x8x128xf32, #tpu.memory_space<vmem>>, vector<1x1x1x8x128xf32>
    %1328 = vector.shape_cast %1327 : vector<1x1x1x8x128xf32> to vector<8x128xf32>
    %1329 = arith.mulf %1326, %1328 : vector<8x128xf32>
    %1330 = arith.addf %1317, %1329 : vector<8x128xf32>
    %c0_1408 = arith.constant 0 : index
    %c3_1409 = arith.constant 3 : index
    %c43_1410 = arith.constant 43 : index
    %c0_1411 = arith.constant 0 : index
    %c0_1412 = arith.constant 0 : index
    %1331 = vector.load %arg2[%c0_1408, %c3_1409, %c43_1410, %c0_1411, %c0_1412] : memref<1x4x75x8x128xf32, #tpu.memory_space<vmem>>, vector<1x1x1x8x128xf32>
    %1332 = vector.shape_cast %1331 : vector<1x1x1x8x128xf32> to vector<8x128xf32>
    %1333 = arith.mulf %1326, %1332 : vector<8x128xf32>
    %1334 = arith.addf %1321, %1333 : vector<8x128xf32>
    %c0_1413 = arith.constant 0 : index
    %c3_1414 = arith.constant 3 : index
    %c68_1415 = arith.constant 68 : index
    %c0_1416 = arith.constant 0 : index
    %c0_1417 = arith.constant 0 : index
    %1335 = vector.load %arg2[%c0_1413, %c3_1414, %c68_1415, %c0_1416, %c0_1417] : memref<1x4x75x8x128xf32, #tpu.memory_space<vmem>>, vector<1x1x1x8x128xf32>
    %1336 = vector.shape_cast %1335 : vector<1x1x1x8x128xf32> to vector<8x128xf32>
    %1337 = arith.mulf %1326, %1336 : vector<8x128xf32>
    %1338 = arith.addf %1325, %1337 : vector<8x128xf32>
    %1339 = arith.mulf %1099, %1105 : vector<8x128xf32>
    %c0_1418 = arith.constant 0 : index
    %c3_1419 = arith.constant 3 : index
    %c19_1420 = arith.constant 19 : index
    %c0_1421 = arith.constant 0 : index
    %c0_1422 = arith.constant 0 : index
    %1340 = vector.load %arg2[%c0_1418, %c3_1419, %c19_1420, %c0_1421, %c0_1422] : memref<1x4x75x8x128xf32, #tpu.memory_space<vmem>>, vector<1x1x1x8x128xf32>
    %1341 = vector.shape_cast %1340 : vector<1x1x1x8x128xf32> to vector<8x128xf32>
    %1342 = arith.mulf %1339, %1341 : vector<8x128xf32>
    %1343 = arith.addf %1330, %1342 : vector<8x128xf32>
    %c0_1423 = arith.constant 0 : index
    %c3_1424 = arith.constant 3 : index
    %c44_1425 = arith.constant 44 : index
    %c0_1426 = arith.constant 0 : index
    %c0_1427 = arith.constant 0 : index
    %1344 = vector.load %arg2[%c0_1423, %c3_1424, %c44_1425, %c0_1426, %c0_1427] : memref<1x4x75x8x128xf32, #tpu.memory_space<vmem>>, vector<1x1x1x8x128xf32>
    %1345 = vector.shape_cast %1344 : vector<1x1x1x8x128xf32> to vector<8x128xf32>
    %1346 = arith.mulf %1339, %1345 : vector<8x128xf32>
    %1347 = arith.addf %1334, %1346 : vector<8x128xf32>
    %c0_1428 = arith.constant 0 : index
    %c3_1429 = arith.constant 3 : index
    %c69_1430 = arith.constant 69 : index
    %c0_1431 = arith.constant 0 : index
    %c0_1432 = arith.constant 0 : index
    %1348 = vector.load %arg2[%c0_1428, %c3_1429, %c69_1430, %c0_1431, %c0_1432] : memref<1x4x75x8x128xf32, #tpu.memory_space<vmem>>, vector<1x1x1x8x128xf32>
    %1349 = vector.shape_cast %1348 : vector<1x1x1x8x128xf32> to vector<8x128xf32>
    %1350 = arith.mulf %1339, %1349 : vector<8x128xf32>
    %1351 = arith.addf %1338, %1350 : vector<8x128xf32>
    %c0_1433 = arith.constant 0 : index
    %c3_1434 = arith.constant 3 : index
    %c20_1435 = arith.constant 20 : index
    %c0_1436 = arith.constant 0 : index
    %c0_1437 = arith.constant 0 : index
    %1352 = vector.load %arg2[%c0_1433, %c3_1434, %c20_1435, %c0_1436, %c0_1437] : memref<1x4x75x8x128xf32, #tpu.memory_space<vmem>>, vector<1x1x1x8x128xf32>
    %1353 = vector.shape_cast %1352 : vector<1x1x1x8x128xf32> to vector<8x128xf32>
    %1354 = arith.mulf %1101, %1353 : vector<8x128xf32>
    %1355 = arith.addf %1343, %1354 : vector<8x128xf32>
    %c0_1438 = arith.constant 0 : index
    %c3_1439 = arith.constant 3 : index
    %c45_1440 = arith.constant 45 : index
    %c0_1441 = arith.constant 0 : index
    %c0_1442 = arith.constant 0 : index
    %1356 = vector.load %arg2[%c0_1438, %c3_1439, %c45_1440, %c0_1441, %c0_1442] : memref<1x4x75x8x128xf32, #tpu.memory_space<vmem>>, vector<1x1x1x8x128xf32>
    %1357 = vector.shape_cast %1356 : vector<1x1x1x8x128xf32> to vector<8x128xf32>
    %1358 = arith.mulf %1101, %1357 : vector<8x128xf32>
    %1359 = arith.addf %1347, %1358 : vector<8x128xf32>
    %c0_1443 = arith.constant 0 : index
    %c3_1444 = arith.constant 3 : index
    %c70_1445 = arith.constant 70 : index
    %c0_1446 = arith.constant 0 : index
    %c0_1447 = arith.constant 0 : index
    %1360 = vector.load %arg2[%c0_1443, %c3_1444, %c70_1445, %c0_1446, %c0_1447] : memref<1x4x75x8x128xf32, #tpu.memory_space<vmem>>, vector<1x1x1x8x128xf32>
    %1361 = vector.shape_cast %1360 : vector<1x1x1x8x128xf32> to vector<8x128xf32>
    %1362 = arith.mulf %1101, %1361 : vector<8x128xf32>
    %1363 = arith.addf %1351, %1362 : vector<8x128xf32>
    %1364 = arith.mulf %1101, %1083 : vector<8x128xf32>
    %c0_1448 = arith.constant 0 : index
    %c3_1449 = arith.constant 3 : index
    %c21_1450 = arith.constant 21 : index
    %c0_1451 = arith.constant 0 : index
    %c0_1452 = arith.constant 0 : index
    %1365 = vector.load %arg2[%c0_1448, %c3_1449, %c21_1450, %c0_1451, %c0_1452] : memref<1x4x75x8x128xf32, #tpu.memory_space<vmem>>, vector<1x1x1x8x128xf32>
    %1366 = vector.shape_cast %1365 : vector<1x1x1x8x128xf32> to vector<8x128xf32>
    %1367 = arith.mulf %1364, %1366 : vector<8x128xf32>
    %1368 = arith.addf %1355, %1367 : vector<8x128xf32>
    %c0_1453 = arith.constant 0 : index
    %c3_1454 = arith.constant 3 : index
    %c46_1455 = arith.constant 46 : index
    %c0_1456 = arith.constant 0 : index
    %c0_1457 = arith.constant 0 : index
    %1369 = vector.load %arg2[%c0_1453, %c3_1454, %c46_1455, %c0_1456, %c0_1457] : memref<1x4x75x8x128xf32, #tpu.memory_space<vmem>>, vector<1x1x1x8x128xf32>
    %1370 = vector.shape_cast %1369 : vector<1x1x1x8x128xf32> to vector<8x128xf32>
    %1371 = arith.mulf %1364, %1370 : vector<8x128xf32>
    %1372 = arith.addf %1359, %1371 : vector<8x128xf32>
    %c0_1458 = arith.constant 0 : index
    %c3_1459 = arith.constant 3 : index
    %c71_1460 = arith.constant 71 : index
    %c0_1461 = arith.constant 0 : index
    %c0_1462 = arith.constant 0 : index
    %1373 = vector.load %arg2[%c0_1458, %c3_1459, %c71_1460, %c0_1461, %c0_1462] : memref<1x4x75x8x128xf32, #tpu.memory_space<vmem>>, vector<1x1x1x8x128xf32>
    %1374 = vector.shape_cast %1373 : vector<1x1x1x8x128xf32> to vector<8x128xf32>
    %1375 = arith.mulf %1364, %1374 : vector<8x128xf32>
    %1376 = arith.addf %1363, %1375 : vector<8x128xf32>
    %1377 = arith.mulf %1101, %1085 : vector<8x128xf32>
    %c0_1463 = arith.constant 0 : index
    %c3_1464 = arith.constant 3 : index
    %c22_1465 = arith.constant 22 : index
    %c0_1466 = arith.constant 0 : index
    %c0_1467 = arith.constant 0 : index
    %1378 = vector.load %arg2[%c0_1463, %c3_1464, %c22_1465, %c0_1466, %c0_1467] : memref<1x4x75x8x128xf32, #tpu.memory_space<vmem>>, vector<1x1x1x8x128xf32>
    %1379 = vector.shape_cast %1378 : vector<1x1x1x8x128xf32> to vector<8x128xf32>
    %1380 = arith.mulf %1377, %1379 : vector<8x128xf32>
    %1381 = arith.addf %1368, %1380 : vector<8x128xf32>
    %c0_1468 = arith.constant 0 : index
    %c3_1469 = arith.constant 3 : index
    %c47_1470 = arith.constant 47 : index
    %c0_1471 = arith.constant 0 : index
    %c0_1472 = arith.constant 0 : index
    %1382 = vector.load %arg2[%c0_1468, %c3_1469, %c47_1470, %c0_1471, %c0_1472] : memref<1x4x75x8x128xf32, #tpu.memory_space<vmem>>, vector<1x1x1x8x128xf32>
    %1383 = vector.shape_cast %1382 : vector<1x1x1x8x128xf32> to vector<8x128xf32>
    %1384 = arith.mulf %1377, %1383 : vector<8x128xf32>
    %1385 = arith.addf %1372, %1384 : vector<8x128xf32>
    %c0_1473 = arith.constant 0 : index
    %c3_1474 = arith.constant 3 : index
    %c72_1475 = arith.constant 72 : index
    %c0_1476 = arith.constant 0 : index
    %c0_1477 = arith.constant 0 : index
    %1386 = vector.load %arg2[%c0_1473, %c3_1474, %c72_1475, %c0_1476, %c0_1477] : memref<1x4x75x8x128xf32, #tpu.memory_space<vmem>>, vector<1x1x1x8x128xf32>
    %1387 = vector.shape_cast %1386 : vector<1x1x1x8x128xf32> to vector<8x128xf32>
    %1388 = arith.mulf %1377, %1387 : vector<8x128xf32>
    %1389 = arith.addf %1376, %1388 : vector<8x128xf32>
    %1390 = arith.mulf %1101, %1103 : vector<8x128xf32>
    %c0_1478 = arith.constant 0 : index
    %c3_1479 = arith.constant 3 : index
    %c23_1480 = arith.constant 23 : index
    %c0_1481 = arith.constant 0 : index
    %c0_1482 = arith.constant 0 : index
    %1391 = vector.load %arg2[%c0_1478, %c3_1479, %c23_1480, %c0_1481, %c0_1482] : memref<1x4x75x8x128xf32, #tpu.memory_space<vmem>>, vector<1x1x1x8x128xf32>
    %1392 = vector.shape_cast %1391 : vector<1x1x1x8x128xf32> to vector<8x128xf32>
    %1393 = arith.mulf %1390, %1392 : vector<8x128xf32>
    %1394 = arith.addf %1381, %1393 : vector<8x128xf32>
    %c0_1483 = arith.constant 0 : index
    %c3_1484 = arith.constant 3 : index
    %c48_1485 = arith.constant 48 : index
    %c0_1486 = arith.constant 0 : index
    %c0_1487 = arith.constant 0 : index
    %1395 = vector.load %arg2[%c0_1483, %c3_1484, %c48_1485, %c0_1486, %c0_1487] : memref<1x4x75x8x128xf32, #tpu.memory_space<vmem>>, vector<1x1x1x8x128xf32>
    %1396 = vector.shape_cast %1395 : vector<1x1x1x8x128xf32> to vector<8x128xf32>
    %1397 = arith.mulf %1390, %1396 : vector<8x128xf32>
    %1398 = arith.addf %1385, %1397 : vector<8x128xf32>
    %c0_1488 = arith.constant 0 : index
    %c3_1489 = arith.constant 3 : index
    %c73_1490 = arith.constant 73 : index
    %c0_1491 = arith.constant 0 : index
    %c0_1492 = arith.constant 0 : index
    %1399 = vector.load %arg2[%c0_1488, %c3_1489, %c73_1490, %c0_1491, %c0_1492] : memref<1x4x75x8x128xf32, #tpu.memory_space<vmem>>, vector<1x1x1x8x128xf32>
    %1400 = vector.shape_cast %1399 : vector<1x1x1x8x128xf32> to vector<8x128xf32>
    %1401 = arith.mulf %1390, %1400 : vector<8x128xf32>
    %1402 = arith.addf %1389, %1401 : vector<8x128xf32>
    %1403 = arith.mulf %1101, %1105 : vector<8x128xf32>
    %c0_1493 = arith.constant 0 : index
    %c3_1494 = arith.constant 3 : index
    %c24_1495 = arith.constant 24 : index
    %c0_1496 = arith.constant 0 : index
    %c0_1497 = arith.constant 0 : index
    %1404 = vector.load %arg2[%c0_1493, %c3_1494, %c24_1495, %c0_1496, %c0_1497] : memref<1x4x75x8x128xf32, #tpu.memory_space<vmem>>, vector<1x1x1x8x128xf32>
    %1405 = vector.shape_cast %1404 : vector<1x1x1x8x128xf32> to vector<8x128xf32>
    %1406 = arith.mulf %1403, %1405 : vector<8x128xf32>
    %1407 = arith.addf %1394, %1406 : vector<8x128xf32>
    %c0_1498 = arith.constant 0 : index
    %c3_1499 = arith.constant 3 : index
    %c49_1500 = arith.constant 49 : index
    %c0_1501 = arith.constant 0 : index
    %c0_1502 = arith.constant 0 : index
    %1408 = vector.load %arg2[%c0_1498, %c3_1499, %c49_1500, %c0_1501, %c0_1502] : memref<1x4x75x8x128xf32, #tpu.memory_space<vmem>>, vector<1x1x1x8x128xf32>
    %1409 = vector.shape_cast %1408 : vector<1x1x1x8x128xf32> to vector<8x128xf32>
    %1410 = arith.mulf %1403, %1409 : vector<8x128xf32>
    %1411 = arith.addf %1398, %1410 : vector<8x128xf32>
    %c0_1503 = arith.constant 0 : index
    %c3_1504 = arith.constant 3 : index
    %c74_1505 = arith.constant 74 : index
    %c0_1506 = arith.constant 0 : index
    %c0_1507 = arith.constant 0 : index
    %1412 = vector.load %arg2[%c0_1503, %c3_1504, %c74_1505, %c0_1506, %c0_1507] : memref<1x4x75x8x128xf32, #tpu.memory_space<vmem>>, vector<1x1x1x8x128xf32>
    %1413 = vector.shape_cast %1412 : vector<1x1x1x8x128xf32> to vector<8x128xf32>
    %1414 = arith.mulf %1403, %1413 : vector<8x128xf32>
    %1415 = arith.addf %1402, %1414 : vector<8x128xf32>
    %1416 = arith.addf %7, %361 : vector<8x128xf32>
    %1417 = arith.addf %1416, %715 : vector<8x128xf32>
    %1418 = arith.addf %1417, %1069 : vector<8x128xf32>
    %1419 = tpu.reciprocal %1418 : vector<8x128xf32> -> vector<8x128xf32>
    %1420 = arith.mulf %1069, %1419 : vector<8x128xf32>
    %1421 = arith.mulf %715, %1419 : vector<8x128xf32>
    %1422 = arith.mulf %361, %1419 : vector<8x128xf32>
    %1423 = arith.mulf %7, %1419 : vector<8x128xf32>
    %1424 = arith.mulf %345, %1420 : vector<8x128xf32>
    %1425 = arith.mulf %699, %1421 : vector<8x128xf32>
    %1426 = arith.addf %1424, %1425 : vector<8x128xf32>
    %1427 = arith.mulf %1053, %1422 : vector<8x128xf32>
    %1428 = arith.addf %1426, %1427 : vector<8x128xf32>
    %1429 = arith.mulf %1407, %1423 : vector<8x128xf32>
    %1430 = arith.addf %1428, %1429 : vector<8x128xf32>
    %c0_1508 = arith.constant 0 : index
    %c0_1509 = arith.constant 0 : index
    %c0_1510 = arith.constant 0 : index
    %c0_1511 = arith.constant 0 : index
    %1431 = vector.load %arg4[%c0_1508, %c0_1509, %c0_1510, %c0_1511] : memref<1x3x8x128xf32, #tpu.memory_space<vmem>>, vector<1x1x8x128xf32>
    %1432 = vector.shape_cast %1431 : vector<1x1x8x128xf32> to vector<8x128xf32>
    %1433 = vector.shape_cast %1430 : vector<8x128xf32> to vector<1x1x8x128xf32>
    tpu.vector_store %arg4[%c0_1508, %c0_1509, %c0_1510, %c0_1511], %1433 {strides = array<i32>} : memref<1x3x8x128xf32, #tpu.memory_space<vmem>>, vector<1x1x8x128xf32>,
    %1434 = arith.mulf %349, %1420 : vector<8x128xf32>
    %1435 = arith.mulf %703, %1421 : vector<8x128xf32>
    %1436 = arith.addf %1434, %1435 : vector<8x128xf32>
    %1437 = arith.mulf %1057, %1422 : vector<8x128xf32>
    %1438 = arith.addf %1436, %1437 : vector<8x128xf32>
    %1439 = arith.mulf %1411, %1423 : vector<8x128xf32>
    %1440 = arith.addf %1438, %1439 : vector<8x128xf32>
    %c0_1512 = arith.constant 0 : index
    %c1_1513 = arith.constant 1 : index
    %c0_1514 = arith.constant 0 : index
    %c0_1515 = arith.constant 0 : index
    %1441 = vector.load %arg4[%c0_1512, %c1_1513, %c0_1514, %c0_1515] : memref<1x3x8x128xf32, #tpu.memory_space<vmem>>, vector<1x1x8x128xf32>
    %1442 = vector.shape_cast %1441 : vector<1x1x8x128xf32> to vector<8x128xf32>
    %1443 = vector.shape_cast %1440 : vector<8x128xf32> to vector<1x1x8x128xf32>
    tpu.vector_store %arg4[%c0_1512, %c1_1513, %c0_1514, %c0_1515], %1443 {strides = array<i32>} : memref<1x3x8x128xf32, #tpu.memory_space<vmem>>, vector<1x1x8x128xf32>,
    %1444 = arith.mulf %353, %1420 : vector<8x128xf32>
    %1445 = arith.mulf %707, %1421 : vector<8x128xf32>
    %1446 = arith.addf %1444, %1445 : vector<8x128xf32>
    %1447 = arith.mulf %1061, %1422 : vector<8x128xf32>
    %1448 = arith.addf %1446, %1447 : vector<8x128xf32>
    %1449 = arith.mulf %1415, %1423 : vector<8x128xf32>
    %1450 = arith.addf %1448, %1449 : vector<8x128xf32>
    %c0_1516 = arith.constant 0 : index
    %c2_1517 = arith.constant 2 : index
    %c0_1518 = arith.constant 0 : index
    %c0_1519 = arith.constant 0 : index
    %1451 = vector.load %arg4[%c0_1516, %c2_1517, %c0_1518, %c0_1519] : memref<1x3x8x128xf32, #tpu.memory_space<vmem>>, vector<1x1x8x128xf32>
    %1452 = vector.shape_cast %1451 : vector<1x1x8x128xf32> to vector<8x128xf32>
    %1453 = vector.shape_cast %1450 : vector<8x128xf32> to vector<1x1x8x128xf32>
    tpu.vector_store %arg4[%c0_1516, %c2_1517, %c0_1518, %c0_1519], %1453 {strides = array<i32>} : memref<1x3x8x128xf32, #tpu.memory_space<vmem>>, vector<1x1x8x128xf32>,
    return
  }
  func.func @transform_0(%arg0: i32, %arg1: i32) -> (i32, i32, i32, i32, i32) {
    %c0_i32 = arith.constant 0 : i32
    %c0_i32_0 = arith.constant 0 : i32
    %c0_i32_1 = arith.constant 0 : i32
    %c0_i32_2 = arith.constant 0 : i32
    return %arg1, %c0_i32, %c0_i32_0, %arg0, %c0_i32_1 : i32, i32, i32, i32, i32
  }
  func.func @transform_1(%arg0: i32, %arg1: i32) -> (i32, i32, i32, i32, i32) {
    %c0_i32 = arith.constant 0 : i32
    %c0_i32_0 = arith.constant 0 : i32
    %c0_i32_1 = arith.constant 0 : i32
    %c0_i32_2 = arith.constant 0 : i32
    return %arg1, %c0_i32, %c0_i32_0, %arg0, %c0_i32_1 : i32, i32, i32, i32, i32
  }
  func.func @transform_2(%arg0: i32, %arg1: i32) -> (i32, i32, i32, i32) {
    %c0_i32 = arith.constant 0 : i32
    %c0_i32_0 = arith.constant 0 : i32
    %c0_i32_1 = arith.constant 0 : i32
    return %arg1, %c0_i32, %arg0, %c0_i32_0 : i32, i32, i32, i32
  }
}

</mosaic_0001>

<bundles_post_ra>
// kernel: tpu_custom_call.1
= control target key start
LH: loop header
LB: loop body
LE: loop exit
PB: predicated region body
PF: predicated region fallthrough
CT: control target
= control target key end

     0   :  { %7 = vsyncpa [#allocation3], 0  ;;  %s6039_s0 = inlined_call_operand.hbm [shape: f32[2,4,75,8,128], index: 0, kind: input, shape index: {}]   ;;  %s6040_s1 = inlined_call_operand.hbm [shape: f32[2,4,2,8,128], index: 1, kind: input, shape index: {}]   ;;  %s6041_s2 = inlined_call_operand.hbm [shape: f32[2,3,8,128], index: 2, kind: output, shape index: {}]  }
   0x1   :  { %9 = vsyncpa [#allocation3 + $0x1], 0 }
   0x2   :  { %10 = vsyncpa [#allocation6], 0 }
   0x3   :  { %12 = vsyncpa [#allocation6 + $0x1], 0 }
   0x4   :  { %13 = vsyncpa [#allocation4], 0 }
   0x5   :  { %15 = vsyncpa [#allocation4 + $0x1], 0  ;;  %s4087_s9 = smov 0   ;;  %s4089_s10 = smov 0  }
   0x6   :  { %s4091_s11 = smov 0   ;;  %s4093_s12 = smov 0  }
   0x7   :  { %s4095_s13 = smov 0   ;;  %s4097_s14 = smov 0  }
   0x8 LB: > { %s3383_s15 = sadd.s32 4294967295, %s4057_s14   ;;  %s3384_s16 = sadd.s32 4294967294, %s4057_s14   ;;  %s4057_s14 = sphi %s4097_s14, %s21_s14   ;;  %s4053_s13 = sphi %s4095_s13, %s6174_s13   ;;  %s4049_s12 = sphi %s4093_s12, %s6173_s12   ;;  %s4045_s11 = sphi %s4091_s11, %s6172_s11   ;;  %s4041_s10 = sphi %s4089_s10, %s6171_s10   ;;  %s4037_s9 = sphi %s4087_s9, %s6170_s9  }
   0x9   : > { %s30_s17 = sadd.s32 1, %s4053_s13  ;;  %s42_s18 = sadd.s32 1, %s4045_s11 }
   0xa   : > { %p31_p0 = scmp.ge.s32.totalorder %s30_s17, 2  ;;  %p49_p1 = scmp.ne.s32.totalorder %s4045_s11, %s4041_s10 }
   0xb   : > { %p50_p2 = scmp.eq.s32.totalorder %s4057_s14, 0  ;;  %p55_p3 = scmp.ne.s32.totalorder %s4041_s10, %s4037_s9 }
   0xc   : > { %s6176_s17 = smov (%p31_p0, %s30_s17), 0  ;;  %p56_p5 = scmp.eq.s32.totalorder %s3383_s15, 0 }
   0xd   : > { %p4128_p4 = por %p50_p2, %p49_p1  ;;  %s37_s20 = ssub.s32 %s4053_s13, %s6176_s17 }
   0xe   : > { %p109_p6 = scmp.eq.s32.totalorder %s3383_s15, 1  ;;  %p40_p7 = scmp.eq.s32.totalorder %s37_s20, 0 }
   0xf   : > { %p4134_p8 = por %p56_p5, %p55_p3  ;;  %p115_p10 = scmp.eq.s32.totalorder %s3384_s16, 1 }
  0x10   : > { %p4138_p9 = por %p109_p6, %p49_p1  ;;  %p3386_p12 = scmp.ge.s32.totalorder %s4057_s14, 2 }
  0x11   : > { %s4143_s23 = scalar_select %p40_p7, %s4045_s11, %s42_s18  }
  0x12   : > { %p4145_p11 = por %p115_p10, %p55_p3  ;;  %p3823_p13 = scmp.lt.s32.totalorder %s4057_s14, 2 }
  0x13   : > { %s4152_s25 = sand.u32 1, %s4045_s11   ;;  %s3770_s27 = smul.u32 38400, %s4053_s13 }
  0x14   : > { %s3769_s26 = smul.u32 2400, %s4152_s25  ;;  %p4158_p0 = pnand %p3823_p13, %p4128_p4 }
  0x15   : > { %s146_s3 = scalar_lea.hbm %s6039_s0, %s3770_s27  ;;  %p3391_p1 = scmp.ge.s32.totalorder %s4057_s14, 1 }
  0x16   : > { %s139_s4 = scalar_lea.vmem [#allocation2], %s3769_s26  ;;  %s136_s6 = scalar_lea.sflag [#allocation3], %s4152_s25 }
  0x17   : > { %s147_s5 = sshll.u32 %s139_s4, 4  ;;  %p3919_p2 = pneg %p4158_p0  ;;  %s148_s5 = int_to_ptr.vmem [resolvable:$true] %s147_s5 }
  0x18   : > { %s3930_s7 = scalar_lea.vmem %s148_s5, 38400  ;;  %s4059_s8 = smov [#allocation2]  }
  0x19   : > { %p3931_p3 = scmp.ne.s32.totalorder %s148_s5, %s3930_s7  ;;  %s3935_s15 = sshll.u32 %s4059_s8, 4  ;;  %s3936_s15 = int_to_ptr.vmem [resolvable:$false] %s3935_s15 }
  0x1a   : > { %s3937_s16 = scalar_lea.vmem %s3936_s15, 76800  ;;  %p3938_p6 = scmp.lt.s32.totalorder %s148_s5, %s3936_s15 }
  0x1b   : > { %p3933_p4 = pnand %p3931_p3, %p3919_p2  ;;  %p3939_p7 = scmp.lt.s32.totalorder %s3937_s16, %s3930_s7 }
  0x1d   : > { %p3934_p5 = pneg %p3933_p4  ;;  %p3940_p10 = por %p3939_p7, %p3938_p6 }
  0x1f   : > { %p3941_p13 = pnand %p3940_p10, %p3934_p5 }
  0x21   : > { %3944 = shalt.err (!%p3941_p13)
}
  0x22   : > { %s4060_s18 = smov 128   ;;  %s4061_s19 = smov 8  }
  0x23   : > { %3815 = dma.hbm_to_vmem [thread:$0]  (!%p4158_p0), %s146_s3, 38400, %s148_s5, %s136_s6, %s4060_s18, %s4060_s18, %s4061_s19  }
  0x24   : > { %p177_p3 = scmp.lt.s32.totalorder %s4057_s14, 3  ;;  %s3388_s20 = sshll.u32 %s4152_s25, 6 }
  0x25   : > { %s3768_s26 = sshll.u32 %s4053_s13, 10  ;;  %s161_s7 = scalar_lea.vmem [#allocation5], %s3388_s20 }
  0x26   : > { %p4179_p4 = pnand %p3391_p1, %p177_p3  ;;  %s168_s4 = scalar_lea.hbm %s6040_s1, %s3768_s26 }
  0x27   : > { %s169_s8 = sshll.u32 %s161_s7, 4  ;;  %s158_s15 = scalar_lea.sflag [#allocation6], %s4152_s25  ;;  %s170_s8 = int_to_ptr.vmem [resolvable:$true] %s169_s8 }
  0x28   : > { %s3958_s16 = scalar_lea.vmem %s170_s8, 1024  ;;  %s4062_s3 = smov [#allocation5]  }
  0x29   : > { %p3959_p5 = scmp.ne.s32.totalorder %s170_s8, %s3958_s16  ;;  %s3963_s5 = sshll.u32 %s4062_s3, 4  ;;  %s3964_s5 = int_to_ptr.vmem [resolvable:$false] %s3963_s5 }
  0x2a   : > { %s3965_s6 = scalar_lea.vmem %s3964_s5, 2048  ;;  %p3966_p1 = scmp.lt.s32.totalorder %s170_s8, %s3964_s5 }
  0x2b   : > { %p3961_p6 = pnand %p3959_p5, %p3919_p2  ;;  %p3967_p10 = scmp.lt.s32.totalorder %s3965_s6, %s3958_s16 }
  0x2d   : > { %p3962_p7 = pneg %p3961_p6  ;;  %p3968_p13 = por %p3967_p10, %p3966_p1 }
  0x2f   : > { %p3969_p3 = pnand %p3968_p13, %p3962_p7 }
  0x31   : > { %3972 = shalt.err (!%p3969_p3)
}
  0x32   : > { %3818 = dma.hbm_to_vmem [thread:$0]  (!%p4158_p0), %s168_s4, 1024, %s170_s8, %s158_s15, %s4060_s18, %s4060_s18, %s4061_s19  }
  0x33   : > { %181 = sbr.rel (%p4179_p4) target bundleno = 532 (0x214), region = 28 }
  0x38   : > { %s4195_s25 = sand.u32 1, %s4041_s10  }
  0x39   : > { %s3771_s20 = smul.u32 2400, %s4195_s25  ;;  %s184_s26 = scalar_lea.sflag [#allocation3], %s4195_s25 }
  0x3b   : > { %s4199_s29 = scalar_lea.vmem [#allocation2], %s3771_s20 }
  0x3c   : > { %4024 = dma.done.wait (%p4134_p8), %s184_s26, 38400  }
  0x3d   : > { %4026 = vsyncadd (%p4134_p8), %s184_s26, 4294928896  ;;  %s3392_s28 = sshll.u32 %s4195_s25, 6  ;;  %s193_s18 = scalar_lea.sflag [#allocation6], %s4195_s25 }
  0x3e   : > { %s4207_s19 = scalar_lea.vmem [#allocation5], %s3392_s28 }
  0x3f   : > { %4028 = dma.done.wait (%p4134_p8), %s193_s18, 1024  }
  0x40   : > { %4030 = vsyncadd (%p4134_p8), %s193_s18, 4294966272  ;;  %v222_v0 = vld [vmem:[%s4207_s19] sm:$0xff]  ;;  %v3393_v1 = vld [vmem:[%s4207_s19 + $0x8] sm:$0xff]  ;;  %v6051_v27 = vmov 683565275   ;;  %s3772_s21 = smul.u32 24, %s4195_s25 }
  0x41   : > { %v4215_v2 = vmul.f32 %v3393_v1, %v222_v0  ;;  %v4217_v3 = vmul.f32 1.5707964, %v222_v0  ;;  %v4219_v4 = vmul.f32 1.5707964, %v3393_v1  ;;  %v6049_v29 = vmov 2475754826  }
  0x42   : > { %v6047_v31 = vmov 2131351028   ;;  %v6055_v33 = vmov 2102212464   ;;  %v6053_v35 = vmov 920167782  }
  0x43   : > { %v230_v5 = vand.u32 2147483647, %v4217_v3  ;;  %v233_v6 = vand.u32 2139095040, %v4217_v3  ;;  %v437_v7 = vand.u32 2147483647, %v4219_v4  ;;  %v440_v8 = vand.u32 2139095040, %v4219_v4 }
  0x44   : > { %v6045_v43 = vmov 1326507024   ;;  %vm439_vm15 = vcmp.lt.s32.totalorder %v4219_v4, 0  ;;  %s3805_s27 = smul.u32 384, %s4049_s12  ;;  %s221_s30 = scalar_lea.vmem [#allocation7], %s3772_s21 }
  0x45   : > { %v234_v9 = vshrl.u32 %v233_v6, 23  ;;  %v237_v10 = vand.u32 8388607, %v230_v5  ;;  %v441_v11 = vshrl.u32 %v440_v8, 23  ;;  %v444_v13 = vand.u32 8388607, %v437_v7 }
  0x46   : > { %s3273_s4 = sshll.u32 %s221_s30, 4  ;;  %s5987_s15 = scalar_lea.hbm %s6041_s2, %s3805_s27  ;;  %s5989_s4 = int_to_ptr.vmem [resolvable:$true] %s3273_s4 }
  0x47   : > { %v3394_v12 = vadd.s32 4294967169, %v234_v9  ;;  %v3402_v14 = vadd.s32 4294967169, %v441_v11  ;;  %v238_v16 = vor.u32 8388608, %v237_v10  ;;  %v445_v17 = vor.u32 8388608, %v444_v13  ;;  %s3259_s12 = scalar_lea.sflag [#allocation4], %s4195_s25  ;;  %s3973_s16 = scalar_lea.vmem %s5989_s4, 384 }
  0x48   : > { %p3974_p8 = scmp.ne.s32.totalorder %s5989_s4, %s3973_s16  ;;  %s4069_s3 = smov [#allocation7]  }
  0x49   : > { %v240_v15 = vadd.s32 1, %v3394_v12  ;;  %v447_v18 = vadd.s32 1, %v3402_v14  ;;  %v4229_v23 = vshll.u32 %v238_v16, 8  ;;  %v4231_v25 = vshll.u32 %v445_v17, 8  ;;  %s3977_s5 = sshll.u32 %s4069_s3, 4  ;;  %s3978_s5 = int_to_ptr.vmem [resolvable:$false] %s3977_s5 }
  0x4a   : > { %p3975_p0 = pnand %p3974_p8, %p4138_p9  ;;  %s3979_s6 = scalar_lea.vmem %s3978_s5, 768 }
  0x4b   : > { %vm241_vm0 = vcmp.gt.s32.totalorder %v240_v15, 0  ;;  %vm448_vm1 = vcmp.gt.s32.totalorder %v447_v18, 0  ;;  %p3980_p4 = scmp.lt.s32.totalorder %s5989_s4, %s3978_s5  ;;  %p3981_p5 = scmp.lt.s32.totalorder %s3979_s6, %s3973_s16 }
  0x4c   : > { %v242_v19 = vsel %vm241_vm0, %v240_v15, 0  ;;  %v449_v22 = vsel %vm448_vm1, %v447_v18, 0  ;;  %vm4327_vm0 = vcmp.le.f32.partialorder %v437_v7, 0.7853982  ;;  %p3976_p2 = pneg %p3975_p0 }
  0x4d   : > { %v243_v20 = vshrl.u32 %v242_v19, 5  ;;  %v244_v21 = vand.u32 31, %v242_v19  ;;  %v451_v24 = vand.u32 31, %v449_v22  ;;  %v4238_v37 = vshrl.u32 %v449_v22, 5  ;;  %p3982_p6 = por %p3981_p5, %p3980_p4 }
  0x4f   : > { %v245_v26 = vsub.s32 32, %v244_v21  ;;  %v247_v28 = vshll.u32 %v6051_v27, %v244_v21  ;;  %v250_v30 = vshll.u32 %v6049_v29, %v244_v21  ;;  %v253_v32 = vshll.u32 %v6047_v31, %v244_v21  ;;  %p3983_p7 = pnand %p3982_p6, %p3976_p2 }
  0x50   : > { %v256_v34 = vshll.u32 %v6055_v33, %v244_v21  ;;  %v259_v36 = vshll.u32 %v6053_v35, %v244_v21  ;;  %vm262_vm2 = vcmp.lt.s32.totalorder %v243_v20, 1  ;;  %vm263_vm3 = vcmp.lt.s32.totalorder %v243_v20, 2 }
  0x51   : > { %v246_v38 = vshrl.u32 %v6051_v27, %v245_v26  ;;  %v248_v39 = vshrl.u32 %v6049_v29, %v245_v26  ;;  %v251_v40 = vshrl.u32 %v6047_v31, %v245_v26  ;;  %v254_v41 = vshrl.u32 %v6055_v33, %v245_v26 }
  0x52   : > { %v257_v42 = vshrl.u32 %v6053_v35, %v245_v26  ;;  %v260_v44 = vshrl.u32 %v6045_v43, %v245_v26  ;;  %vm265_vm4 = vcmp.lt.s32.totalorder %v243_v20, 4  ;;  %v452_v48 = vsub.s32 32, %v451_v24 }
  0x53   : > { %v249_v45 = vor.u32 %v248_v39, %v247_v28  ;;  %v252_v46 = vor.u32 %v251_v40, %v250_v30  ;;  %v255_v47 = vor.u32 %v254_v41, %v253_v32  ;;  %vm264_vm5 = vcmp.lt.s32.totalorder %v243_v20, 3 }
  0x54   : > { %v258_v49 = vor.u32 %v257_v42, %v256_v34  ;;  %v261_v50 = vor.u32 %v260_v44, %v259_v36  ;;  %v454_v51 = vshll.u32 %v6051_v27, %v451_v24  ;;  %v457_v59 = vshll.u32 %v6049_v29, %v451_v24  ;;  %v3484_v44 = vld [vmem:[%s4207_s19 + $0x10] sm:$0xff] }
  0x55   : > { %v266_v52 = vsel %vm262_vm2, %v246_v38, %v249_v45  ;;  %v267_v53 = vsel %vm265_vm4, %v255_v47, 2102212464  ;;  %v270_v54 = vsel %vm262_vm2, %v249_v45, %v252_v46  ;;  %v274_v55 = vsel %vm262_vm2, %v252_v46, %v255_v47  ;;  %v4287_v45 = vld [vmem:[%s4207_s19 + $0x18] sm:$0xff] }
  0x56   : > { %v268_v56 = vsel %vm264_vm5, %v252_v46, %v267_v53  ;;  %v271_v57 = vsel %vm265_vm4, %v258_v49, 920167782  ;;  %v275_v58 = vsel %vm265_vm4, %v261_v50, 1326507024  ;;  %v453_v62 = vshrl.u32 %v6051_v27, %v452_v48 }
  0x57   : > { %v272_v60 = vsel %vm264_vm5, %v255_v47, %v271_v57  ;;  %v276_v61 = vsel %vm264_vm5, %v258_v49, %v275_v58  ;;  %v455_v63 = vshrl.u32 %v6049_v29, %v452_v48  ;;  %v269_v0 = vsel %vm263_vm3, %v266_v52, %v268_v56 }
  0x58   : > { %v273_v1 = vsel %vm263_vm3, %v270_v54, %v272_v60  ;;  %v277_v6 = vsel %vm263_vm3, %v274_v55, %v276_v61  ;;  %v458_v8 = vshrl.u32 %v6047_v31, %v452_v48  ;;  %v460_v15 = vshll.u32 %v6047_v31, %v451_v24 }
  0x59   : > { %v4258_v9 = vmul.u32.u64.low %v4229_v23, %v277_v6  ;;  %v4259_v10 = vmul.u32.u64.high %v4229_v23, %v277_v6, %v4258_v9  ;;  %v4262_v11 = vmul.u32.u64.low %v4229_v23, %v273_v1  ;;  %v4263_v12 = vmul.u32.u64.high %v4229_v23, %v273_v1, %v4262_v11 }
  0x5a   : > { %v456_v13 = vor.u32 %v455_v63, %v454_v51  ;;  %v459_v14 = vor.u32 %v458_v8, %v457_v59  ;;  %v461_v16 = vshrl.u32 %v6055_v33, %v452_v48  ;;  %v463_v17 = vshll.u32 %v6055_v33, %v451_v24 }
  0x5b   : > { %v464_v18 = vshrl.u32 %v6053_v35, %v452_v48  ;;  %v466_v19 = vshll.u32 %v6053_v35, %v451_v24  ;;  %v467_v20 = vshrl.u32 %v6045_v43, %v452_v48  ;;  %v285_v21 = vmul.u32 %v4229_v23, %v269_v0 }
  0x5c   : > { %v462_v22 = vor.u32 %v461_v16, %v460_v15  ;;  %vm469_vm6 = vcmp.lt.s32.totalorder %v4238_v37, 1  ;;  %vm470_vm7 = vcmp.lt.s32.totalorder %v4238_v37, 2  ;;  %vm287_vm8 = vc.u32 %v4259_v10, %v4262_v11 }
  0x5d   : > { %v288_v26 = vadd.s32 1, %v4263_v12  ;;  %v465_v28 = vor.u32 %v464_v18, %v463_v17  ;;  %vm471_vm9 = vcmp.lt.s32.totalorder %v4238_v37, 3  ;;  %v468_v24 = vor.u32 %v467_v20, %v466_v19 }
  0x5e   : > { %vm472_vm10 = vcmp.lt.s32.totalorder %v4238_v37, 4  ;;  %v473_v30 = vsel %vm469_vm6, %v453_v62, %v456_v13  ;;  %v477_v23 = vsel %vm469_vm6, %v456_v13, %v459_v14  ;;  %v481_v38 = vsel %vm469_vm6, %v459_v14, %v462_v22 }
  0x5f   : > { %v289_v32 = vsel %vm287_vm8, %v288_v26, %v4263_v12  ;;  %v474_v34 = vsel %vm472_vm10, %v462_v22, 2102212464  ;;  %v478_v36 = vsel %vm472_vm10, %v465_v28, 920167782  ;;  %v482_v42 = vsel %vm472_vm10, %v468_v24, 1326507024 }
  0x60   : > { %v290_v39 = vadd.s32 %v289_v32, %v285_v21  ;;  %v475_v40 = vsel %vm471_vm9, %v459_v14, %v474_v34  ;;  %v479_v41 = vsel %vm471_vm9, %v462_v22, %v478_v36  ;;  %v483_v48 = vsel %vm471_vm9, %v465_v28, %v482_v42 }
  0x61   : > { %v476_v46 = vsel %vm470_vm7, %v473_v30, %v475_v40  ;;  %v480_v47 = vsel %vm470_vm7, %v477_v23, %v479_v41  ;;  %v4296_v49 = vmul.f32 %v4287_v45, %v3484_v44  ;;  %v484_v51 = vsel %vm470_vm7, %v481_v38, %v483_v48 }
  0x62   : > { %v291_v50 = vadd.s32 536870912, %v290_v39  ;;  %v4301_v52 = vmul.u32.u64.low %v4231_v25, %v480_v47  ;;  %v4302_v53 = vmul.u32.u64.high %v4231_v25, %v480_v47, %v4301_v52  ;;  %v492_v57 = vmul.u32 %v4231_v25, %v476_v46 }
  0x63   : > { %6085 = vst [vmem:[#allocation11_spill] sm:$0xff] %v4296_v49  ;;  %v4305_v54 = vmul.u32.u64.low %v4231_v25, %v484_v51  ;;  %v4306_v55 = vmul.u32.u64.high %v4231_v25, %v484_v51, %v4305_v54  ;;  %v4315_v62 = vmul.f32 1.5707964, %v3484_v44  ;;  %v286_v32 = vadd.s32 %v4262_v11, %v4259_v10 }
  0x64   : > { %v4308_v56 = vshrl.u32 %v291_v50, 30  ;;  %v495_v59 = vadd.s32 1, %v4302_v53  ;;  %vm232_vm4 = vcmp.lt.s32.totalorder %v4217_v3, 0  ;;  %vm4374_vm6 = vcmp.le.f32.partialorder %v230_v5, 0.7853982 }
  0x65   : > { %vm494_vm11 = vc.u32 %v4306_v55, %v4301_v52  ;;  %v983_v8 = vand.u32 2139095040, %v4315_v62  ;;  %v493_v26 = vadd.s32 %v4301_v52, %v4306_v55 }
  0x66   : > { %v293_v58 = vshll.u32 %v4308_v56, 30  ;;  %v496_v60 = vsel %vm494_vm11, %v495_v59, %v4302_v53 }
  0x67   : > { %v497_v61 = vadd.s32 %v496_v60, %v492_v57  ;;  %v984_v14 = vshrl.u32 %v983_v8, 23 }
  0x68   : > { %v294_v37 = vsub.s32 %v290_v39, %v293_v58 }
  0x69   : > { %v498_v0 = vadd.s32 536870912, %v497_v61  ;;  %v3486_v17 = vadd.s32 4294967169, %v984_v14 }
  0x6a   : > { %v296_v63 = vsub.s32 0, %v294_v37 }
  0x6b   : > { %v4317_v6 = vshrl.u32 %v498_v0, 30  ;;  %v990_v21 = vadd.s32 1, %v3486_v17 }
  0x6c   : > { %v3395_v1 = vmin.u32 %v296_v63, %v294_v37 }
  0x6d   : > { %v500_v9 = vshll.u32 %v4317_v6, 30  ;;  %vm991_vm14 = vcmp.gt.s32.totalorder %v990_v21, 0 }
  0x6e   : > { %v298_v25 = vclz %v3395_v1  ;;  %v992_v40 = vsel %vm991_vm14, %v990_v21, 0  ;;  %v6044_v1 = vand.u32 2147483647, %v4315_v62  ;;  %vm529_vm14 = vweird.f32 %v4219_v4 }
  0x6f   : > { %v501_v13 = vsub.s32 %v497_v61, %v500_v9  ;;  %v994_v51 = vand.u32 31, %v992_v40  ;;  %v4338_v8 = vshrl.u32 %v992_v40, 5 }
  0x70   : > { %v3396_v12 = vadd.s32 4294967294, %v298_v25 }
  0x71   : > { %v503_v15 = vsub.s32 0, %v501_v13  ;;  %v995_v57 = vsub.s32 32, %v994_v51  ;;  %v1009_v63 = vshll.u32 %v6053_v35, %v994_v51  ;;  %v997_v25 = vshll.u32 %v6051_v27, %v994_v51 }
  0x72   : > { %vm3397_vm12 = vcmp.lt.s32.totalorder %v3396_v12, 0  ;;  %v1003_v14 = vshll.u32 %v6047_v31, %v994_v51  ;;  %vm1015_vm1 = vcmp.lt.s32.totalorder %v4338_v8, 4  ;;  %vm1012_vm2 = vcmp.lt.s32.totalorder %v4338_v8, 1 }
  0x73   : > { %v3403_v16 = vmin.u32 %v503_v15, %v501_v13  ;;  %v301_v18 = vsel %vm3397_vm12, 0, %v3396_v12  ;;  %v1007_v61 = vshrl.u32 %v6053_v35, %v995_v57  ;;  %v1010_v0 = vshrl.u32 %v6045_v43, %v995_v57 }
  0x74   : > { %v306_v22 = vsub.s32 4294967266, %v301_v18  ;;  %v302_v34 = vsub.s32 32, %v301_v18  ;;  %v303_v44 = vshll.u32 %v294_v37, %v301_v18  ;;  %v1006_v37 = vshll.u32 %v6055_v33, %v994_v51 }
  0x75   : > { %v505_v19 = vclz %v3403_v16  ;;  %v998_v9 = vshrl.u32 %v6049_v29, %v995_v57  ;;  %v1000_v12 = vshll.u32 %v6049_v29, %v994_v51  ;;  %v1004_v15 = vshrl.u32 %v6055_v33, %v995_v57 }
  0x76   : > { %v307_v36 = vadd.s32 127, %v306_v22  ;;  %v304_v46 = vshrl.u32 %v286_v32, %v302_v34  ;;  %v1008_v17 = vor.u32 %v1007_v61, %v1006_v37  ;;  %v1011_v18 = vor.u32 %v1010_v0, %v1009_v63 }
  0x77   : > { %v3404_v20 = vadd.s32 4294967294, %v505_v19  ;;  %v523_v19 = vsub.s32 4, %v4317_v6  ;;  %v999_v21 = vor.u32 %v998_v9, %v997_v25  ;;  %vm1014_vm3 = vcmp.lt.s32.totalorder %v4338_v8, 3 }
  0x78   : > { %v308_v47 = vshll.u32 %v307_v36, 23  ;;  %v305_v53 = vor.u32 %v304_v46, %v303_v44  ;;  %vm1013_vm5 = vcmp.lt.s32.totalorder %v4338_v8, 2  ;;  %v316_v37 = vsub.s32 4, %v4308_v56 }
  0x79   : > { %vm3405_vm13 = vcmp.lt.s32.totalorder %v3404_v20, 0 }
  0x7a   : > { %v508_v28 = vsel %vm3405_vm13, 0, %v3404_v20  ;;  %v309_v54 = vor.u32 4788187, %v308_v47  ;;  %v312_v58 = vcvt.s32.f32 %v305_v53  ;;  %v987_v20 = vand.u32 8388607, %v6044_v1  ;;  %v3451_v1 = vld [vmem:[%s4199_s29 + $0x70] sm:$0xff] }
  0x7b   : > { %v509_v24 = vsub.s32 32, %v508_v28  ;;  %v510_v30 = vshll.u32 %v501_v13, %v508_v28  ;;  %v513_v23 = vsub.s32 4294967266, %v508_v28  ;;  %v1001_v13 = vshrl.u32 %v6047_v31, %v995_v57 }
  0x7c   : > { %v310_v11 = vand.u32 2147483647, %v309_v54  ;;  %v988_v32 = vor.u32 8388608, %v987_v20 }
  0x7d   : > { %v511_v38 = vshrl.u32 %v493_v26, %v509_v24  ;;  %v514_v39 = vadd.s32 127, %v513_v23  ;;  %v1002_v22 = vor.u32 %v1001_v13, %v1000_v12  ;;  %v1005_v26 = vor.u32 %v1004_v15, %v1003_v14 }
  0x7e   : > { %v313_v16 = vmul.f32 %v312_v58, %v310_v11  ;;  %v1021_v24 = vsel %vm1015_vm1, %v1008_v17, 920167782  ;;  %v524_v23 = vsel %vm439_vm15, %v523_v19, %v4317_v6  ;;  %v1028_v44 = vshll.u32 %v988_v32, 8 }
  0x7f   : > { %v512_v41 = vor.u32 %v511_v38, %v510_v30  ;;  %v515_v42 = vshll.u32 %v514_v39, 23  ;;  %v1025_v30 = vsel %vm1015_vm1, %v1011_v18, 1326507024  ;;  %v1020_v34 = vsel %vm1012_vm2, %v999_v21, %v1002_v22 }
  0x80   : > { %v314_v28 = vxor.u32 2147483648, %v313_v16  ;;  %v1022_v36 = vsel %vm1014_vm3, %v1005_v26, %v1021_v24  ;;  %v1024_v38 = vsel %vm1012_vm2, %v1002_v22, %v1005_v26  ;;  %v1026_v39 = vsel %vm1014_vm3, %v1008_v17, %v1025_v30 }
  0x81   : > { %v516_v48 = vor.u32 4788187, %v515_v42  ;;  %v519_v50 = vcvt.s32.f32 %v512_v41  ;;  %v526_v41 = vsel %vm4327_vm0, 0, %v524_v23  ;;  %v4383_v42 = vmul.f32 1.5707964, %v4287_v45 }
  0x82   : > { %v315_v6 = vsel %vm232_vm4, %v314_v28, %v313_v16  ;;  %v1023_v46 = vsel %vm1013_vm5, %v1020_v34, %v1022_v36  ;;  %v1027_v47 = vsel %vm1013_vm5, %v1024_v38, %v1026_v39  ;;  %v530_v11 = vand.u32 3, %v526_v41  ;;  %v4429_v34 = vld [vmem:[%s4207_s19 + $0x20] sm:$0xff] }
  0x83   : > { %v517_v52 = vand.u32 2147483647, %v516_v48  ;;  %v318_v5 = vsel %vm4374_vm6, %v4217_v3, %v315_v6  ;;  %v633_v48 = vadd.s32 3, %v526_v41  ;;  %v1017_v59 = vsel %vm1015_vm1, %v1005_v26, 2102212464  ;;  %6090 = vst [vmem:[#allocation12_spill] sm:$0xff] %v4429_v34 }
  0x84   : > { %v4396_v53 = vmul.u32.u64.low %v1028_v44, %v1023_v46  ;;  %v4397_v45 = vmul.u32.u64.high %v1028_v44, %v1023_v46, %v4396_v53  ;;  %vm532_vm7 = vcmp.eq.s32.totalorder %v530_v11, 0  ;;  %vm535_vm8 = vcmp.eq.s32.totalorder %v530_v11, 2  ;;  %v3412_v6 = vld [vmem:[%s4199_s29 + $0x8] sm:$0xff]  ;;  %v3413_v41 = vld [vmem:[%s4199_s29 + $0xd0] sm:$0xff] }
  0x85   : > { %v520_v55 = vmul.f32 %v519_v50, %v517_v52  ;;  %v1190_v50 = vand.u32 2139095040, %v4383_v42  ;;  %v4393_v51 = vmul.u32.u64.low %v1028_v44, %v1027_v47  ;;  %v4394_v52 = vmul.u32.u64.high %v1028_v44, %v1027_v47, %v4393_v51 }
  0x86   : > { %v634_v58 = vand.u32 3, %v633_v48  ;;  %vm531_vm11 = vcmp.lt.s32.totalorder %v530_v11, 2  ;;  %v1038_v12 = vadd.s32 1, %v4397_v45  ;;  %v6043_v23 = vand.u32 2147483647, %v4383_v42 }
  0x87   : > { %v521_v10 = vxor.u32 2147483648, %v520_v55  ;;  %vm1037_vm13 = vc.u32 %v4394_v52, %v4396_v53  ;;  %v4446_v48 = vmul.f32 1.5707964, %v4429_v34 }
  0x88   : > { %vm636_vm9 = vcmp.eq.s32.totalorder %v634_v58, 0  ;;  %vm639_vm10 = vcmp.eq.s32.totalorder %v634_v58, 2  ;;  %vm635_vm12 = vcmp.lt.s32.totalorder %v634_v58, 2  ;;  %v1039_v8 = vsel %vm1037_vm13, %v1038_v12, %v4397_v45 }
  0x89   : > { %v522_v60 = vsel %vm439_vm15, %v521_v10, %v520_v55  ;;  %v996_v55 = vshrl.u32 %v6051_v27, %v995_v57  ;;  %v317_v57 = vsel %vm232_vm4, %v316_v37, %v4308_v56  ;;  %v1194_v46 = vand.u32 8388607, %v6043_v23  ;;  %6093 = vst [vmem:[#allocation15_spill] sm:$0xff] %v4446_v48 }
  0x8a   : > { %v525_v7 = vsel %vm4327_vm0, %v4219_v4, %v522_v60  ;;  %v1191_v60 = vshrl.u32 %v1190_v50, 23  ;;  %v319_v17 = vsel %vm4374_vm6, 0, %v317_v57 }
  0x8b   : > { %3883 = vcosq.f32 %v525_v7  ;;  %v1016_v0 = vsel %vm1012_vm2, %v996_v55, %v999_v21  ;;  %v323_v20 = vand.u32 3, %v319_v17  ;;  %v426_v4 = vadd.s32 3, %v319_v17  ;;  %v3414_v55 = vld [vmem:[%s4199_s29 + $0x198] sm:$0xff]  ;;  %v3417_v17 = vld [vmem:[%s4199_s29 + $0x1a0] sm:$0xff] }
  0x8c   : > { %3885 = vsinq.f32 %v525_v7  ;;  %v1018_v7 = vsel %vm1014_vm3, %v1002_v22, %v1017_v59  ;;  %v3494_v25 = vadd.s32 4294967169, %v1191_v60  ;;  %vm322_vm2 = vweird.f32 %v4217_v3  ;;  %v3410_v59 = vld [vmem:[%s4199_s29 + $0xc8] sm:$0xff] }
  0x8d   : > { %3887 = vcosq.f32 %v318_v5  ;;  %v1019_v9 = vsel %vm1013_vm5, %v1016_v0, %v1018_v7  ;;  %vm328_vm15 = vcmp.eq.s32.totalorder %v323_v20, 2  ;;  %vm325_vm1 = vcmp.eq.s32.totalorder %v323_v20, 0 }
  0x8e   : > { %3889 = vsinq.f32 %v318_v5  ;;  %v1035_v18 = vmul.u32 %v1028_v44, %v1019_v9  ;;  %v1197_v21 = vadd.s32 1, %v3494_v25  ;;  %vm324_vm3 = vcmp.lt.s32.totalorder %v323_v20, 2  ;;  %v4443_v5 = vld [vmem:[%s4207_s19 + $0x28] sm:$0xff] }
  0x8f   : > { %v4440_v47 = vand.u32 3, %v426_v4  ;;  %6092 = vst [vmem:[#allocation14_spill] sm:$0xff] %v4443_v5  ;;  %v1195_v7 = vor.u32 8388608, %v1194_v46  ;;  %v4465_v57 = vmul.f32 1.5707964, %v4443_v5  ;;  %v1734_v4 = vand.u32 2139095040, %v4446_v48 }
  0x90   : > { %v4424_v30 = vadd.s32 %v1039_v8, %v1035_v18  ;;  %vm1198_vm0 = vcmp.gt.s32.totalorder %v1197_v21, 0  ;;  %v6042_v25 = vand.u32 2147483647, %v4446_v48  ;;  %v6094_v5 = vmov 2102212464  }
  0x91   : > { %vm428_vm4 = vcmp.lt.s32.totalorder %v4440_v47, 2  ;;  %vm429_vm5 = vcmp.eq.s32.totalorder %v4440_v47, 0  ;;  %vm432_vm6 = vcmp.eq.s32.totalorder %v4440_v47, 2  ;;  %v4482_v20 = vshll.u32 %v1195_v7, 8 }
  0x92   : > { %v1041_v44 = vadd.s32 536870912, %v4424_v30 }
  0x94   : > { %v4462_v0 = vshrl.u32 %v1041_v44, 30 }
  0x98   : > { %v3884_v54 = vpop.eup %3883 }
  0x99   : > { %v3886_v10 = vpop.eup %3885  ;;  %v536_v63 = vxor.u32 2147483648, %v3884_v54 }
  0x9a   : > { %v533_v61 = vxor.u32 2147483648, %v3886_v10  ;;  %v4420_v22 = vpop.eup %3887 }
  0x9b   : > { %v537_v14 = vsel %vm535_vm8, %v536_v63, %v3886_v10  ;;  %v641_v16 = vsel %vm639_vm10, %v536_v63, %v3886_v10  ;;  %v4422_v26 = vpop.eup %3889  ;;  %v329_v32 = vxor.u32 2147483648, %v4420_v22  ;;  %v1199_v10 = vsel %vm1198_vm0, %v1197_v21, 0  ;;  %v3416_v63 = vld [vmem:[%s4199_s29 + $0xd8] sm:$0xff] }
  0x9c   : > { %v534_v13 = vsel %vm532_vm7, %v3884_v54, %v533_v61  ;;  %v638_v15 = vsel %vm636_vm9, %v3884_v54, %v533_v61  ;;  %v326_v36 = vxor.u32 2147483648, %v4422_v26  ;;  %v662_v54 = vld [vmem:[%s4199_s29] sm:$0xff]  ;;  %v3415_v61 = vld [vmem:[%s4199_s29 + $0x10] sm:$0xff]  ;;  %v1201_v12 = vand.u32 31, %v1199_v10  ;;  %v3418_v21 = vld [vmem:[%s4199_s29 + $0x18] sm:$0xff] }
  0x9d   : > { %v538_v56 = vsel %vm531_vm11, %v534_v13, %v537_v14  ;;  %v642_v19 = vsel %vm635_vm12, %v638_v15, %v641_v16  ;;  %v330_v50 = vsel %vm328_vm15, %v329_v32, %v4422_v26  ;;  %v3411_v15 = vld [vmem:[%s4199_s29 + $0x190] sm:$0xff] }
  0x9e   : > { %v539_v28 = vsel %vm529_vm14, nan, %v538_v56  ;;  %v643_v24 = vsel %vm529_vm14, nan, %v642_v19  ;;  %v327_v11 = vsel %vm325_vm1, %v4420_v22, %v326_v36  ;;  %v1202_v44 = vsub.s32 32, %v1201_v12 }
  0x9f   : > { %v4432_v38 = vmul.f32 1.4142135, %v539_v28  ;;  %v653_v39 = vmul.f32 %v539_v28, %v539_v28  ;;  %v654_v40 = vmul.f32 %v643_v24, %v643_v24  ;;  %v4450_v51 = vmul.f32 1.4142135, %v643_v24 }
  0xa0   : > { %v656_v45 = vmul.f32 %v643_v24, %v539_v28  ;;  %v331_v13 = vsel %vm324_vm3, %v327_v11, %v330_v50  ;;  %v3419_v28 = vld [vmem:[%s4199_s29 + $0xe0] sm:$0xff]  ;;  %v1043_v24 = vshll.u32 %v4462_v0, 30  ;;  %v431_v50 = vsel %vm429_vm5, %v4420_v22, %v326_v36 }
  0xa1   : > { %6091 = vst [vmem:[#allocation13_spill] sm:$0xff] %v4432_v38  ;;  %v655_v58 = vsub.f32 %v653_v39, %v654_v40  ;;  %v669_v37 = vmul.f32 %v3412_v6, %v4432_v38  ;;  %v673_v60 = vmul.f32 %v3413_v41, %v4432_v38  ;;  %v677_v9 = vmul.f32 %v3414_v55, %v4432_v38  ;;  %v3420_v55 = vld [vmem:[%s4199_s29 + $0x1a8] sm:$0xff] }
  0xa2   : > { %v657_v14 = vadd.f32 %v656_v45, %v656_v45  ;;  %v681_v16 = vmul.f32 %v3415_v61, %v4450_v51  ;;  %v685_v8 = vmul.f32 %v3416_v63, %v4450_v51  ;;  %v4487_v39 = vand.u32 8388607, %v6042_v25 }
  0xa3   : > { %v4476_v18 = vmul.f32 1.4142135, %v655_v58  ;;  %v670_v56 = vadd.f32 %v669_v37, %v662_v54  ;;  %v674_v19 = vadd.f32 %v3410_v59, %v673_v60  ;;  %v678_v40 = vadd.f32 %v3411_v15, %v677_v9  ;;  %v3421_v37 = vld [vmem:[%s4199_s29 + $0x20] sm:$0xff]  ;;  %v3422_v60 = vld [vmem:[%s4199_s29 + $0xe8] sm:$0xff] }
  0xa4   : > { %v689_v6 = vmul.f32 %v3417_v17, %v4450_v51  ;;  %v4490_v41 = vshrl.u32 %v1199_v10, 5  ;;  %v4494_v46 = vsel %vm322_vm2, nan, %v331_v13  ;;  %v434_v45 = vsel %vm432_vm6, %v329_v32, %v4422_v26 }
  0xa5   : > { %v4502_v54 = vmul.f32 1.4142135, %v657_v14  ;;  %v682_v11 = vadd.f32 %v681_v16, %v670_v56  ;;  %v686_v10 = vadd.f32 %v685_v8, %v674_v19  ;;  %v693_v58 = vmul.f32 %v3418_v21, %v4476_v18  ;;  %v3423_v14 = vld [vmem:[%s4199_s29 + $0x1b0] sm:$0xff]  ;;  %v3424_v21 = vld [vmem:[%s4199_s29 + $0x28] sm:$0xff] }
  0xa6   : > { %v697_v59 = vmul.f32 %v3419_v28, %v4476_v18  ;;  %v4510_v61 = vsub.s32 %v4424_v30, %v1043_v24  ;;  %v1204_v22 = vshll.u32 %v6051_v27, %v1201_v12  ;;  %v1207_v26 = vshll.u32 %v6049_v29, %v1201_v12  ;;  %v3425_v28 = vld [vmem:[%s4199_s29 + $0xf0] sm:$0xff] }
  0xa7   : > { %v4514_v32 = vshrl.u32 %v1734_v4, 23  ;;  %v690_v36 = vadd.f32 %v689_v6, %v678_v40  ;;  %v701_v63 = vmul.f32 %v3420_v55, %v4476_v18  ;;  %v1210_v7 = vshll.u32 %v6047_v31, %v1201_v12 }
  0xa8   : > { %v1213_v9 = vshll.u32 %v6055_v33, %v1201_v12  ;;  %v435_v13 = vsel %vm428_vm4, %v431_v50, %v434_v45  ;;  %v4522_v30 = vmul.f32 1.4142135, %v4494_v46  ;;  %v1205_v15 = vshrl.u32 %v6049_v29, %v1202_v44 }
  0xa9   : > { %v4527_v16 = vshll.u32 %v6053_v35, %v1201_v12  ;;  %v694_v17 = vadd.f32 %v693_v58, %v682_v11  ;;  %v698_v56 = vadd.f32 %v697_v59, %v686_v10  ;;  %v705_v19 = vmul.f32 %v3421_v37, %v4502_v54  ;;  %v3426_v10 = vld [vmem:[%s4199_s29 + $0x1b8] sm:$0xff] }
  0xaa   : > { %v709_v8 = vmul.f32 %v3422_v60, %v4502_v54  ;;  %v1046_v47 = vsub.s32 0, %v4510_v61  ;;  %v1203_v24 = vshrl.u32 %v6051_v27, %v1202_v44  ;;  %v1208_v4 = vshrl.u32 %v6047_v31, %v1202_v44 }
  0xab   : > { %v1211_v40 = vshrl.u32 %v6055_v33, %v1202_v44  ;;  %v702_v12 = vadd.f32 %v701_v63, %v690_v36  ;;  %v713_v6 = vmul.f32 %v3423_v14, %v4502_v54  ;;  %v1214_v50 = vshrl.u32 %v6053_v35, %v1202_v44  ;;  %v3427_v63 = vld [vmem:[%s4199_s29 + $0x30] sm:$0xff] }
  0xac   : > { %v1217_v45 = vshrl.u32 %v6045_v43, %v1202_v44  ;;  %v4542_v55 = vsel %vm322_vm2, nan, %v435_v13  ;;  %v717_v11 = vmul.f32 %v3424_v21, %v4522_v30  ;;  %v1206_v58 = vor.u32 %v1205_v15, %v1204_v22  ;;  %v3428_v22 = vld [vmem:[%s4199_s29 + $0xf8] sm:$0xff] }
  0xad   : > { %vm1219_vm7 = vcmp.lt.s32.totalorder %v4490_v41, 1  ;;  %v706_v59 = vadd.f32 %v705_v19, %v694_v17  ;;  %v710_v37 = vadd.f32 %v709_v8, %v698_v56  ;;  %v721_v60 = vmul.f32 %v3425_v28, %v4522_v30  ;;  %v3429_v8 = vld [vmem:[%s4199_s29 + $0x1c0] sm:$0xff] }
  0xae   : > { %v727_v36 = vmul.f32 %v4432_v38, %v4522_v30  ;;  %v4552_v44 = vmul.f32 %v4494_v46, %v4494_v46  ;;  %v4556_v3 = vmul.f32 %v4542_v55, %v4542_v55  ;;  %v3487_v13 = vmin.u32 %v1046_v47, %v4510_v61 }
  0xaf   : > { %v1209_v14 = vor.u32 %v1208_v4, %v1207_v26  ;;  %v714_v15 = vadd.f32 %v713_v6, %v702_v12  ;;  %v725_v17 = vmul.f32 %v3426_v10, %v4522_v30  ;;  %v1212_v56 = vor.u32 %v1211_v40, %v1210_v7  ;;  %v3430_v4 = vld [vmem:[%s4199_s29 + $0x38] sm:$0xff]  ;;  %v3431_v12 = vld [vmem:[%s4199_s29 + $0x100] sm:$0xff] }
  0xb0   : > { %v1215_v19 = vor.u32 %v1214_v50, %v1213_v9  ;;  %v740_v21 = vmul.f32 %v4450_v51, %v4522_v30  ;;  %v1218_v28 = vor.u32 %v1217_v45, %v4527_v16  ;;  %vm1220_vm8 = vcmp.lt.s32.totalorder %v4490_v41, 2 }
  0xb1   : > { %vm1222_vm9 = vcmp.lt.s32.totalorder %v4490_v41, 4  ;;  %v718_v25 = vadd.f32 %v717_v11, %v706_v59  ;;  %v722_v47 = vadd.f32 %v721_v60, %v710_v37  ;;  %v730_v23 = vmul.f32 %v3427_v63, %v727_v36  ;;  %v3432_v59 = vld [vmem:[%s4199_s29 + $0x1c8] sm:$0xff] }
  0xb2   : > { %v734_v26 = vmul.f32 %v3428_v22, %v727_v36  ;;  %v4571_v7 = vmul.f32 1.4142135, %v4542_v55  ;;  %v650_v9 = vsub.f32 %v4552_v44, %v4556_v3  ;;  %v1048_v40 = vclz %v3487_v13  ;;  %v3433_v22 = vld [vmem:[%s4199_s29 + $0x40] sm:$0xff]  ;;  %v3434_v13 = vld [vmem:[%s4199_s29 + $0x108] sm:$0xff] }
  0xb3   : > { %vm1221_vm10 = vcmp.lt.s32.totalorder %v4490_v41, 3  ;;  %v726_v16 = vadd.f32 %v725_v17, %v714_v15  ;;  %v738_v6 = vmul.f32 %v3429_v8, %v727_v36  ;;  %v1224_v50 = vsel %vm1222_vm9, %v1212_v56, 2102212464  ;;  %v3450_v41 = vld [vmem:[%s4199_s29 + $0x1f8] sm:$0xff] }
  0xb4   : > { %v1227_v45 = vsel %vm1219_vm7, %v1206_v58, %v1209_v14  ;;  %v743_v11 = vmul.f32 %v3430_v4, %v740_v21  ;;  %v747_v10 = vmul.f32 %v3431_v12, %v740_v21  ;;  %v753_v37 = vmul.f32 %v4476_v18, %v4522_v30  ;;  %v3435_v4 = vld [vmem:[%s4199_s29 + $0x1d0] sm:$0xff] }
  0xb5   : > { %v1228_v60 = vsel %vm1222_vm9, %v1215_v19, 920167782  ;;  %v731_v44 = vadd.f32 %v730_v23, %v718_v25  ;;  %v735_v3 = vadd.f32 %v734_v26, %v722_v47  ;;  %v1231_v63 = vsel %vm1219_vm7, %v1209_v14, %v1212_v56 }
  0xb6   : > { %v1229_v36 = vsel %vm1221_vm10, %v1212_v56, %v1228_v60  ;;  %v1223_v15 = vsel %vm1219_vm7, %v1203_v24, %v1206_v58  ;;  %v1225_v17 = vsel %vm1221_vm10, %v1209_v14, %v1224_v50  ;;  %v1232_v23 = vsel %vm1222_vm9, %v1218_v28, 1326507024  ;;  %v3439_v50 = vld [vmem:[%s4199_s29 + $0x50] sm:$0xff] }
  0xb7   : > { %v1230_v8 = vsel %vm1220_vm8, %v1227_v45, %v1229_v36  ;;  %v739_v25 = vadd.f32 %v738_v6, %v726_v16  ;;  %v751_v47 = vmul.f32 %v3432_v59, %v740_v21  ;;  %v3488_v26 = vadd.s32 4294967294, %v1048_v40  ;;  %v3436_v6 = vld [vmem:[%s4199_s29 + $0x48] sm:$0xff] }
  0xb8   : > { %v1233_v56 = vsel %vm1221_vm10, %v1215_v19, %v1232_v23  ;;  %v766_v24 = vmul.f32 %v4502_v54, %v4522_v30  ;;  %v4607_v14 = vmul.u32.u64.low %v4482_v20, %v1230_v8  ;;  %v4608_v12 = vmul.u32.u64.high %v4482_v20, %v1230_v8, %v4607_v14 }
  0xb9   : > { %v1234_v58 = vsel %vm1220_vm8, %v1231_v63, %v1233_v56  ;;  %v744_v28 = vadd.f32 %v743_v11, %v731_v44  ;;  %v756_v21 = vmul.f32 %v3433_v22, %v753_v37  ;;  %v760_v40 = vmul.f32 %v3434_v13, %v753_v37  ;;  %v3437_v63 = vld [vmem:[%s4199_s29 + $0x110] sm:$0xff]  ;;  %v3452_v22 = vld [vmem:[%s4199_s29 + $0x138] sm:$0xff] }
  0xba   : > { %v1226_v19 = vsel %vm1220_vm8, %v1223_v15, %v1225_v17  ;;  %v748_v16 = vadd.f32 %v747_v10, %v735_v3  ;;  %v4616_v30 = vmul.u32.u64.low %v4482_v20, %v1234_v58  ;;  %v4617_v45 = vmul.u32.u64.high %v4482_v20, %v1234_v58, %v4616_v30  ;;  %v3438_v10 = vld [vmem:[%s4199_s29 + $0x1d8] sm:$0xff] }
  0xbb   : > { %v3579_v59 = vadd.s32 4294967169, %v4514_v32  ;;  %v752_v60 = vadd.f32 %v751_v47, %v739_v25  ;;  %v764_v36 = vmul.f32 %v3435_v4, %v753_v37  ;;  %v4623_v11 = vadd.s32 %v4396_v53, %v4394_v52  ;;  %v3440_v52 = vld [vmem:[%s4199_s29 + $0x118] sm:$0xff]  ;;  %v3441_v53 = vld [vmem:[%s4199_s29 + $0x1e0] sm:$0xff] }
  0xbc   : > { %v1242_v44 = vmul.u32 %v4482_v20, %v1226_v19  ;;  %v1245_v3 = vadd.s32 1, %v4608_v12  ;;  %v4630_v32 = vmul.f32 1.4142135, %v650_v9  ;;  %v757_v15 = vadd.f32 %v756_v21, %v744_v28  ;;  %v3454_v20 = vld [vmem:[%s4199_s29 + $0x78] sm:$0xff]  ;;  %v3455_v21 = vld [vmem:[%s4199_s29 + $0x140] sm:$0xff] }
  0xbd   : > { %v1741_v13 = vadd.s32 1, %v3579_v59  ;;  %v769_v37 = vmul.f32 %v3436_v6, %v766_v24  ;;  %v781_v17 = vmul.f32 %v3439_v50, %v4571_v7  ;;  %v761_v8 = vadd.f32 %v760_v40, %v748_v16  ;;  %v3442_v28 = vld [vmem:[%s4199_s29 + $0x58] sm:$0xff]  ;;  %v3456_v40 = vld [vmem:[%s4199_s29 + $0x208] sm:$0xff]  ;;  %v3443_v6 = vld [vmem:[%s4199_s29 + $0x120] sm:$0xff] }
  0xbe   : > { %v773_v23 = vmul.f32 %v3437_v63, %v766_v24  ;;  %vm3489_vm11 = vcmp.lt.s32.totalorder %v3488_v26, 0  ;;  %vm1244_vm12 = vc.u32 %v4617_v45, %v4607_v14  ;;  %v765_v25 = vadd.f32 %v764_v36, %v752_v60  ;;  %v3444_v59 = vld [vmem:[%s4199_s29 + $0x1e8] sm:$0xff] }
  0xbf   : > { %v777_v9 = vmul.f32 %v3438_v10, %v766_v24  ;;  %v791_v47 = vmul.f32 %v4432_v38, %v4571_v7  ;;  %v1246_v56 = vsel %vm1244_vm12, %v1245_v3, %v4608_v12  ;;  %v785_v4 = vmul.f32 %v3440_v52, %v4571_v7  ;;  %v3445_v3 = vld [vmem:[%s4199_s29 + $0x60] sm:$0xff]  ;;  %v3447_v52 = vld [vmem:[%s4199_s29 + $0x1f0] sm:$0xff] }
  0xc0   : > { %v789_v58 = vmul.f32 %v3441_v53, %v4571_v7  ;;  %v1247_v19 = vadd.s32 %v1246_v56, %v1242_v44  ;;  %vm1742_vm13 = vcmp.gt.s32.totalorder %v1741_v13, 0  ;;  %v770_v16 = vadd.f32 %v769_v37, %v757_v15  ;;  %v3446_v37 = vld [vmem:[%s4199_s29 + $0x128] sm:$0xff]  ;;  %v3449_v56 = vld [vmem:[%s4199_s29 + $0x130] sm:$0xff] }
  0xc1   : > { %v4648_v24 = vmul.f32 %v3454_v20, %v4630_v32  ;;  %v4651_v50 = vsel %vm3489_vm11, 0, %v3488_v26  ;;  %v1743_v12 = vsel %vm1742_vm13, %v1741_v13, 0  ;;  %v774_v30 = vadd.f32 %v773_v23, %v761_v8 }
  0xc2   : > { %v804_v60 = vmul.f32 %v4450_v51, %v4571_v7  ;;  %v1248_v36 = vadd.s32 536870912, %v1247_v19  ;;  %v1745_v63 = vand.u32 31, %v1743_v12  ;;  %v778_v10 = vadd.f32 %v777_v9, %v765_v25  ;;  %v3448_v9 = vld [vmem:[%s4199_s29 + $0x68] sm:$0xff] }
  0xc3   : > { %v794_v44 = vmul.f32 %v3442_v28, %v791_v47  ;;  %v4658_v15 = vmul.f32 %v3455_v21, %v4630_v32  ;;  %v4661_v26 = vmul.f32 %v3456_v40, %v4630_v32  ;;  %v798_v13 = vmul.f32 %v3443_v6, %v791_v47 }
  0xc4   : > { %v817_v53 = vmul.f32 %v4476_v18, %v4571_v7  ;;  %v1056_v8 = vsub.s32 4294967266, %v4651_v50  ;;  %v4668_v23 = vshrl.u32 %v1248_v36, 30  ;;  %v782_v20 = vadd.f32 %v781_v17, %v770_v16 }
  0xc5   : > { %v802_v25 = vmul.f32 %v3444_v59, %v791_v47  ;;  %v830_v28 = vmul.f32 %v4502_v54, %v4571_v7  ;;  %v4676_v21 = vmul.f32 %v4630_v32, %v4432_v38  ;;  %v786_v40 = vadd.f32 %v785_v4, %v774_v30 }
  0xc6   : > { %v807_v6 = vmul.f32 %v3445_v3, %v804_v60  ;;  %v1250_v43 = vshll.u32 %v4668_v23, 30  ;;  %v4682_v36 = vsub.s32 32, %v1745_v63  ;;  %v790_v17 = vadd.f32 %v789_v58, %v778_v10 }
  0xc7   : > { %v811_v47 = vmul.f32 %v3446_v37, %v804_v60  ;;  %v815_v16 = vmul.f32 %v3447_v52, %v804_v60  ;;  %v1052_v59 = vsub.s32 32, %v4651_v50  ;;  %v820_v7 = vmul.f32 %v3448_v9, %v817_v53  ;;  %v3453_v37 = vld [vmem:[%s4199_s29 + $0x200] sm:$0xff] }
  0xc8   : > { %v824_v31 = vmul.f32 %v3449_v56, %v817_v53  ;;  %v1057_v29 = vadd.s32 127, %v1056_v8  ;;  %v4685_v27 = vsub.s32 %v1247_v19, %v1250_v43  ;;  %v795_v4 = vadd.f32 %v794_v44, %v782_v20 }
  0xc9   : > { %v828_v30 = vmul.f32 %v3450_v41, %v817_v53  ;;  %v833_v3 = vmul.f32 %v3451_v1, %v830_v28  ;;  %v837_v35 = vmul.f32 %v3452_v22, %v830_v28  ;;  %v799_v33 = vadd.f32 %v798_v13, %v786_v40 }
  0xca   : > { %v1253_v48 = vsub.s32 0, %v4685_v27  ;;  %v1757_v34 = vshll.u32 %v6094_v5, %v1745_v63  ;;  %v6095_v58 = vmov 920167782   ;;  %v803_v60 = vadd.f32 %v802_v25, %v790_v17 }
  0xcb   : > { %v1758_v10 = vshrl.u32 %v6095_v58, %v4682_v36  ;;  %v1053_v52 = vshll.u32 %v4510_v61, %v4651_v50  ;;  %v1054_v43 = vshrl.u32 %v4623_v11, %v1052_v59  ;;  %v4695_v19 = vshrl.u32 %v1743_v12, 5 }
  0xcc   : > { %v1058_v41 = vshll.u32 %v1057_v29, 23  ;;  %v3495_v1 = vmin.u32 %v1253_v48, %v4685_v27  ;;  %v6096_v22 = vmov 683565275   ;;  %v6097_v13 = vmov 2475754826  }
  0xcd   : > { %v1748_v44 = vshll.u32 %v6096_v22, %v1745_v63  ;;  %v1751_v53 = vshll.u32 %v6097_v13, %v1745_v63  ;;  %v1749_v8 = vshrl.u32 %v6097_v13, %v4682_v36  ;;  %v6098_v20 = vmov 2131351028  }
  0xce   : > { %v1752_v25 = vshrl.u32 %v6098_v20, %v4682_v36  ;;  %v1754_v9 = vshll.u32 %v6098_v20, %v1745_v63  ;;  %v1755_v61 = vshrl.u32 %v6094_v5, %v4682_v36  ;;  %v808_v11 = vadd.f32 %v807_v6, %v795_v4 }
  0xcf   : > { %v841_v50 = vmul.f32 %v3453_v37, %v830_v28  ;;  %v1255_v29 = vclz %v3495_v1  ;;  %v1759_v12 = vor.u32 %v1758_v10, %v1757_v34  ;;  %v812_v48 = vadd.f32 %v811_v47, %v799_v33 }
  0xd0   : > { %v1760_v56 = vshll.u32 %v6095_v58, %v1745_v63  ;;  %v6099_v40 = vmov 1326507024   ;;  %vm1766_vm14 = vcmp.lt.s32.totalorder %v4695_v19, 4  ;;  %v816_v59 = vadd.f32 %v815_v16, %v803_v60 }
  0xd1   : > { %v1761_v17 = vshrl.u32 %v6099_v40, %v4682_v36  ;;  %v1055_v13 = vor.u32 %v1054_v43, %v1053_v52  ;;  %v1059_v49 = vor.u32 4788187, %v1058_v41  ;;  %v3496_v38 = vadd.s32 4294967294, %v1255_v29 }
  0xd2   : > { %v1243_v20 = vadd.s32 %v4607_v14, %v4617_v45  ;;  %v4713_v5 = vor.u32 %v1749_v8, %v1748_v44  ;;  %v4715_v28 = vor.u32 %v1752_v25, %v1751_v53  ;;  %v1756_v34 = vor.u32 %v1755_v61, %v1754_v9 }
  0xd3   : > { %vm3497_vm15 = vcmp.lt.s32.totalorder %v3496_v38, 0  ;;  %vm1763_vm0 = vcmp.lt.s32.totalorder %v4695_v19, 1  ;;  %vm1765_vm1 = vcmp.lt.s32.totalorder %v4695_v19, 3  ;;  %v1772_v33 = vsel %vm1766_vm14, %v1759_v12, 920167782 }
  0xd4   : > { %v821_v63 = vadd.f32 %v820_v7, %v808_v11  ;;  %v825_v6 = vadd.f32 %v824_v31, %v812_v48  ;;  %v1258_v47 = vsel %vm3497_vm15, 0, %v3496_v38  ;;  %v1762_v16 = vor.u32 %v1761_v17, %v1760_v56  ;;  %v3457_v7 = vld [vmem:[%s4199_s29 + $0x80] sm:$0xff]  ;;  %v3458_v31 = vld [vmem:[%s4199_s29 + $0x148] sm:$0xff]  ;;  %v3459_v11 = vld [vmem:[%s4199_s29 + $0x210] sm:$0xff] }
  0xd5   : > { %v829_v14 = vadd.f32 %v828_v30, %v816_v59  ;;  %v1259_v45 = vsub.s32 32, %v1258_v47  ;;  %v1260_v4 = vshll.u32 %v4685_v27, %v1258_v47  ;;  %v1263_v10 = vsub.s32 4294967266, %v1258_v47  ;;  %v3460_v59 = vld [vmem:[%s4199_s29 + $0x88] sm:$0xff] }
  0xd6   : > { %v1062_v60 = vcvt.s32.f32 %v1055_v13  ;;  %vm1764_vm2 = vcmp.lt.s32.totalorder %v4695_v19, 2  ;;  %v1771_v37 = vsel %vm1763_vm0, %v4713_v5, %v4715_v28  ;;  %v1773_v52 = vsel %vm1765_vm1, %v1756_v34, %v1772_v33 }
  0xd7   : > { %v1060_v38 = vand.u32 2147483647, %v1059_v49  ;;  %v1261_v43 = vshrl.u32 %v1243_v20, %v1259_v45  ;;  %v1264_v30 = vadd.s32 127, %v1263_v10  ;;  %v1775_v27 = vsel %vm1763_vm0, %v4715_v28, %v1756_v34 }
  0xd8   : > { %v834_v41 = vadd.f32 %v833_v3, %v821_v63  ;;  %v838_v1 = vadd.f32 %v837_v35, %v825_v6  ;;  %vm982_vm3 = vcmp.lt.s32.totalorder %v4315_v62, 0  ;;  %v1776_v44 = vsel %vm1766_vm14, %v1762_v16, 1326507024  ;;  %v3461_v6 = vld [vmem:[%s4199_s29 + $0x150] sm:$0xff] }
  0xd9   : > { %v6100_v13 = vor.u32 8388608, %v4487_v39  ;;  %v1262_v49 = vor.u32 %v1261_v43, %v1260_v4  ;;  %v1265_v8 = vshll.u32 %v1264_v30, 23  ;;  %v1774_v20 = vsel %vm1764_vm2, %v1771_v37, %v1773_v52  ;;  %v3464_v43 = vld [vmem:[%s4199_s29 + $0x158] sm:$0xff] }
  0xda   : > { %v1777_v3 = vsel %vm1765_vm1, %v1759_v12, %v1776_v44  ;;  %v858_v35 = vmul.f32 %v3457_v7, %v4676_v21  ;;  %v862_v25 = vmul.f32 %v3458_v31, %v4676_v21  ;;  %v868_v9 = vmul.f32 %v4630_v32, %v4450_v51 }
  0xdb   : > { %v4739_v53 = vshll.u32 %v6100_v13, 8  ;;  %v1778_v39 = vsel %vm1764_vm2, %v1775_v27, %v1777_v3  ;;  %v842_v61 = vadd.f32 %v841_v50, %v829_v14  ;;  %v1063_v29 = vmul.f32 %v1062_v60, %v1060_v38  ;;  %v3462_v60 = vld [vmem:[%s4199_s29 + $0x218] sm:$0xff]  ;;  %v3463_v38 = vld [vmem:[%s4199_s29 + $0x90] sm:$0xff] }
  0xdc   : > { %v1266_v48 = vor.u32 4788187, %v1265_v8  ;;  %v1269_v56 = vcvt.s32.f32 %v1262_v49  ;;  %v846_v17 = vadd.f32 %v4648_v24, %v834_v41  ;;  %v850_v12 = vadd.f32 %v4658_v15, %v838_v1 }
  0xdd   : > { %v4756_v33 = vmul.u32.u64.low %v4739_v53, %v1774_v20  ;;  %v4757_v63 = vmul.u32.u64.high %v4739_v53, %v1774_v20, %v4756_v33  ;;  %v1747_v50 = vshrl.u32 %v6096_v22, %v4682_v36  ;;  %v651_v24 = vmul.f32 %v4542_v55, %v4494_v46 }
  0xde   : > { %v1267_v47 = vand.u32 2147483647, %v1266_v48  ;;  %v4764_v16 = vmul.u32.u64.low %v4739_v53, %v1778_v39  ;;  %v4765_v14 = vmul.u32.u64.high %v4739_v53, %v1778_v39, %v4764_v16  ;;  %v866_v15 = vmul.f32 %v3459_v11, %v4676_v21  ;;  %v3467_v48 = vld [vmem:[%s4199_s29 + $0x160] sm:$0xff] }
  0xdf   : > { %v6101_v45 = vand.u32 2147483647, %v4315_v62  ;;  %v1768_v10 = vsel %vm1766_vm14, %v1756_v34, 2102212464  ;;  %v871_v36 = vmul.f32 %v3460_v59, %v868_v9  ;;  %v881_v37 = vmul.f32 %v4476_v18, %v4630_v32  ;;  %v3469_v16 = vld [vmem:[%s4199_s29 + $0xa0] sm:$0xff] }
  0xe0   : > { %v1064_v52 = vxor.u32 2147483648, %v1063_v29  ;;  %v1270_v7 = vmul.f32 %v1269_v56, %v1267_v47  ;;  %v854_v46 = vadd.f32 %v4661_v26, %v842_v61  ;;  %v859_v55 = vadd.f32 %v858_v35, %v846_v17 }
  0xe1   : > { %vm4772_vm4 = vcmp.le.f32.partialorder %v6101_v45, 0.7853982  ;;  %v863_v21 = vadd.f32 %v862_v25, %v850_v12  ;;  %v875_v31 = vmul.f32 %v3461_v6, %v868_v9  ;;  %v1767_v34 = vsel %vm1763_vm0, %v1747_v50, %v4713_v5  ;;  %v3465_v25 = vld [vmem:[%s4199_s29 + $0x220] sm:$0xff] }
  0xe2   : > { %v1271_v30 = vxor.u32 2147483648, %v1270_v7  ;;  %v1769_v27 = vsel %vm1765_vm1, %v4715_v28, %v1768_v10  ;;  %v6104_v41 = vand.u32 2139095040, %v4465_v57  ;;  %v652_v26 = vadd.f32 %v651_v24, %v651_v24 }
  0xe3   : > { %v879_v44 = vmul.f32 %v3462_v60, %v868_v9  ;;  %v6105_v13 = vand.u32 2147483647, %v4383_v42  ;;  %vm1189_vm6 = vcmp.lt.s32.totalorder %v4383_v42, 0  ;;  %v884_v8 = vmul.f32 %v3463_v38, %v881_v37  ;;  %v3466_v9 = vld [vmem:[%s4199_s29 + $0x98] sm:$0xff]  ;;  %v6108_v38 = vld [vmem:[#allocation13_spill] sm:$0xff] }
  0xe4   : > { %v1942_v1 = vshrl.u32 %v6104_v41, 23  ;;  %v888_v5 = vmul.f32 %v3464_v43, %v881_v37  ;;  %v894_v20 = vmul.f32 %v4502_v54, %v4630_v32  ;;  %v1065_v28 = vsel %vm982_vm3, %v1064_v52, %v1063_v29  ;;  %v3470_v52 = vld [vmem:[%s4199_s29 + $0x168] sm:$0xff] }
  0xe5   : > { %vm4794_vm5 = vcmp.le.f32.partialorder %v6105_v13, 0.7853982  ;;  %v867_v3 = vadd.f32 %v866_v15, %v854_v46  ;;  %v872_v35 = vadd.f32 %v871_v36, %v859_v55  ;;  %v1770_v39 = vsel %vm1764_vm2, %v1767_v34, %v1769_v27  ;;  %v3468_v36 = vld [vmem:[%s4199_s29 + $0x228] sm:$0xff] }
  0xe6   : > { %v1789_v61 = vadd.s32 1, %v4757_v63  ;;  %v876_v11 = vadd.f32 %v875_v31, %v863_v21  ;;  %v1272_v56 = vsel %vm1189_vm6, %v1271_v30, %v1270_v7  ;;  %vm1788_vm7 = vc.u32 %v4765_v14, %v4756_v33  ;;  %v3471_v31 = vld [vmem:[%s4199_s29 + $0x230] sm:$0xff]  ;;  %v3472_v27 = vld [vmem:[%s4199_s29 + $0xa8] sm:$0xff] }
  0xe7   : > { %v3587_v32 = vadd.s32 4294967169, %v1942_v1  ;;  %v1066_v29 = vsub.s32 4, %v4462_v0  ;;  %v1068_v19 = vsel %vm4772_vm4, %v4315_v62, %v1065_v28  ;;  %v659_v17 = vmul.f32 1.4142135, %v652_v26  ;;  %v3473_v1 = vld [vmem:[%s4199_s29 + $0x170] sm:$0xff] }
  0xe8   : > { %v892_v12 = vmul.f32 %v3465_v25, %v881_v37  ;;  %v897_v59 = vmul.f32 %v3466_v9, %v894_v20  ;;  %v1786_v6 = vmul.u32 %v4739_v53, %v1770_v39  ;;  %v880_v47 = vadd.f32 %v879_v44, %v867_v3  ;;  %v4847_v28 = vld [vmem:[%s4207_s19 + $0x30] sm:$0xff]  ;;  %v4850_v3 = vld [vmem:[%s4207_s19 + $0x38] sm:$0xff] }
  0xe9   : > { %v901_v50 = vmul.f32 %v3467_v48, %v894_v20  ;;  %v1275_v24 = vsel %vm4794_vm5, %v4383_v42, %v1272_v56  ;;  %v1790_v15 = vsel %vm1788_vm7, %v1789_v61, %v4757_v63  ;;  %v885_v45 = vadd.f32 %v884_v8, %v872_v35  ;;  %v3474_v61 = vld [vmem:[%s4199_s29 + $0x238] sm:$0xff] }
  0xea   : > { %v889_v10 = vadd.f32 %v888_v5, %v876_v11  ;;  %3891 = vcosq.f32 %v1068_v19  ;;  %v1948_v60 = vadd.s32 1, %v3587_v32  ;;  %v226_v37 = vand.u32 2147483647, %v4215_v2  ;;  %v3475_v11 = vld [vmem:[%s4199_s29 + $0xb0] sm:$0xff]  ;;  %v3476_v56 = vld [vmem:[%s4199_s29 + $0x178] sm:$0xff] }
  0xeb   : > { %3893 = vsinq.f32 %v1068_v19  ;;  %v1273_v53 = vsub.s32 4, %v4668_v23  ;;  %v909_v7 = vmul.f32 %v3469_v16, %v659_v17  ;;  %v1067_v46 = vsel %vm982_vm3, %v1066_v29, %v4462_v0  ;;  %v6110_v0 = vld [vmem:[#allocation11_spill] sm:$0xff] }
  0xec   : > { %3895 = vcosq.f32 %v1275_v24  ;;  %v4830_v63 = vadd.s32 %v1790_v15, %v1786_v6  ;;  %v893_v55 = vadd.f32 %v892_v12, %v880_v47  ;;  %v905_v21 = vmul.f32 %v3468_v36, %v894_v20  ;;  %v3478_v6 = vld [vmem:[%s4199_s29 + $0xb8] sm:$0xff]  ;;  %v3479_v47 = vld [vmem:[%s4199_s29 + $0x180] sm:$0xff] }
  0xed   : > { %v919_v2 = vmul.f32 %v659_v17, %v6108_v38  ;;  %3897 = vsinq.f32 %v1275_v24  ;;  %v898_v43 = vadd.f32 %v897_v59, %v885_v45  ;;  %v902_v30 = vadd.f32 %v901_v50, %v889_v10  ;;  %v3477_v59 = vld [vmem:[%s4199_s29 + $0x240] sm:$0xff]  ;;  %v3480_v10 = vld [vmem:[%s4199_s29 + $0x248] sm:$0xff] }
  0xee   : > { %v913_v34 = vmul.f32 %v3470_v52, %v659_v17  ;;  %vm1949_vm8 = vcmp.gt.s32.totalorder %v1948_v60, 0  ;;  %v4835_v41 = vadd.f32 1e-09, %v226_v37  ;;  %v976_v26 = vand.u32 2147483647, %v6110_v0  ;;  %v3481_v36 = vld [vmem:[%s4199_s29 + $0xc0] sm:$0xff] }
  0xef   : > { %v1274_v44 = vsel %vm1189_vm6, %v1273_v53, %v4668_v23  ;;  %v917_v13 = vmul.f32 %v3471_v31, %v659_v17  ;;  %v932_v8 = vmul.f32 %v659_v17, %v4450_v51  ;;  %v1069_v5 = vsel %vm4772_vm4, 0, %v1067_v46 }
  0xf0   : > { %6109 = vst [vmem:[#allocation13_spill] sm:$0xff] %v4835_v41  ;;  %v1792_v20 = vadd.s32 536870912, %v4830_v63  ;;  %v906_v35 = vadd.f32 %v905_v21, %v893_v55  ;;  %v922_v25 = vmul.f32 %v3472_v27, %v919_v2  ;;  %v1950_v9 = vsel %vm1949_vm8, %v1948_v60, 0  ;;  %v3545_v41 = vld [vmem:[%s4199_s29 + $0x390] sm:$0xff] }
  0xf1   : > { %v4854_v23 = vmul.f32 %v4850_v3, %v4847_v28  ;;  %v910_v51 = vadd.f32 %v909_v7, %v898_v43  ;;  %v914_v39 = vadd.f32 %v913_v34, %v902_v30  ;;  %v926_v4 = vmul.f32 %v3473_v1, %v919_v2  ;;  %v3482_v7 = vld [vmem:[%s4199_s29 + $0x188] sm:$0xff] }
  0xf2   : > { %v1276_v48 = vsel %vm4794_vm5, 0, %v1274_v44  ;;  %v945_v32 = vmul.f32 %v4476_v18, %v659_v17  ;;  %v4862_v29 = vadd.f32 1e-09, %v976_v26  ;;  %v1176_v19 = vadd.s32 3, %v1069_v5  ;;  %v6113_v44 = vld [vmem:[#allocation12_spill] sm:$0xff] }
  0xf3   : > { %v6065_v12 = vand.u32 2147483647, %v4465_v57  ;;  %v4869_v50 = vmul.f32 %v4502_v54, %v659_v17  ;;  %v4871_v16 = vand.u32 3, %v1069_v5  ;;  %v4873_v49 = vshrl.u32 %v1792_v20, 30 }
  0xf4   : > { %6111 = vst [vmem:[#allocation11_spill] sm:$0xff] %v4862_v29  ;;  %v1952_v24 = vand.u32 31, %v1950_v9  ;;  %v918_v15 = vadd.f32 %v917_v13, %v906_v35  ;;  %v930_v45 = vmul.f32 %v3474_v61, %v919_v2  ;;  %v935_v18 = vmul.f32 %v3475_v11, %v932_v8  ;;  %v6114_v13 = vld [vmem:[#allocation14_spill] sm:$0xff] }
  0xf5   : > { %v1383_v60 = vadd.s32 3, %v1276_v48  ;;  %v923_v37 = vadd.f32 %v922_v25, %v910_v51  ;;  %v927_v52 = vadd.f32 %v926_v4, %v914_v39  ;;  %v939_v53 = vmul.f32 %v3476_v56, %v932_v8 }
  0xf6   : > { %v4878_v46 = vand.u32 3, %v1276_v48  ;;  %v943_v54 = vmul.f32 %v3477_v59, %v932_v8  ;;  %v4882_v17 = vmul.f32 %v3478_v6, %v945_v32  ;;  %v4884_v21 = vmul.f32 %v3479_v47, %v945_v32 }
  0xf7   : > { %v4880_v55 = vpop.eup %3891  ;;  %v4886_v31 = vand.u32 3, %v1176_v19  ;;  %v4890_v2 = vmul.f32 %v3480_v10, %v945_v32  ;;  %v4893_v43 = vmul.f32 %v3481_v36, %v4869_v50  ;;  %v1794_v30 = vshll.u32 %v4873_v49, 30 }
  0xf8   : > { %v4888_v38 = vpop.eup %3893  ;;  %v4896_v34 = vsub.s32 32, %v1952_v24  ;;  %v931_v1 = vadd.f32 %v930_v45, %v918_v15  ;;  %v4899_v0 = vmul.f32 %v3482_v7, %v4869_v50  ;;  %v1384_v26 = vand.u32 3, %v1383_v60 }
  0xf9   : > { %v3896_v27 = vpop.eup %3895  ;;  %v4903_v8 = vmul.f32 %v6114_v13, %v6113_v44  ;;  %v936_v20 = vadd.f32 %v935_v18, %v923_v37  ;;  %v4905_v35 = vadd.f32 %v939_v53, %v927_v52  ;;  %vm1075_vm9 = vcmp.eq.s32.totalorder %v4871_v16, 0 }
  0xfa   : > { %6112 = vst [vmem:[#allocation16_spill] sm:$0xff] %v4899_v0  ;;  %v3898_v5 = vpop.eup %3897  ;;  %vm1078_vm10 = vcmp.eq.s32.totalorder %v4871_v16, 2  ;;  %vm1281_vm11 = vcmp.lt.s32.totalorder %v4878_v46, 2  ;;  %v4912_v25 = vand.u32 8388607, %v6065_v12  ;;  %v1076_v51 = vxor.u32 2147483648, %v4888_v38 }
  0xfb   : > { %v1079_v39 = vxor.u32 2147483648, %v4880_v55  ;;  %vm1179_vm12 = vcmp.eq.s32.totalorder %v4886_v31, 0  ;;  %vm1182_vm13 = vcmp.eq.s32.totalorder %v4886_v31, 2  ;;  %vm1282_vm14 = vcmp.eq.s32.totalorder %v4878_v46, 0 }
  0xfc   : > { %vm1285_vm15 = vcmp.eq.s32.totalorder %v4878_v46, 2  ;;  %vm1279_vm0 = vweird.f32 %v4383_v42  ;;  %v4922_v4 = vsub.s32 %v4830_v63, %v1794_v30  ;;  %v4924_v61 = vshrl.u32 %v1950_v9, 5 }
  0xfd   : > { %v6115_v11 = vmov 2102212464   ;;  %v1965_v56 = vshrl.u32 %v6095_v58, %v4896_v34  ;;  %vm1074_vm1 = vcmp.lt.s32.totalorder %v4871_v16, 2  ;;  %v1283_v32 = vxor.u32 2147483648, %v3898_v5 }
  0xfe   : > { %v1964_v48 = vshll.u32 %v6115_v11, %v1952_v24  ;;  %v1286_v19 = vxor.u32 2147483648, %v3896_v27  ;;  %vm1386_vm2 = vcmp.eq.s32.totalorder %v1384_v26, 0  ;;  %vm1389_vm3 = vcmp.eq.s32.totalorder %v1384_v26, 2 }
  0xff   : > { %vm1178_vm4 = vcmp.lt.s32.totalorder %v4886_v31, 2  ;;  %v1955_v59 = vshll.u32 %v6096_v22, %v1952_v24  ;;  %v6116_v63 = vmov 2475754826   ;;  %v1967_v9 = vshll.u32 %v6095_v58, %v1952_v24 }
 0x100   : > { %v1956_v6 = vshrl.u32 %v6116_v63, %v4896_v34  ;;  %v1968_v47 = vshrl.u32 %v6099_v40, %v4896_v34  ;;  %v1958_v15 = vshll.u32 %v6116_v63, %v1952_v24  ;;  %v6117_v45 = vmov 2131351028  }
 0x101   : > { %v1959_v18 = vshrl.u32 %v6117_v45, %v4896_v34  ;;  %v1961_v10 = vshll.u32 %v6117_v45, %v1952_v24  ;;  %v1962_v36 = vshrl.u32 %v6115_v11, %v4896_v34  ;;  %vm1385_vm5 = vcmp.lt.s32.totalorder %v1384_v26, 2 }
 0x102   : > { %v1797_v60 = vsub.s32 0, %v4922_v4  ;;  %v1966_v37 = vor.u32 %v1965_v56, %v1964_v48  ;;  %vm1973_vm6 = vcmp.lt.s32.totalorder %v4924_v61, 4  ;;  %vm1072_vm7 = vweird.f32 %v4315_v62 }
 0x103   : > { %v1284_v52 = vsel %vm1282_vm14, %v3896_v27, %v1283_v32  ;;  %v1287_v53 = vsel %vm1285_vm15, %v1286_v19, %v3898_v5  ;;  %v1388_v24 = vsel %vm1386_vm2, %v3896_v27, %v1283_v32  ;;  %v1391_v7 = vsel %vm1389_vm3, %v1286_v19, %v3898_v5 }
 0x104   : > { %v944_v30 = vadd.f32 %v943_v54, %v931_v1  ;;  %v1727_v44 = vand.u32 2147483647, %v4903_v8  ;;  %v4953_v13 = vor.u32 %v1956_v6, %v1955_v59  ;;  %v1969_v48 = vor.u32 %v1968_v47, %v1967_v9  ;;  %v3483_v8 = vld [vmem:[%s4199_s29 + $0x250] sm:$0xff] }
 0x105   : > { %v4955_v56 = vor.u32 %v1959_v18, %v1958_v15  ;;  %v1963_v12 = vor.u32 %v1962_v36, %v1961_v10  ;;  %vm1970_vm8 = vcmp.lt.s32.totalorder %v4924_v61, 1  ;;  %vm1972_vm14 = vcmp.lt.s32.totalorder %v4924_v61, 3  ;;  %v3505_v10 = vld [vmem:[%s4199_s29 + $0x260] sm:$0xff] }
 0x106   : > { %v1288_v0 = vsel %vm1281_vm11, %v1284_v52, %v1287_v53  ;;  %v1392_v27 = vsel %vm1385_vm5, %v1388_v24, %v1391_v7  ;;  %v3580_v5 = vmin.u32 %v1797_v60, %v4922_v4  ;;  %v1979_v54 = vsel %vm1973_vm6, %v1966_v37, 920167782  ;;  %v3507_v24 = vld [vmem:[%s4199_s29 + $0x3f0] sm:$0xff] }
 0x107   : > { %v949_v1 = vadd.f32 %v4882_v17, %v936_v20  ;;  %v1077_v32 = vsel %vm1075_vm9, %v4880_v55, %v1076_v51  ;;  %v1080_v19 = vsel %vm1078_vm10, %v1079_v39, %v4888_v38  ;;  %v1946_v46 = vor.u32 8388608, %v4912_v25 }
 0x108   : > { %v1181_v26 = vsel %vm1179_vm12, %v4880_v55, %v1076_v51  ;;  %v1184_v59 = vsel %vm1182_vm13, %v1079_v39, %v4888_v38  ;;  %vm1971_vm11 = vcmp.lt.s32.totalorder %v4924_v61, 2  ;;  %v1983_v17 = vsel %vm1973_vm6, %v1969_v48, 1326507024 }
 0x109   : > { %v1289_v20 = vsel %vm1279_vm0, nan, %v1288_v0  ;;  %v1393_v6 = vsel %vm1279_vm0, nan, %v1392_v27  ;;  %v1978_v55 = vsel %vm1970_vm8, %v4953_v13, %v4955_v56  ;;  %v1980_v38 = vsel %vm1972_vm14, %v1963_v12, %v1979_v54 }
 0x10a   : > { %v4995_v25 = vadd.f32 %v4884_v21, %v4905_v35  ;;  %v4998_v51 = vmul.f32 %v3483_v8, %v4869_v50  ;;  %v1081_v42 = vsel %vm1074_vm1, %v1077_v32, %v1080_v19  ;;  %v1799_v0 = vclz %v3580_v5 }
 0x10b   : > { %v1185_v39 = vsel %vm1178_vm4, %v1181_v26, %v1184_v59  ;;  %v1982_v9 = vsel %vm1970_vm8, %v4955_v56, %v1963_v12  ;;  %v1984_v47 = vsel %vm1972_vm14, %v1966_v37, %v1983_v17  ;;  %v5009_v21 = vshll.u32 %v1946_v46, 8  ;;  %v3503_v46 = vld [vmem:[%s4199_s29 + $0x320] sm:$0xff] }
 0x10c   : > { %6118 = vst [vmem:[#allocation12_spill] sm:$0xff] %v4995_v25  ;;  %6119 = vst [vmem:[#allocation14_spill] sm:$0xff] %v4998_v51  ;;  %v5011_v50 = vmul.f32 1.4142135, %v1289_v20  ;;  %v1403_v35 = vmul.f32 %v1289_v20, %v1289_v20  ;;  %v1404_v16 = vmul.f32 %v1393_v6, %v1393_v6  ;;  %v1981_v15 = vsel %vm1971_vm11, %v1978_v55, %v1980_v38  ;;  %v3517_v17 = vld [vmem:[%s4199_s29 + $0x280] sm:$0xff]  ;;  %v3504_v38 = vld [vmem:[%s4199_s29 + $0x3e8] sm:$0xff] }
 0x10d   : > { %v5016_v31 = vadd.f32 %v4890_v2, %v944_v30  ;;  %v5019_v18 = vadd.f32 %v4893_v43, %v949_v1  ;;  %v5022_v36 = vadd.f32 1e-09, %v1727_v44  ;;  %v5025_v60 = vmul.f32 1.5707964, %v4847_v28  ;;  %v3506_v43 = vld [vmem:[%s4199_s29 + $0x328] sm:$0xff] }
 0x10e   : > { %v1082_v37 = vsel %vm1072_vm7, nan, %v1081_v42  ;;  %v1186_v52 = vsel %vm1072_vm7, nan, %v1185_v39  ;;  %v3581_v53 = vadd.s32 4294967294, %v1799_v0  ;;  %v1985_v2 = vsel %vm1971_vm11, %v1982_v9, %v1984_v47  ;;  %v3508_v1 = vld [vmem:[%s4199_s29 + $0x268] sm:$0xff]  ;;  %v3509_v42 = vld [vmem:[%s4199_s29 + $0x330] sm:$0xff]  ;;  %v3510_v0 = vld [vmem:[%s4199_s29 + $0x3f8] sm:$0xff] }
 0x10f   : > { %6120 = vst [vmem:[#allocation17_spill] sm:$0xff] %v5016_v31  ;;  %6121 = vst [vmem:[#allocation18_spill] sm:$0xff] %v5019_v18  ;;  %v1954_v7 = vshrl.u32 %v6096_v22, %v4896_v34  ;;  %v1975_v28 = vsel %vm1973_vm6, %v1963_v12, 2102212464  ;;  %v5040_v30 = vmul.u32.u64.low %v5009_v21, %v1981_v15  ;;  %v5041_v44 = vmul.u32.u64.high %v5009_v21, %v1981_v15, %v5040_v30  ;;  %v3502_v34 = vld [vmem:[%s4199_s29 + $0x258] sm:$0xff]  ;;  %v3519_v15 = vld [vmem:[%s4199_s29 + $0x410] sm:$0xff] }
 0x110   : > { %6122 = vst [vmem:[#allocation19_spill] sm:$0xff] %v5022_v36  ;;  %6123 = vst [vmem:[#allocation20_spill] sm:$0xff] %v5025_v60  ;;  %v5044_v62 = vmul.f32 1.4142135, %v1393_v6  ;;  %v1405_v48 = vsub.f32 %v1403_v35, %v1404_v16  ;;  %v1406_v27 = vmul.f32 %v1393_v6, %v1289_v20  ;;  %v1420_v5 = vmul.f32 %v3505_v10, %v5011_v50  ;;  %v3518_v20 = vld [vmem:[%s4199_s29 + $0x348] sm:$0xff]  ;;  %v3562_v18 = vld [vmem:[%s4199_s29 + $0x2f8] sm:$0xff] }
 0x111   : > { %v5047_v54 = vmul.f32 1.4142135, %v1082_v37  ;;  %v5052_v12 = vmul.u32.u64.low %v5009_v21, %v1985_v2  ;;  %v5053_v8 = vmul.u32.u64.high %v5009_v21, %v1985_v2, %v5052_v12  ;;  %v5056_v32 = vmul.f32 1.5707964, %v4850_v3  ;;  %v3511_v2 = vld [vmem:[%s4199_s29 + $0x270] sm:$0xff]  ;;  %v3520_v51 = vld [vmem:[%s4199_s29 + $0x288] sm:$0xff] }
 0x112   : > { %v5058_v19 = vmul.f32 1.4142135, %v1186_v52  ;;  %v1424_v26 = vmul.f32 %v3506_v43, %v5011_v50  ;;  %v1428_v59 = vmul.f32 %v3507_v24, %v5011_v50  ;;  %vm3582_vm9 = vcmp.lt.s32.totalorder %v3581_v53, 0 }
 0x113   : > { %6124 = vst [vmem:[#allocation21_spill] sm:$0xff] %v5056_v32  ;;  %v1398_v6 = vmul.f32 %v1082_v37, %v1082_v37  ;;  %v1399_v55 = vmul.f32 %v1186_v52, %v1186_v52  ;;  %v1974_v3 = vsel %vm1970_vm8, %v1954_v7, %v4953_v13  ;;  %v1976_v39 = vsel %vm1972_vm14, %v4955_v56, %v1975_v28  ;;  %v3546_v32 = vld [vmem:[%s4199_s29 + $0x458] sm:$0xff] }
 0x114   : > { %v1407_v9 = vadd.f32 %v1406_v27, %v1406_v27  ;;  %v5074_v47 = vmul.f32 1.4142135, %v1405_v48  ;;  %v1421_v35 = vadd.f32 %v3502_v34, %v1420_v5  ;;  %v1432_v16 = vmul.f32 %v3508_v1, %v5044_v62  ;;  %v3532_v27 = vld [vmem:[%s4199_s29 + $0x2a8] sm:$0xff]  ;;  %v3533_v5 = vld [vmem:[%s4199_s29 + $0x370] sm:$0xff]  ;;  %v3513_v34 = vld [vmem:[%s4199_s29 + $0x400] sm:$0xff] }
 0x115   : > { %v1401_v10 = vmul.f32 %v1186_v52, %v1082_v37  ;;  %v5080_v43 = vmul.f32 %v3517_v17, %v5047_v54  ;;  %v5083_v13 = vmul.f32 %v3518_v20, %v5047_v54  ;;  %v5086_v56 = vsel %vm3582_vm9, 0, %v3581_v53  ;;  %v3512_v52 = vld [vmem:[%s4199_s29 + $0x338] sm:$0xff] }
 0x116   : > { %v1425_v24 = vadd.f32 %v3503_v46, %v1424_v26  ;;  %v1429_v7 = vadd.f32 %v3504_v38, %v1428_v59  ;;  %v1436_v28 = vmul.f32 %v3509_v42, %v5044_v62  ;;  %v1440_v48 = vmul.f32 %v3510_v0, %v5044_v62  ;;  %v6126_v38 = vld [vmem:[#allocation15_spill] sm:$0xff] }
 0x117   : > { %v1400_v37 = vsub.f32 %v1398_v6, %v1399_v55  ;;  %v5095_v1 = vmul.f32 %v3519_v15, %v5047_v54  ;;  %v1977_v12 = vsel %vm1971_vm11, %v1974_v3, %v1976_v39  ;;  %v1996_v53 = vadd.s32 1, %v5041_v44  ;;  %v3514_v6 = vld [vmem:[%s4199_s29 + $0x278] sm:$0xff]  ;;  %v3516_v15 = vld [vmem:[%s4199_s29 + $0x408] sm:$0xff] }
 0x118   : > { %v5100_v46 = vmul.f32 1.4142135, %v1407_v9  ;;  %v1433_v26 = vadd.f32 %v1432_v16, %v1421_v35  ;;  %v1444_v59 = vmul.f32 %v3511_v2, %v5074_v47  ;;  %v1807_v17 = vsub.s32 4294967266, %v5086_v56  ;;  %v3534_v9 = vld [vmem:[%s4199_s29 + $0x438] sm:$0xff]  ;;  %v3515_v16 = vld [vmem:[%s4199_s29 + $0x340] sm:$0xff] }
 0x119   : > { %v1402_v20 = vadd.f32 %v1401_v10, %v1401_v10  ;;  %v5106_v55 = vmul.f32 %v3532_v27, %v5058_v19  ;;  %v5109_v61 = vmul.f32 %v3533_v5, %v5058_v19  ;;  %vm1733_vm10 = vcmp.lt.s32.totalorder %v6126_v38, 0 }
 0x11a   : > { %6125 = vst [vmem:[#allocation22_spill] sm:$0xff] %v5100_v46  ;;  %vm1995_vm12 = vc.u32 %v5053_v8, %v5040_v30  ;;  %v1437_v42 = vadd.f32 %v1436_v28, %v1425_v24  ;;  %v1441_v0 = vadd.f32 %v1440_v48, %v1429_v7  ;;  %v1448_v3 = vmul.f32 %v3512_v52, %v5074_v47  ;;  %v3547_v7 = vld [vmem:[%s4199_s29 + $0x2d0] sm:$0xff]  ;;  %v3548_v28 = vld [vmem:[%s4199_s29 + $0x398] sm:$0xff] }
 0x11b   : > { %v1452_v39 = vmul.f32 %v3513_v34, %v5074_v47  ;;  %v5117_v35 = vmul.f32 1.4142135, %v1400_v37  ;;  %v1787_v10 = vadd.s32 %v4756_v33, %v4765_v14  ;;  %v1803_v2 = vsub.s32 32, %v5086_v56 }
 0x11c   : > { %v1993_v27 = vmul.u32 %v5009_v21, %v1977_v12  ;;  %v1445_v5 = vadd.f32 %v1444_v59, %v1433_v26  ;;  %v1456_v24 = vmul.f32 %v3514_v6, %v5100_v46  ;;  %v6127_v48 = vand.u32 2147483647, %v6126_v38 }
 0x11d   : > { %v1808_v52 = vadd.s32 127, %v1807_v17  ;;  %v1997_v33 = vsel %vm1995_vm12, %v1996_v53, %v5041_v44  ;;  %v5138_v14 = vmul.f32 1.4142135, %v1402_v20  ;;  %v5141_v21 = vmul.f32 %v3534_v9, %v5058_v19  ;;  %v3563_v20 = vld [vmem:[%s4199_s29 + $0x3c0] sm:$0xff] }
 0x11e   : > { %vm5130_vm13 = vcmp.le.f32.partialorder %v6127_v48, 0.7853982  ;;  %v1817_v34 = vsub.s32 4, %v4873_v49  ;;  %v2485_v12 = vand.u32 2139095040, %v5025_v60  ;;  %v1449_v26 = vadd.f32 %v1448_v3, %v1437_v42  ;;  %v3549_v48 = vld [vmem:[%s4199_s29 + $0x460] sm:$0xff] }
 0x11f   : > { %6130 = vst [vmem:[#allocation15_spill] sm:$0xff] %v5138_v14  ;;  %v1453_v59 = vadd.f32 %v1452_v39, %v1441_v0  ;;  %v1460_v17 = vmul.f32 %v3515_v16, %v5100_v46  ;;  %v1464_v6 = vmul.f32 %v3516_v15, %v5100_v46  ;;  %v5150_v44 = vmul.f32 %v3547_v7, %v5117_v35  ;;  %v3564_v39 = vld [vmem:[%s4199_s29 + $0x488] sm:$0xff] }
 0x120   : > { %v5153_v53 = vmul.f32 %v3548_v28, %v5117_v35  ;;  %v1804_v9 = vshll.u32 %v4922_v4, %v5086_v56  ;;  %v1998_v42 = vadd.s32 %v1997_v33, %v1993_v27  ;;  %v1457_v0 = vadd.f32 %v1456_v24, %v1445_v5  ;;  %v3522_v24 = vld [vmem:[%s4199_s29 + $0x418] sm:$0xff] }
 0x121   : > { %v1478_v3 = vmul.f32 %v5011_v50, %v5047_v54  ;;  %v1805_v16 = vshrl.u32 %v1787_v10, %v1803_v2  ;;  %v1809_v15 = vshll.u32 %v1808_v52, 23  ;;  %v5163_v7 = vmul.f32 %v3549_v48, %v5117_v35  ;;  %v3521_v2 = vld [vmem:[%s4199_s29 + $0x350] sm:$0xff] }
 0x122   : > { %v5166_v28 = vmul.f32 %v3562_v18, %v5138_v14  ;;  %v1999_v31 = vadd.s32 536870912, %v1998_v42  ;;  %v2486_v4 = vshrl.u32 %v2485_v12, 23  ;;  %v1461_v56 = vadd.f32 %v1460_v17, %v1449_v26  ;;  %v3523_v17 = vld [vmem:[%s4199_s29 + $0x290] sm:$0xff] }
 0x123   : > { %6131 = vst [vmem:[#allocation23_spill] sm:$0xff] %v5163_v7  ;;  %v1465_v27 = vadd.f32 %v1464_v6, %v1453_v59  ;;  %v5169_v5 = vmul.f32 %v3563_v20, %v5138_v14  ;;  %v1818_v10 = vsel %vm1733_vm10, %v1817_v34, %v4873_v49  ;;  %v1491_v52 = vmul.f32 %v5044_v62, %v5047_v54  ;;  %v3550_v7 = vld [vmem:[%s4199_s29 + $0x2d8] sm:$0xff] }
 0x124   : > { %6132 = vst [vmem:[#allocation24_spill] sm:$0xff] %v5166_v28  ;;  %v5179_v33 = vmul.f32 %v3564_v39, %v5138_v14  ;;  %v5181_v18 = vshrl.u32 %v1999_v31, 30  ;;  %v1469_v26 = vadd.f32 %v5080_v43, %v1457_v0  ;;  %v1481_v59 = vmul.f32 %v3520_v51, %v1478_v3  ;;  %v3524_v51 = vld [vmem:[%s4199_s29 + $0x358] sm:$0xff]  ;;  %v3525_v0 = vld [vmem:[%s4199_s29 + $0x420] sm:$0xff] }
 0x125   : > { %6133 = vst [vmem:[#allocation25_spill] sm:$0xff] %v5169_v5  ;;  %v1806_v6 = vor.u32 %v1805_v16, %v1804_v9  ;;  %v1810_v49 = vor.u32 4788187, %v1809_v15  ;;  %v1820_v34 = vsel %vm5130_vm13, 0, %v1818_v10  ;;  %v3672_v20 = vadd.s32 4294967169, %v2486_v4 }
 0x126   : > { %6134 = vst [vmem:[#allocation26_spill] sm:$0xff] %v5179_v33  ;;  %v2001_v48 = vshll.u32 %v5181_v18, 30  ;;  %v1473_v39 = vadd.f32 %v5083_v13, %v1461_v56  ;;  %v1477_v12 = vadd.f32 %v5095_v1, %v1465_v27  ;;  %v1485_v25 = vmul.f32 %v3521_v2, %v1478_v3  ;;  %v3526_v1 = vld [vmem:[%s4199_s29 + $0x298] sm:$0xff] }
 0x127   : > { %v1489_v33 = vmul.f32 %v3522_v24, %v1478_v3  ;;  %v1494_v43 = vmul.f32 %v3523_v17, %v1491_v52  ;;  %v1927_v9 = vadd.s32 3, %v1820_v34  ;;  %v2478_v15 = vand.u32 2147483647, %v4854_v23 }
 0x128   : > { %v5194_v16 = vsub.s32 %v1998_v42, %v2001_v48  ;;  %v1482_v4 = vadd.f32 %v1481_v59, %v1469_v26  ;;  %v1504_v10 = vmul.f32 %v5074_v47, %v5047_v54  ;;  %v1811_v13 = vand.u32 2147483647, %v1810_v49  ;;  %v3527_v49 = vld [vmem:[%s4199_s29 + $0x360] sm:$0xff]  ;;  %v3528_v48 = vld [vmem:[%s4199_s29 + $0x428] sm:$0xff] }
 0x129   : > { %v1813_v56 = vcvt.s32.f32 %v1806_v6  ;;  %v1542_v3 = vmul.f32 %v5011_v50, %v5058_v19  ;;  %v6135_v2 = vand.u32 2147483647, %v5025_v60  ;;  %v2492_v23 = vadd.s32 1, %v3672_v20  ;;  %v3535_v6 = vld [vmem:[%s4199_s29 + $0x2b0] sm:$0xff] }
 0x12a   : > { %v2004_v27 = vsub.s32 0, %v5194_v16  ;;  %v1486_v24 = vadd.f32 %v1485_v25, %v1473_v39  ;;  %v1490_v26 = vadd.f32 %v1489_v33, %v1477_v12  ;;  %v1498_v59 = vmul.f32 %v3524_v51, %v1491_v52  ;;  %v3529_v25 = vld [vmem:[%s4199_s29 + $0x2a0] sm:$0xff]  ;;  %v3530_v33 = vld [vmem:[%s4199_s29 + $0x368] sm:$0xff]  ;;  %v3531_v12 = vld [vmem:[%s4199_s29 + $0x430] sm:$0xff] }
 0x12b   : > { %v5205_v42 = vand.u32 8388607, %v6135_v2  ;;  %v1502_v17 = vmul.f32 %v3525_v0, %v1491_v52  ;;  %v1517_v31 = vmul.f32 %v5100_v46, %v5047_v54  ;;  %v5212_v5 = vand.u32 3, %v1820_v34  ;;  %v3536_v0 = vld [vmem:[%s4199_s29 + $0x378] sm:$0xff] }
 0x12c   : > { %v5214_v60 = vand.u32 3, %v1927_v9  ;;  %v3588_v2 = vmin.u32 %v2004_v27, %v5194_v16  ;;  %v1495_v28 = vadd.f32 %v1494_v43, %v1482_v4  ;;  %v1507_v20 = vmul.f32 %v3526_v1, %v1504_v10  ;;  %v3537_v4 = vld [vmem:[%s4199_s29 + $0x440] sm:$0xff] }
 0x12d   : > { %v1814_v52 = vmul.f32 %v1813_v56, %v1811_v13  ;;  %v5220_v39 = vadd.f32 1e-09, %v2478_v15  ;;  %v5222_v51 = vmul.f32 %v3535_v6, %v1542_v3  ;;  %v1994_v54 = vadd.s32 %v5040_v30, %v5053_v8 }
 0x12e   : > { %v2006_v34 = vclz %v3588_v2  ;;  %vm2493_vm15 = vcmp.gt.s32.totalorder %v2492_v23, 0  ;;  %v1499_v9 = vadd.f32 %v1498_v59, %v1486_v24  ;;  %v1503_v36 = vadd.f32 %v1502_v17, %v1490_v26  ;;  %v3539_v17 = vld [vmem:[%s4199_s29 + $0x380] sm:$0xff] }
 0x12f   : > { %6136 = vst [vmem:[#allocation27_spill] sm:$0xff] %v5220_v39  ;;  %v1511_v27 = vmul.f32 %v3527_v49, %v1504_v10  ;;  %v1515_v43 = vmul.f32 %v3528_v48, %v1504_v10  ;;  %v1520_v1 = vmul.f32 %v3529_v25, %v1517_v31  ;;  %v1524_v29 = vmul.f32 %v3530_v33, %v1517_v31  ;;  %v3541_v49 = vld [vmem:[%s4199_s29 + $0x2c0] sm:$0xff] }
 0x130   : > { %v1528_v13 = vmul.f32 %v3531_v12, %v1517_v31  ;;  %v3589_v15 = vadd.s32 4294967294, %v2006_v34  ;;  %v1508_v56 = vadd.f32 %v1507_v20, %v1495_v28  ;;  %v5228_v6 = vmul.f32 %v3536_v0, %v1542_v3  ;;  %v3538_v31 = vld [vmem:[%s4199_s29 + $0x2b8] sm:$0xff] }
 0x131   : > { %v1815_v39 = vxor.u32 2147483648, %v1814_v52  ;;  %v2494_v30 = vsel %vm2493_vm15, %v2492_v23, 0  ;;  %v5230_v8 = vmul.f32 %v3537_v4, %v1542_v3  ;;  %v1555_v24 = vmul.f32 %v5044_v62, %v5058_v19  ;;  %v3540_v3 = vld [vmem:[%s4199_s29 + $0x448] sm:$0xff] }
 0x132   : > { %v1568_v10 = vmul.f32 %v5074_v47, %v5058_v19  ;;  %vm3590_vm0 = vcmp.lt.s32.totalorder %v3589_v15, 0  ;;  %v1512_v26 = vadd.f32 %v1511_v27, %v1499_v9  ;;  %v1516_v59 = vadd.f32 %v1515_v43, %v1503_v36  ;;  %v3543_v9 = vld [vmem:[%s4199_s29 + $0x450] sm:$0xff]  ;;  %v3544_v27 = vld [vmem:[%s4199_s29 + $0x2c8] sm:$0xff] }
 0x133   : > { %v1581_v28 = vmul.f32 %v5100_v46, %v5058_v19  ;;  %v2009_v23 = vsel %vm3590_vm0, 0, %v3589_v15  ;;  %v2496_v25 = vand.u32 31, %v2494_v30  ;;  %v1521_v33 = vadd.f32 %v1520_v1, %v1508_v56 }
 0x134   : > { %v2010_v48 = vsub.s32 32, %v2009_v23  ;;  %v2011_v2 = vshll.u32 %v5194_v16, %v2009_v23  ;;  %v2014_v20 = vsub.s32 4294967266, %v2009_v23  ;;  %v1606_v36 = vmul.f32 %v5117_v35, %v5011_v50  ;;  %v3542_v16 = vld [vmem:[%s4199_s29 + $0x388] sm:$0xff] }
 0x135   : > { %v5247_v12 = vmul.f32 %v5117_v35, %v5044_v62  ;;  %v1816_v19 = vsel %vm1733_vm10, %v1815_v39, %v1814_v52  ;;  %v1558_v0 = vmul.f32 %v3538_v31, %v1555_v24  ;;  %v5251_v34 = vmul.f32 %v3539_v17, %v1555_v24 }
 0x136   : > { %v2012_v43 = vshrl.u32 %v1994_v54, %v2010_v48  ;;  %v2015_v4 = vadd.s32 127, %v2014_v20  ;;  %v1525_v1 = vadd.f32 %v1524_v29, %v1512_v26  ;;  %v1529_v15 = vadd.f32 %v1528_v13, %v1516_v59  ;;  %v3558_v54 = vld [vmem:[%s4199_s29 + $0x478] sm:$0xff] }
 0x137   : > { %v5256_v56 = vmul.f32 %v3540_v3, %v1555_v24  ;;  %v5258_v23 = vmul.f32 %v3541_v49, %v1568_v10  ;;  %vm1940_vm1 = vcmp.lt.s32.totalorder %v4465_v57, 0  ;;  %v1819_v52 = vsel %vm5130_vm13, %v6126_v38, %v1816_v19  ;;  %v3552_v19 = vld [vmem:[%s4199_s29 + $0x468] sm:$0xff] }
 0x138   : > { %v6137_v39 = vand.u32 2147483647, %v4465_v57  ;;  %v2013_v29 = vor.u32 %v2012_v43, %v2011_v2  ;;  %v2016_v13 = vshll.u32 %v2015_v4, 23  ;;  %v5273_v24 = vsub.s32 32, %v2496_v25 }
 0x139   : > { %v1533_v26 = vadd.f32 %v5106_v55, %v1521_v33  ;;  %v5276_v59 = vmul.f32 %v3542_v16, %v1568_v10  ;;  %v5278_v31 = vmul.f32 %v3543_v9, %v1568_v10  ;;  %v5280_v37 = vmul.f32 %v3544_v27, %v1581_v28 }
 0x13a   : > { %vm5269_vm2 = vcmp.le.f32.partialorder %v6137_v39, 0.7853982  ;;  %v5282_v17 = vmul.f32 %v3545_v41, %v1581_v28  ;;  %v5284_v3 = vmul.f32 %v3546_v32, %v1581_v28  ;;  %v2017_v49 = vor.u32 4788187, %v2016_v13  ;;  %v3551_v28 = vld [vmem:[%s4199_s29 + $0x3a0] sm:$0xff] }
 0x13b   : > { %v2020_v48 = vcvt.s32.f32 %v2013_v29  ;;  %v1537_v2 = vadd.f32 %v5109_v61, %v1525_v1  ;;  %v1541_v20 = vadd.f32 %v5141_v21, %v1529_v15  ;;  %v5288_v55 = vmul.f32 %v3550_v7, %v1606_v36  ;;  %v3553_v7 = vld [vmem:[%s4199_s29 + $0x2e0] sm:$0xff] }
 0x13c   : > { %3899 = vcosq.f32 %v1819_v52  ;;  %v2018_v10 = vand.u32 2147483647, %v2017_v49  ;;  %v2508_v33 = vshll.u32 %v6115_v11, %v2496_v25  ;;  %v2509_v41 = vshrl.u32 %v6095_v58, %v5273_v24 }
 0x13d   : > { %3901 = vsinq.f32 %v1819_v52  ;;  %v1546_v32 = vadd.f32 %v5222_v51, %v1533_v26  ;;  %v5296_v16 = vshrl.u32 %v2494_v30, 5  ;;  %v2511_v61 = vshll.u32 %v6095_v58, %v2496_v25 }
 0x13e   : > { %v2512_v21 = vshrl.u32 %v6099_v40, %v5273_v24  ;;  %v2021_v9 = vmul.f32 %v2020_v48, %v2018_v10  ;;  %v2024_v27 = vsub.s32 4, %v5181_v18  ;;  %v2499_v43 = vshll.u32 %v6096_v22, %v2496_v25  ;;  %v3554_v40 = vld [vmem:[%s4199_s29 + $0x3a8] sm:$0xff] }
 0x13f   : > { %v2500_v4 = vshrl.u32 %v6116_v63, %v5273_v24  ;;  %v2502_v51 = vshll.u32 %v6116_v63, %v2496_v25  ;;  %v2503_v30 = vshrl.u32 %v6117_v45, %v5273_v24  ;;  %v2505_v1 = vshll.u32 %v6117_v45, %v2496_v25 }
 0x140   : > { %v2506_v15 = vshrl.u32 %v6115_v11, %v5273_v24  ;;  %v5312_v52 = vmul.f32 %v3551_v28, %v1606_v36  ;;  %v5314_v39 = vmul.f32 %v3552_v19, %v1606_v36  ;;  %v2022_v29 = vxor.u32 2147483648, %v2021_v9 }
 0x141   : > { %v2510_v13 = vor.u32 %v2509_v41, %v2508_v33  ;;  %v1550_v26 = vadd.f32 %v5228_v6, %v1537_v2  ;;  %v5318_v49 = vmul.f32 %v3553_v7, %v5247_v12  ;;  %v2513_v48 = vor.u32 %v2512_v21, %v2511_v61  ;;  %v3555_v33 = vld [vmem:[%s4199_s29 + $0x470] sm:$0xff]  ;;  %v3556_v7 = vld [vmem:[%s4199_s29 + $0x2e8] sm:$0xff] }
 0x142   : > { %vm2517_vm3 = vcmp.lt.s32.totalorder %v5296_v16, 4  ;;  %v1554_v10 = vadd.f32 %v5230_v8, %v1541_v20  ;;  %v1559_v25 = vadd.f32 %v1558_v0, %v1546_v32  ;;  %v2023_v28 = vsel %vm1940_vm1, %v2022_v29, %v2021_v9  ;;  %v3557_v9 = vld [vmem:[%s4199_s29 + $0x3b0] sm:$0xff] }
 0x143   : > { %v2025_v36 = vsel %vm1940_vm1, %v2024_v27, %v5181_v18  ;;  %v2026_v6 = vsel %vm5269_vm2, %v4465_v57, %v2023_v28  ;;  %v5332_v2 = vor.u32 %v2500_v4, %v2499_v43  ;;  %v5334_v41 = vor.u32 %v2503_v30, %v2502_v51  ;;  %v3560_v28 = vld [vmem:[%s4199_s29 + $0x3b8] sm:$0xff] }
 0x144   : > { %v2507_v19 = vor.u32 %v2506_v15, %v2505_v1  ;;  %3903 = vcosq.f32 %v2026_v6  ;;  %vm2514_vm4 = vcmp.lt.s32.totalorder %v5296_v16, 1  ;;  %vm2516_vm5 = vcmp.lt.s32.totalorder %v5296_v16, 3 }
 0x145   : > { %v2523_v18 = vsel %vm2517_vm3, %v2510_v13, 920167782  ;;  %v5341_v8 = vmul.f32 %v3554_v40, %v5247_v12  ;;  %vm1826_vm6 = vcmp.eq.s32.totalorder %v5212_v5, 0  ;;  %vm1829_vm7 = vcmp.eq.s32.totalorder %v5212_v5, 2 }
 0x146   : > { %3905 = vsinq.f32 %v2026_v6  ;;  %v2490_v0 = vor.u32 8388608, %v5205_v42  ;;  %v2527_v20 = vsel %vm2517_vm3, %v2513_v48, 1326507024  ;;  %v1563_v32 = vadd.f32 %v5251_v34, %v1550_v26  ;;  %v3561_v6 = vld [vmem:[%s4199_s29 + $0x480] sm:$0xff] }
 0x147   : > { %v5350_v61 = vmul.f32 %v3555_v33, %v5247_v12  ;;  %v1632_v40 = vmul.f32 %v5074_v47, %v5117_v35  ;;  %vm1930_vm8 = vcmp.eq.s32.totalorder %v5214_v60, 0  ;;  %vm1933_vm14 = vcmp.eq.s32.totalorder %v5214_v60, 2 }
 0x148   : > { %v2027_v21 = vsel %vm5269_vm2, 0, %v2025_v36  ;;  %v1567_v42 = vadd.f32 %v5256_v56, %v1554_v10  ;;  %vm2515_vm11 = vcmp.lt.s32.totalorder %v5296_v16, 2  ;;  %v2522_v12 = vsel %vm2514_vm4, %v5332_v2, %v5334_v41 }
 0x149   : > { %v2524_v34 = vsel %vm2516_vm5, %v2507_v19, %v2523_v18  ;;  %v3900_v27 = vpop.eup %3899  ;;  %v1572_v43 = vadd.f32 %v5258_v23, %v1559_v25  ;;  %v1645_v56 = vmul.f32 %v5100_v46, %v5117_v35  ;;  %vm1825_vm9 = vcmp.lt.s32.totalorder %v5212_v5, 2 }
 0x14a   : > { %v2526_v4 = vsel %vm2514_vm4, %v5334_v41, %v2507_v19  ;;  %v2528_v51 = vsel %vm2516_vm5, %v2510_v13, %v2527_v20  ;;  %v3902_v30 = vpop.eup %3901  ;;  %v5380_v1 = vmul.f32 %v5138_v14, %v5011_v50  ;;  %v5384_v23 = vmul.f32 %v5138_v14, %v5044_v62  ;;  %v3559_v13 = vld [vmem:[%s4199_s29 + $0x2f0] sm:$0xff] }
 0x14b   : > { %vm1929_vm10 = vcmp.lt.s32.totalorder %v5214_v60, 2  ;;  %v2134_v35 = vadd.s32 3, %v2027_v21  ;;  %v5387_v15 = vshll.u32 %v2490_v0, 8  ;;  %v5389_v29 = vmul.f32 %v3556_v7, %v1632_v40 }
 0x14c   : > { %6140 = vst [vmem:[#allocation28_spill] sm:$0xff] %v5384_v23  ;;  %v5391_v26 = vmul.f32 %v3557_v9, %v1632_v40  ;;  %v5396_v48 = vmul.f32 %v5074_v47, %v5138_v14  ;;  %v2525_v50 = vsel %vm2515_vm11, %v2522_v12, %v2524_v34  ;;  %v1576_v62 = vadd.f32 %v5276_v59, %v1563_v32  ;;  %v3620_v14 = vld [vmem:[%s4199_s29 + $0x5b8] sm:$0xff] }
 0x14d   : > { %v1580_v10 = vadd.f32 %v5278_v31, %v1567_v42  ;;  %v5402_v25 = vmul.f32 %v3558_v54, %v1632_v40  ;;  %vm1823_vm12 = vweird.f32 %v6126_v38  ;;  %v2529_v36 = vsel %vm2515_vm11, %v2526_v4, %v2528_v51 }
 0x14e   : > { %6141 = vst [vmem:[#allocation29_spill] sm:$0xff] %v5396_v48  ;;  %v1585_v33 = vadd.f32 %v5280_v37, %v1572_v43  ;;  %v1827_v47 = vxor.u32 2147483648, %v3902_v30  ;;  %v1830_v18 = vxor.u32 2147483648, %v3900_v27  ;;  %vm2030_vm13 = vweird.f32 %v4465_v57  ;;  %v3595_v57 = vld [vmem:[%s4199_s29 + $0x4b0] sm:$0xff] }
 0x14f   : > { %v2031_v0 = vand.u32 3, %v2027_v21  ;;  %v5411_v20 = vmul.f32 %v3559_v13, %v1645_v56  ;;  %v2135_v59 = vand.u32 3, %v2134_v35  ;;  %v5418_v40 = vmul.f32 %v3560_v28, %v1645_v56 }
 0x150   : > { %v5414_v31 = vmul.u32.u64.low %v5387_v15, %v2525_v50  ;;  %v5415_v32 = vmul.u32.u64.high %v5387_v15, %v2525_v50, %v5414_v31  ;;  %v2498_v42 = vshrl.u32 %v6096_v22, %v5273_v24  ;;  %v1589_v9 = vadd.f32 %v5282_v17, %v1576_v62 }
 0x151   : > { %6142 = vst [vmem:[#allocation30_spill] sm:$0xff] %v5418_v40  ;;  %v5423_v37 = vmul.u32.u64.low %v5387_v15, %v2529_v36  ;;  %v5424_v7 = vmul.u32.u64.high %v5387_v15, %v2529_v36, %v5423_v37  ;;  %v1593_v21 = vadd.f32 %v5284_v3, %v1580_v10  ;;  %v5428_v12 = vmul.f32 %v3561_v6, %v1645_v56  ;;  %v3904_v4 = vpop.eup %3903  ;;  %v3598_v36 = vld [vmem:[%s4199_s29 + $0x4b8] sm:$0xff] }
 0x152   : > { %v2519_v34 = vsel %vm2517_vm3, %v2507_v19, 2102212464  ;;  %v5433_v43 = vadd.f32 %v5150_v44, %v1585_v33  ;;  %v1828_v54 = vsel %vm1826_vm6, %v3900_v27, %v1827_v47  ;;  %v1831_v24 = vsel %vm1829_vm7, %v1830_v18, %v3902_v30  ;;  %v6144_v33 = vld [vmem:[#allocation23_spill] sm:$0xff] }
 0x153   : > { %6143 = vst [vmem:[#allocation31_spill] sm:$0xff] %v5428_v12  ;;  %vm2033_vm15 = vcmp.eq.s32.totalorder %v2031_v0, 0  ;;  %v1932_v17 = vsel %vm1930_vm8, %v3900_v27, %v1827_v47  ;;  %v1935_v3 = vsel %vm1933_vm14, %v1830_v18, %v3902_v30  ;;  %vm2036_vm0 = vcmp.eq.s32.totalorder %v2031_v0, 2  ;;  %v3906_v19 = vpop.eup %3905 }
 0x154   : > { %vm2140_vm1 = vcmp.eq.s32.totalorder %v2135_v59, 2  ;;  %v2037_v56 = vxor.u32 2147483648, %v3904_v4  ;;  %vm2137_vm2 = vcmp.eq.s32.totalorder %v2135_v59, 0  ;;  %v2518_v44 = vsel %vm2514_vm4, %v2498_v42, %v5332_v2  ;;  %v3601_v42 = vld [vmem:[%s4199_s29 + $0x4c0] sm:$0xff] }
 0x155   : > { %v2520_v51 = vsel %vm2516_vm5, %v5334_v41, %v2519_v34  ;;  %v1832_v27 = vsel %vm1825_vm9, %v1828_v54, %v1831_v24  ;;  %vm2032_vm3 = vcmp.lt.s32.totalorder %v2031_v0, 2  ;;  %v2034_v35 = vxor.u32 2147483648, %v3906_v19  ;;  %v3599_v0 = vld [vmem:[%s4199_s29 + $0x580] sm:$0xff]  ;;  %v3602_v34 = vld [vmem:[%s4199_s29 + $0x588] sm:$0xff]  ;;  %v3603_v54 = vld [vmem:[%s4199_s29 + $0x650] sm:$0xff] }
 0x156   : > { %vm2136_vm6 = vcmp.lt.s32.totalorder %v2135_v59, 2  ;;  %v5452_v30 = vadd.f32 %v5153_v53, %v1589_v9  ;;  %v1936_v13 = vsel %vm1929_vm10, %v1932_v17, %v1935_v3  ;;  %v2038_v50 = vsel %vm2036_vm0, %v2037_v56, %v3906_v19  ;;  %v3600_v59 = vld [vmem:[%s4199_s29 + $0x648] sm:$0xff]  ;;  %v3596_v17 = vld [vmem:[%s4199_s29 + $0x578] sm:$0xff]  ;;  %v3597_v3 = vld [vmem:[%s4199_s29 + $0x640] sm:$0xff] }
 0x157   : > { %v2142_v2 = vsel %vm2140_vm1, %v2037_v56, %v3906_v19  ;;  %v2035_v41 = vsel %vm2033_vm15, %v3904_v4, %v2034_v35  ;;  %v2139_v62 = vsel %vm2137_vm2, %v3904_v4, %v2034_v35  ;;  %v2521_v5 = vsel %vm2515_vm11, %v2518_v44, %v2520_v51 }
 0x158   : > { %v2540_v10 = vadd.s32 1, %v5415_v32  ;;  %v5462_v53 = vsel %vm1823_vm12, nan, %v1832_v27  ;;  %v2039_v60 = vsel %vm2032_vm3, %v2035_v41, %v2038_v50  ;;  %v2143_v28 = vsel %vm2136_vm6, %v2139_v62, %v2142_v2  ;;  %v3605_v62 = vld [vmem:[%s4199_s29 + $0x590] sm:$0xff] }
 0x159   : > { %vm2539_vm4 = vc.u32 %v5424_v7, %v5414_v31  ;;  %v5468_v6 = vadd.f32 %v6144_v33, %v1593_v21  ;;  %v5472_v16 = vsel %vm1823_vm12, nan, %v1936_v13  ;;  %v2040_v47 = vsel %vm2030_vm13, nan, %v2039_v60  ;;  %v3610_v13 = vld [vmem:[%s4199_s29 + $0x4d8] sm:$0xff]  ;;  %v3607_v33 = vld [vmem:[%s4199_s29 + $0x4d0] sm:$0xff] }
 0x15a   : > { %v2144_v18 = vsel %vm2030_vm13, nan, %v2143_v28  ;;  %v5481_v37 = vmul.f32 1.4142135, %v2040_v47  ;;  %v2154_v21 = vmul.f32 %v2040_v47, %v2040_v47  ;;  %v5488_v24 = vmul.f32 1.4142135, %v5462_v53 }
 0x15b   : > { %v5483_v9 = vmul.f32 1.4142135, %v2144_v18  ;;  %v2155_v38 = vmul.f32 %v2144_v18, %v2144_v18  ;;  %v2157_v4 = vmul.f32 %v2144_v18, %v2040_v47  ;;  %v2537_v19 = vmul.u32 %v5387_v15, %v2521_v5  ;;  %v3608_v47 = vld [vmem:[%s4199_s29 + $0x598] sm:$0xff] }
 0x15c   : > { %v2541_v56 = vsel %vm2539_vm4, %v2540_v10, %v5415_v32  ;;  %v2171_v51 = vmul.f32 %v3598_v36, %v5481_v37  ;;  %v2175_v27 = vmul.f32 %v3599_v0, %v5481_v37  ;;  %v2179_v35 = vmul.f32 %v3600_v59, %v5481_v37  ;;  %v3604_v32 = vld [vmem:[%s4199_s29 + $0x4c8] sm:$0xff]  ;;  %v3606_v36 = vld [vmem:[%s4199_s29 + $0x658] sm:$0xff]  ;;  %v3609_v0 = vld [vmem:[%s4199_s29 + $0x660] sm:$0xff] }
 0x15d   : > { %v2156_v44 = vsub.f32 %v2154_v21, %v2155_v38  ;;  %v2158_v50 = vadd.f32 %v2157_v4, %v2157_v4  ;;  %v2183_v15 = vmul.f32 %v3601_v42, %v5483_v9  ;;  %v2187_v2 = vmul.f32 %v3602_v34, %v5483_v9 }
 0x15e   : > { %v2191_v41 = vmul.f32 %v3603_v54, %v5483_v9  ;;  %v2172_v10 = vadd.f32 %v3595_v57, %v2171_v51  ;;  %v2176_v60 = vadd.f32 %v3596_v17, %v2175_v27  ;;  %v2180_v28 = vadd.f32 %v3597_v3, %v2179_v35  ;;  %v3611_v57 = vld [vmem:[%s4199_s29 + $0x5a0] sm:$0xff]  ;;  %v3612_v17 = vld [vmem:[%s4199_s29 + $0x668] sm:$0xff] }
 0x15f   : > { %v5507_v5 = vmul.f32 1.4142135, %v2156_v44  ;;  %v5512_v18 = vmul.f32 1.4142135, %v2158_v50  ;;  %v2219_v59 = vmul.f32 %v3610_v13, %v5488_v24  ;;  %v2229_v42 = vmul.f32 %v5481_v37, %v5488_v24  ;;  %v3614_v13 = vld [vmem:[%s4199_s29 + $0x5a8] sm:$0xff]  ;;  %v3615_v50 = vld [vmem:[%s4199_s29 + $0x670] sm:$0xff] }
 0x160   : > { %v5518_v21 = vadd.s32 %v2541_v56, %v2537_v19  ;;  %v2184_v38 = vadd.f32 %v2183_v15, %v2172_v10  ;;  %v2188_v34 = vadd.f32 %v2187_v2, %v2176_v60  ;;  %v2192_v54 = vadd.f32 %v2191_v41, %v2180_v28  ;;  %v3613_v19 = vld [vmem:[%s4199_s29 + $0x4e0] sm:$0xff] }
 0x161   : > { %v2195_v4 = vmul.f32 %v3604_v32, %v5507_v5  ;;  %v2199_v3 = vmul.f32 %v3605_v62, %v5507_v5  ;;  %v2203_v44 = vmul.f32 %v3606_v36, %v5507_v5  ;;  %v2207_v51 = vmul.f32 %v3607_v33, %v5512_v18  ;;  %v6145_v2 = vld [vmem:[#allocation21_spill] sm:$0xff]  ;;  %v3616_v36 = vld [vmem:[%s4199_s29 + $0x4e8] sm:$0xff] }
 0x162   : > { %v2211_v27 = vmul.f32 %v3608_v47, %v5512_v18  ;;  %v2215_v35 = vmul.f32 %v3609_v0, %v5512_v18  ;;  %v2242_v15 = vmul.f32 %v5483_v9, %v5488_v24  ;;  %v6146_v41 = vand.u32 2139095040, %v6145_v2  ;;  %v3617_v0 = vld [vmem:[%s4199_s29 + $0x5b0] sm:$0xff] }
 0x163   : > { %v2196_v56 = vadd.f32 %v2195_v4, %v2184_v38  ;;  %v2200_v62 = vadd.f32 %v2199_v3, %v2188_v34  ;;  %v2204_v10 = vadd.f32 %v2203_v44, %v2192_v54  ;;  %v2223_v60 = vmul.f32 %v3611_v57, %v5488_v24  ;;  %v3618_v38 = vld [vmem:[%s4199_s29 + $0x678] sm:$0xff]  ;;  %v3619_v57 = vld [vmem:[%s4199_s29 + $0x4f0] sm:$0xff] }
 0x164   : > { %v2693_v32 = vshrl.u32 %v6146_v41, 23  ;;  %v2227_v28 = vmul.f32 %v3612_v17, %v5488_v24  ;;  %v2232_v47 = vmul.f32 %v3613_v19, %v2229_v42  ;;  %v2255_v4 = vmul.f32 %v5507_v5, %v5488_v24 }
 0x165   : > { %v2208_v33 = vadd.f32 %v2207_v51, %v2196_v56  ;;  %v2543_v46 = vadd.s32 536870912, %v5518_v21  ;;  %v2212_v41 = vadd.f32 %v2211_v27, %v2200_v62  ;;  %v2216_v34 = vadd.f32 %v2215_v35, %v2204_v10  ;;  %v3621_v51 = vld [vmem:[%s4199_s29 + $0x680] sm:$0xff]  ;;  %v3622_v27 = vld [vmem:[%s4199_s29 + $0x4f8] sm:$0xff] }
 0x166   : > { %v2236_v54 = vmul.f32 %v3614_v13, %v2229_v42  ;;  %v2240_v3 = vmul.f32 %v3615_v50, %v2229_v42  ;;  %v2245_v44 = vmul.f32 %v3616_v36, %v2242_v15  ;;  %v2268_v19 = vmul.f32 %v5512_v18, %v5488_v24  ;;  %v3623_v50 = vld [vmem:[%s4199_s29 + $0x5c0] sm:$0xff] }
 0x167   : > { %v2220_v17 = vadd.f32 %v2219_v59, %v2208_v33  ;;  %v3680_v56 = vadd.s32 4294967169, %v2693_v32  ;;  %v2224_v48 = vadd.f32 %v2223_v60, %v2212_v41  ;;  %v2228_v23 = vadd.f32 %v2227_v28, %v2216_v34  ;;  %v3624_v59 = vld [vmem:[%s4199_s29 + $0x688] sm:$0xff]  ;;  %v3625_v60 = vld [vmem:[%s4199_s29 + $0x500] sm:$0xff] }
 0x168   : > { %v2249_v12 = vmul.f32 %v3617_v0, %v2242_v15  ;;  %v2253_v40 = vmul.f32 %v3618_v38, %v2242_v15  ;;  %v5550_v35 = vmul.f32 1.4142135, %v5472_v16  ;;  %v2258_v13 = vmul.f32 %v3619_v57, %v2255_v4  ;;  %v3626_v34 = vld [vmem:[%s4199_s29 + $0x5c8] sm:$0xff] }
 0x169   : > { %v2233_v42 = vadd.f32 %v2232_v47, %v2220_v17  ;;  %v5554_v62 = vshrl.u32 %v2543_v46, 30  ;;  %v2237_v10 = vadd.f32 %v2236_v54, %v2224_v48  ;;  %v2241_v24 = vadd.f32 %v2240_v3, %v2228_v23  ;;  %v3628_v3 = vld [vmem:[%s4199_s29 + $0x508] sm:$0xff]  ;;  %v3565_v17 = vld [vmem:[%s4199_s29 + $0x300] sm:$0xff] }
 0x16a   : > { %v2262_v32 = vmul.f32 %v3620_v14, %v2255_v4  ;;  %v2266_v36 = vmul.f32 %v3621_v51, %v2255_v4  ;;  %v1610_v15 = vadd.f32 %v5288_v55, %v5433_v43  ;;  %v2271_v33 = vmul.f32 %v3622_v27, %v2268_v19  ;;  %v3627_v14 = vld [vmem:[%s4199_s29 + $0x690] sm:$0xff] }
 0x16b   : > { %v2246_v28 = vadd.f32 %v2245_v44, %v2233_v42  ;;  %v2699_v0 = vadd.s32 1, %v3680_v56  ;;  %v2250_v47 = vadd.f32 %v2249_v12, %v2237_v10  ;;  %v2254_v38 = vadd.f32 %v2253_v40, %v2241_v24  ;;  %v3566_v44 = vld [vmem:[%s4199_s29 + $0x3c8] sm:$0xff]  ;;  %v3630_v24 = vld [vmem:[%s4199_s29 + $0x698] sm:$0xff] }
 0x16c   : > { %v2275_v41 = vmul.f32 %v3623_v50, %v2268_v19  ;;  %v2279_v46 = vmul.f32 %v3624_v59, %v2268_v19  ;;  %v2283_v23 = vmul.f32 %v3625_v60, %v5550_v35  ;;  %v2293_v4 = vmul.f32 %v5481_v37, %v5550_v35  ;;  %v3629_v50 = vld [vmem:[%s4199_s29 + $0x5d0] sm:$0xff] }
 0x16d   : > { %v2259_v48 = vadd.f32 %v2258_v13, %v2246_v28  ;;  %v2545_v55 = vshll.u32 %v5554_v62, 30  ;;  %v2149_v43 = vmul.f32 %v5462_v53, %v5462_v53  ;;  %v2150_v40 = vmul.f32 %v5472_v16, %v5472_v16 }
 0x16e   : > { %v2263_v12 = vadd.f32 %v2262_v32, %v2250_v47  ;;  %v2267_v54 = vadd.f32 %v2266_v36, %v2254_v38  ;;  %v1614_v57 = vadd.f32 %v5312_v52, %v5452_v30  ;;  %v2287_v19 = vmul.f32 %v3626_v34, %v5550_v35  ;;  %v3567_v34 = vld [vmem:[%s4199_s29 + $0x490] sm:$0xff] }
 0x16f   : > { %v2272_v51 = vadd.f32 %v2271_v33, %v2259_v48  ;;  %v2689_v56 = vand.u32 2147483647, %v6145_v2  ;;  %v2291_v13 = vmul.f32 %v3627_v14, %v5550_v35  ;;  %vm2700_vm5 = vcmp.gt.s32.totalorder %v2699_v0, 0  ;;  %v3631_v33 = vld [vmem:[%s4199_s29 + $0x510] sm:$0xff] }
 0x170   : > { %v2276_v27 = vadd.f32 %v2275_v41, %v2263_v12  ;;  %v2280_v42 = vadd.f32 %v2279_v46, %v2267_v54  ;;  %v2296_v10 = vmul.f32 %v3628_v3, %v2293_v4  ;;  %v2306_v52 = vmul.f32 %v5483_v9, %v5550_v35 }
 0x171   : > { %v2284_v59 = vadd.f32 %v2283_v23, %v2272_v51  ;;  %v5582_v30 = vsub.s32 %v5518_v21, %v2545_v55  ;;  %v1618_v32 = vadd.f32 %v5314_v39, %v5468_v6  ;;  %v5587_v36 = vmul.f32 %v3565_v17, %v5380_v1  ;;  %v3632_v6 = vld [vmem:[%s4199_s29 + $0x5d8] sm:$0xff] }
 0x172   : > { %v5590_v60 = vmul.f32 %v3566_v44, %v5380_v1  ;;  %v2151_v28 = vsub.f32 %v2149_v43, %v2150_v40  ;;  %v1623_v47 = vadd.f32 %v5318_v49, %v1610_v15  ;;  %v2288_v38 = vadd.f32 %v2287_v19, %v2276_v27  ;;  %v3633_v43 = vld [vmem:[%s4199_s29 + $0x6a0] sm:$0xff]  ;;  %v3634_v40 = vld [vmem:[%s4199_s29 + $0x518] sm:$0xff]  ;;  %v3640_v44 = vld [vmem:[%s4199_s29 + $0x528] sm:$0xff] }
 0x173   : > { %v2300_v41 = vmul.f32 %v3629_v50, %v2293_v4  ;;  %v2701_v46 = vsel %vm2700_vm5, %v2699_v0, 0  ;;  %v1627_v21 = vadd.f32 %v5341_v8, %v1614_v57  ;;  %v2292_v48 = vadd.f32 %v2291_v13, %v2280_v42  ;;  %v3641_v19 = vld [vmem:[%s4199_s29 + $0x5f0] sm:$0xff]  ;;  %v3642_v27 = vld [vmem:[%s4199_s29 + $0x6b8] sm:$0xff]  ;;  %v3636_v50 = vld [vmem:[%s4199_s29 + $0x6a8] sm:$0xff] }
 0x174   : > { %v2304_v39 = vmul.f32 %v3630_v24, %v2293_v4  ;;  %v2696_v23 = vand.u32 8388607, %v2689_v56  ;;  %v2297_v14 = vadd.f32 %v2296_v10, %v2284_v59  ;;  %v2309_v55 = vmul.f32 %v3631_v33, %v2306_v52  ;;  %v3637_v24 = vld [vmem:[%s4199_s29 + $0x520] sm:$0xff] }
 0x175   : > { %v2319_v49 = vmul.f32 %v5507_v5, %v5550_v35  ;;  %v2548_v15 = vsub.s32 0, %v5582_v30  ;;  %v1631_v8 = vadd.f32 %v5350_v61, %v1618_v32  ;;  %v2152_v0 = vmul.f32 %v5472_v16, %v5462_v53  ;;  %v3635_v16 = vld [vmem:[%s4199_s29 + $0x5e0] sm:$0xff] }
 0x176   : > { %v5606_v4 = vmul.f32 1.4142135, %v2151_v28  ;;  %v2703_v12 = vand.u32 31, %v2701_v46  ;;  %v5610_v54 = vadd.f32 %v5389_v29, %v1623_v47  ;;  %v5613_v3 = vmul.f32 %v3567_v34, %v5380_v1 }
 0x177   : > { %v2301_v57 = vadd.f32 %v2300_v41, %v2288_v38  ;;  %v2313_v17 = vmul.f32 %v3632_v6, %v2306_v52  ;;  %v5617_v61 = vadd.f32 %v5391_v26, %v1627_v21  ;;  %v2305_v51 = vadd.f32 %v2304_v39, %v2292_v48  ;;  %v3638_v21 = vld [vmem:[%s4199_s29 + $0x5e8] sm:$0xff]  ;;  %v3639_v6 = vld [vmem:[%s4199_s29 + $0x6b0] sm:$0xff] }
 0x178   : > { %v2317_v53 = vmul.f32 %v3633_v43, %v2306_v52  ;;  %v2697_v42 = vor.u32 8388608, %v2696_v23  ;;  %v2310_v13 = vadd.f32 %v2309_v55, %v2297_v14  ;;  %v2322_v29 = vmul.f32 %v3634_v40, %v2319_v49 }
 0x179   : > { %v2332_v1 = vmul.f32 %v5512_v18, %v5550_v35  ;;  %v3673_v59 = vmin.u32 %v2548_v15, %v5582_v30  ;;  %v5627_v10 = vadd.f32 %v5402_v25, %v1631_v8  ;;  %v5629_v26 = vadd.f32 %v2152_v0, %v2152_v0 }
 0x17a   : > { %v2347_v52 = vmul.f32 %v3640_v44, %v5606_v4  ;;  %v2704_v32 = vsub.s32 32, %v2703_v12  ;;  %v2314_v28 = vadd.f32 %v2313_v17, %v2301_v57  ;;  %v2326_v33 = vmul.f32 %v3635_v16, %v2319_v49  ;;  %v3643_v44 = vld [vmem:[%s4199_s29 + $0x530] sm:$0xff] }
 0x17b   : > { %v2351_v47 = vmul.f32 %v3641_v19, %v5606_v4  ;;  %v2355_v38 = vmul.f32 %v3642_v27, %v5606_v4  ;;  %v2318_v41 = vadd.f32 %v2317_v53, %v2305_v51  ;;  %v2330_v35 = vmul.f32 %v3636_v50, %v2319_v49  ;;  %v3644_v51 = vld [vmem:[%s4199_s29 + $0x5f8] sm:$0xff]  ;;  %v3645_v19 = vld [vmem:[%s4199_s29 + $0x6c0] sm:$0xff] }
 0x17c   : > { %v5636_v34 = vshrl.u32 %v2701_v46, 5  ;;  %v5638_v25 = vshll.u32 %v2697_v42, 8  ;;  %v2323_v48 = vadd.f32 %v2322_v29, %v2310_v13  ;;  %v2335_v39 = vmul.f32 %v3637_v24, %v2332_v1 }
 0x17d   : > { %v2550_v23 = vclz %v3673_v59  ;;  %v2706_v14 = vshll.u32 %v6096_v22, %v2703_v12  ;;  %v2707_v55 = vshrl.u32 %v6116_v63, %v2704_v32  ;;  %v2709_v43 = vshll.u32 %v6116_v63, %v2703_v12 }
 0x17e   : > { %v2712_v49 = vshll.u32 %v6117_v45, %v2703_v12  ;;  %v2715_v46 = vshll.u32 %v6115_v11, %v2703_v12  ;;  %v2327_v15 = vadd.f32 %v2326_v33, %v2314_v28  ;;  %v2339_v8 = vmul.f32 %v3638_v21, %v2332_v1  ;;  %v3646_v28 = vld [vmem:[%s4199_s29 + $0x538] sm:$0xff]  ;;  %v3647_v33 = vld [vmem:[%s4199_s29 + $0x600] sm:$0xff] }
 0x17f   : > { %v2357_v0 = vmul.f32 %v5606_v4, %v5481_v37  ;;  %v2710_v40 = vshrl.u32 %v6117_v45, %v2704_v32  ;;  %v2331_v57 = vadd.f32 %v2330_v35, %v2318_v41  ;;  %v2343_v17 = vmul.f32 %v3639_v6, %v2332_v1  ;;  %v3648_v6 = vld [vmem:[%s4199_s29 + $0x6c8] sm:$0xff] }
 0x180   : > { %v2713_v53 = vshrl.u32 %v6115_v11, %v2704_v32  ;;  %v2716_v63 = vshrl.u32 %v6095_v58, %v2704_v32  ;;  %v2336_v16 = vadd.f32 %v2335_v39, %v2323_v48  ;;  %v3674_v27 = vadd.s32 4294967294, %v2550_v23 }
 0x181   : > { %v2718_v42 = vshll.u32 %v6095_v58, %v2703_v12  ;;  %v6147_v13 = vmov 1326507024   ;;  %v2370_v45 = vmul.f32 %v5606_v4, %v5483_v9  ;;  %v2705_v50 = vshrl.u32 %v6096_v22, %v2704_v32 }
 0x182   : > { %v2719_v29 = vshrl.u32 %v6147_v13, %v2704_v32  ;;  %v2708_v1 = vor.u32 %v2707_v55, %v2706_v14  ;;  %vm2721_vm7 = vcmp.lt.s32.totalorder %v5636_v34, 1  ;;  %v2340_v59 = vadd.f32 %v2339_v8, %v2327_v15 }
 0x183   : > { %v2360_v11 = vmul.f32 %v3643_v44, %v2357_v0  ;;  %v2364_v24 = vmul.f32 %v3644_v51, %v2357_v0  ;;  %v2711_v41 = vor.u32 %v2710_v40, %v2709_v43  ;;  %v2344_v35 = vadd.f32 %v2343_v17, %v2331_v57 }
 0x184   : > { %v2368_v21 = vmul.f32 %v3645_v19, %v2357_v0  ;;  %v2714_v58 = vor.u32 %v2713_v53, %v2712_v49  ;;  %v2717_v12 = vor.u32 %v2716_v63, %v2715_v46  ;;  %v2348_v48 = vadd.f32 %v2347_v52, %v2336_v16  ;;  %v3649_v0 = vld [vmem:[%s4199_s29 + $0x540] sm:$0xff]  ;;  %v3650_v63 = vld [vmem:[%s4199_s29 + $0x608] sm:$0xff] }
 0x185   : > { %vm3675_vm8 = vcmp.lt.s32.totalorder %v3674_v27, 0  ;;  %v2720_v39 = vor.u32 %v2719_v29, %v2718_v42  ;;  %vm2724_vm14 = vcmp.lt.s32.totalorder %v5636_v34, 4  ;;  %v2373_v22 = vmul.f32 %v3646_v28, %v2370_v45  ;;  %v3651_v29 = vld [vmem:[%s4199_s29 + $0x6d0] sm:$0xff] }
 0x186   : > { %v2377_v32 = vmul.f32 %v3647_v33, %v2370_v45  ;;  %v2383_v23 = vmul.f32 %v5507_v5, %v5606_v4  ;;  %vm2723_vm11 = vcmp.lt.s32.totalorder %v5636_v34, 3  ;;  %v2352_v14 = vadd.f32 %v2351_v47, %v2340_v59  ;;  %v3652_v33 = vld [vmem:[%s4199_s29 + $0x548] sm:$0xff] }
 0x187   : > { %vm2722_vm9 = vcmp.lt.s32.totalorder %v5636_v34, 2  ;;  %v2726_v55 = vsel %vm2724_vm14, %v2714_v58, 2102212464  ;;  %v2729_v52 = vsel %vm2721_vm7, %v2708_v1, %v2711_v41  ;;  %v2356_v43 = vadd.f32 %v2355_v38, %v2344_v35  ;;  %v6148_v35 = vld [vmem:[#allocation13_spill] sm:$0xff] }
 0x188   : > { %v5672_v49 = vsel %vm3675_vm8, 0, %v3674_v27  ;;  %v2730_v46 = vsel %vm2724_vm14, %v2717_v12, 920167782  ;;  %v2733_v15 = vsel %vm2721_vm7, %v2711_v41, %v2714_v58  ;;  %v2361_v8 = vadd.f32 %v2360_v11, %v2348_v48  ;;  %v3653_v48 = vld [vmem:[%s4199_s29 + $0x610] sm:$0xff] }
 0x189   : > { %v2381_v47 = vmul.f32 %v3648_v6, %v2370_v45  ;;  %v2731_v40 = vsel %vm2723_vm11, %v2714_v58, %v2730_v46  ;;  %v2734_v57 = vsel %vm2724_vm14, %v2720_v39, 1326507024  ;;  %v2725_v38 = vsel %vm2721_vm7, %v2705_v50, %v2708_v1 }
 0x18a   : > { %v2727_v17 = vsel %vm2723_vm11, %v2711_v41, %v2726_v55  ;;  %v2732_v44 = vsel %vm2722_vm9, %v2729_v52, %v2731_v40  ;;  %v2735_v51 = vsel %vm2723_vm11, %v2717_v12, %v2734_v57  ;;  %v2365_v53 = vadd.f32 %v2364_v24, %v2352_v14  ;;  %v6151_v52 = vld [vmem:[#allocation30_spill] sm:$0xff] }
 0x18b   : > { %v2396_v16 = vmul.f32 %v5512_v18, %v5606_v4  ;;  %v2558_v19 = vsub.s32 4294967266, %v5672_v49  ;;  %v2736_v27 = vsel %vm2722_vm9, %v2733_v15, %v2735_v51  ;;  %v2369_v42 = vadd.f32 %v2368_v21, %v2356_v43  ;;  %v6149_v21 = vld [vmem:[#allocation11_spill] sm:$0xff]  ;;  %v3656_v51 = vld [vmem:[%s4199_s29 + $0x618] sm:$0xff] }
 0x18c   : > { %v2386_v13 = vmul.f32 %v3649_v0, %v2383_v23  ;;  %v5699_v45 = vmul.u32.u64.low %v5638_v25, %v2736_v27  ;;  %v5700_v50 = vmul.u32.u64.high %v5638_v25, %v2736_v27, %v5699_v45  ;;  %v2374_v1 = vadd.f32 %v2373_v22, %v2361_v8  ;;  %v3655_v15 = vld [vmem:[%s4199_s29 + $0x550] sm:$0xff]  ;;  %v3568_v0 = vld [vmem:[%s4199_s29 + $0x308] sm:$0xff]  ;;  %v3657_v27 = vld [vmem:[%s4199_s29 + $0x6e0] sm:$0xff] }
 0x18d   : > { %v2728_v59 = vsel %vm2722_vm9, %v2725_v38, %v2727_v17  ;;  %v5705_v11 = vmul.u32.u64.low %v5638_v25, %v2732_v44  ;;  %v5706_v4 = vmul.u32.u64.high %v5638_v25, %v2732_v44, %v5705_v11  ;;  %v1649_v24 = vadd.f32 %v5411_v20, %v5610_v54  ;;  %v6150_v54 = vld [vmem:[#allocation19_spill] sm:$0xff]  ;;  %v6155_v45 = vld [vmem:[#allocation28_spill] sm:$0xff] }
 0x18e   : > { %v2390_v28 = vmul.f32 %v3650_v63, %v2383_v23  ;;  %v2538_v41 = vadd.s32 %v5414_v31, %v5424_v7  ;;  %v3224_v58 = vadd.f32 %v6149_v21, %v6148_v35  ;;  %v2378_v12 = vadd.f32 %v2377_v32, %v2365_v53  ;;  %v6152_v8 = vld [vmem:[#allocation27_spill] sm:$0xff] }
 0x18f   : > { %v2394_v34 = vmul.f32 %v3651_v29, %v2383_v23  ;;  %v2554_v39 = vsub.s32 32, %v5672_v49  ;;  %v2559_v22 = vadd.s32 127, %v2558_v19  ;;  %v2382_v6 = vadd.f32 %v2381_v47, %v2369_v42  ;;  %v3654_v23 = vld [vmem:[%s4199_s29 + $0x6d8] sm:$0xff] }
 0x190   : > { %v2744_v20 = vmul.u32 %v5638_v25, %v2728_v59  ;;  %vm2746_vm10 = vc.u32 %v5700_v50, %v5705_v11  ;;  %v3225_v31 = vadd.f32 %v3224_v58, %v6150_v54  ;;  %v5723_v7 = vmul.f32 1.4142135, %v5629_v26  ;;  %v3569_v26 = vld [vmem:[%s4199_s29 + $0x3d0] sm:$0xff]  ;;  %v3658_v59 = vld [vmem:[%s4199_s29 + $0x558] sm:$0xff] }
 0x191   : > { %v2387_v32 = vadd.f32 %v2386_v13, %v2374_v1  ;;  %v2399_v14 = vmul.f32 %v3652_v33, %v2396_v16  ;;  %v2747_v55 = vadd.s32 1, %v5706_v4  ;;  %v1653_v43 = vadd.f32 %v6151_v52, %v5617_v61  ;;  %v6154_v13 = vld [vmem:[#allocation24_spill] sm:$0xff]  ;;  %v3571_v33 = vld [vmem:[%s4199_s29 + $0x310] sm:$0xff] }
 0x192   : > { %v2403_v46 = vmul.f32 %v3653_v48, %v2396_v16  ;;  %v2555_v25 = vshll.u32 %v5582_v30, %v5672_v49  ;;  %v3226_v47 = vadd.f32 %v3225_v31, %v6152_v8  ;;  %v2391_v40 = vadd.f32 %v2390_v28, %v2378_v12  ;;  %v6153_v49 = vld [vmem:[#allocation31_spill] sm:$0xff]  ;;  %v3570_v28 = vld [vmem:[%s4199_s29 + $0x498] sm:$0xff] }
 0x193   : > { %v2556_v57 = vshrl.u32 %v2538_v41, %v2554_v39  ;;  %v2560_v38 = vshll.u32 %v2559_v22, 23  ;;  %v2748_v17 = vsel %vm2746_vm10, %v2747_v55, %v5706_v4  ;;  %v2395_v61 = vadd.f32 %v2394_v34, %v2382_v6  ;;  %v6156_v34 = vld [vmem:[#allocation25_spill] sm:$0xff]  ;;  %v6157_v6 = vld [vmem:[#allocation26_spill] sm:$0xff] }
 0x194   : > { %v2407_v44 = vmul.f32 %v3654_v23, %v2396_v16  ;;  %v2749_v30 = vadd.s32 %v2748_v17, %v2744_v20  ;;  %3907 = vrcp.f32 %v3226_v47  ;;  %v1657_v53 = vadd.f32 %v6153_v49, %v5627_v10  ;;  %v3659_v39 = vld [vmem:[%s4199_s29 + $0x620] sm:$0xff]  ;;  %v3572_v47 = vld [vmem:[%s4199_s29 + $0x3d8] sm:$0xff] }
 0x195   : > { %v2400_v63 = vadd.f32 %v2399_v14, %v2387_v32  ;;  %v2411_v19 = vmul.f32 %v3655_v15, %v5723_v7  ;;  %v2421_v42 = vmul.f32 %v5723_v7, %v5481_v37  ;;  %v1661_v29 = vadd.f32 %v6154_v13, %v1649_v24  ;;  %v3660_v14 = vld [vmem:[%s4199_s29 + $0x6e8] sm:$0xff]  ;;  %v3661_v15 = vld [vmem:[%s4199_s29 + $0x560] sm:$0xff]  ;;  %v6160_v13 = vld [vmem:[#allocation15_spill] sm:$0xff] }
 0x196   : > { %v1686_v1 = vmul.f32 %v3568_v0, %v6155_v45  ;;  %v1690_v16 = vmul.f32 %v3569_v26, %v6155_v45  ;;  %v2750_v4 = vadd.s32 536870912, %v2749_v30  ;;  %v2404_v10 = vadd.f32 %v2403_v46, %v2391_v40  ;;  %v3573_v0 = vld [vmem:[%s4199_s29 + $0x4a0] sm:$0xff] }
 0x197   : > { %v2415_v41 = vmul.f32 %v3656_v51, %v5723_v7  ;;  %v2557_v58 = vor.u32 %v2556_v57, %v2555_v25  ;;  %v2561_v12 = vor.u32 4788187, %v2560_v38  ;;  %v1665_v37 = vadd.f32 %v6156_v34, %v1653_v43  ;;  %v6158_v43 = vld [vmem:[#allocation29_spill] sm:$0xff]  ;;  %v3576_v34 = vld [vmem:[%s4199_s29 + $0x4a8] sm:$0xff] }
 0x198   : > { %v2408_v24 = vadd.f32 %v2407_v44, %v2395_v61  ;;  %v2419_v48 = vmul.f32 %v3657_v27, %v5723_v7  ;;  %v5756_v22 = vshrl.u32 %v2750_v4, 30  ;;  %v1669_v20 = vadd.f32 %v6157_v6, %v1657_v53  ;;  %v3662_v61 = vld [vmem:[%s4199_s29 + $0x628] sm:$0xff]  ;;  %v6159_v44 = vld [vmem:[#allocation20_spill] sm:$0xff] }
 0x199   : > { %v2412_v31 = vadd.f32 %v2411_v19, %v2400_v63  ;;  %v2424_v32 = vmul.f32 %v3658_v59, %v2421_v42  ;;  %v2434_v23 = vmul.f32 %v5723_v7, %v5483_v9  ;;  %v1674_v55 = vadd.f32 %v5587_v36, %v1661_v29  ;;  %v3663_v19 = vld [vmem:[%s4199_s29 + $0x6f0] sm:$0xff]  ;;  %v6161_v29 = vld [vmem:[#allocation22_spill] sm:$0xff] }
 0x19a   : > { %v1694_v52 = vmul.f32 %v3570_v28, %v6155_v45  ;;  %v1699_v46 = vmul.f32 %v3571_v33, %v6158_v43  ;;  %v2752_v25 = vshll.u32 %v5756_v22, 30  ;;  %v2416_v26 = vadd.f32 %v2415_v41, %v2404_v10  ;;  %v3664_v59 = vld [vmem:[%s4199_s29 + $0x568] sm:$0xff]  ;;  %v3575_v28 = vld [vmem:[%s4199_s29 + $0x3e0] sm:$0xff] }
 0x19b   : > { %v2428_v40 = vmul.f32 %v3659_v39, %v2421_v42  ;;  %v2562_v57 = vand.u32 2147483647, %v2561_v12  ;;  %v2564_v38 = vcvt.s32.f32 %v2557_v58  ;;  %v1678_v17 = vadd.f32 %v5590_v60, %v1665_v37 }
 0x19c   : > { %v2420_v9 = vadd.f32 %v2419_v48, %v2408_v24  ;;  %v2432_v36 = vmul.f32 %v3660_v14, %v2421_v42  ;;  %vm2484_vm12 = vcmp.lt.s32.totalorder %v6159_v44, 0  ;;  %v5772_v51 = vsub.s32 %v2749_v30, %v2752_v25  ;;  %v3665_v48 = vld [vmem:[%s4199_s29 + $0x630] sm:$0xff] }
 0x19d   : > { %v1682_v49 = vadd.f32 %v5613_v3, %v1669_v20  ;;  %v2425_v53 = vadd.f32 %v2424_v32, %v2412_v31  ;;  %v2437_v63 = vmul.f32 %v3661_v15, %v2434_v23  ;;  %v2447_v27 = vmul.f32 %v5507_v5, %v5723_v7  ;;  %v3574_v3 = vld [vmem:[%s4199_s29 + $0x318] sm:$0xff]  ;;  %v3667_v15 = vld [vmem:[%s4199_s29 + $0x570] sm:$0xff] }
 0x19e   : > { %v1703_v60 = vmul.f32 %v3572_v47, %v6158_v43  ;;  %v1707_v42 = vmul.f32 %v3573_v0, %v6158_v43  ;;  %v1709_v45 = vmul.f32 %v6161_v29, %v6160_v13  ;;  %v2755_v30 = vsub.s32 0, %v5772_v51  ;;  %v3666_v32 = vld [vmem:[%s4199_s29 + $0x6f8] sm:$0xff] }
 0x19f   : > { %v1687_v4 = vadd.f32 %v1686_v1, %v1674_v55  ;;  %v2429_v33 = vadd.f32 %v2428_v40, %v2416_v26  ;;  %v2441_v10 = vmul.f32 %v3662_v61, %v2434_v23  ;;  %v6162_v41 = vand.u32 2147483647, %v6159_v44  ;;  %v3668_v26 = vld [vmem:[%s4199_s29 + $0x638] sm:$0xff] }
 0x1a0   : > { %v2565_v58 = vmul.f32 %v2564_v38, %v2562_v57  ;;  %v1691_v12 = vadd.f32 %v1690_v16, %v1678_v17  ;;  %v2433_v37 = vadd.f32 %v2432_v36, %v2420_v9  ;;  %v2445_v24 = vmul.f32 %v3663_v19, %v2434_v23  ;;  %v3669_v17 = vld [vmem:[%s4199_s29 + $0x700] sm:$0xff] }
 0x1a1   : > { %vm5788_vm13 = vcmp.le.f32.partialorder %v6162_v41, 0.7853982  ;;  %v3681_v1 = vmin.u32 %v2755_v30, %v5772_v51  ;;  %v3908_v39 = vpop.eup %3907  ;;  %v1695_v6 = vadd.f32 %v1694_v52, %v1682_v49  ;;  %v2438_v20 = vadd.f32 %v2437_v63, %v2425_v53  ;;  %v6168_v41 = vld [vmem:[#allocation14_spill] sm:$0xff] }
 0x1a2   : > { %v2450_v31 = vmul.f32 %v3664_v59, %v2447_v27  ;;  %v2460_v14 = vmul.f32 %v5512_v18, %v5723_v7  ;;  %v1712_v55 = vmul.f32 %v3574_v3, %v1709_v45  ;;  %v1716_v43 = vmul.f32 %v3575_v28, %v1709_v45  ;;  %v6166_v59 = vld [vmem:[#allocation16_spill] sm:$0xff] }
 0x1a3   : > { %v2757_v16 = vclz %v3681_v1  ;;  %v3228_v25 = vmul.f32 %v3908_v39, %v6152_v8  ;;  %v1720_v23 = vmul.f32 %v3576_v34, %v1709_v45  ;;  %v2442_v47 = vadd.f32 %v2441_v10, %v2429_v33  ;;  %v6165_v45 = vld [vmem:[#allocation12_spill] sm:$0xff]  ;;  %v6167_v10 = vld [vmem:[#allocation17_spill] sm:$0xff] }
 0x1a4   : > { %v2454_v0 = vmul.f32 %v3665_v48, %v2447_v27  ;;  %v2566_v40 = vxor.u32 2147483648, %v2565_v58  ;;  %v1700_v57 = vadd.f32 %v1699_v46, %v1687_v4  ;;  %v2446_v52 = vadd.f32 %v2445_v24, %v2433_v37 }
 0x1a5   : > { %v2458_v38 = vmul.f32 %v3666_v32, %v2447_v27  ;;  %v3682_v9 = vadd.s32 4294967294, %v2757_v16  ;;  %v1704_v36 = vadd.f32 %v1703_v60, %v1691_v12  ;;  %v1708_v61 = vadd.f32 %v1707_v42, %v1695_v6 }
 0x1a6   : > { %v2451_v49 = vadd.f32 %v2450_v31, %v2438_v20  ;;  %v2463_v18 = vmul.f32 %v3667_v15, %v2460_v14  ;;  %v2467_v7 = vmul.f32 %v3668_v26, %v2460_v14  ;;  %v2745_v53 = vadd.s32 %v5705_v11, %v5700_v50 }
 0x1a7   : > { %vm3683_vm15 = vcmp.lt.s32.totalorder %v3682_v9, 0  ;;  %v3230_v8 = vmul.f32 %v3908_v39, %v6149_v21  ;;  %v2455_v63 = vadd.f32 %v2454_v0, %v2442_v47  ;;  %v2471_v19 = vmul.f32 %v3669_v17, %v2460_v14 }
 0x1a8   : > { %v2567_v46 = vsel %vm2484_vm12, %v2566_v40, %v2565_v58  ;;  %v2760_v13 = vsel %vm3683_vm15, 0, %v3682_v9  ;;  %v2459_v27 = vadd.f32 %v2458_v38, %v2446_v52  ;;  %v966_v30 = vadd.f32 %v6166_v59, %v6165_v45 }
 0x1a9   : > { %v2761_v29 = vsub.s32 32, %v2760_v13  ;;  %v2762_v60 = vshll.u32 %v5772_v51, %v2760_v13  ;;  %v2765_v42 = vsub.s32 4294967266, %v2760_v13  ;;  %v1713_v4 = vadd.f32 %v1712_v55, %v1700_v57 }
 0x1aa   : > { %v2464_v3 = vadd.f32 %v2463_v18, %v2451_v49  ;;  %v3229_v50 = vmul.f32 %v3908_v39, %v6150_v54  ;;  %v1717_v11 = vadd.f32 %v1716_v43, %v1704_v36  ;;  %v2570_v21 = vsel %vm5788_vm13, %v6159_v44, %v2567_v46  ;;  %v6169_v54 = vld [vmem:[#allocation18_spill] sm:$0xff] }
 0x1ab   : > { %v2763_v28 = vshrl.u32 %v2745_v53, %v2761_v29  ;;  %v2766_v33 = vadd.s32 127, %v2765_v42  ;;  %v970_v58 = vadd.f32 %v6168_v41, %v6167_v10  ;;  %v1721_v12 = vadd.f32 %v1720_v23, %v1708_v61 }
 0x1ac   : > { %v2468_v51 = vadd.f32 %v2467_v7, %v2455_v63  ;;  %v5817_v34 = vmul.f32 %v3908_v39, %v6148_v35  ;;  %v2472_v37 = vadd.f32 %v2471_v19, %v2459_v27  ;;  %3909 = vcosq.f32 %v2570_v21 }
 0x1ad   : > { %v2764_v24 = vor.u32 %v2763_v28, %v2762_v60  ;;  %v2767_v48 = vshll.u32 %v2766_v33, 23  ;;  %v3232_v1 = vmul.f32 %v3228_v25, %v6169_v54  ;;  %v3233_v6 = vmul.f32 %v3229_v50, %v1713_v4 }
 0x1ae   : > { %v3235_v20 = vmul.f32 %v3230_v8, %v2464_v3  ;;  %v3240_v14 = vmul.f32 %v3228_v25, %v966_v30  ;;  %v3241_v55 = vmul.f32 %v3229_v50, %v1717_v11  ;;  %v3243_v15 = vmul.f32 %v3230_v8, %v2468_v51  ;;  %v3692_v51 = vld [vmem:[%s4199_s29 + $0x7d8] sm:$0xff] }
 0x1af   : > { %v2768_v31 = vor.u32 4788187, %v2767_v48  ;;  %v2771_v32 = vcvt.s32.f32 %v2764_v24  ;;  %v3234_v43 = vadd.f32 %v3233_v6, %v3232_v1  ;;  %v3249_v16 = vmul.f32 %v3228_v25, %v970_v58  ;;  %v3691_v58 = vld [vmem:[%s4199_s29 + $0x710] sm:$0xff]  ;;  %v3694_v24 = vld [vmem:[%s4199_s29 + $0x718] sm:$0xff] }
 0x1b0   : > { %v3250_v23 = vmul.f32 %v3229_v50, %v1721_v12  ;;  %3911 = vsinq.f32 %v2570_v21  ;;  %v3242_v35 = vadd.f32 %v3241_v55, %v3240_v14  ;;  %v3252_v39 = vmul.f32 %v3230_v8, %v2472_v37  ;;  %v3693_v37 = vld [vmem:[%s4199_s29 + $0x8a0] sm:$0xff] }
 0x1b1   : > { %v2769_v47 = vand.u32 2147483647, %v2768_v31  ;;  %v5820_v0 = vadd.f32 %v3235_v20, %v3234_v43  ;;  %v2568_v40 = vsub.s32 4, %v5554_v62  ;;  %vm2691_vm0 = vcmp.lt.s32.totalorder %v6145_v2, 0  ;;  %v3695_v20 = vld [vmem:[%s4199_s29 + $0x7e0] sm:$0xff]  ;;  %v3696_v31 = vld [vmem:[%s4199_s29 + $0x8a8] sm:$0xff] }
 0x1b2   : > { %v3251_v26 = vadd.f32 %v3250_v23, %v3249_v16  ;;  %v5823_v52 = vadd.f32 %v3243_v15, %v3242_v35  ;;  %v2775_v38 = vsub.s32 4, %v5756_v22  ;;  %vm2690_vm1 = vcmp.le.f32.partialorder %v2689_v56, 0.7853982  ;;  %v3688_v43 = vld [vmem:[%s4199_s29 + $0x708] sm:$0xff]  ;;  %v3689_v15 = vld [vmem:[%s4199_s29 + $0x7d0] sm:$0xff]  ;;  %v3690_v16 = vld [vmem:[%s4199_s29 + $0x898] sm:$0xff] }
 0x1b3   : > { %v2772_v57 = vmul.f32 %v2771_v32, %v2769_v47  ;;  %v2569_v9 = vsel %vm2484_vm12, %v2568_v40, %v5554_v62  ;;  %vm2574_vm4 = vweird.f32 %v6159_v44 }
 0x1b4   : > { %v5827_v17 = vadd.f32 %v3252_v39, %v3251_v26  ;;  %v2776_v61 = vsel %vm2691_vm0, %v2775_v38, %v5756_v22  ;;  %v2571_v18 = vsel %vm5788_vm13, 0, %v2569_v9  ;;  %vm2781_vm13 = vweird.f32 %v6145_v2  ;;  %v3698_v9 = vld [vmem:[%s4199_s29 + $0x7e8] sm:$0xff] }
 0x1b5   : > { %v2773_v25 = vxor.u32 2147483648, %v2772_v57  ;;  %v2778_v53 = vsel %vm2690_vm1, 0, %v2776_v61  ;;  %v2575_v8 = vand.u32 3, %v2571_v18  ;;  %v2678_v56 = vadd.s32 3, %v2571_v18 }
 0x1b6   : > { %v2885_v19 = vadd.s32 3, %v2778_v53  ;;  %v2782_v27 = vand.u32 3, %v2778_v53  ;;  %v3700_v53 = vld [vmem:[%s4199_s29 + $0x728] sm:$0xff] }
 0x1b7   : > { %v2774_v36 = vsel %vm2691_vm0, %v2773_v25, %v2772_v57  ;;  %vm2577_vm2 = vcmp.eq.s32.totalorder %v2575_v8, 0  ;;  %vm2580_vm3 = vcmp.eq.s32.totalorder %v2575_v8, 2  ;;  %v2679_v62 = vand.u32 3, %v2678_v56  ;;  %v3697_v25 = vld [vmem:[%s4199_s29 + $0x720] sm:$0xff] }
 0x1b8   : > { %v2777_v49 = vsel %vm2690_vm1, %v6145_v2, %v2774_v36  ;;  %v2886_v22 = vand.u32 3, %v2885_v19  ;;  %vm2576_vm6 = vcmp.lt.s32.totalorder %v2575_v8, 2  ;;  %vm2787_vm7 = vcmp.eq.s32.totalorder %v2782_v27, 2  ;;  %v3701_v8 = vld [vmem:[%s4199_s29 + $0x7f0] sm:$0xff]  ;;  %v3702_v19 = vld [vmem:[%s4199_s29 + $0x8b8] sm:$0xff] }
 0x1b9   : > { %3913 = vcosq.f32 %v2777_v49  ;;  %v3910_v7 = vpop.eup %3909  ;;  %vm2681_vm5 = vcmp.eq.s32.totalorder %v2679_v62, 0  ;;  %vm2684_vm14 = vcmp.eq.s32.totalorder %v2679_v62, 2  ;;  %vm2784_vm11 = vcmp.eq.s32.totalorder %v2782_v27, 0 }
 0x1ba   : > { %3915 = vsinq.f32 %v2777_v49  ;;  %v2581_v13 = vxor.u32 2147483648, %v3910_v7  ;;  %vm2891_vm8 = vcmp.eq.s32.totalorder %v2886_v22, 2  ;;  %vm2888_vm9 = vcmp.eq.s32.totalorder %v2886_v22, 0 }
 0x1bb   : > { %vm2783_vm10 = vcmp.lt.s32.totalorder %v2782_v27, 2  ;;  %vm2887_vm12 = vcmp.lt.s32.totalorder %v2886_v22, 2  ;;  %vm2680_vm15 = vcmp.lt.s32.totalorder %v2679_v62, 2 }
 0x1bd   : > { %v3912_v63 = vpop.eup %3911 }
 0x1be   : > { %v2578_v46 = vxor.u32 2147483648, %v3912_v63  ;;  %v2582_v60 = vsel %vm2580_vm3, %v2581_v13, %v3912_v63  ;;  %v2686_v50 = vsel %vm2684_vm14, %v2581_v13, %v3912_v63 }
 0x1c0   : > { %v2579_v29 = vsel %vm2577_vm2, %v3910_v7, %v2578_v46  ;;  %v2683_v33 = vsel %vm2681_vm5, %v3910_v7, %v2578_v46  ;;  %v3699_v7 = vld [vmem:[%s4199_s29 + $0x8b0] sm:$0xff] }
 0x1c1   : > { %v2583_v59 = vsel %vm2576_vm6, %v2579_v29, %v2582_v60  ;;  %v2687_v32 = vsel %vm2680_vm15, %v2683_v33, %v2686_v50  ;;  %v3703_v46 = vld [vmem:[%s4199_s29 + $0x730] sm:$0xff]  ;;  %v3704_v60 = vld [vmem:[%s4199_s29 + $0x7f8] sm:$0xff] }
 0x1c2   : > { %v5842_v28 = vsel %vm2574_vm4, nan, %v2583_v59  ;;  %v5877_v63 = vsel %vm2574_vm4, nan, %v2687_v32 }
 0x1c3   : > { %v5857_v14 = vmul.f32 1.4142135, %v5842_v28 }
 0x1c5   : > { %v2970_v50 = vmul.f32 %v3703_v46, %v5857_v14 }
 0x1c6   : > { %v3914_v42 = vpop.eup %3913 }
 0x1c7   : > { %v3916_v5 = vpop.eup %3915  ;;  %v2788_v45 = vxor.u32 2147483648, %v3914_v42 }
 0x1c8   : > { %v2785_v30 = vxor.u32 2147483648, %v3916_v5 }
 0x1c9   : > { %v2789_v4 = vsel %vm2787_vm7, %v2788_v45, %v3916_v5  ;;  %v2893_v3 = vsel %vm2891_vm8, %v2788_v45, %v3916_v5 }
 0x1ca   : > { %v2786_v11 = vsel %vm2784_vm11, %v3914_v42, %v2785_v30  ;;  %v2890_v21 = vsel %vm2888_vm9, %v3914_v42, %v2785_v30  ;;  %v3705_v42 = vld [vmem:[%s4199_s29 + $0x8c0] sm:$0xff]  ;;  %v3706_v30 = vld [vmem:[%s4199_s29 + $0x738] sm:$0xff] }
 0x1cb   : > { %v2790_v10 = vsel %vm2783_vm10, %v2786_v11, %v2789_v4  ;;  %v2894_v41 = vsel %vm2887_vm12, %v2890_v21, %v2893_v3  ;;  %v3707_v11 = vld [vmem:[%s4199_s29 + $0x800] sm:$0xff]  ;;  %v3708_v21 = vld [vmem:[%s4199_s29 + $0x8c8] sm:$0xff] }
 0x1cc   : > { %v2791_v2 = vsel %vm2781_vm13, nan, %v2790_v10  ;;  %v2895_v12 = vsel %vm2781_vm13, nan, %v2894_v41 }
 0x1cd   : > { %v5849_v48 = vmul.f32 1.4142135, %v2791_v2  ;;  %v5851_v54 = vmul.f32 1.4142135, %v2895_v12  ;;  %v2905_v1 = vmul.f32 %v2791_v2, %v2791_v2  ;;  %v2906_v6 = vmul.f32 %v2895_v12, %v2895_v12 }
 0x1ce   : > { %v2908_v55 = vmul.f32 %v2895_v12, %v2791_v2  ;;  %v2978_v2 = vmul.f32 %v3705_v42, %v5857_v14  ;;  %v3709_v12 = vld [vmem:[%s4199_s29 + $0x740] sm:$0xff] }
 0x1cf   : > { %v2907_v23 = vsub.f32 %v2905_v1, %v2906_v6  ;;  %v2922_v47 = vmul.f32 %v3691_v58, %v5849_v48  ;;  %v2926_v35 = vmul.f32 %v3692_v51, %v5849_v48  ;;  %v2930_v39 = vmul.f32 %v3693_v37, %v5849_v48  ;;  %v3711_v1 = vld [vmem:[%s4199_s29 + $0x8d0] sm:$0xff] }
 0x1d0   : > { %v2909_v26 = vadd.f32 %v2908_v55, %v2908_v55  ;;  %v2934_v40 = vmul.f32 %v3694_v24, %v5851_v54  ;;  %v2938_v57 = vmul.f32 %v3695_v20, %v5851_v54  ;;  %v2942_v38 = vmul.f32 %v3696_v31, %v5851_v54  ;;  %v3710_v24 = vld [vmem:[%s4199_s29 + $0x808] sm:$0xff] }
 0x1d1   : > { %v5870_v36 = vmul.f32 1.4142135, %v2907_v23  ;;  %v2923_v61 = vadd.f32 %v3688_v43, %v2922_v47  ;;  %v2927_v49 = vadd.f32 %v3689_v15, %v2926_v35  ;;  %v2931_v18 = vadd.f32 %v3690_v16, %v2930_v39  ;;  %v3712_v43 = vld [vmem:[%s4199_s29 + $0x748] sm:$0xff]  ;;  %v3713_v47 = vld [vmem:[%s4199_s29 + $0x810] sm:$0xff]  ;;  %v3714_v35 = vld [vmem:[%s4199_s29 + $0x8d8] sm:$0xff] }
 0x1d2   : > { %v5879_v56 = vmul.f32 1.4142135, %v2909_v26  ;;  %v2980_v13 = vmul.f32 %v5849_v48, %v5857_v14  ;;  %v2993_v33 = vmul.f32 %v5851_v54, %v5857_v14  ;;  %v2974_v58 = vmul.f32 %v3704_v60, %v5857_v14 }
 0x1d3   : > { %v2935_v62 = vadd.f32 %v2934_v40, %v2923_v61  ;;  %v2939_v27 = vadd.f32 %v2938_v57, %v2927_v49  ;;  %v2943_v22 = vadd.f32 %v2942_v38, %v2931_v18  ;;  %v2946_v29 = vmul.f32 %v3697_v25, %v5870_v36  ;;  %v3715_v25 = vld [vmem:[%s4199_s29 + $0x750] sm:$0xff] }
 0x1d4   : > { %v2950_v44 = vmul.f32 %v3698_v9, %v5870_v36  ;;  %v2954_v5 = vmul.f32 %v3699_v7, %v5870_v36  ;;  %v2958_v45 = vmul.f32 %v3700_v53, %v5879_v56  ;;  %v2962_v59 = vmul.f32 %v3701_v8, %v5879_v56  ;;  %v3716_v7 = vld [vmem:[%s4199_s29 + $0x818] sm:$0xff]  ;;  %v3717_v53 = vld [vmem:[%s4199_s29 + $0x8e0] sm:$0xff] }
 0x1d5   : > { %v2947_v4 = vadd.f32 %v2946_v29, %v2935_v62  ;;  %v2966_v3 = vmul.f32 %v3702_v19, %v5879_v56  ;;  %v2983_v37 = vmul.f32 %v3706_v30, %v2980_v13  ;;  %v3006_v6 = vmul.f32 %v5870_v36, %v5857_v14  ;;  %v3720_v29 = vld [vmem:[%s4199_s29 + $0x8e8] sm:$0xff] }
 0x1d6   : > { %v2951_v10 = vadd.f32 %v2950_v44, %v2939_v27  ;;  %v2955_v41 = vadd.f32 %v2954_v5, %v2943_v22  ;;  %v2987_v32 = vmul.f32 %v3707_v11, %v2980_v13  ;;  %v2991_v55 = vmul.f32 %v3708_v21, %v2980_v13  ;;  %v3718_v13 = vld [vmem:[%s4199_s29 + $0x758] sm:$0xff]  ;;  %v3719_v22 = vld [vmem:[%s4199_s29 + $0x820] sm:$0xff]  ;;  %v3723_v11 = vld [vmem:[%s4199_s29 + $0x8f0] sm:$0xff] }
 0x1d7   : > { %v2959_v51 = vadd.f32 %v2958_v45, %v2947_v4  ;;  %v2897_v15 = vmul.f32 1.4142135, %v5877_v63  ;;  %v2996_v23 = vmul.f32 %v3709_v12, %v2993_v33  ;;  %v3019_v39 = vmul.f32 %v5879_v56, %v5857_v14 }
 0x1d8   : > { %v2963_v20 = vadd.f32 %v2962_v59, %v2951_v10  ;;  %v2967_v31 = vadd.f32 %v2966_v3, %v2955_v41  ;;  %v3000_v57 = vmul.f32 %v3710_v24, %v2993_v33  ;;  %v3004_v38 = vmul.f32 %v3711_v1, %v2993_v33  ;;  %v3721_v59 = vld [vmem:[%s4199_s29 + $0x760] sm:$0xff]  ;;  %v3726_v24 = vld [vmem:[%s4199_s29 + $0x8f8] sm:$0xff] }
 0x1d9   : > { %v2971_v16 = vadd.f32 %v2970_v50, %v2959_v51  ;;  %v2900_v9 = vmul.f32 %v5842_v28, %v5842_v28  ;;  %v2901_v61 = vmul.f32 %v5877_v63, %v5877_v63  ;;  %v3009_v18 = vmul.f32 %v3712_v43, %v3006_v6  ;;  %v3722_v50 = vld [vmem:[%s4199_s29 + $0x828] sm:$0xff] }
 0x1da   : > { %v2975_v26 = vadd.f32 %v2974_v58, %v2963_v20  ;;  %v2979_v40 = vadd.f32 %v2978_v2, %v2967_v31  ;;  %v3013_v19 = vmul.f32 %v3713_v47, %v3006_v6  ;;  %v3017_v46 = vmul.f32 %v3714_v35, %v3006_v6  ;;  %v3724_v2 = vld [vmem:[%s4199_s29 + $0x768] sm:$0xff]  ;;  %v3728_v47 = vld [vmem:[%s4199_s29 + $0x838] sm:$0xff]  ;;  %v3729_v35 = vld [vmem:[%s4199_s29 + $0x900] sm:$0xff] }
 0x1db   : > { %v2984_v49 = vadd.f32 %v2983_v37, %v2971_v16  ;;  %v3022_v27 = vmul.f32 %v3715_v25, %v3019_v39  ;;  %v3044_v60 = vmul.f32 %v5849_v48, %v2897_v15  ;;  %v3026_v5 = vmul.f32 %v3716_v7, %v3019_v39  ;;  %v3725_v37 = vld [vmem:[%s4199_s29 + $0x830] sm:$0xff]  ;;  %v3730_v25 = vld [vmem:[%s4199_s29 + $0x778] sm:$0xff]  ;;  %v3732_v7 = vld [vmem:[%s4199_s29 + $0x908] sm:$0xff] }
 0x1dc   : > { %v2988_v14 = vadd.f32 %v2987_v32, %v2975_v26  ;;  %v2992_v8 = vadd.f32 %v2991_v55, %v2979_v40  ;;  %v3030_v45 = vmul.f32 %v3717_v53, %v3019_v39  ;;  %v2902_v30 = vsub.f32 %v2900_v9, %v2901_v61  ;;  %v3727_v55 = vld [vmem:[%s4199_s29 + $0x770] sm:$0xff] }
 0x1dd   : > { %v2997_v62 = vadd.f32 %v2996_v23, %v2984_v49  ;;  %v3034_v3 = vmul.f32 %v3718_v13, %v2897_v15  ;;  %v3057_v21 = vmul.f32 %v5851_v54, %v2897_v15  ;;  %v3038_v41 = vmul.f32 %v3719_v22, %v2897_v15 }
 0x1de   : > { %v3001_v42 = vadd.f32 %v3000_v57, %v2988_v14  ;;  %v3005_v44 = vadd.f32 %v3004_v38, %v2992_v8  ;;  %v3042_v58 = vmul.f32 %v3720_v29, %v2897_v15  ;;  %v3047_v51 = vmul.f32 %v3721_v59, %v3044_v60  ;;  %v3737_v59 = vld [vmem:[%s4199_s29 + $0x850] sm:$0xff] }
 0x1df   : > { %v3010_v4 = vadd.f32 %v3009_v18, %v2997_v62  ;;  %v3070_v1 = vmul.f32 %v5870_v36, %v2897_v15  ;;  %v3051_v31 = vmul.f32 %v3722_v50, %v3044_v60  ;;  %v3055_v32 = vmul.f32 %v3723_v11, %v3044_v60  ;;  %v3731_v18 = vld [vmem:[%s4199_s29 + $0x840] sm:$0xff]  ;;  %v3734_v62 = vld [vmem:[%s4199_s29 + $0x848] sm:$0xff] }
 0x1e0   : > { %v3014_v33 = vadd.f32 %v3013_v19, %v3001_v42  ;;  %v3018_v10 = vadd.f32 %v3017_v46, %v3005_v44  ;;  %v2910_v43 = vmul.f32 1.4142135, %v2902_v30  ;;  %v3060_v23 = vmul.f32 %v3724_v2, %v3057_v21  ;;  %v3733_v19 = vld [vmem:[%s4199_s29 + $0x780] sm:$0xff]  ;;  %v3736_v42 = vld [vmem:[%s4199_s29 + $0x788] sm:$0xff]  ;;  %v3738_v30 = vld [vmem:[%s4199_s29 + $0x918] sm:$0xff] }
 0x1e1   : > { %v3023_v12 = vadd.f32 %v3022_v27, %v3010_v4  ;;  %v3083_v39 = vmul.f32 %v5879_v56, %v2897_v15  ;;  %v3064_v57 = vmul.f32 %v3725_v37, %v3057_v21  ;;  %v3068_v38 = vmul.f32 %v3726_v24, %v3057_v21  ;;  %v3735_v27 = vld [vmem:[%s4199_s29 + $0x910] sm:$0xff]  ;;  %v3741_v2 = vld [vmem:[%s4199_s29 + $0x920] sm:$0xff] }
 0x1e2   : > { %v3027_v6 = vadd.f32 %v3026_v5, %v3014_v33  ;;  %v3031_v20 = vadd.f32 %v3030_v45, %v3018_v10  ;;  %v2903_v9 = vmul.f32 %v5877_v63, %v5842_v28  ;;  %v3073_v49 = vmul.f32 %v3727_v55, %v3070_v1  ;;  %v3739_v33 = vld [vmem:[%s4199_s29 + $0x790] sm:$0xff]  ;;  %v3743_v55 = vld [vmem:[%s4199_s29 + $0x860] sm:$0xff] }
 0x1e3   : > { %v3035_v16 = vadd.f32 %v3034_v3, %v3023_v12  ;;  %v3077_v8 = vmul.f32 %v3728_v47, %v3070_v1  ;;  %v3081_v15 = vmul.f32 %v3729_v35, %v3070_v1  ;;  %v3086_v13 = vmul.f32 %v3730_v25, %v3083_v39  ;;  %v3746_v25 = vld [vmem:[%s4199_s29 + $0x868] sm:$0xff] }
 0x1e4   : > { %v3039_v26 = vadd.f32 %v3038_v41, %v3027_v6  ;;  %v3043_v40 = vadd.f32 %v3042_v58, %v3031_v20  ;;  %v3108_v22 = vmul.f32 %v2910_v43, %v5849_v48  ;;  %v3090_v29 = vmul.f32 %v3731_v18, %v3083_v39  ;;  %v3740_v58 = vld [vmem:[%s4199_s29 + $0x858] sm:$0xff] }
 0x1e5   : > { %v3048_v61 = vadd.f32 %v3047_v51, %v3035_v16  ;;  %v3094_v60 = vmul.f32 %v3732_v7, %v3083_v39  ;;  %v2904_v44 = vadd.f32 %v2903_v9, %v2903_v9  ;;  %v3098_v45 = vmul.f32 %v3733_v19, %v2910_v43  ;;  %v3742_v6 = vld [vmem:[%s4199_s29 + $0x798] sm:$0xff]  ;;  %v3744_v16 = vld [vmem:[%s4199_s29 + $0x928] sm:$0xff]  ;;  %v3747_v9 = vld [vmem:[%s4199_s29 + $0x930] sm:$0xff] }
 0x1e6   : > { %v3052_v53 = vadd.f32 %v3051_v31, %v3039_v26  ;;  %v3056_v14 = vadd.f32 %v3055_v32, %v3043_v40  ;;  %v3121_v4 = vmul.f32 %v2910_v43, %v5851_v54  ;;  %v3102_v11 = vmul.f32 %v3734_v62, %v2910_v43  ;;  %v3745_v40 = vld [vmem:[%s4199_s29 + $0x7a0] sm:$0xff] }
 0x1e7   : > { %v3061_v46 = vadd.f32 %v3060_v23, %v3048_v61  ;;  %v3106_v21 = vmul.f32 %v3735_v27, %v2910_v43  ;;  %v3111_v41 = vmul.f32 %v3736_v42, %v3108_v22  ;;  %v3134_v12 = vmul.f32 %v5870_v36, %v2910_v43 }
 0x1e8   : > { %v3065_v28 = vadd.f32 %v3064_v57, %v3052_v53  ;;  %v3069_v63 = vadd.f32 %v3068_v38, %v3056_v14  ;;  %v3115_v24 = vmul.f32 %v3737_v59, %v3108_v22  ;;  %v3119_v1 = vmul.f32 %v3738_v30, %v3108_v22  ;;  %v3748_v53 = vld [vmem:[%s4199_s29 + $0x7a8] sm:$0xff]  ;;  %v3751_v22 = vld [vmem:[%s4199_s29 + $0x7b0] sm:$0xff]  ;;  %v3754_v59 = vld [vmem:[%s4199_s29 + $0x7b8] sm:$0xff] }
 0x1e9   : > { %v3074_v5 = vadd.f32 %v3073_v49, %v3061_v46  ;;  %v2911_v20 = vmul.f32 1.4142135, %v2904_v44  ;;  %v3124_v32 = vmul.f32 %v3739_v33, %v3121_v4  ;;  %v3147_v23 = vmul.f32 %v5879_v56, %v2910_v43 }
 0x1ea   : > { %v3078_v3 = vadd.f32 %v3077_v8, %v3065_v28  ;;  %v3082_v50 = vadd.f32 %v3081_v15, %v3069_v63  ;;  %v3128_v39 = vmul.f32 %v3740_v58, %v3121_v4  ;;  %v3132_v26 = vmul.f32 %v3741_v2, %v3121_v4  ;;  %v3749_v8 = vld [vmem:[%s4199_s29 + $0x870] sm:$0xff]  ;;  %v3750_v15 = vld [vmem:[%s4199_s29 + $0x938] sm:$0xff] }
 0x1eb   : > { %v3087_v10 = vadd.f32 %v3086_v13, %v3074_v5  ;;  %v3137_v38 = vmul.f32 %v3742_v6, %v3134_v12  ;;  %v3141_v18 = vmul.f32 %v3743_v55, %v3134_v12  ;;  %v3145_v7 = vmul.f32 %v3744_v16, %v3134_v12  ;;  %v3758_v12 = vld [vmem:[%s4199_s29 + $0x888] sm:$0xff]  ;;  %v3761_v16 = vld [vmem:[%s4199_s29 + $0x890] sm:$0xff] }
 0x1ec   : > { %v3091_v51 = vadd.f32 %v3090_v29, %v3078_v3  ;;  %v3095_v37 = vadd.f32 %v3094_v60, %v3082_v50  ;;  %v3150_v14 = vmul.f32 %v3745_v40, %v3147_v23  ;;  %v3172_v19 = vmul.f32 %v2911_v20, %v5849_v48  ;;  %v3752_v29 = vld [vmem:[%s4199_s29 + $0x878] sm:$0xff]  ;;  %v3753_v60 = vld [vmem:[%s4199_s29 + $0x940] sm:$0xff]  ;;  %v3756_v50 = vld [vmem:[%s4199_s29 + $0x948] sm:$0xff] }
 0x1ed   : > { %v3099_v31 = vadd.f32 %v3098_v45, %v3087_v10  ;;  %v3154_v62 = vmul.f32 %v3746_v25, %v3147_v23  ;;  %v3158_v27 = vmul.f32 %v3747_v9, %v3147_v23  ;;  %v3162_v63 = vmul.f32 %v3748_v53, %v2911_v20  ;;  %v3755_v3 = vld [vmem:[%s4199_s29 + $0x880] sm:$0xff]  ;;  %v3762_v23 = vld [vmem:[%s4199_s29 + $0x958] sm:$0xff] }
 0x1ee   : > { %v3103_v47 = vadd.f32 %v3102_v11, %v3091_v51  ;;  %v3107_v35 = vadd.f32 %v3106_v21, %v3095_v37  ;;  %v3185_v42 = vmul.f32 %v2911_v20, %v5851_v54  ;;  %v3166_v45 = vmul.f32 %v3749_v8, %v2911_v20  ;;  %v3759_v51 = vld [vmem:[%s4199_s29 + $0x950] sm:$0xff] }
 0x1ef   : > { %v3112_v57 = vadd.f32 %v3111_v41, %v3099_v31  ;;  %v3170_v48 = vmul.f32 %v3750_v15, %v2911_v20  ;;  %v3175_v4 = vmul.f32 %v3751_v22, %v3172_v19  ;;  %v3198_v11 = vmul.f32 %v5870_v36, %v2911_v20  ;;  %v3757_v41 = vld [vmem:[%s4199_s29 + $0x7c0] sm:$0xff] }
 0x1f0   : > { %v3116_v61 = vadd.f32 %v3115_v24, %v3103_v47  ;;  %v3120_v49 = vadd.f32 %v3119_v1, %v3107_v35  ;;  %v3179_v10 = vmul.f32 %v3752_v29, %v3172_v19  ;;  %v3183_v54 = vmul.f32 %v3753_v60, %v3172_v19 }
 0x1f1   : > { %v3125_v43 = vadd.f32 %v3124_v32, %v3112_v57  ;;  %v3188_v2 = vmul.f32 %v3754_v59, %v3185_v42  ;;  %v3211_v37 = vmul.f32 %v5879_v56, %v2911_v20  ;;  %v3192_v6 = vmul.f32 %v3755_v3, %v3185_v42  ;;  %v3760_v32 = vld [vmem:[%s4199_s29 + $0x7c8] sm:$0xff] }
 0x1f2   : > { %v3129_v46 = vadd.f32 %v3128_v39, %v3116_v61  ;;  %v3133_v13 = vadd.f32 %v3132_v26, %v3120_v49  ;;  %v3196_v31 = vmul.f32 %v3756_v50, %v3185_v42  ;;  %v3201_v55 = vmul.f32 %v3757_v41, %v3198_v11 }
 0x1f3   : > { %v3138_v28 = vadd.f32 %v3137_v38, %v3125_v43  ;;  %v3205_v39 = vmul.f32 %v3758_v12, %v3198_v11  ;;  %v3209_v26 = vmul.f32 %v3759_v51, %v3198_v11  ;;  %v3214_v57 = vmul.f32 %v3760_v32, %v3211_v37 }
 0x1f4   : > { %v3142_v44 = vadd.f32 %v3141_v18, %v3129_v46  ;;  %v3146_v5 = vadd.f32 %v3145_v7, %v3133_v13  ;;  %v3218_v56 = vmul.f32 %v3761_v16, %v3211_v37  ;;  %v3222_v20 = vmul.f32 %v3762_v23, %v3211_v37 }
 0x1f5   : > { %v3151_v30 = vadd.f32 %v3150_v14, %v3138_v28 }
 0x1f6   : > { %v3155_v21 = vadd.f32 %v3154_v62, %v3142_v44  ;;  %v3159_v33 = vadd.f32 %v3158_v27, %v3146_v5 }
 0x1f7   : > { %v3163_v58 = vadd.f32 %v3162_v63, %v3151_v30 }
 0x1f8   : > { %v3167_v24 = vadd.f32 %v3166_v45, %v3155_v21  ;;  %v3171_v1 = vadd.f32 %v3170_v48, %v3159_v33 }
 0x1f9   : > { %v3176_v36 = vadd.f32 %v3175_v4, %v3163_v58 }
 0x1fa   : > { %v3180_v47 = vadd.f32 %v3179_v10, %v3167_v24  ;;  %v3184_v35 = vadd.f32 %v3183_v54, %v3171_v1 }
 0x1fb   : > { %v3189_v40 = vadd.f32 %v3188_v2, %v3176_v36 }
 0x1fc   : > { %v3193_v38 = vadd.f32 %v3192_v6, %v3180_v47  ;;  %v3197_v25 = vadd.f32 %v3196_v31, %v3184_v35 }
 0x1fd   : > { %v3202_v9 = vadd.f32 %v3201_v55, %v3189_v40 }
 0x1fe   : > { %v3206_v61 = vadd.f32 %v3205_v39, %v3193_v38  ;;  %v3210_v49 = vadd.f32 %v3209_v26, %v3197_v25 }
 0x1ff   : > { %v3215_v18 = vadd.f32 %v3214_v57, %v3202_v9 }
 0x200   : > { %v3219_v7 = vadd.f32 %v3218_v56, %v3206_v61  ;;  %v3223_v53 = vadd.f32 %v3222_v20, %v3210_v49 }
 0x201   : > { %v3237_v43 = vmul.f32 %v5817_v34, %v3215_v18 }
 0x202   : > { %v3245_v14 = vmul.f32 %v5817_v34, %v3219_v7  ;;  %v3254_v8 = vmul.f32 %v5817_v34, %v3223_v53 }
 0x203   : > { %v3238_v15 = vadd.f32 %v3237_v43, %v5820_v0 }
 0x204   : > { %v3246_v19 = vadd.f32 %v3245_v14, %v5823_v52  ;;  %v3255_v46 = vadd.f32 %v3254_v8, %v5827_v17 }
 0x205   : > { %3239 = vst [vmem:[%s221_s30] sm:$0xff] %v3238_v15 }
 0x206   : > { %3763 = vst [vmem:[%s221_s30 + $0x8] sm:$0xff] %v3246_v19  ;;  %3764 = vst [vmem:[%s221_s30 + $0x10] sm:$0xff] %v3255_v46 }
 0x207   : > { %3986 = shalt.err (!%p3983_p7)
}
 0x208   : > { %s3987_s20 = scalar_lea.hbm %s5987_s15, 384  ;;  %s3991_s28 = scalar_lea.hbm %s6041_s2, 768 }
 0x209   : > { %p3988_p1 = scmp.ne.s32.totalorder %s5987_s15, %s3987_s20  ;;  %p3992_p3 = scmp.lt.s32.totalorder %s5987_s15, %s6041_s2 }
 0x20a   : > { %p3993_p8 = scmp.lt.s32.totalorder %s3991_s28, %s3987_s20 }
 0x20b   : > { %p3989_p10 = pnand %p3988_p1, %p4138_p9 }
 0x20c   : > { %p3994_p0 = por %p3993_p8, %p3992_p3 }
 0x20d   : > { %p3990_p13 = pneg %p3989_p10 }
 0x20f   : > { %p3995_p2 = pnand %p3994_p0, %p3990_p13 }
 0x211   : > { %3998 = shalt.err (!%p3995_p2)
}
 0x212   : > { %s4070_s21 = smov 128   ;;  %s4071_s27 = smov 8  }
 0x213   : > { %3810 = dma.vmem_to_hbm [thread:$0]  (%p4138_p9), %s5989_s4, 384, %s5987_s15, %s3259_s12, %s4070_s21, %s4070_s21, %s4071_s27  }
 0x214 PF: > { %s3288_s30 = sand.u32 1, %s4037_s9   ;;  %p3820_p4 = pnand %p3386_p12, %p4145_p11 }
 0x215   : > { %s3289_s7 = scalar_lea.sflag [#allocation4], %s3288_s30 }
 0x216   : > { %p3821_p5 = pneg %p3820_p4 }
 0x218   : > { %4032 = dma.done.wait (%p3821_p5), %s3289_s7, 384  }
 0x219   : > { %4034 = vsyncadd (%p3821_p5), %s3289_s7, 4294966912  ;;  %s21_s14 = sadd.s32 1, %s4057_s14   ;;  %s6170_s9 = smov %s4041_s10 }
 0x21a   : > { %p18_p6 = scmp.ge.s32.totalorder %s21_s14, 4   ;;  %s6171_s10 = smov %s4045_s11 }
 0x21b   : > { %s6172_s11 = smov %s4143_s23  ;;  %s6173_s12 = smov %s4053_s13 }
 0x21c   : > { %s6174_s13 = smov %s6176_s17  ;;  %20 = sbr.rel (!%p18_p6) target bundleno = 8 (0x8), region = 394 }
 0x221   :  { %3294 = vsyncpa [#allocation3], 1 }
 0x222   :  { %3296 = vsyncpa [#allocation3 + $0x1], 1 }
 0x223   :  { %3297 = vsyncpa [#allocation6], 1 }
 0x224   :  { %3299 = vsyncpa [#allocation6 + $0x1], 1 }
 0x225   :  { %3300 = vsyncpa [#allocation4], 1 }
 0x226   :  { %3302 = vsyncpa [#allocation4 + $0x1], 1 }

</bundles_post_ra>
